<compile_context>
chip_gen: v7x
topology: tpu7x:2x2x1
jax: 0.10.0
libtpu: 0.0.40
codegen_flags: <defaults>
</compile_context>

<pallas_src>
import functools

import jax
import jax.numpy as jnp
from jax.experimental import pallas as pl
from jax.experimental.pallas import tpu as pltpu


# ----------------------------------------------------------------------------
# small helpers
# ----------------------------------------------------------------------------
def _round_up(x, m):
    return ((x + m - 1) // m) * m


def _pick_rows(m, target=1024):
    """Row tile for elementwise kernels: whole array if small, else a divisor
    (avoids per-call jnp.pad copies), else fall back to padding."""
    if m <= target:
        return m, m
    d = target - (target % 8)
    while d >= 8:
        if m % d == 0:
            return d, m
        d -= 8
    return target, _round_up(m, target)


def _pad_rows(x, rows, value=0.0):
    if x.shape[0] == rows:
        return x
    return jnp.pad(x, ((0, rows - x.shape[0]), (0, 0)), constant_values=value)


# ----------------------------------------------------------------------------
# Pallas kernels: tiled MXU matmul (bf16 in, f32 acc), optional fused BN stats
# ----------------------------------------------------------------------------
def _matmul_kernel(a_ref, b_ref, o_ref, acc_ref):
    @pl.when(pl.program_id(2) == 0)
    def _():
        acc_ref[...] = jnp.zeros_like(acc_ref)

    acc_ref[...] += jnp.dot(a_ref[...], b_ref[...],
                            preferred_element_type=jnp.float32)

    @pl.when(pl.program_id(2) == pl.num_programs(2) - 1)
    def _():
        o_ref[...] = acc_ref[...].astype(o_ref.dtype)


def _matmul_stats_kernel(a_ref, b_ref, o_ref, s_ref, sq_ref, acc_ref):
    @pl.when(pl.program_id(2) == 0)
    def _():
        acc_ref[...] = jnp.zeros_like(acc_ref)

    acc_ref[...] += jnp.dot(a_ref[...], b_ref[...],
                            preferred_element_type=jnp.float32)

    @pl.when(pl.program_id(2) == pl.num_programs(2) - 1)
    def _():
        acc = acc_ref[...]
        o_ref[...] = acc.astype(o_ref.dtype)
        # per-M-tile column statistics (BN batch stats fused into the epilogue)
        s_ref[...] = jnp.sum(acc, axis=0)[None, None, :]
        sq_ref[...] = jnp.sum(acc * acc, axis=0)[None, None, :]


def _pick_mm_tiles(M, N, K):
    # 256-wide tiles feed the 2x256^2 MXU of v6e/v7x natively; tiny dims get a
    # single full block (no wasted grid steps / padding).
    if M >= 256:
        bm, Mp = 256, _round_up(M, 256)
    else:
        bm = max(16, _round_up(M, 16))
        Mp = bm
    if N >= 256:
        bn, Np = 256, _round_up(N, 256)
    else:
        bn = _round_up(N, 128)
        Np = bn
    Kp = _round_up(K, 128)
    if Kp <= 1024:
        bk = Kp                      # single K step, no extra K blocks
    else:
        bk = 128
        for d in (512, 384, 256):
            if Kp % d == 0:
                bk = d
                break
    return bm, bn, bk, Mp, Np, Kp


def pallas_matmul(a, b, out_dtype=jnp.float32, with_stats=False):
    """C = A @ B on the MXU. bf16 operands recommended; accumulation is f32.

    with_stats=True additionally returns the column sum and sum-of-squares of
    the f32 accumulator (used for BatchNorm batch statistics), saving a full
    HBM re-read of the conv output."""
    M, K = a.shape
    K2, N = b.shape
    assert K == K2
    bm, bn, bk, Mp, Np, Kp = _pick_mm_tiles(M, N, K)

    a_p = a if (Mp == M and Kp == K) else jnp.pad(a, ((0, Mp - M), (0, Kp - K)))
    b_p = b if (Kp == K and Np == N) else jnp.pad(b, ((0, Kp - K), (0, Np - N)))

    grid = (Mp // bm, Np // bn, Kp // bk)
    in_specs = [pl.BlockSpec((bm, bk), lambda i, j, k: (i, k)),
                pl.BlockSpec((bk, bn), lambda i, j, k: (k, j))]
    out_spec = pl.BlockSpec((bm, bn), lambda i, j, k: (i, j))
    scratch = [pltpu.VMEM((bm, bn), jnp.float32)]
    cparams = pltpu.CompilerParams(
        dimension_semantics=("parallel", "parallel", "arbitrary"))

    if not with_stats:
        y = pl.pallas_call(
            _matmul_kernel,
            out_shape=jax.ShapeDtypeStruct((Mp, Np), out_dtype),
            grid_spec=pltpu.PrefetchScalarGridSpec(
                num_scalar_prefetch=0, grid=grid, in_specs=in_specs,
                out_specs=out_spec, scratch_shapes=scratch),
            compiler_params=cparams,
        )(a_p, b_p)
        return y[:M, :N]

    n_mt = Mp // bm
    y, s, sq = pl.pallas_call(
        _matmul_stats_kernel,
        out_shape=(jax.ShapeDtypeStruct((Mp, Np), out_dtype),
                   jax.ShapeDtypeStruct((n_mt, 1, Np), jnp.float32),
                   jax.ShapeDtypeStruct((n_mt, 1, Np), jnp.float32)),
        grid_spec=pltpu.PrefetchScalarGridSpec(
            num_scalar_prefetch=0, grid=grid, in_specs=in_specs,
            out_specs=(out_spec,
                       pl.BlockSpec((1, 1, bn), lambda i, j, k: (i, 0, j)),
                       pl.BlockSpec((1, 1, bn), lambda i, j, k: (i, 0, j))),
            scratch_shapes=scratch),
        compiler_params=cparams,
    )(a_p, b_p)
    col_sum = jnp.sum(s, axis=(0, 1))[:N]      # padded rows/cols contribute 0
    col_sumsq = jnp.sum(sq, axis=(0, 1))[:N]
    return y[:M, :N], col_sum, col_sumsq


# ----------------------------------------------------------------------------
# Pallas kernels: fused BN apply (+residual) (+ReLU), f32 math, bf16 in/out
# ----------------------------------------------------------------------------
def _bn_apply_kernel(x_ref, scale_ref, shift_ref, o_ref, *, relu):
    y = x_ref[...].astype(jnp.float32) * scale_ref[...] + shift_ref[...]
    if relu:
        y = jnp.maximum(y, 0.0)
    o_ref[...] = y.astype(o_ref.dtype)


def _bn_apply_res_kernel(x_ref, scale_ref, shift_ref, res_ref, o_ref, *, relu):
    y = (x_ref[...].astype(jnp.float32) * scale_ref[...] + shift_ref[...]
         + res_ref[...].astype(jnp.float32))
    if relu:
        y = jnp.maximum(y, 0.0)
    o_ref[...] = y.astype(o_ref.dtype)


def pallas_bn_apply(x2d, scale, shift, residual=None, relu=True,
                    out_dtype=jnp.bfloat16):
    M, C = x2d.shape
    # Lane-densify narrow channel counts (C=64): fold row pairs into a 128-wide
    # last dim so stores are full-lane vst instead of masked vst.msk.
    fold = 1
    if C < 128 and 128 % C == 0 and M % (128 // C) == 0:
        fold = 128 // C
    Mf, Cf = M // fold, C * fold
    x2 = x2d.reshape(Mf, Cf)
    sc = jnp.tile(scale.astype(jnp.float32).reshape(1, C), (1, fold))
    sh = jnp.tile(shift.astype(jnp.float32).reshape(1, C), (1, fold))

    br, Mp = _pick_rows(Mf)
    xp = _pad_rows(x2, Mp)

    if residual is None:
        kern = functools.partial(_bn_apply_kernel, relu=relu)
        operands = (xp, sc, sh)
        in_specs = [pl.BlockSpec((br, Cf), lambda i: (i, 0)),
                    pl.BlockSpec((1, Cf), lambda i: (0, 0)),
                    pl.BlockSpec((1, Cf), lambda i: (0, 0))]
    else:
        rp = _pad_rows(residual.reshape(Mf, Cf), Mp)
        kern = functools.partial(_bn_apply_res_kernel, relu=relu)
        operands = (xp, sc, sh, rp)
        in_specs = [pl.BlockSpec((br, Cf), lambda i: (i, 0)),
                    pl.BlockSpec((1, Cf), lambda i: (0, 0)),
                    pl.BlockSpec((1, Cf), lambda i: (0, 0)),
                    pl.BlockSpec((br, Cf), lambda i: (i, 0))]

    out = pl.pallas_call(
        kern,
        out_shape=jax.ShapeDtypeStruct((Mp, Cf), out_dtype),
        grid=(Mp // br,),
        in_specs=in_specs,
        out_specs=pl.BlockSpec((br, Cf), lambda i: (i, 0)),
        compiler_params=pltpu.CompilerParams(dimension_semantics=("parallel",)),
    )(*operands)
    return out[:Mf].reshape(M, C)


# ----------------------------------------------------------------------------
# Convolution (im2col + MXU matmul with fused BN stats) + BN + (res) + (ReLU)
# ----------------------------------------------------------------------------
def _im2col(x, KH, KW, stride, padding):
    N, H, W, Cin = x.shape
    Ho = (H + 2 * padding - KH) // stride + 1
    Wo = (W + 2 * padding - KW) // stride + 1
    if KH == 1 and KW == 1 and padding == 0:
        xs = x if stride == 1 else x[:, ::stride, ::stride, :]
        return xs.reshape(N * Ho * Wo, Cin), Ho, Wo      # no blow-up for 1x1 convs
    xp = x if padding == 0 else jnp.pad(
        x, ((0, 0), (padding, padding), (padding, padding), (0, 0)))
    cols = []
    for kh in range(KH):
        for kw in range(KW):
            cols.append(xp[:, kh:kh + (Ho - 1) * stride + 1:stride,
                           kw:kw + (Wo - 1) * stride + 1:stride, :])
    # TODO(synk): replace with implicit-GEMM (in-kernel tap loop over the padded
    # activation) to avoid this KH*KW x HBM materialization (kept in bf16 here).
    a = jnp.stack(cols, axis=3).reshape(N * Ho * Wo, KH * KW * Cin)
    return a, Ho, Wo


def conv_bn(x, w, gamma, beta, stride, padding, residual=None, relu=True,
            eps=1e-5):
    """conv2d -> BatchNorm(batch stats, training mode) -> [+residual] -> [ReLU]."""
    N = x.shape[0]
    Cout, Cin, KH, KW = w.shape
    a, Ho, Wo = _im2col(x, KH, KW, stride, padding)
    wm = jnp.transpose(w, (2, 3, 1, 0)).reshape(KH * KW * Cin, Cout)
    y, col_sum, col_sumsq = pallas_matmul(
        a.astype(jnp.bfloat16), wm.astype(jnp.bfloat16),
        out_dtype=jnp.bfloat16, with_stats=True)
    M = N * Ho * Wo
    mean = col_sum / M
    var = jnp.maximum(col_sumsq / M - mean * mean, 0.0)   # biased var, clamped >= 0
    inv = jax.lax.rsqrt(var + eps)
    scale = gamma * inv
    shift = beta - mean * scale
    r2 = residual.reshape(M, Cout) if residual is not None else None
    out = pallas_bn_apply(y, scale, shift, residual=r2, relu=relu)
    return out.reshape(N, Ho, Wo, Cout)


# ----------------------------------------------------------------------------
# Pallas kernel: MaxPool2d(kernel=3, stride=2, padding=1) via 9 shifted views
# ----------------------------------------------------------------------------
def _maxpool9_kernel(r0, r1, r2, r3, r4, r5, r6, r7, r8, o_ref):
    m = r0[...]
    for r in (r1, r2, r3, r4, r5, r6, r7, r8):
        m = jnp.maximum(m, r[...])
    o_ref[...] = m


def pallas_maxpool_3x3s2p1(x):
    N, H, W, C = x.shape
    k, s, p = 3, 2, 1
    Ho = (H + 2 * p - k) // s + 1
    Wo = (W + 2 * p - k) // s + 1
    neg = float(jnp.finfo(x.dtype).min)
    xp = jnp.pad(x, ((0, 0), (p, p), (p, p), (0, 0)), constant_values=neg)
    M = N * Ho * Wo
    fold = 1
    if C < 128 and 128 % C == 0 and M % (128 // C) == 0:
        fold = 128 // C
    Mf, Cf = M // fold, C * fold
    views = []
    for kh in range(k):
        for kw in range(k):
            v = xp[:, kh:kh + (Ho - 1) * s + 1:s, kw:kw + (Wo - 1) * s + 1:s, :]
            views.append(v.reshape(Mf, Cf))
    br, Mp = _pick_rows(Mf)
    views = [_pad_rows(v, Mp) for v in views]
    out = pl.pallas_call(
        _maxpool9_kernel,
        out_shape=jax.ShapeDtypeStruct((Mp, Cf), x.dtype),
        grid=(Mp // br,),
        in_specs=[pl.BlockSpec((br, Cf), lambda i: (i, 0))] * 9,
        out_specs=pl.BlockSpec((br, Cf), lambda i: (i, 0)),
        compiler_params=pltpu.CompilerParams(dimension_semantics=("parallel",)),
    )(*views)
    return out[:Mf].reshape(N, Ho, Wo, C)


# ----------------------------------------------------------------------------
# Pallas kernel: AdaptiveAvgPool2d((1,1))
# ----------------------------------------------------------------------------
def _avgpool_kernel(x_ref, o_ref):
    o_ref[...] = jnp.mean(x_ref[...].astype(jnp.float32), axis=1, keepdims=True)


def pallas_avgpool(x):
    N, H, W, C = x.shape
    HW = H * W
    xr = x.reshape(N, HW, C)
    out = pl.pallas_call(
        _avgpool_kernel,
        out_shape=jax.ShapeDtypeStruct((N, 1, C), jnp.float32),
        grid=(N,),
        in_specs=[pl.BlockSpec((1, HW, C), lambda i: (i, 0, 0))],
        out_specs=pl.BlockSpec((1, 1, C), lambda i: (i, 0, 0)),
        compiler_params=pltpu.CompilerParams(dimension_semantics=("parallel",)),
    )(xr)
    return out.reshape(N, C)


# ----------------------------------------------------------------------------
# ResNet (BasicBlock) parameters + forward
# ----------------------------------------------------------------------------
LAYER_PLANES = (64, 128, 256, 512)
LAYER_STRIDES = (1, 2, 2, 2)


def _kaiming(key, cout, cin, kh, kw):
    fan_out = cout * kh * kw                      # mode='fan_out', relu gain
    std = (2.0 / fan_out) ** 0.5
    return jax.random.normal(key, (cout, cin, kh, kw), jnp.float32) * std


def make_params(key, layers=(1, 1, 1, 1), num_classes=10):
    params = {}
    keys = iter(jax.random.split(key, 64))
    params['conv1'] = _kaiming(next(keys), 64, 3, 7, 7)
    params['bn1'] = (jnp.ones(64, jnp.float32), jnp.zeros(64, jnp.float32))
    inplanes = 64
    for li, (planes, blocks, stride) in enumerate(
            zip(LAYER_PLANES, layers, LAYER_STRIDES)):
        layer = []
        for b in range(blocks):
            s = stride if b == 0 else 1
            blk = {
                'conv1': _kaiming(next(keys), planes, inplanes, 3, 3),
                'bn1': (jnp.ones(planes, jnp.float32), jnp.zeros(planes, jnp.float32)),
                'conv2': _kaiming(next(keys), planes, planes, 3, 3),
                'bn2': (jnp.ones(planes, jnp.float32), jnp.zeros(planes, jnp.float32)),
            }
            if s != 1 or inplanes != planes:        # downsample (conv1x1 + BN)
                blk['down_conv'] = _kaiming(next(keys), planes, inplanes, 1, 1)
                blk['down_bn'] = (jnp.ones(planes, jnp.float32),
                                  jnp.zeros(planes, jnp.float32))
            inplanes = planes
            layer.append(blk)
        params[f'layer{li + 1}'] = layer
    k1, k2 = jax.random.split(next(keys))
    bound = 1.0 / (512 ** 0.5)                      # nn.Linear default init
    params['fc_w'] = jax.random.uniform(k1, (num_classes, 512), jnp.float32,
                                        -bound, bound)
    params['fc_b'] = jax.random.uniform(k2, (num_classes,), jnp.float32,
                                        -bound, bound)
    return params


def basic_block(x, blk, stride):
    identity = x
    out = conv_bn(x, blk['conv1'], *blk['bn1'], stride=stride, padding=1, relu=True)
    if 'down_conv' in blk:
        identity = conv_bn(x, blk['down_conv'], *blk['down_bn'],
                           stride=stride, padding=0, relu=False)
    # bn2 + residual add + relu fused in one elementwise kernel
    return conv_bn(out, blk['conv2'], *blk['bn2'], stride=1, padding=1,
                   residual=identity, relu=True)


def resnet_forward(params, x_nchw):
    # NCHW -> NHWC; carry activations in bf16 between layers (MXU-friendly, half HBM)
    x = jnp.transpose(x_nchw, (0, 2, 3, 1)).astype(jnp.bfloat16)
    x = conv_bn(x, params['conv1'], *params['bn1'], stride=2, padding=3, relu=True)
    x = pallas_maxpool_3x3s2p1(x)
    for li in range(1, 5):
        for bi, blk in enumerate(params[f'layer{li}']):
            stride = LAYER_STRIDES[li - 1] if bi == 0 else 1
            x = basic_block(x, blk, stride)
    feat = pallas_avgpool(x)                                  # (N, 512) f32
    logits = pallas_matmul(feat.astype(jnp.bfloat16),
                           jnp.transpose(params['fc_w']).astype(jnp.bfloat16),
                           out_dtype=jnp.float32)
    return logits + params['fc_b'][None, :]                   # bias in glue (tiny)


if __name__ == "__main__":
    key = jax.random.PRNGKey(0)
    kp, kx = jax.random.split(key)
    params = make_params(kp, layers=(1, 1, 1, 1), num_classes=10)
    x = jax.random.normal(kx, (2, 3, 32, 32), jnp.float32)    # NCHW like PyTorch
    fwd = jax.jit(resnet_forward)
    out = jax.block_until_ready(fwd(params, x))
    assert out.shape == (2, 10) and out.dtype == jnp.float32
    print("KERNEL_OK")
</pallas_src>

<mosaic_0001>
module attributes {stable_mosaic.version = 11 : i64} {
  func.func @_matmul_stats_kernel(%arg0: i32, %arg1: i32, %arg2: i32, %arg3: memref<256x256xbf16, #tpu.memory_space<vmem>>, %arg4: memref<256x128xbf16, #tpu.memory_space<vmem>>, %arg5: memref<256x128xbf16, #tpu.memory_space<vmem>>, %arg6: memref<1x1x128xf32, #tpu.memory_space<vmem>>, %arg7: memref<1x1x128xf32, #tpu.memory_space<vmem>>, %arg8: memref<256x128xf32, #tpu.memory_space<vmem>>) attributes {dimension_semantics = [#tpu.dimension_semantics<parallel>, #tpu.dimension_semantics<parallel>, #tpu.dimension_semantics<arbitrary>], iteration_bounds = array<i64: 2, 1, 1>, scalar_prefetch = 0 : i64, scratch_operands = 1 : i64, tpu.core_type = #tpu.core_type<tc>, window_params = [{transform_indices = @transform_0, window_bounds = array<i64: 256, 256>}, {transform_indices = @transform_1, window_bounds = array<i64: 256, 128>}, {transform_indices = @transform_2, window_bounds = array<i64: 256, 128>}, {transform_indices = @transform_3, window_bounds = array<i64: 1, 1, 128>}, {transform_indices = @transform_4, window_bounds = array<i64: 1, 1, 128>}]} {
    %c0_i32 = arith.constant 0 : i32
    %0 = arith.cmpi eq, %arg2, %c0_i32 : i32
    %1 = arith.extui %0 : i1 to i32
    %c0_i32_0 = arith.constant 0 : i32
    %2 = arith.cmpi ne, %1, %c0_i32_0 : i32
    scf.if %2 {
      %cst_10 = arith.constant 0.000000e+00 : f32
      %12 = vector.broadcast %cst_10 : f32 to vector<256x128xf32>
      %c0_11 = arith.constant 0 : index
      %c0_12 = arith.constant 0 : index
      %13 = vector.load %arg8[%c0_11, %c0_12] : memref<256x128xf32, #tpu.memory_space<vmem>>, vector<256x128xf32>
      tpu.vector_store %arg8[%c0_11, %c0_12], %12 {strides = array<i32>} : memref<256x128xf32, #tpu.memory_space<vmem>>, vector<256x128xf32>,
    } else {
    }
    %c0 = arith.constant 0 : index
    %c0_1 = arith.constant 0 : index
    %3 = vector.load %arg8[%c0, %c0_1] : memref<256x128xf32, #tpu.memory_space<vmem>>, vector<256x128xf32>
    %c0_2 = arith.constant 0 : index
    %c0_3 = arith.constant 0 : index
    %4 = vector.load %arg3[%c0_2, %c0_3] : memref<256x256xbf16, #tpu.memory_space<vmem>>, vector<256x256xbf16>
    %c0_4 = arith.constant 0 : index
    %c0_5 = arith.constant 0 : index
    %5 = vector.load %arg4[%c0_4, %c0_5] : memref<256x128xbf16, #tpu.memory_space<vmem>>, vector<256x128xbf16>
    %cst = arith.constant dense<0.000000e+00> : vector<256x128xf32>
    %6 = tpu.matmul %4, %5, %cst {dimension_numbers = #tpu.dot_dimension_numbers<[1], [0], [0], [1], [0, 0, 1, 1], [], []>} : vector<256x256xbf16>, vector<256x128xbf16>, vector<256x128xf32> -> vector<256x128xf32>
    %7 = arith.addf %3, %6 : vector<256x128xf32>
    %c0_6 = arith.constant 0 : index
    %c0_7 = arith.constant 0 : index
    %8 = vector.load %arg8[%c0_6, %c0_7] : memref<256x128xf32, #tpu.memory_space<vmem>>, vector<256x128xf32>
    tpu.vector_store %arg8[%c0_6, %c0_7], %7 {strides = array<i32>} : memref<256x128xf32, #tpu.memory_space<vmem>>, vector<256x128xf32>,
    %c0_i32_8 = arith.constant 0 : i32
    %9 = arith.cmpi eq, %arg2, %c0_i32_8 : i32
    %10 = arith.extui %9 : i1 to i32
    %c0_i32_9 = arith.constant 0 : i32
    %11 = arith.cmpi ne, %10, %c0_i32_9 : i32
    scf.if %11 {
      %c0_10 = arith.constant 0 : index
      %c0_11 = arith.constant 0 : index
      %12 = vector.load %arg8[%c0_10, %c0_11] : memref<256x128xf32, #tpu.memory_space<vmem>>, vector<256x128xf32>
      %13 = arith.truncf %12 : vector<256x128xf32> to vector<256x128xbf16>
      %c0_12 = arith.constant 0 : index
      %c0_13 = arith.constant 0 : index
      %14 = vector.load %arg5[%c0_12, %c0_13] : memref<256x128xbf16, #tpu.memory_space<vmem>>, vector<256x128xbf16>
      tpu.vector_store %arg5[%c0_12, %c0_13], %13 {strides = array<i32>} : memref<256x128xbf16, #tpu.memory_space<vmem>>, vector<256x128xbf16>,
      %cst_14 = arith.constant dense<0.000000e+00> : vector<128xf32>
      %15 = vector.multi_reduction <add>, %12, %cst_14 [0] : vector<256x128xf32> to vector<128xf32>
      %16 = vector.shape_cast %15 : vector<128xf32> to vector<1x1x128xf32>
      %c0_15 = arith.constant 0 : index
      %c0_16 = arith.constant 0 : index
      %c0_17 = arith.constant 0 : index
      %17 = vector.load %arg6[%c0_15, %c0_16, %c0_17] : memref<1x1x128xf32, #tpu.memory_space<vmem>>, vector<1x1x128xf32>
      tpu.vector_store %arg6[%c0_15, %c0_16, %c0_17], %16 {strides = array<i32>} : memref<1x1x128xf32, #tpu.memory_space<vmem>>, vector<1x1x128xf32>,
      %18 = arith.mulf %12, %12 : vector<256x128xf32>
      %cst_18 = arith.constant dense<0.000000e+00> : vector<128xf32>
      %19 = vector.multi_reduction <add>, %18, %cst_18 [0] : vector<256x128xf32> to vector<128xf32>
      %20 = vector.shape_cast %19 : vector<128xf32> to vector<1x1x128xf32>
      %c0_19 = arith.constant 0 : index
      %c0_20 = arith.constant 0 : index
      %c0_21 = arith.constant 0 : index
      %21 = vector.load %arg7[%c0_19, %c0_20, %c0_21] : memref<1x1x128xf32, #tpu.memory_space<vmem>>, vector<1x1x128xf32>
      tpu.vector_store %arg7[%c0_19, %c0_20, %c0_21], %20 {strides = array<i32>} : memref<1x1x128xf32, #tpu.memory_space<vmem>>, vector<1x1x128xf32>,
    } else {
    }
    return
  }
  func.func @transform_0(%arg0: i32, %arg1: i32, %arg2: i32) -> (i32, i32) {
    %c0_i32 = arith.constant 0 : i32
    return %arg0, %arg2 : i32, i32
  }
  func.func @transform_1(%arg0: i32, %arg1: i32, %arg2: i32) -> (i32, i32) {
    %c0_i32 = arith.constant 0 : i32
    return %arg2, %arg1 : i32, i32
  }
  func.func @transform_2(%arg0: i32, %arg1: i32, %arg2: i32) -> (i32, i32) {
    %c0_i32 = arith.constant 0 : i32
    return %arg0, %arg1 : i32, i32
  }
  func.func @transform_3(%arg0: i32, %arg1: i32, %arg2: i32) -> (i32, i32, i32) {
    %c0_i32 = arith.constant 0 : i32
    %c0_i32_0 = arith.constant 0 : i32
    return %arg0, %c0_i32, %arg1 : i32, i32, i32
  }
  func.func @transform_4(%arg0: i32, %arg1: i32, %arg2: i32) -> (i32, i32, i32) {
    %c0_i32 = arith.constant 0 : i32
    %c0_i32_0 = arith.constant 0 : i32
    return %arg0, %c0_i32, %arg1 : i32, i32, i32
  }
}

module attributes {stable_mosaic.version = 11 : i64} {
  func.func @_bn_apply_kernel(%arg0: i32, %arg1: memref<256x128xbf16, #tpu.memory_space<vmem>>, %arg2: memref<1x128xf32, #tpu.memory_space<vmem>>, %arg3: memref<1x128xf32, #tpu.memory_space<vmem>>, %arg4: memref<256x128xbf16, #tpu.memory_space<vmem>>) attributes {dimension_semantics = [#tpu.dimension_semantics<parallel>], iteration_bounds = array<i64: 1>, scalar_prefetch = 0 : i64, scratch_operands = 0 : i64, tpu.core_type = #tpu.core_type<tc>, window_params = [{transform_indices = @transform_0, window_bounds = array<i64: 256, 128>}, {pipeline_mode = #tpu.pipeline_mode<synchronous>, transform_indices = @transform_1, window_bounds = array<i64: 1, 128>}, {pipeline_mode = #tpu.pipeline_mode<synchronous>, transform_indices = @transform_2, window_bounds = array<i64: 1, 128>}, {transform_indices = @transform_3, window_bounds = array<i64: 256, 128>}]} {
    %c0 = arith.constant 0 : index
    %c0_0 = arith.constant 0 : index
    %0 = vector.load %arg1[%c0, %c0_0] : memref<256x128xbf16, #tpu.memory_space<vmem>>, vector<256x128xbf16>
    %1 = arith.extf %0 : vector<256x128xbf16> to vector<256x128xf32>
    %c0_1 = arith.constant 0 : index
    %c0_2 = arith.constant 0 : index
    %2 = vector.load %arg2[%c0_1, %c0_2] : memref<1x128xf32, #tpu.memory_space<vmem>>, vector<1x128xf32>
    %3 = vector.broadcast %2 : vector<1x128xf32> to vector<256x128xf32>
    %4 = arith.mulf %1, %3 : vector<256x128xf32>
    %c0_3 = arith.constant 0 : index
    %c0_4 = arith.constant 0 : index
    %5 = vector.load %arg3[%c0_3, %c0_4] : memref<1x128xf32, #tpu.memory_space<vmem>>, vector<1x128xf32>
    %6 = vector.broadcast %5 : vector<1x128xf32> to vector<256x128xf32>
    %7 = arith.addf %4, %6 : vector<256x128xf32>
    %cst = arith.constant 0.000000e+00 : f32
    %8 = vector.broadcast %cst : f32 to vector<256x128xf32>
    %9 = arith.maximumf %7, %8 : vector<256x128xf32>
    %10 = arith.truncf %9 : vector<256x128xf32> to vector<256x128xbf16>
    %c0_5 = arith.constant 0 : index
    %c0_6 = arith.constant 0 : index
    %11 = vector.load %arg4[%c0_5, %c0_6] : memref<256x128xbf16, #tpu.memory_space<vmem>>, vector<256x128xbf16>
    tpu.vector_store %arg4[%c0_5, %c0_6], %10 {strides = array<i32>} : memref<256x128xbf16, #tpu.memory_space<vmem>>, vector<256x128xbf16>,
    return
  }
  func.func @transform_0(%arg0: i32) -> (i32, i32) {
    %c0_i32 = arith.constant 0 : i32
    %c0_i32_0 = arith.constant 0 : i32
    return %arg0, %c0_i32 : i32, i32
  }
  func.func @transform_1(%arg0: i32) -> (i32, i32) {
    %c0_i32 = arith.constant 0 : i32
    %c0_i32_0 = arith.constant 0 : i32
    %c0_i32_1 = arith.constant 0 : i32
    return %c0_i32, %c0_i32_0 : i32, i32
  }
  func.func @transform_2(%arg0: i32) -> (i32, i32) {
    %c0_i32 = arith.constant 0 : i32
    %c0_i32_0 = arith.constant 0 : i32
    %c0_i32_1 = arith.constant 0 : i32
    return %c0_i32, %c0_i32_0 : i32, i32
  }
  func.func @transform_3(%arg0: i32) -> (i32, i32) {
    %c0_i32 = arith.constant 0 : i32
    %c0_i32_0 = arith.constant 0 : i32
    return %arg0, %c0_i32 : i32, i32
  }
}

module attributes {stable_mosaic.version = 11 : i64} {
  func.func @_maxpool9_kernel(%arg0: i32, %arg1: memref<64x128xbf16, #tpu.memory_space<vmem>>, %arg2: memref<64x128xbf16, #tpu.memory_space<vmem>>, %arg3: memref<64x128xbf16, #tpu.memory_space<vmem>>, %arg4: memref<64x128xbf16, #tpu.memory_space<vmem>>, %arg5: memref<64x128xbf16, #tpu.memory_space<vmem>>, %arg6: memref<64x128xbf16, #tpu.memory_space<vmem>>, %arg7: memref<64x128xbf16, #tpu.memory_space<vmem>>, %arg8: memref<64x128xbf16, #tpu.memory_space<vmem>>, %arg9: memref<64x128xbf16, #tpu.memory_space<vmem>>, %arg10: memref<64x128xbf16, #tpu.memory_space<vmem>>) attributes {dimension_semantics = [#tpu.dimension_semantics<parallel>], iteration_bounds = array<i64: 1>, scalar_prefetch = 0 : i64, scratch_operands = 0 : i64, tpu.core_type = #tpu.core_type<tc>, window_params = [{transform_indices = @transform_0, window_bounds = array<i64: 64, 128>}, {transform_indices = @transform_1, window_bounds = array<i64: 64, 128>}, {transform_indices = @transform_2, window_bounds = array<i64: 64, 128>}, {transform_indices = @transform_3, window_bounds = array<i64: 64, 128>}, {transform_indices = @transform_4, window_bounds = array<i64: 64, 128>}, {transform_indices = @transform_5, window_bounds = array<i64: 64, 128>}, {transform_indices = @transform_6, window_bounds = array<i64: 64, 128>}, {transform_indices = @transform_7, window_bounds = array<i64: 64, 128>}, {transform_indices = @transform_8, window_bounds = array<i64: 64, 128>}, {transform_indices = @transform_9, window_bounds = array<i64: 64, 128>}]} {
    %c0 = arith.constant 0 : index
    %c0_0 = arith.constant 0 : index
    %0 = vector.load %arg1[%c0, %c0_0] : memref<64x128xbf16, #tpu.memory_space<vmem>>, vector<64x128xbf16>
    %c0_1 = arith.constant 0 : index
    %c0_2 = arith.constant 0 : index
    %1 = vector.load %arg2[%c0_1, %c0_2] : memref<64x128xbf16, #tpu.memory_space<vmem>>, vector<64x128xbf16>
    %2 = arith.maximumf %0, %1 : vector<64x128xbf16>
    %c0_3 = arith.constant 0 : index
    %c0_4 = arith.constant 0 : index
    %3 = vector.load %arg3[%c0_3, %c0_4] : memref<64x128xbf16, #tpu.memory_space<vmem>>, vector<64x128xbf16>
    %4 = arith.maximumf %2, %3 : vector<64x128xbf16>
    %c0_5 = arith.constant 0 : index
    %c0_6 = arith.constant 0 : index
    %5 = vector.load %arg4[%c0_5, %c0_6] : memref<64x128xbf16, #tpu.memory_space<vmem>>, vector<64x128xbf16>
    %6 = arith.maximumf %4, %5 : vector<64x128xbf16>
    %c0_7 = arith.constant 0 : index
    %c0_8 = arith.constant 0 : index
    %7 = vector.load %arg5[%c0_7, %c0_8] : memref<64x128xbf16, #tpu.memory_space<vmem>>, vector<64x128xbf16>
    %8 = arith.maximumf %6, %7 : vector<64x128xbf16>
    %c0_9 = arith.constant 0 : index
    %c0_10 = arith.constant 0 : index
    %9 = vector.load %arg6[%c0_9, %c0_10] : memref<64x128xbf16, #tpu.memory_space<vmem>>, vector<64x128xbf16>
    %10 = arith.maximumf %8, %9 : vector<64x128xbf16>
    %c0_11 = arith.constant 0 : index
    %c0_12 = arith.constant 0 : index
    %11 = vector.load %arg7[%c0_11, %c0_12] : memref<64x128xbf16, #tpu.memory_space<vmem>>, vector<64x128xbf16>
    %12 = arith.maximumf %10, %11 : vector<64x128xbf16>
    %c0_13 = arith.constant 0 : index
    %c0_14 = arith.constant 0 : index
    %13 = vector.load %arg8[%c0_13, %c0_14] : memref<64x128xbf16, #tpu.memory_space<vmem>>, vector<64x128xbf16>
    %14 = arith.maximumf %12, %13 : vector<64x128xbf16>
    %c0_15 = arith.constant 0 : index
    %c0_16 = arith.constant 0 : index
    %15 = vector.load %arg9[%c0_15, %c0_16] : memref<64x128xbf16, #tpu.memory_space<vmem>>, vector<64x128xbf16>
    %16 = arith.maximumf %14, %15 : vector<64x128xbf16>
    %c0_17 = arith.constant 0 : index
    %c0_18 = arith.constant 0 : index
    %17 = vector.load %arg10[%c0_17, %c0_18] : memref<64x128xbf16, #tpu.memory_space<vmem>>, vector<64x128xbf16>
    tpu.vector_store %arg10[%c0_17, %c0_18], %16 {strides = array<i32>} : memref<64x128xbf16, #tpu.memory_space<vmem>>, vector<64x128xbf16>,
    return
  }
  func.func @transform_0(%arg0: i32) -> (i32, i32) {
    %c0_i32 = arith.constant 0 : i32
    %c0_i32_0 = arith.constant 0 : i32
    return %arg0, %c0_i32 : i32, i32
  }
  func.func @transform_1(%arg0: i32) -> (i32, i32) {
    %c0_i32 = arith.constant 0 : i32
    %c0_i32_0 = arith.constant 0 : i32
    return %arg0, %c0_i32 : i32, i32
  }
  func.func @transform_2(%arg0: i32) -> (i32, i32) {
    %c0_i32 = arith.constant 0 : i32
    %c0_i32_0 = arith.constant 0 : i32
    return %arg0, %c0_i32 : i32, i32
  }
  func.func @transform_3(%arg0: i32) -> (i32, i32) {
    %c0_i32 = arith.constant 0 : i32
    %c0_i32_0 = arith.constant 0 : i32
    return %arg0, %c0_i32 : i32, i32
  }
  func.func @transform_4(%arg0: i32) -> (i32, i32) {
    %c0_i32 = arith.constant 0 : i32
    %c0_i32_0 = arith.constant 0 : i32
    return %arg0, %c0_i32 : i32, i32
  }
  func.func @transform_5(%arg0: i32) -> (i32, i32) {
    %c0_i32 = arith.constant 0 : i32
    %c0_i32_0 = arith.constant 0 : i32
    return %arg0, %c0_i32 : i32, i32
  }
  func.func @transform_6(%arg0: i32) -> (i32, i32) {
    %c0_i32 = arith.constant 0 : i32
    %c0_i32_0 = arith.constant 0 : i32
    return %arg0, %c0_i32 : i32, i32
  }
  func.func @transform_7(%arg0: i32) -> (i32, i32) {
    %c0_i32 = arith.constant 0 : i32
    %c0_i32_0 = arith.constant 0 : i32
    return %arg0, %c0_i32 : i32, i32
  }
  func.func @transform_8(%arg0: i32) -> (i32, i32) {
    %c0_i32 = arith.constant 0 : i32
    %c0_i32_0 = arith.constant 0 : i32
    return %arg0, %c0_i32 : i32, i32
  }
  func.func @transform_9(%arg0: i32) -> (i32, i32) {
    %c0_i32 = arith.constant 0 : i32
    %c0_i32_0 = arith.constant 0 : i32
    return %arg0, %c0_i32 : i32, i32
  }
}

module attributes {stable_mosaic.version = 11 : i64} {
  func.func @_bn_apply_kernel(%arg0: i32, %arg1: memref<64x128xbf16, #tpu.memory_space<vmem>>, %arg2: memref<1x128xf32, #tpu.memory_space<vmem>>, %arg3: memref<1x128xf32, #tpu.memory_space<vmem>>, %arg4: memref<64x128xbf16, #tpu.memory_space<vmem>>) attributes {dimension_semantics = [#tpu.dimension_semantics<parallel>], iteration_bounds = array<i64: 1>, scalar_prefetch = 0 : i64, scratch_operands = 0 : i64, tpu.core_type = #tpu.core_type<tc>, window_params = [{transform_indices = @transform_0, window_bounds = array<i64: 64, 128>}, {pipeline_mode = #tpu.pipeline_mode<synchronous>, transform_indices = @transform_1, window_bounds = array<i64: 1, 128>}, {pipeline_mode = #tpu.pipeline_mode<synchronous>, transform_indices = @transform_2, window_bounds = array<i64: 1, 128>}, {transform_indices = @transform_3, window_bounds = array<i64: 64, 128>}]} {
    %c0 = arith.constant 0 : index
    %c0_0 = arith.constant 0 : index
    %0 = vector.load %arg1[%c0, %c0_0] : memref<64x128xbf16, #tpu.memory_space<vmem>>, vector<64x128xbf16>
    %1 = arith.extf %0 : vector<64x128xbf16> to vector<64x128xf32>
    %c0_1 = arith.constant 0 : index
    %c0_2 = arith.constant 0 : index
    %2 = vector.load %arg2[%c0_1, %c0_2] : memref<1x128xf32, #tpu.memory_space<vmem>>, vector<1x128xf32>
    %3 = vector.broadcast %2 : vector<1x128xf32> to vector<64x128xf32>
    %4 = arith.mulf %1, %3 : vector<64x128xf32>
    %c0_3 = arith.constant 0 : index
    %c0_4 = arith.constant 0 : index
    %5 = vector.load %arg3[%c0_3, %c0_4] : memref<1x128xf32, #tpu.memory_space<vmem>>, vector<1x128xf32>
    %6 = vector.broadcast %5 : vector<1x128xf32> to vector<64x128xf32>
    %7 = arith.addf %4, %6 : vector<64x128xf32>
    %cst = arith.constant 0.000000e+00 : f32
    %8 = vector.broadcast %cst : f32 to vector<64x128xf32>
    %9 = arith.maximumf %7, %8 : vector<64x128xf32>
    %10 = arith.truncf %9 : vector<64x128xf32> to vector<64x128xbf16>
    %c0_5 = arith.constant 0 : index
    %c0_6 = arith.constant 0 : index
    %11 = vector.load %arg4[%c0_5, %c0_6] : memref<64x128xbf16, #tpu.memory_space<vmem>>, vector<64x128xbf16>
    tpu.vector_store %arg4[%c0_5, %c0_6], %10 {strides = array<i32>} : memref<64x128xbf16, #tpu.memory_space<vmem>>, vector<64x128xbf16>,
    return
  }
  func.func @transform_0(%arg0: i32) -> (i32, i32) {
    %c0_i32 = arith.constant 0 : i32
    %c0_i32_0 = arith.constant 0 : i32
    return %arg0, %c0_i32 : i32, i32
  }
  func.func @transform_1(%arg0: i32) -> (i32, i32) {
    %c0_i32 = arith.constant 0 : i32
    %c0_i32_0 = arith.constant 0 : i32
    %c0_i32_1 = arith.constant 0 : i32
    return %c0_i32, %c0_i32_0 : i32, i32
  }
  func.func @transform_2(%arg0: i32) -> (i32, i32) {
    %c0_i32 = arith.constant 0 : i32
    %c0_i32_0 = arith.constant 0 : i32
    %c0_i32_1 = arith.constant 0 : i32
    return %c0_i32, %c0_i32_0 : i32, i32
  }
  func.func @transform_3(%arg0: i32) -> (i32, i32) {
    %c0_i32 = arith.constant 0 : i32
    %c0_i32_0 = arith.constant 0 : i32
    return %arg0, %c0_i32 : i32, i32
  }
}

module attributes {stable_mosaic.version = 11 : i64} {
  func.func @_bn_apply_res_kernel(%arg0: i32, %arg1: memref<64x128xbf16, #tpu.memory_space<vmem>>, %arg2: memref<1x128xf32, #tpu.memory_space<vmem>>, %arg3: memref<1x128xf32, #tpu.memory_space<vmem>>, %arg4: memref<64x128xbf16, #tpu.memory_space<vmem>>, %arg5: memref<64x128xbf16, #tpu.memory_space<vmem>>) attributes {dimension_semantics = [#tpu.dimension_semantics<parallel>], iteration_bounds = array<i64: 1>, scalar_prefetch = 0 : i64, scratch_operands = 0 : i64, tpu.core_type = #tpu.core_type<tc>, window_params = [{transform_indices = @transform_0, window_bounds = array<i64: 64, 128>}, {pipeline_mode = #tpu.pipeline_mode<synchronous>, transform_indices = @transform_1, window_bounds = array<i64: 1, 128>}, {pipeline_mode = #tpu.pipeline_mode<synchronous>, transform_indices = @transform_2, window_bounds = array<i64: 1, 128>}, {transform_indices = @transform_3, window_bounds = array<i64: 64, 128>}, {transform_indices = @transform_4, window_bounds = array<i64: 64, 128>}]} {
    %c0 = arith.constant 0 : index
    %c0_0 = arith.constant 0 : index
    %0 = vector.load %arg1[%c0, %c0_0] : memref<64x128xbf16, #tpu.memory_space<vmem>>, vector<64x128xbf16>
    %1 = arith.extf %0 : vector<64x128xbf16> to vector<64x128xf32>
    %c0_1 = arith.constant 0 : index
    %c0_2 = arith.constant 0 : index
    %2 = vector.load %arg2[%c0_1, %c0_2] : memref<1x128xf32, #tpu.memory_space<vmem>>, vector<1x128xf32>
    %3 = vector.broadcast %2 : vector<1x128xf32> to vector<64x128xf32>
    %4 = arith.mulf %1, %3 : vector<64x128xf32>
    %c0_3 = arith.constant 0 : index
    %c0_4 = arith.constant 0 : index
    %5 = vector.load %arg3[%c0_3, %c0_4] : memref<1x128xf32, #tpu.memory_space<vmem>>, vector<1x128xf32>
    %6 = vector.broadcast %5 : vector<1x128xf32> to vector<64x128xf32>
    %7 = arith.addf %4, %6 : vector<64x128xf32>
    %c0_5 = arith.constant 0 : index
    %c0_6 = arith.constant 0 : index
    %8 = vector.load %arg4[%c0_5, %c0_6] : memref<64x128xbf16, #tpu.memory_space<vmem>>, vector<64x128xbf16>
    %9 = arith.extf %8 : vector<64x128xbf16> to vector<64x128xf32>
    %10 = arith.addf %7, %9 : vector<64x128xf32>
    %cst = arith.constant 0.000000e+00 : f32
    %11 = vector.broadcast %cst : f32 to vector<64x128xf32>
    %12 = arith.maximumf %10, %11 : vector<64x128xf32>
    %13 = arith.truncf %12 : vector<64x128xf32> to vector<64x128xbf16>
    %c0_7 = arith.constant 0 : index
    %c0_8 = arith.constant 0 : index
    %14 = vector.load %arg5[%c0_7, %c0_8] : memref<64x128xbf16, #tpu.memory_space<vmem>>, vector<64x128xbf16>
    tpu.vector_store %arg5[%c0_7, %c0_8], %13 {strides = array<i32>} : memref<64x128xbf16, #tpu.memory_space<vmem>>, vector<64x128xbf16>,
    return
  }
  func.func @transform_0(%arg0: i32) -> (i32, i32) {
    %c0_i32 = arith.constant 0 : i32
    %c0_i32_0 = arith.constant 0 : i32
    return %arg0, %c0_i32 : i32, i32
  }
  func.func @transform_1(%arg0: i32) -> (i32, i32) {
    %c0_i32 = arith.constant 0 : i32
    %c0_i32_0 = arith.constant 0 : i32
    %c0_i32_1 = arith.constant 0 : i32
    return %c0_i32, %c0_i32_0 : i32, i32
  }
  func.func @transform_2(%arg0: i32) -> (i32, i32) {
    %c0_i32 = arith.constant 0 : i32
    %c0_i32_0 = arith.constant 0 : i32
    %c0_i32_1 = arith.constant 0 : i32
    return %c0_i32, %c0_i32_0 : i32, i32
  }
  func.func @transform_3(%arg0: i32) -> (i32, i32) {
    %c0_i32 = arith.constant 0 : i32
    %c0_i32_0 = arith.constant 0 : i32
    return %arg0, %c0_i32 : i32, i32
  }
  func.func @transform_4(%arg0: i32) -> (i32, i32) {
    %c0_i32 = arith.constant 0 : i32
    %c0_i32_0 = arith.constant 0 : i32
    return %arg0, %c0_i32 : i32, i32
  }
}

module attributes {stable_mosaic.version = 11 : i64} {
  func.func @_matmul_stats_kernel(%arg0: i32, %arg1: i32, %arg2: i32, %arg3: memref<128x640xbf16, #tpu.memory_space<vmem>>, %arg4: memref<640x128xbf16, #tpu.memory_space<vmem>>, %arg5: memref<128x128xbf16, #tpu.memory_space<vmem>>, %arg6: memref<1x1x128xf32, #tpu.memory_space<vmem>>, %arg7: memref<1x1x128xf32, #tpu.memory_space<vmem>>, %arg8: memref<128x128xf32, #tpu.memory_space<vmem>>) attributes {dimension_semantics = [#tpu.dimension_semantics<parallel>, #tpu.dimension_semantics<parallel>, #tpu.dimension_semantics<arbitrary>], iteration_bounds = array<i64: 1, 1, 1>, scalar_prefetch = 0 : i64, scratch_operands = 1 : i64, tpu.core_type = #tpu.core_type<tc>, window_params = [{transform_indices = @transform_0, window_bounds = array<i64: 128, 640>}, {transform_indices = @transform_1, window_bounds = array<i64: 640, 128>}, {transform_indices = @transform_2, window_bounds = array<i64: 128, 128>}, {transform_indices = @transform_3, window_bounds = array<i64: 1, 1, 128>}, {transform_indices = @transform_4, window_bounds = array<i64: 1, 1, 128>}]} {
    %c0_i32 = arith.constant 0 : i32
    %0 = arith.cmpi eq, %arg2, %c0_i32 : i32
    %1 = arith.extui %0 : i1 to i32
    %c0_i32_0 = arith.constant 0 : i32
    %2 = arith.cmpi ne, %1, %c0_i32_0 : i32
    scf.if %2 {
      %cst_10 = arith.constant 0.000000e+00 : f32
      %12 = vector.broadcast %cst_10 : f32 to vector<128x128xf32>
      %c0_11 = arith.constant 0 : index
      %c0_12 = arith.constant 0 : index
      %13 = vector.load %arg8[%c0_11, %c0_12] : memref<128x128xf32, #tpu.memory_space<vmem>>, vector<128x128xf32>
      tpu.vector_store %arg8[%c0_11, %c0_12], %12 {strides = array<i32>} : memref<128x128xf32, #tpu.memory_space<vmem>>, vector<128x128xf32>,
    } else {
    }
    %c0 = arith.constant 0 : index
    %c0_1 = arith.constant 0 : index
    %3 = vector.load %arg8[%c0, %c0_1] : memref<128x128xf32, #tpu.memory_space<vmem>>, vector<128x128xf32>
    %c0_2 = arith.constant 0 : index
    %c0_3 = arith.constant 0 : index
    %4 = vector.load %arg3[%c0_2, %c0_3] : memref<128x640xbf16, #tpu.memory_space<vmem>>, vector<128x640xbf16>
    %c0_4 = arith.constant 0 : index
    %c0_5 = arith.constant 0 : index
    %5 = vector.load %arg4[%c0_4, %c0_5] : memref<640x128xbf16, #tpu.memory_space<vmem>>, vector<640x128xbf16>
    %cst = arith.constant dense<0.000000e+00> : vector<128x128xf32>
    %6 = tpu.matmul %4, %5, %cst {dimension_numbers = #tpu.dot_dimension_numbers<[1], [0], [0], [1], [0, 0, 1, 1], [], []>} : vector<128x640xbf16>, vector<640x128xbf16>, vector<128x128xf32> -> vector<128x128xf32>
    %7 = arith.addf %3, %6 : vector<128x128xf32>
    %c0_6 = arith.constant 0 : index
    %c0_7 = arith.constant 0 : index
    %8 = vector.load %arg8[%c0_6, %c0_7] : memref<128x128xf32, #tpu.memory_space<vmem>>, vector<128x128xf32>
    tpu.vector_store %arg8[%c0_6, %c0_7], %7 {strides = array<i32>} : memref<128x128xf32, #tpu.memory_space<vmem>>, vector<128x128xf32>,
    %c0_i32_8 = arith.constant 0 : i32
    %9 = arith.cmpi eq, %arg2, %c0_i32_8 : i32
    %10 = arith.extui %9 : i1 to i32
    %c0_i32_9 = arith.constant 0 : i32
    %11 = arith.cmpi ne, %10, %c0_i32_9 : i32
    scf.if %11 {
      %c0_10 = arith.constant 0 : index
      %c0_11 = arith.constant 0 : index
      %12 = vector.load %arg8[%c0_10, %c0_11] : memref<128x128xf32, #tpu.memory_space<vmem>>, vector<128x128xf32>
      %13 = arith.truncf %12 : vector<128x128xf32> to vector<128x128xbf16>
      %c0_12 = arith.constant 0 : index
      %c0_13 = arith.constant 0 : index
      %14 = vector.load %arg5[%c0_12, %c0_13] : memref<128x128xbf16, #tpu.memory_space<vmem>>, vector<128x128xbf16>
      tpu.vector_store %arg5[%c0_12, %c0_13], %13 {strides = array<i32>} : memref<128x128xbf16, #tpu.memory_space<vmem>>, vector<128x128xbf16>,
      %cst_14 = arith.constant dense<0.000000e+00> : vector<128xf32>
      %15 = vector.multi_reduction <add>, %12, %cst_14 [0] : vector<128x128xf32> to vector<128xf32>
      %16 = vector.shape_cast %15 : vector<128xf32> to vector<1x1x128xf32>
      %c0_15 = arith.constant 0 : index
      %c0_16 = arith.constant 0 : index
      %c0_17 = arith.constant 0 : index
      %17 = vector.load %arg6[%c0_15, %c0_16, %c0_17] : memref<1x1x128xf32, #tpu.memory_space<vmem>>, vector<1x1x128xf32>
      tpu.vector_store %arg6[%c0_15, %c0_16, %c0_17], %16 {strides = array<i32>} : memref<1x1x128xf32, #tpu.memory_space<vmem>>, vector<1x1x128xf32>,
      %18 = arith.mulf %12, %12 : vector<128x128xf32>
      %cst_18 = arith.constant dense<0.000000e+00> : vector<128xf32>
      %19 = vector.multi_reduction <add>, %18, %cst_18 [0] : vector<128x128xf32> to vector<128xf32>
      %20 = vector.shape_cast %19 : vector<128xf32> to vector<1x1x128xf32>
      %c0_19 = arith.constant 0 : index
      %c0_20 = arith.constant 0 : index
      %c0_21 = arith.constant 0 : index
      %21 = vector.load %arg7[%c0_19, %c0_20, %c0_21] : memref<1x1x128xf32, #tpu.memory_space<vmem>>, vector<1x1x128xf32>
      tpu.vector_store %arg7[%c0_19, %c0_20, %c0_21], %20 {strides = array<i32>} : memref<1x1x128xf32, #tpu.memory_space<vmem>>, vector<1x1x128xf32>,
    } else {
    }
    return
  }
  func.func @transform_0(%arg0: i32, %arg1: i32, %arg2: i32) -> (i32, i32) {
    %c0_i32 = arith.constant 0 : i32
    return %arg0, %arg2 : i32, i32
  }
  func.func @transform_1(%arg0: i32, %arg1: i32, %arg2: i32) -> (i32, i32) {
    %c0_i32 = arith.constant 0 : i32
    return %arg2, %arg1 : i32, i32
  }
  func.func @transform_2(%arg0: i32, %arg1: i32, %arg2: i32) -> (i32, i32) {
    %c0_i32 = arith.constant 0 : i32
    return %arg0, %arg1 : i32, i32
  }
  func.func @transform_3(%arg0: i32, %arg1: i32, %arg2: i32) -> (i32, i32, i32) {
    %c0_i32 = arith.constant 0 : i32
    %c0_i32_0 = arith.constant 0 : i32
    return %arg0, %c0_i32, %arg1 : i32, i32, i32
  }
  func.func @transform_4(%arg0: i32, %arg1: i32, %arg2: i32) -> (i32, i32, i32) {
    %c0_i32 = arith.constant 0 : i32
    %c0_i32_0 = arith.constant 0 : i32
    return %arg0, %c0_i32, %arg1 : i32, i32, i32
  }
}

module attributes {stable_mosaic.version = 11 : i64} {
  func.func @_matmul_stats_kernel(%arg0: i32, %arg1: i32, %arg2: i32, %arg3: memref<32x128xbf16, #tpu.memory_space<vmem>>, %arg4: memref<128x128xbf16, #tpu.memory_space<vmem>>, %arg5: memref<32x128xbf16, #tpu.memory_space<vmem>>, %arg6: memref<1x1x128xf32, #tpu.memory_space<vmem>>, %arg7: memref<1x1x128xf32, #tpu.memory_space<vmem>>, %arg8: memref<32x128xf32, #tpu.memory_space<vmem>>) attributes {dimension_semantics = [#tpu.dimension_semantics<parallel>, #tpu.dimension_semantics<parallel>, #tpu.dimension_semantics<arbitrary>], iteration_bounds = array<i64: 1, 1, 1>, scalar_prefetch = 0 : i64, scratch_operands = 1 : i64, tpu.core_type = #tpu.core_type<tc>, window_params = [{transform_indices = @transform_0, window_bounds = array<i64: 32, 128>}, {transform_indices = @transform_1, window_bounds = array<i64: 128, 128>}, {transform_indices = @transform_2, window_bounds = array<i64: 32, 128>}, {transform_indices = @transform_3, window_bounds = array<i64: 1, 1, 128>}, {transform_indices = @transform_4, window_bounds = array<i64: 1, 1, 128>}]} {
    %c0_i32 = arith.constant 0 : i32
    %0 = arith.cmpi eq, %arg2, %c0_i32 : i32
    %1 = arith.extui %0 : i1 to i32
    %c0_i32_0 = arith.constant 0 : i32
    %2 = arith.cmpi ne, %1, %c0_i32_0 : i32
    scf.if %2 {
      %cst_10 = arith.constant 0.000000e+00 : f32
      %12 = vector.broadcast %cst_10 : f32 to vector<32x128xf32>
      %c0_11 = arith.constant 0 : index
      %c0_12 = arith.constant 0 : index
      %13 = vector.load %arg8[%c0_11, %c0_12] : memref<32x128xf32, #tpu.memory_space<vmem>>, vector<32x128xf32>
      tpu.vector_store %arg8[%c0_11, %c0_12], %12 {strides = array<i32>} : memref<32x128xf32, #tpu.memory_space<vmem>>, vector<32x128xf32>,
    } else {
    }
    %c0 = arith.constant 0 : index
    %c0_1 = arith.constant 0 : index
    %3 = vector.load %arg8[%c0, %c0_1] : memref<32x128xf32, #tpu.memory_space<vmem>>, vector<32x128xf32>
    %c0_2 = arith.constant 0 : index
    %c0_3 = arith.constant 0 : index
    %4 = vector.load %arg3[%c0_2, %c0_3] : memref<32x128xbf16, #tpu.memory_space<vmem>>, vector<32x128xbf16>
    %c0_4 = arith.constant 0 : index
    %c0_5 = arith.constant 0 : index
    %5 = vector.load %arg4[%c0_4, %c0_5] : memref<128x128xbf16, #tpu.memory_space<vmem>>, vector<128x128xbf16>
    %cst = arith.constant dense<0.000000e+00> : vector<32x128xf32>
    %6 = tpu.matmul %4, %5, %cst {dimension_numbers = #tpu.dot_dimension_numbers<[1], [0], [0], [1], [0, 0, 1, 1], [], []>} : vector<32x128xbf16>, vector<128x128xbf16>, vector<32x128xf32> -> vector<32x128xf32>
    %7 = arith.addf %3, %6 : vector<32x128xf32>
    %c0_6 = arith.constant 0 : index
    %c0_7 = arith.constant 0 : index
    %8 = vector.load %arg8[%c0_6, %c0_7] : memref<32x128xf32, #tpu.memory_space<vmem>>, vector<32x128xf32>
    tpu.vector_store %arg8[%c0_6, %c0_7], %7 {strides = array<i32>} : memref<32x128xf32, #tpu.memory_space<vmem>>, vector<32x128xf32>,
    %c0_i32_8 = arith.constant 0 : i32
    %9 = arith.cmpi eq, %arg2, %c0_i32_8 : i32
    %10 = arith.extui %9 : i1 to i32
    %c0_i32_9 = arith.constant 0 : i32
    %11 = arith.cmpi ne, %10, %c0_i32_9 : i32
    scf.if %11 {
      %c0_10 = arith.constant 0 : index
      %c0_11 = arith.constant 0 : index
      %12 = vector.load %arg8[%c0_10, %c0_11] : memref<32x128xf32, #tpu.memory_space<vmem>>, vector<32x128xf32>
      %13 = arith.truncf %12 : vector<32x128xf32> to vector<32x128xbf16>
      %c0_12 = arith.constant 0 : index
      %c0_13 = arith.constant 0 : index
      %14 = vector.load %arg5[%c0_12, %c0_13] : memref<32x128xbf16, #tpu.memory_space<vmem>>, vector<32x128xbf16>
      tpu.vector_store %arg5[%c0_12, %c0_13], %13 {strides = array<i32>} : memref<32x128xbf16, #tpu.memory_space<vmem>>, vector<32x128xbf16>,
      %cst_14 = arith.constant dense<0.000000e+00> : vector<128xf32>
      %15 = vector.multi_reduction <add>, %12, %cst_14 [0] : vector<32x128xf32> to vector<128xf32>
      %16 = vector.shape_cast %15 : vector<128xf32> to vector<1x1x128xf32>
      %c0_15 = arith.constant 0 : index
      %c0_16 = arith.constant 0 : index
      %c0_17 = arith.constant 0 : index
      %17 = vector.load %arg6[%c0_15, %c0_16, %c0_17] : memref<1x1x128xf32, #tpu.memory_space<vmem>>, vector<1x1x128xf32>
      tpu.vector_store %arg6[%c0_15, %c0_16, %c0_17], %16 {strides = array<i32>} : memref<1x1x128xf32, #tpu.memory_space<vmem>>, vector<1x1x128xf32>,
      %18 = arith.mulf %12, %12 : vector<32x128xf32>
      %cst_18 = arith.constant dense<0.000000e+00> : vector<128xf32>
      %19 = vector.multi_reduction <add>, %18, %cst_18 [0] : vector<32x128xf32> to vector<128xf32>
      %20 = vector.shape_cast %19 : vector<128xf32> to vector<1x1x128xf32>
      %c0_19 = arith.constant 0 : index
      %c0_20 = arith.constant 0 : index
      %c0_21 = arith.constant 0 : index
      %21 = vector.load %arg7[%c0_19, %c0_20, %c0_21] : memref<1x1x128xf32, #tpu.memory_space<vmem>>, vector<1x1x128xf32>
      tpu.vector_store %arg7[%c0_19, %c0_20, %c0_21], %20 {strides = array<i32>} : memref<1x1x128xf32, #tpu.memory_space<vmem>>, vector<1x1x128xf32>,
    } else {
    }
    return
  }
  func.func @transform_0(%arg0: i32, %arg1: i32, %arg2: i32) -> (i32, i32) {
    %c0_i32 = arith.constant 0 : i32
    return %arg0, %arg2 : i32, i32
  }
  func.func @transform_1(%arg0: i32, %arg1: i32, %arg2: i32) -> (i32, i32) {
    %c0_i32 = arith.constant 0 : i32
    return %arg2, %arg1 : i32, i32
  }
  func.func @transform_2(%arg0: i32, %arg1: i32, %arg2: i32) -> (i32, i32) {
    %c0_i32 = arith.constant 0 : i32
    return %arg0, %arg1 : i32, i32
  }
  func.func @transform_3(%arg0: i32, %arg1: i32, %arg2: i32) -> (i32, i32, i32) {
    %c0_i32 = arith.constant 0 : i32
    %c0_i32_0 = arith.constant 0 : i32
    return %arg0, %c0_i32, %arg1 : i32, i32, i32
  }
  func.func @transform_4(%arg0: i32, %arg1: i32, %arg2: i32) -> (i32, i32, i32) {
    %c0_i32 = arith.constant 0 : i32
    %c0_i32_0 = arith.constant 0 : i32
    return %arg0, %c0_i32, %arg1 : i32, i32, i32
  }
}

module attributes {stable_mosaic.version = 11 : i64} {
  func.func @_bn_apply_kernel(%arg0: i32, %arg1: memref<32x128xbf16, #tpu.memory_space<vmem>>, %arg2: memref<1x128xf32, #tpu.memory_space<vmem>>, %arg3: memref<1x128xf32, #tpu.memory_space<vmem>>, %arg4: memref<32x128xbf16, #tpu.memory_space<vmem>>) attributes {dimension_semantics = [#tpu.dimension_semantics<parallel>], iteration_bounds = array<i64: 1>, scalar_prefetch = 0 : i64, scratch_operands = 0 : i64, tpu.core_type = #tpu.core_type<tc>, window_params = [{transform_indices = @transform_0, window_bounds = array<i64: 32, 128>}, {pipeline_mode = #tpu.pipeline_mode<synchronous>, transform_indices = @transform_1, window_bounds = array<i64: 1, 128>}, {pipeline_mode = #tpu.pipeline_mode<synchronous>, transform_indices = @transform_2, window_bounds = array<i64: 1, 128>}, {transform_indices = @transform_3, window_bounds = array<i64: 32, 128>}]} {
    %c0 = arith.constant 0 : index
    %c0_0 = arith.constant 0 : index
    %0 = vector.load %arg1[%c0, %c0_0] : memref<32x128xbf16, #tpu.memory_space<vmem>>, vector<32x128xbf16>
    %1 = arith.extf %0 : vector<32x128xbf16> to vector<32x128xf32>
    %c0_1 = arith.constant 0 : index
    %c0_2 = arith.constant 0 : index
    %2 = vector.load %arg2[%c0_1, %c0_2] : memref<1x128xf32, #tpu.memory_space<vmem>>, vector<1x128xf32>
    %3 = vector.broadcast %2 : vector<1x128xf32> to vector<32x128xf32>
    %4 = arith.mulf %1, %3 : vector<32x128xf32>
    %c0_3 = arith.constant 0 : index
    %c0_4 = arith.constant 0 : index
    %5 = vector.load %arg3[%c0_3, %c0_4] : memref<1x128xf32, #tpu.memory_space<vmem>>, vector<1x128xf32>
    %6 = vector.broadcast %5 : vector<1x128xf32> to vector<32x128xf32>
    %7 = arith.addf %4, %6 : vector<32x128xf32>
    %8 = arith.truncf %7 : vector<32x128xf32> to vector<32x128xbf16>
    %c0_5 = arith.constant 0 : index
    %c0_6 = arith.constant 0 : index
    %9 = vector.load %arg4[%c0_5, %c0_6] : memref<32x128xbf16, #tpu.memory_space<vmem>>, vector<32x128xbf16>
    tpu.vector_store %arg4[%c0_5, %c0_6], %8 {strides = array<i32>} : memref<32x128xbf16, #tpu.memory_space<vmem>>, vector<32x128xbf16>,
    return
  }
  func.func @transform_0(%arg0: i32) -> (i32, i32) {
    %c0_i32 = arith.constant 0 : i32
    %c0_i32_0 = arith.constant 0 : i32
    return %arg0, %c0_i32 : i32, i32
  }
  func.func @transform_1(%arg0: i32) -> (i32, i32) {
    %c0_i32 = arith.constant 0 : i32
    %c0_i32_0 = arith.constant 0 : i32
    %c0_i32_1 = arith.constant 0 : i32
    return %c0_i32, %c0_i32_0 : i32, i32
  }
  func.func @transform_2(%arg0: i32) -> (i32, i32) {
    %c0_i32 = arith.constant 0 : i32
    %c0_i32_0 = arith.constant 0 : i32
    %c0_i32_1 = arith.constant 0 : i32
    return %c0_i32, %c0_i32_0 : i32, i32
  }
  func.func @transform_3(%arg0: i32) -> (i32, i32) {
    %c0_i32 = arith.constant 0 : i32
    %c0_i32_0 = arith.constant 0 : i32
    return %arg0, %c0_i32 : i32, i32
  }
}

module attributes {stable_mosaic.version = 11 : i64} {
  func.func @_matmul_stats_kernel(%arg0: i32, %arg1: i32, %arg2: i32, %arg3: memref<32x640xbf16, #tpu.memory_space<vmem>>, %arg4: memref<640x128xbf16, #tpu.memory_space<vmem>>, %arg5: memref<32x128xbf16, #tpu.memory_space<vmem>>, %arg6: memref<1x1x128xf32, #tpu.memory_space<vmem>>, %arg7: memref<1x1x128xf32, #tpu.memory_space<vmem>>, %arg8: memref<32x128xf32, #tpu.memory_space<vmem>>) attributes {dimension_semantics = [#tpu.dimension_semantics<parallel>, #tpu.dimension_semantics<parallel>, #tpu.dimension_semantics<arbitrary>], iteration_bounds = array<i64: 1, 1, 1>, scalar_prefetch = 0 : i64, scratch_operands = 1 : i64, tpu.core_type = #tpu.core_type<tc>, window_params = [{transform_indices = @transform_0, window_bounds = array<i64: 32, 640>}, {transform_indices = @transform_1, window_bounds = array<i64: 640, 128>}, {transform_indices = @transform_2, window_bounds = array<i64: 32, 128>}, {transform_indices = @transform_3, window_bounds = array<i64: 1, 1, 128>}, {transform_indices = @transform_4, window_bounds = array<i64: 1, 1, 128>}]} {
    %c0_i32 = arith.constant 0 : i32
    %0 = arith.cmpi eq, %arg2, %c0_i32 : i32
    %1 = arith.extui %0 : i1 to i32
    %c0_i32_0 = arith.constant 0 : i32
    %2 = arith.cmpi ne, %1, %c0_i32_0 : i32
    scf.if %2 {
      %cst_10 = arith.constant 0.000000e+00 : f32
      %12 = vector.broadcast %cst_10 : f32 to vector<32x128xf32>
      %c0_11 = arith.constant 0 : index
      %c0_12 = arith.constant 0 : index
      %13 = vector.load %arg8[%c0_11, %c0_12] : memref<32x128xf32, #tpu.memory_space<vmem>>, vector<32x128xf32>
      tpu.vector_store %arg8[%c0_11, %c0_12], %12 {strides = array<i32>} : memref<32x128xf32, #tpu.memory_space<vmem>>, vector<32x128xf32>,
    } else {
    }
    %c0 = arith.constant 0 : index
    %c0_1 = arith.constant 0 : index
    %3 = vector.load %arg8[%c0, %c0_1] : memref<32x128xf32, #tpu.memory_space<vmem>>, vector<32x128xf32>
    %c0_2 = arith.constant 0 : index
    %c0_3 = arith.constant 0 : index
    %4 = vector.load %arg3[%c0_2, %c0_3] : memref<32x640xbf16, #tpu.memory_space<vmem>>, vector<32x640xbf16>
    %c0_4 = arith.constant 0 : index
    %c0_5 = arith.constant 0 : index
    %5 = vector.load %arg4[%c0_4, %c0_5] : memref<640x128xbf16, #tpu.memory_space<vmem>>, vector<640x128xbf16>
    %cst = arith.constant dense<0.000000e+00> : vector<32x128xf32>
    %6 = tpu.matmul %4, %5, %cst {dimension_numbers = #tpu.dot_dimension_numbers<[1], [0], [0], [1], [0, 0, 1, 1], [], []>} : vector<32x640xbf16>, vector<640x128xbf16>, vector<32x128xf32> -> vector<32x128xf32>
    %7 = arith.addf %3, %6 : vector<32x128xf32>
    %c0_6 = arith.constant 0 : index
    %c0_7 = arith.constant 0 : index
    %8 = vector.load %arg8[%c0_6, %c0_7] : memref<32x128xf32, #tpu.memory_space<vmem>>, vector<32x128xf32>
    tpu.vector_store %arg8[%c0_6, %c0_7], %7 {strides = array<i32>} : memref<32x128xf32, #tpu.memory_space<vmem>>, vector<32x128xf32>,
    %c0_i32_8 = arith.constant 0 : i32
    %9 = arith.cmpi eq, %arg2, %c0_i32_8 : i32
    %10 = arith.extui %9 : i1 to i32
    %c0_i32_9 = arith.constant 0 : i32
    %11 = arith.cmpi ne, %10, %c0_i32_9 : i32
    scf.if %11 {
      %c0_10 = arith.constant 0 : index
      %c0_11 = arith.constant 0 : index
      %12 = vector.load %arg8[%c0_10, %c0_11] : memref<32x128xf32, #tpu.memory_space<vmem>>, vector<32x128xf32>
      %13 = arith.truncf %12 : vector<32x128xf32> to vector<32x128xbf16>
      %c0_12 = arith.constant 0 : index
      %c0_13 = arith.constant 0 : index
      %14 = vector.load %arg5[%c0_12, %c0_13] : memref<32x128xbf16, #tpu.memory_space<vmem>>, vector<32x128xbf16>
      tpu.vector_store %arg5[%c0_12, %c0_13], %13 {strides = array<i32>} : memref<32x128xbf16, #tpu.memory_space<vmem>>, vector<32x128xbf16>,
      %cst_14 = arith.constant dense<0.000000e+00> : vector<128xf32>
      %15 = vector.multi_reduction <add>, %12, %cst_14 [0] : vector<32x128xf32> to vector<128xf32>
      %16 = vector.shape_cast %15 : vector<128xf32> to vector<1x1x128xf32>
      %c0_15 = arith.constant 0 : index
      %c0_16 = arith.constant 0 : index
      %c0_17 = arith.constant 0 : index
      %17 = vector.load %arg6[%c0_15, %c0_16, %c0_17] : memref<1x1x128xf32, #tpu.memory_space<vmem>>, vector<1x1x128xf32>
      tpu.vector_store %arg6[%c0_15, %c0_16, %c0_17], %16 {strides = array<i32>} : memref<1x1x128xf32, #tpu.memory_space<vmem>>, vector<1x1x128xf32>,
      %18 = arith.mulf %12, %12 : vector<32x128xf32>
      %cst_18 = arith.constant dense<0.000000e+00> : vector<128xf32>
      %19 = vector.multi_reduction <add>, %18, %cst_18 [0] : vector<32x128xf32> to vector<128xf32>
      %20 = vector.shape_cast %19 : vector<128xf32> to vector<1x1x128xf32>
      %c0_19 = arith.constant 0 : index
      %c0_20 = arith.constant 0 : index
      %c0_21 = arith.constant 0 : index
      %21 = vector.load %arg7[%c0_19, %c0_20, %c0_21] : memref<1x1x128xf32, #tpu.memory_space<vmem>>, vector<1x1x128xf32>
      tpu.vector_store %arg7[%c0_19, %c0_20, %c0_21], %20 {strides = array<i32>} : memref<1x1x128xf32, #tpu.memory_space<vmem>>, vector<1x1x128xf32>,
    } else {
    }
    return
  }
  func.func @transform_0(%arg0: i32, %arg1: i32, %arg2: i32) -> (i32, i32) {
    %c0_i32 = arith.constant 0 : i32
    return %arg0, %arg2 : i32, i32
  }
  func.func @transform_1(%arg0: i32, %arg1: i32, %arg2: i32) -> (i32, i32) {
    %c0_i32 = arith.constant 0 : i32
    return %arg2, %arg1 : i32, i32
  }
  func.func @transform_2(%arg0: i32, %arg1: i32, %arg2: i32) -> (i32, i32) {
    %c0_i32 = arith.constant 0 : i32
    return %arg0, %arg1 : i32, i32
  }
  func.func @transform_3(%arg0: i32, %arg1: i32, %arg2: i32) -> (i32, i32, i32) {
    %c0_i32 = arith.constant 0 : i32
    %c0_i32_0 = arith.constant 0 : i32
    return %arg0, %c0_i32, %arg1 : i32, i32, i32
  }
  func.func @transform_4(%arg0: i32, %arg1: i32, %arg2: i32) -> (i32, i32, i32) {
    %c0_i32 = arith.constant 0 : i32
    %c0_i32_0 = arith.constant 0 : i32
    return %arg0, %c0_i32, %arg1 : i32, i32, i32
  }
}

module attributes {stable_mosaic.version = 11 : i64} {
  func.func @_bn_apply_kernel(%arg0: i32, %arg1: memref<32x128xbf16, #tpu.memory_space<vmem>>, %arg2: memref<1x128xf32, #tpu.memory_space<vmem>>, %arg3: memref<1x128xf32, #tpu.memory_space<vmem>>, %arg4: memref<32x128xbf16, #tpu.memory_space<vmem>>) attributes {dimension_semantics = [#tpu.dimension_semantics<parallel>], iteration_bounds = array<i64: 1>, scalar_prefetch = 0 : i64, scratch_operands = 0 : i64, tpu.core_type = #tpu.core_type<tc>, window_params = [{transform_indices = @transform_0, window_bounds = array<i64: 32, 128>}, {pipeline_mode = #tpu.pipeline_mode<synchronous>, transform_indices = @transform_1, window_bounds = array<i64: 1, 128>}, {pipeline_mode = #tpu.pipeline_mode<synchronous>, transform_indices = @transform_2, window_bounds = array<i64: 1, 128>}, {transform_indices = @transform_3, window_bounds = array<i64: 32, 128>}]} {
    %c0 = arith.constant 0 : index
    %c0_0 = arith.constant 0 : index
    %0 = vector.load %arg1[%c0, %c0_0] : memref<32x128xbf16, #tpu.memory_space<vmem>>, vector<32x128xbf16>
    %1 = arith.extf %0 : vector<32x128xbf16> to vector<32x128xf32>
    %c0_1 = arith.constant 0 : index
    %c0_2 = arith.constant 0 : index
    %2 = vector.load %arg2[%c0_1, %c0_2] : memref<1x128xf32, #tpu.memory_space<vmem>>, vector<1x128xf32>
    %3 = vector.broadcast %2 : vector<1x128xf32> to vector<32x128xf32>
    %4 = arith.mulf %1, %3 : vector<32x128xf32>
    %c0_3 = arith.constant 0 : index
    %c0_4 = arith.constant 0 : index
    %5 = vector.load %arg3[%c0_3, %c0_4] : memref<1x128xf32, #tpu.memory_space<vmem>>, vector<1x128xf32>
    %6 = vector.broadcast %5 : vector<1x128xf32> to vector<32x128xf32>
    %7 = arith.addf %4, %6 : vector<32x128xf32>
    %cst = arith.constant 0.000000e+00 : f32
    %8 = vector.broadcast %cst : f32 to vector<32x128xf32>
    %9 = arith.maximumf %7, %8 : vector<32x128xf32>
    %10 = arith.truncf %9 : vector<32x128xf32> to vector<32x128xbf16>
    %c0_5 = arith.constant 0 : index
    %c0_6 = arith.constant 0 : index
    %11 = vector.load %arg4[%c0_5, %c0_6] : memref<32x128xbf16, #tpu.memory_space<vmem>>, vector<32x128xbf16>
    tpu.vector_store %arg4[%c0_5, %c0_6], %10 {strides = array<i32>} : memref<32x128xbf16, #tpu.memory_space<vmem>>, vector<32x128xbf16>,
    return
  }
  func.func @transform_0(%arg0: i32) -> (i32, i32) {
    %c0_i32 = arith.constant 0 : i32
    %c0_i32_0 = arith.constant 0 : i32
    return %arg0, %c0_i32 : i32, i32
  }
  func.func @transform_1(%arg0: i32) -> (i32, i32) {
    %c0_i32 = arith.constant 0 : i32
    %c0_i32_0 = arith.constant 0 : i32
    %c0_i32_1 = arith.constant 0 : i32
    return %c0_i32, %c0_i32_0 : i32, i32
  }
  func.func @transform_2(%arg0: i32) -> (i32, i32) {
    %c0_i32 = arith.constant 0 : i32
    %c0_i32_0 = arith.constant 0 : i32
    %c0_i32_1 = arith.constant 0 : i32
    return %c0_i32, %c0_i32_0 : i32, i32
  }
  func.func @transform_3(%arg0: i32) -> (i32, i32) {
    %c0_i32 = arith.constant 0 : i32
    %c0_i32_0 = arith.constant 0 : i32
    return %arg0, %c0_i32 : i32, i32
  }
}

module attributes {stable_mosaic.version = 11 : i64} {
  func.func @_matmul_stats_kernel(%arg0: i32, %arg1: i32, %arg2: i32, %arg3: memref<32x384xbf16, #tpu.memory_space<vmem>>, %arg4: memref<384x128xbf16, #tpu.memory_space<vmem>>, %arg5: memref<32x128xbf16, #tpu.memory_space<vmem>>, %arg6: memref<1x1x128xf32, #tpu.memory_space<vmem>>, %arg7: memref<1x1x128xf32, #tpu.memory_space<vmem>>, %arg8: memref<32x128xf32, #tpu.memory_space<vmem>>) attributes {dimension_semantics = [#tpu.dimension_semantics<parallel>, #tpu.dimension_semantics<parallel>, #tpu.dimension_semantics<arbitrary>], iteration_bounds = array<i64: 1, 1, 3>, scalar_prefetch = 0 : i64, scratch_operands = 1 : i64, tpu.core_type = #tpu.core_type<tc>, window_params = [{transform_indices = @transform_0, window_bounds = array<i64: 32, 384>}, {transform_indices = @transform_1, window_bounds = array<i64: 384, 128>}, {transform_indices = @transform_2, window_bounds = array<i64: 32, 128>}, {transform_indices = @transform_3, window_bounds = array<i64: 1, 1, 128>}, {transform_indices = @transform_4, window_bounds = array<i64: 1, 1, 128>}]} {
    %c0_i32 = arith.constant 0 : i32
    %0 = arith.cmpi eq, %arg2, %c0_i32 : i32
    %1 = arith.extui %0 : i1 to i32
    %c0_i32_0 = arith.constant 0 : i32
    %2 = arith.cmpi ne, %1, %c0_i32_0 : i32
    scf.if %2 {
      %cst_9 = arith.constant 0.000000e+00 : f32
      %12 = vector.broadcast %cst_9 : f32 to vector<32x128xf32>
      %c0_10 = arith.constant 0 : index
      %c0_11 = arith.constant 0 : index
      %13 = vector.load %arg8[%c0_10, %c0_11] : memref<32x128xf32, #tpu.memory_space<vmem>>, vector<32x128xf32>
      tpu.vector_store %arg8[%c0_10, %c0_11], %12 {strides = array<i32>} : memref<32x128xf32, #tpu.memory_space<vmem>>, vector<32x128xf32>,
    } else {
    }
    %c0 = arith.constant 0 : index
    %c0_1 = arith.constant 0 : index
    %3 = vector.load %arg8[%c0, %c0_1] : memref<32x128xf32, #tpu.memory_space<vmem>>, vector<32x128xf32>
    %c0_2 = arith.constant 0 : index
    %c0_3 = arith.constant 0 : index
    %4 = vector.load %arg3[%c0_2, %c0_3] : memref<32x384xbf16, #tpu.memory_space<vmem>>, vector<32x384xbf16>
    %c0_4 = arith.constant 0 : index
    %c0_5 = arith.constant 0 : index
    %5 = vector.load %arg4[%c0_4, %c0_5] : memref<384x128xbf16, #tpu.memory_space<vmem>>, vector<384x128xbf16>
    %cst = arith.constant dense<0.000000e+00> : vector<32x128xf32>
    %6 = tpu.matmul %4, %5, %cst {dimension_numbers = #tpu.dot_dimension_numbers<[1], [0], [0], [1], [0, 0, 1, 1], [], []>} : vector<32x384xbf16>, vector<384x128xbf16>, vector<32x128xf32> -> vector<32x128xf32>
    %7 = arith.addf %3, %6 : vector<32x128xf32>
    %c0_6 = arith.constant 0 : index
    %c0_7 = arith.constant 0 : index
    %8 = vector.load %arg8[%c0_6, %c0_7] : memref<32x128xf32, #tpu.memory_space<vmem>>, vector<32x128xf32>
    tpu.vector_store %arg8[%c0_6, %c0_7], %7 {strides = array<i32>} : memref<32x128xf32, #tpu.memory_space<vmem>>, vector<32x128xf32>,
    %c2_i32 = arith.constant 2 : i32
    %9 = arith.cmpi eq, %arg2, %c2_i32 : i32
    %10 = arith.extui %9 : i1 to i32
    %c0_i32_8 = arith.constant 0 : i32
    %11 = arith.cmpi ne, %10, %c0_i32_8 : i32
    scf.if %11 {
      %c0_9 = arith.constant 0 : index
      %c0_10 = arith.constant 0 : index
      %12 = vector.load %arg8[%c0_9, %c0_10] : memref<32x128xf32, #tpu.memory_space<vmem>>, vector<32x128xf32>
      %13 = arith.truncf %12 : vector<32x128xf32> to vector<32x128xbf16>
      %c0_11 = arith.constant 0 : index
      %c0_12 = arith.constant 0 : index
      %14 = vector.load %arg5[%c0_11, %c0_12] : memref<32x128xbf16, #tpu.memory_space<vmem>>, vector<32x128xbf16>
      tpu.vector_store %arg5[%c0_11, %c0_12], %13 {strides = array<i32>} : memref<32x128xbf16, #tpu.memory_space<vmem>>, vector<32x128xbf16>,
      %cst_13 = arith.constant dense<0.000000e+00> : vector<128xf32>
      %15 = vector.multi_reduction <add>, %12, %cst_13 [0] : vector<32x128xf32> to vector<128xf32>
      %16 = vector.shape_cast %15 : vector<128xf32> to vector<1x1x128xf32>
      %c0_14 = arith.constant 0 : index
      %c0_15 = arith.constant 0 : index
      %c0_16 = arith.constant 0 : index
      %17 = vector.load %arg6[%c0_14, %c0_15, %c0_16] : memref<1x1x128xf32, #tpu.memory_space<vmem>>, vector<1x1x128xf32>
      tpu.vector_store %arg6[%c0_14, %c0_15, %c0_16], %16 {strides = array<i32>} : memref<1x1x128xf32, #tpu.memory_space<vmem>>, vector<1x1x128xf32>,
      %18 = arith.mulf %12, %12 : vector<32x128xf32>
      %cst_17 = arith.constant dense<0.000000e+00> : vector<128xf32>
      %19 = vector.multi_reduction <add>, %18, %cst_17 [0] : vector<32x128xf32> to vector<128xf32>
      %20 = vector.shape_cast %19 : vector<128xf32> to vector<1x1x128xf32>
      %c0_18 = arith.constant 0 : index
      %c0_19 = arith.constant 0 : index
      %c0_20 = arith.constant 0 : index
      %21 = vector.load %arg7[%c0_18, %c0_19, %c0_20] : memref<1x1x128xf32, #tpu.memory_space<vmem>>, vector<1x1x128xf32>
      tpu.vector_store %arg7[%c0_18, %c0_19, %c0_20], %20 {strides = array<i32>} : memref<1x1x128xf32, #tpu.memory_space<vmem>>, vector<1x1x128xf32>,
    } else {
    }
    return
  }
  func.func @transform_0(%arg0: i32, %arg1: i32, %arg2: i32) -> (i32, i32) {
    %c0_i32 = arith.constant 0 : i32
    return %arg0, %arg2 : i32, i32
  }
  func.func @transform_1(%arg0: i32, %arg1: i32, %arg2: i32) -> (i32, i32) {
    %c0_i32 = arith.constant 0 : i32
    return %arg2, %arg1 : i32, i32
  }
  func.func @transform_2(%arg0: i32, %arg1: i32, %arg2: i32) -> (i32, i32) {
    %c0_i32 = arith.constant 0 : i32
    return %arg0, %arg1 : i32, i32
  }
  func.func @transform_3(%arg0: i32, %arg1: i32, %arg2: i32) -> (i32, i32, i32) {
    %c0_i32 = arith.constant 0 : i32
    %c0_i32_0 = arith.constant 0 : i32
    return %arg0, %c0_i32, %arg1 : i32, i32, i32
  }
  func.func @transform_4(%arg0: i32, %arg1: i32, %arg2: i32) -> (i32, i32, i32) {
    %c0_i32 = arith.constant 0 : i32
    %c0_i32_0 = arith.constant 0 : i32
    return %arg0, %c0_i32, %arg1 : i32, i32, i32
  }
}

module attributes {stable_mosaic.version = 11 : i64} {
  func.func @_bn_apply_res_kernel(%arg0: i32, %arg1: memref<32x128xbf16, #tpu.memory_space<vmem>>, %arg2: memref<1x128xf32, #tpu.memory_space<vmem>>, %arg3: memref<1x128xf32, #tpu.memory_space<vmem>>, %arg4: memref<32x128xbf16, #tpu.memory_space<vmem>>, %arg5: memref<32x128xbf16, #tpu.memory_space<vmem>>) attributes {dimension_semantics = [#tpu.dimension_semantics<parallel>], iteration_bounds = array<i64: 1>, scalar_prefetch = 0 : i64, scratch_operands = 0 : i64, tpu.core_type = #tpu.core_type<tc>, window_params = [{transform_indices = @transform_0, window_bounds = array<i64: 32, 128>}, {pipeline_mode = #tpu.pipeline_mode<synchronous>, transform_indices = @transform_1, window_bounds = array<i64: 1, 128>}, {pipeline_mode = #tpu.pipeline_mode<synchronous>, transform_indices = @transform_2, window_bounds = array<i64: 1, 128>}, {transform_indices = @transform_3, window_bounds = array<i64: 32, 128>}, {transform_indices = @transform_4, window_bounds = array<i64: 32, 128>}]} {
    %c0 = arith.constant 0 : index
    %c0_0 = arith.constant 0 : index
    %0 = vector.load %arg1[%c0, %c0_0] : memref<32x128xbf16, #tpu.memory_space<vmem>>, vector<32x128xbf16>
    %1 = arith.extf %0 : vector<32x128xbf16> to vector<32x128xf32>
    %c0_1 = arith.constant 0 : index
    %c0_2 = arith.constant 0 : index
    %2 = vector.load %arg2[%c0_1, %c0_2] : memref<1x128xf32, #tpu.memory_space<vmem>>, vector<1x128xf32>
    %3 = vector.broadcast %2 : vector<1x128xf32> to vector<32x128xf32>
    %4 = arith.mulf %1, %3 : vector<32x128xf32>
    %c0_3 = arith.constant 0 : index
    %c0_4 = arith.constant 0 : index
    %5 = vector.load %arg3[%c0_3, %c0_4] : memref<1x128xf32, #tpu.memory_space<vmem>>, vector<1x128xf32>
    %6 = vector.broadcast %5 : vector<1x128xf32> to vector<32x128xf32>
    %7 = arith.addf %4, %6 : vector<32x128xf32>
    %c0_5 = arith.constant 0 : index
    %c0_6 = arith.constant 0 : index
    %8 = vector.load %arg4[%c0_5, %c0_6] : memref<32x128xbf16, #tpu.memory_space<vmem>>, vector<32x128xbf16>
    %9 = arith.extf %8 : vector<32x128xbf16> to vector<32x128xf32>
    %10 = arith.addf %7, %9 : vector<32x128xf32>
    %cst = arith.constant 0.000000e+00 : f32
    %11 = vector.broadcast %cst : f32 to vector<32x128xf32>
    %12 = arith.maximumf %10, %11 : vector<32x128xf32>
    %13 = arith.truncf %12 : vector<32x128xf32> to vector<32x128xbf16>
    %c0_7 = arith.constant 0 : index
    %c0_8 = arith.constant 0 : index
    %14 = vector.load %arg5[%c0_7, %c0_8] : memref<32x128xbf16, #tpu.memory_space<vmem>>, vector<32x128xbf16>
    tpu.vector_store %arg5[%c0_7, %c0_8], %13 {strides = array<i32>} : memref<32x128xbf16, #tpu.memory_space<vmem>>, vector<32x128xbf16>,
    return
  }
  func.func @transform_0(%arg0: i32) -> (i32, i32) {
    %c0_i32 = arith.constant 0 : i32
    %c0_i32_0 = arith.constant 0 : i32
    return %arg0, %c0_i32 : i32, i32
  }
  func.func @transform_1(%arg0: i32) -> (i32, i32) {
    %c0_i32 = arith.constant 0 : i32
    %c0_i32_0 = arith.constant 0 : i32
    %c0_i32_1 = arith.constant 0 : i32
    return %c0_i32, %c0_i32_0 : i32, i32
  }
  func.func @transform_2(%arg0: i32) -> (i32, i32) {
    %c0_i32 = arith.constant 0 : i32
    %c0_i32_0 = arith.constant 0 : i32
    %c0_i32_1 = arith.constant 0 : i32
    return %c0_i32, %c0_i32_0 : i32, i32
  }
  func.func @transform_3(%arg0: i32) -> (i32, i32) {
    %c0_i32 = arith.constant 0 : i32
    %c0_i32_0 = arith.constant 0 : i32
    return %arg0, %c0_i32 : i32, i32
  }
  func.func @transform_4(%arg0: i32) -> (i32, i32) {
    %c0_i32 = arith.constant 0 : i32
    %c0_i32_0 = arith.constant 0 : i32
    return %arg0, %c0_i32 : i32, i32
  }
}

module attributes {stable_mosaic.version = 11 : i64} {
  func.func @_bn_apply_kernel(%arg0: i32, %arg1: memref<8x256xbf16, #tpu.memory_space<vmem>>, %arg2: memref<1x256xf32, #tpu.memory_space<vmem>>, %arg3: memref<1x256xf32, #tpu.memory_space<vmem>>, %arg4: memref<8x256xbf16, #tpu.memory_space<vmem>>) attributes {dimension_semantics = [#tpu.dimension_semantics<parallel>], iteration_bounds = array<i64: 1>, scalar_prefetch = 0 : i64, scratch_operands = 0 : i64, tpu.core_type = #tpu.core_type<tc>, window_params = [{transform_indices = @transform_0, window_bounds = array<i64: 8, 256>}, {pipeline_mode = #tpu.pipeline_mode<synchronous>, transform_indices = @transform_1, window_bounds = array<i64: 1, 256>}, {pipeline_mode = #tpu.pipeline_mode<synchronous>, transform_indices = @transform_2, window_bounds = array<i64: 1, 256>}, {transform_indices = @transform_3, window_bounds = array<i64: 8, 256>}]} {
    %c0 = arith.constant 0 : index
    %c0_0 = arith.constant 0 : index
    %0 = vector.load %arg1[%c0, %c0_0] : memref<8x256xbf16, #tpu.memory_space<vmem>>, vector<8x256xbf16>
    %1 = arith.extf %0 : vector<8x256xbf16> to vector<8x256xf32>
    %c0_1 = arith.constant 0 : index
    %c0_2 = arith.constant 0 : index
    %2 = vector.load %arg2[%c0_1, %c0_2] : memref<1x256xf32, #tpu.memory_space<vmem>>, vector<1x256xf32>
    %3 = vector.broadcast %2 : vector<1x256xf32> to vector<8x256xf32>
    %4 = arith.mulf %1, %3 : vector<8x256xf32>
    %c0_3 = arith.constant 0 : index
    %c0_4 = arith.constant 0 : index
    %5 = vector.load %arg3[%c0_3, %c0_4] : memref<1x256xf32, #tpu.memory_space<vmem>>, vector<1x256xf32>
    %6 = vector.broadcast %5 : vector<1x256xf32> to vector<8x256xf32>
    %7 = arith.addf %4, %6 : vector<8x256xf32>
    %8 = arith.truncf %7 : vector<8x256xf32> to vector<8x256xbf16>
    %c0_5 = arith.constant 0 : index
    %c0_6 = arith.constant 0 : index
    %9 = vector.load %arg4[%c0_5, %c0_6] : memref<8x256xbf16, #tpu.memory_space<vmem>>, vector<8x256xbf16>
    tpu.vector_store %arg4[%c0_5, %c0_6], %8 {strides = array<i32>} : memref<8x256xbf16, #tpu.memory_space<vmem>>, vector<8x256xbf16>,
    return
  }
  func.func @transform_0(%arg0: i32) -> (i32, i32) {
    %c0_i32 = arith.constant 0 : i32
    %c0_i32_0 = arith.constant 0 : i32
    return %arg0, %c0_i32 : i32, i32
  }
  func.func @transform_1(%arg0: i32) -> (i32, i32) {
    %c0_i32 = arith.constant 0 : i32
    %c0_i32_0 = arith.constant 0 : i32
    %c0_i32_1 = arith.constant 0 : i32
    return %c0_i32, %c0_i32_0 : i32, i32
  }
  func.func @transform_2(%arg0: i32) -> (i32, i32) {
    %c0_i32 = arith.constant 0 : i32
    %c0_i32_0 = arith.constant 0 : i32
    %c0_i32_1 = arith.constant 0 : i32
    return %c0_i32, %c0_i32_0 : i32, i32
  }
  func.func @transform_3(%arg0: i32) -> (i32, i32) {
    %c0_i32 = arith.constant 0 : i32
    %c0_i32_0 = arith.constant 0 : i32
    return %arg0, %c0_i32 : i32, i32
  }
}

module attributes {stable_mosaic.version = 11 : i64} {
  func.func @_matmul_stats_kernel(%arg0: i32, %arg1: i32, %arg2: i32, %arg3: memref<16x128xbf16, #tpu.memory_space<vmem>>, %arg4: memref<128x256xbf16, #tpu.memory_space<vmem>>, %arg5: memref<16x256xbf16, #tpu.memory_space<vmem>>, %arg6: memref<1x1x256xf32, #tpu.memory_space<vmem>>, %arg7: memref<1x1x256xf32, #tpu.memory_space<vmem>>, %arg8: memref<16x256xf32, #tpu.memory_space<vmem>>) attributes {dimension_semantics = [#tpu.dimension_semantics<parallel>, #tpu.dimension_semantics<parallel>, #tpu.dimension_semantics<arbitrary>], iteration_bounds = array<i64: 1, 1, 1>, scalar_prefetch = 0 : i64, scratch_operands = 1 : i64, tpu.core_type = #tpu.core_type<tc>, window_params = [{transform_indices = @transform_0, window_bounds = array<i64: 16, 128>}, {transform_indices = @transform_1, window_bounds = array<i64: 128, 256>}, {transform_indices = @transform_2, window_bounds = array<i64: 16, 256>}, {transform_indices = @transform_3, window_bounds = array<i64: 1, 1, 256>}, {transform_indices = @transform_4, window_bounds = array<i64: 1, 1, 256>}]} {
    %c0_i32 = arith.constant 0 : i32
    %0 = arith.cmpi eq, %arg2, %c0_i32 : i32
    %1 = arith.extui %0 : i1 to i32
    %c0_i32_0 = arith.constant 0 : i32
    %2 = arith.cmpi ne, %1, %c0_i32_0 : i32
    scf.if %2 {
      %cst_10 = arith.constant 0.000000e+00 : f32
      %12 = vector.broadcast %cst_10 : f32 to vector<16x256xf32>
      %c0_11 = arith.constant 0 : index
      %c0_12 = arith.constant 0 : index
      %13 = vector.load %arg8[%c0_11, %c0_12] : memref<16x256xf32, #tpu.memory_space<vmem>>, vector<16x256xf32>
      tpu.vector_store %arg8[%c0_11, %c0_12], %12 {strides = array<i32>} : memref<16x256xf32, #tpu.memory_space<vmem>>, vector<16x256xf32>,
    } else {
    }
    %c0 = arith.constant 0 : index
    %c0_1 = arith.constant 0 : index
    %3 = vector.load %arg8[%c0, %c0_1] : memref<16x256xf32, #tpu.memory_space<vmem>>, vector<16x256xf32>
    %c0_2 = arith.constant 0 : index
    %c0_3 = arith.constant 0 : index
    %4 = vector.load %arg3[%c0_2, %c0_3] : memref<16x128xbf16, #tpu.memory_space<vmem>>, vector<16x128xbf16>
    %c0_4 = arith.constant 0 : index
    %c0_5 = arith.constant 0 : index
    %5 = vector.load %arg4[%c0_4, %c0_5] : memref<128x256xbf16, #tpu.memory_space<vmem>>, vector<128x256xbf16>
    %cst = arith.constant dense<0.000000e+00> : vector<16x256xf32>
    %6 = tpu.matmul %4, %5, %cst {dimension_numbers = #tpu.dot_dimension_numbers<[1], [0], [0], [1], [0, 0, 1, 1], [], []>} : vector<16x128xbf16>, vector<128x256xbf16>, vector<16x256xf32> -> vector<16x256xf32>
    %7 = arith.addf %3, %6 : vector<16x256xf32>
    %c0_6 = arith.constant 0 : index
    %c0_7 = arith.constant 0 : index
    %8 = vector.load %arg8[%c0_6, %c0_7] : memref<16x256xf32, #tpu.memory_space<vmem>>, vector<16x256xf32>
    tpu.vector_store %arg8[%c0_6, %c0_7], %7 {strides = array<i32>} : memref<16x256xf32, #tpu.memory_space<vmem>>, vector<16x256xf32>,
    %c0_i32_8 = arith.constant 0 : i32
    %9 = arith.cmpi eq, %arg2, %c0_i32_8 : i32
    %10 = arith.extui %9 : i1 to i32
    %c0_i32_9 = arith.constant 0 : i32
    %11 = arith.cmpi ne, %10, %c0_i32_9 : i32
    scf.if %11 {
      %c0_10 = arith.constant 0 : index
      %c0_11 = arith.constant 0 : index
      %12 = vector.load %arg8[%c0_10, %c0_11] : memref<16x256xf32, #tpu.memory_space<vmem>>, vector<16x256xf32>
      %13 = arith.truncf %12 : vector<16x256xf32> to vector<16x256xbf16>
      %c0_12 = arith.constant 0 : index
      %c0_13 = arith.constant 0 : index
      %14 = vector.load %arg5[%c0_12, %c0_13] : memref<16x256xbf16, #tpu.memory_space<vmem>>, vector<16x256xbf16>
      tpu.vector_store %arg5[%c0_12, %c0_13], %13 {strides = array<i32>} : memref<16x256xbf16, #tpu.memory_space<vmem>>, vector<16x256xbf16>,
      %cst_14 = arith.constant dense<0.000000e+00> : vector<256xf32>
      %15 = vector.multi_reduction <add>, %12, %cst_14 [0] : vector<16x256xf32> to vector<256xf32>
      %16 = vector.shape_cast %15 : vector<256xf32> to vector<1x1x256xf32>
      %c0_15 = arith.constant 0 : index
      %c0_16 = arith.constant 0 : index
      %c0_17 = arith.constant 0 : index
      %17 = vector.load %arg6[%c0_15, %c0_16, %c0_17] : memref<1x1x256xf32, #tpu.memory_space<vmem>>, vector<1x1x256xf32>
      tpu.vector_store %arg6[%c0_15, %c0_16, %c0_17], %16 {strides = array<i32>} : memref<1x1x256xf32, #tpu.memory_space<vmem>>, vector<1x1x256xf32>,
      %18 = arith.mulf %12, %12 : vector<16x256xf32>
      %cst_18 = arith.constant dense<0.000000e+00> : vector<256xf32>
      %19 = vector.multi_reduction <add>, %18, %cst_18 [0] : vector<16x256xf32> to vector<256xf32>
      %20 = vector.shape_cast %19 : vector<256xf32> to vector<1x1x256xf32>
      %c0_19 = arith.constant 0 : index
      %c0_20 = arith.constant 0 : index
      %c0_21 = arith.constant 0 : index
      %21 = vector.load %arg7[%c0_19, %c0_20, %c0_21] : memref<1x1x256xf32, #tpu.memory_space<vmem>>, vector<1x1x256xf32>
      tpu.vector_store %arg7[%c0_19, %c0_20, %c0_21], %20 {strides = array<i32>} : memref<1x1x256xf32, #tpu.memory_space<vmem>>, vector<1x1x256xf32>,
    } else {
    }
    return
  }
  func.func @transform_0(%arg0: i32, %arg1: i32, %arg2: i32) -> (i32, i32) {
    %c0_i32 = arith.constant 0 : i32
    return %arg0, %arg2 : i32, i32
  }
  func.func @transform_1(%arg0: i32, %arg1: i32, %arg2: i32) -> (i32, i32) {
    %c0_i32 = arith.constant 0 : i32
    return %arg2, %arg1 : i32, i32
  }
  func.func @transform_2(%arg0: i32, %arg1: i32, %arg2: i32) -> (i32, i32) {
    %c0_i32 = arith.constant 0 : i32
    return %arg0, %arg1 : i32, i32
  }
  func.func @transform_3(%arg0: i32, %arg1: i32, %arg2: i32) -> (i32, i32, i32) {
    %c0_i32 = arith.constant 0 : i32
    %c0_i32_0 = arith.constant 0 : i32
    return %arg0, %c0_i32, %arg1 : i32, i32, i32
  }
  func.func @transform_4(%arg0: i32, %arg1: i32, %arg2: i32) -> (i32, i32, i32) {
    %c0_i32 = arith.constant 0 : i32
    %c0_i32_0 = arith.constant 0 : i32
    return %arg0, %c0_i32, %arg1 : i32, i32, i32
  }
}

module attributes {stable_mosaic.version = 11 : i64} {
  func.func @_matmul_stats_kernel(%arg0: i32, %arg1: i32, %arg2: i32, %arg3: memref<16x384xbf16, #tpu.memory_space<vmem>>, %arg4: memref<384x256xbf16, #tpu.memory_space<vmem>>, %arg5: memref<16x256xbf16, #tpu.memory_space<vmem>>, %arg6: memref<1x1x256xf32, #tpu.memory_space<vmem>>, %arg7: memref<1x1x256xf32, #tpu.memory_space<vmem>>, %arg8: memref<16x256xf32, #tpu.memory_space<vmem>>) attributes {dimension_semantics = [#tpu.dimension_semantics<parallel>, #tpu.dimension_semantics<parallel>, #tpu.dimension_semantics<arbitrary>], iteration_bounds = array<i64: 1, 1, 3>, scalar_prefetch = 0 : i64, scratch_operands = 1 : i64, tpu.core_type = #tpu.core_type<tc>, window_params = [{transform_indices = @transform_0, window_bounds = array<i64: 16, 384>}, {transform_indices = @transform_1, window_bounds = array<i64: 384, 256>}, {transform_indices = @transform_2, window_bounds = array<i64: 16, 256>}, {transform_indices = @transform_3, window_bounds = array<i64: 1, 1, 256>}, {transform_indices = @transform_4, window_bounds = array<i64: 1, 1, 256>}]} {
    %c0_i32 = arith.constant 0 : i32
    %0 = arith.cmpi eq, %arg2, %c0_i32 : i32
    %1 = arith.extui %0 : i1 to i32
    %c0_i32_0 = arith.constant 0 : i32
    %2 = arith.cmpi ne, %1, %c0_i32_0 : i32
    scf.if %2 {
      %cst_9 = arith.constant 0.000000e+00 : f32
      %12 = vector.broadcast %cst_9 : f32 to vector<16x256xf32>
      %c0_10 = arith.constant 0 : index
      %c0_11 = arith.constant 0 : index
      %13 = vector.load %arg8[%c0_10, %c0_11] : memref<16x256xf32, #tpu.memory_space<vmem>>, vector<16x256xf32>
      tpu.vector_store %arg8[%c0_10, %c0_11], %12 {strides = array<i32>} : memref<16x256xf32, #tpu.memory_space<vmem>>, vector<16x256xf32>,
    } else {
    }
    %c0 = arith.constant 0 : index
    %c0_1 = arith.constant 0 : index
    %3 = vector.load %arg8[%c0, %c0_1] : memref<16x256xf32, #tpu.memory_space<vmem>>, vector<16x256xf32>
    %c0_2 = arith.constant 0 : index
    %c0_3 = arith.constant 0 : index
    %4 = vector.load %arg3[%c0_2, %c0_3] : memref<16x384xbf16, #tpu.memory_space<vmem>>, vector<16x384xbf16>
    %c0_4 = arith.constant 0 : index
    %c0_5 = arith.constant 0 : index
    %5 = vector.load %arg4[%c0_4, %c0_5] : memref<384x256xbf16, #tpu.memory_space<vmem>>, vector<384x256xbf16>
    %cst = arith.constant dense<0.000000e+00> : vector<16x256xf32>
    %6 = tpu.matmul %4, %5, %cst {dimension_numbers = #tpu.dot_dimension_numbers<[1], [0], [0], [1], [0, 0, 1, 1], [], []>} : vector<16x384xbf16>, vector<384x256xbf16>, vector<16x256xf32> -> vector<16x256xf32>
    %7 = arith.addf %3, %6 : vector<16x256xf32>
    %c0_6 = arith.constant 0 : index
    %c0_7 = arith.constant 0 : index
    %8 = vector.load %arg8[%c0_6, %c0_7] : memref<16x256xf32, #tpu.memory_space<vmem>>, vector<16x256xf32>
    tpu.vector_store %arg8[%c0_6, %c0_7], %7 {strides = array<i32>} : memref<16x256xf32, #tpu.memory_space<vmem>>, vector<16x256xf32>,
    %c2_i32 = arith.constant 2 : i32
    %9 = arith.cmpi eq, %arg2, %c2_i32 : i32
    %10 = arith.extui %9 : i1 to i32
    %c0_i32_8 = arith.constant 0 : i32
    %11 = arith.cmpi ne, %10, %c0_i32_8 : i32
    scf.if %11 {
      %c0_9 = arith.constant 0 : index
      %c0_10 = arith.constant 0 : index
      %12 = vector.load %arg8[%c0_9, %c0_10] : memref<16x256xf32, #tpu.memory_space<vmem>>, vector<16x256xf32>
      %13 = arith.truncf %12 : vector<16x256xf32> to vector<16x256xbf16>
      %c0_11 = arith.constant 0 : index
      %c0_12 = arith.constant 0 : index
      %14 = vector.load %arg5[%c0_11, %c0_12] : memref<16x256xbf16, #tpu.memory_space<vmem>>, vector<16x256xbf16>
      tpu.vector_store %arg5[%c0_11, %c0_12], %13 {strides = array<i32>} : memref<16x256xbf16, #tpu.memory_space<vmem>>, vector<16x256xbf16>,
      %cst_13 = arith.constant dense<0.000000e+00> : vector<256xf32>
      %15 = vector.multi_reduction <add>, %12, %cst_13 [0] : vector<16x256xf32> to vector<256xf32>
      %16 = vector.shape_cast %15 : vector<256xf32> to vector<1x1x256xf32>
      %c0_14 = arith.constant 0 : index
      %c0_15 = arith.constant 0 : index
      %c0_16 = arith.constant 0 : index
      %17 = vector.load %arg6[%c0_14, %c0_15, %c0_16] : memref<1x1x256xf32, #tpu.memory_space<vmem>>, vector<1x1x256xf32>
      tpu.vector_store %arg6[%c0_14, %c0_15, %c0_16], %16 {strides = array<i32>} : memref<1x1x256xf32, #tpu.memory_space<vmem>>, vector<1x1x256xf32>,
      %18 = arith.mulf %12, %12 : vector<16x256xf32>
      %cst_17 = arith.constant dense<0.000000e+00> : vector<256xf32>
      %19 = vector.multi_reduction <add>, %18, %cst_17 [0] : vector<16x256xf32> to vector<256xf32>
      %20 = vector.shape_cast %19 : vector<256xf32> to vector<1x1x256xf32>
      %c0_18 = arith.constant 0 : index
      %c0_19 = arith.constant 0 : index
      %c0_20 = arith.constant 0 : index
      %21 = vector.load %arg7[%c0_18, %c0_19, %c0_20] : memref<1x1x256xf32, #tpu.memory_space<vmem>>, vector<1x1x256xf32>
      tpu.vector_store %arg7[%c0_18, %c0_19, %c0_20], %20 {strides = array<i32>} : memref<1x1x256xf32, #tpu.memory_space<vmem>>, vector<1x1x256xf32>,
    } else {
    }
    return
  }
  func.func @transform_0(%arg0: i32, %arg1: i32, %arg2: i32) -> (i32, i32) {
    %c0_i32 = arith.constant 0 : i32
    return %arg0, %arg2 : i32, i32
  }
  func.func @transform_1(%arg0: i32, %arg1: i32, %arg2: i32) -> (i32, i32) {
    %c0_i32 = arith.constant 0 : i32
    return %arg2, %arg1 : i32, i32
  }
  func.func @transform_2(%arg0: i32, %arg1: i32, %arg2: i32) -> (i32, i32) {
    %c0_i32 = arith.constant 0 : i32
    return %arg0, %arg1 : i32, i32
  }
  func.func @transform_3(%arg0: i32, %arg1: i32, %arg2: i32) -> (i32, i32, i32) {
    %c0_i32 = arith.constant 0 : i32
    %c0_i32_0 = arith.constant 0 : i32
    return %arg0, %c0_i32, %arg1 : i32, i32, i32
  }
  func.func @transform_4(%arg0: i32, %arg1: i32, %arg2: i32) -> (i32, i32, i32) {
    %c0_i32 = arith.constant 0 : i32
    %c0_i32_0 = arith.constant 0 : i32
    return %arg0, %c0_i32, %arg1 : i32, i32, i32
  }
}

module attributes {stable_mosaic.version = 11 : i64} {
  func.func @_bn_apply_kernel(%arg0: i32, %arg1: memref<8x256xbf16, #tpu.memory_space<vmem>>, %arg2: memref<1x256xf32, #tpu.memory_space<vmem>>, %arg3: memref<1x256xf32, #tpu.memory_space<vmem>>, %arg4: memref<8x256xbf16, #tpu.memory_space<vmem>>) attributes {dimension_semantics = [#tpu.dimension_semantics<parallel>], iteration_bounds = array<i64: 1>, scalar_prefetch = 0 : i64, scratch_operands = 0 : i64, tpu.core_type = #tpu.core_type<tc>, window_params = [{transform_indices = @transform_0, window_bounds = array<i64: 8, 256>}, {pipeline_mode = #tpu.pipeline_mode<synchronous>, transform_indices = @transform_1, window_bounds = array<i64: 1, 256>}, {pipeline_mode = #tpu.pipeline_mode<synchronous>, transform_indices = @transform_2, window_bounds = array<i64: 1, 256>}, {transform_indices = @transform_3, window_bounds = array<i64: 8, 256>}]} {
    %c0 = arith.constant 0 : index
    %c0_0 = arith.constant 0 : index
    %0 = vector.load %arg1[%c0, %c0_0] : memref<8x256xbf16, #tpu.memory_space<vmem>>, vector<8x256xbf16>
    %1 = arith.extf %0 : vector<8x256xbf16> to vector<8x256xf32>
    %c0_1 = arith.constant 0 : index
    %c0_2 = arith.constant 0 : index
    %2 = vector.load %arg2[%c0_1, %c0_2] : memref<1x256xf32, #tpu.memory_space<vmem>>, vector<1x256xf32>
    %3 = vector.broadcast %2 : vector<1x256xf32> to vector<8x256xf32>
    %4 = arith.mulf %1, %3 : vector<8x256xf32>
    %c0_3 = arith.constant 0 : index
    %c0_4 = arith.constant 0 : index
    %5 = vector.load %arg3[%c0_3, %c0_4] : memref<1x256xf32, #tpu.memory_space<vmem>>, vector<1x256xf32>
    %6 = vector.broadcast %5 : vector<1x256xf32> to vector<8x256xf32>
    %7 = arith.addf %4, %6 : vector<8x256xf32>
    %cst = arith.constant 0.000000e+00 : f32
    %8 = vector.broadcast %cst : f32 to vector<8x256xf32>
    %9 = arith.maximumf %7, %8 : vector<8x256xf32>
    %10 = arith.truncf %9 : vector<8x256xf32> to vector<8x256xbf16>
    %c0_5 = arith.constant 0 : index
    %c0_6 = arith.constant 0 : index
    %11 = vector.load %arg4[%c0_5, %c0_6] : memref<8x256xbf16, #tpu.memory_space<vmem>>, vector<8x256xbf16>
    tpu.vector_store %arg4[%c0_5, %c0_6], %10 {strides = array<i32>} : memref<8x256xbf16, #tpu.memory_space<vmem>>, vector<8x256xbf16>,
    return
  }
  func.func @transform_0(%arg0: i32) -> (i32, i32) {
    %c0_i32 = arith.constant 0 : i32
    %c0_i32_0 = arith.constant 0 : i32
    return %arg0, %c0_i32 : i32, i32
  }
  func.func @transform_1(%arg0: i32) -> (i32, i32) {
    %c0_i32 = arith.constant 0 : i32
    %c0_i32_0 = arith.constant 0 : i32
    %c0_i32_1 = arith.constant 0 : i32
    return %c0_i32, %c0_i32_0 : i32, i32
  }
  func.func @transform_2(%arg0: i32) -> (i32, i32) {
    %c0_i32 = arith.constant 0 : i32
    %c0_i32_0 = arith.constant 0 : i32
    %c0_i32_1 = arith.constant 0 : i32
    return %c0_i32, %c0_i32_0 : i32, i32
  }
  func.func @transform_3(%arg0: i32) -> (i32, i32) {
    %c0_i32 = arith.constant 0 : i32
    %c0_i32_0 = arith.constant 0 : i32
    return %arg0, %c0_i32 : i32, i32
  }
}

module attributes {stable_mosaic.version = 11 : i64} {
  func.func @_matmul_stats_kernel(%arg0: i32, %arg1: i32, %arg2: i32, %arg3: memref<16x384xbf16, #tpu.memory_space<vmem>>, %arg4: memref<384x256xbf16, #tpu.memory_space<vmem>>, %arg5: memref<16x256xbf16, #tpu.memory_space<vmem>>, %arg6: memref<1x1x256xf32, #tpu.memory_space<vmem>>, %arg7: memref<1x1x256xf32, #tpu.memory_space<vmem>>, %arg8: memref<16x256xf32, #tpu.memory_space<vmem>>) attributes {dimension_semantics = [#tpu.dimension_semantics<parallel>, #tpu.dimension_semantics<parallel>, #tpu.dimension_semantics<arbitrary>], iteration_bounds = array<i64: 1, 1, 6>, scalar_prefetch = 0 : i64, scratch_operands = 1 : i64, tpu.core_type = #tpu.core_type<tc>, window_params = [{transform_indices = @transform_0, window_bounds = array<i64: 16, 384>}, {transform_indices = @transform_1, window_bounds = array<i64: 384, 256>}, {transform_indices = @transform_2, window_bounds = array<i64: 16, 256>}, {transform_indices = @transform_3, window_bounds = array<i64: 1, 1, 256>}, {transform_indices = @transform_4, window_bounds = array<i64: 1, 1, 256>}]} {
    %c0_i32 = arith.constant 0 : i32
    %0 = arith.cmpi eq, %arg2, %c0_i32 : i32
    %1 = arith.extui %0 : i1 to i32
    %c0_i32_0 = arith.constant 0 : i32
    %2 = arith.cmpi ne, %1, %c0_i32_0 : i32
    scf.if %2 {
      %cst_9 = arith.constant 0.000000e+00 : f32
      %12 = vector.broadcast %cst_9 : f32 to vector<16x256xf32>
      %c0_10 = arith.constant 0 : index
      %c0_11 = arith.constant 0 : index
      %13 = vector.load %arg8[%c0_10, %c0_11] : memref<16x256xf32, #tpu.memory_space<vmem>>, vector<16x256xf32>
      tpu.vector_store %arg8[%c0_10, %c0_11], %12 {strides = array<i32>} : memref<16x256xf32, #tpu.memory_space<vmem>>, vector<16x256xf32>,
    } else {
    }
    %c0 = arith.constant 0 : index
    %c0_1 = arith.constant 0 : index
    %3 = vector.load %arg8[%c0, %c0_1] : memref<16x256xf32, #tpu.memory_space<vmem>>, vector<16x256xf32>
    %c0_2 = arith.constant 0 : index
    %c0_3 = arith.constant 0 : index
    %4 = vector.load %arg3[%c0_2, %c0_3] : memref<16x384xbf16, #tpu.memory_space<vmem>>, vector<16x384xbf16>
    %c0_4 = arith.constant 0 : index
    %c0_5 = arith.constant 0 : index
    %5 = vector.load %arg4[%c0_4, %c0_5] : memref<384x256xbf16, #tpu.memory_space<vmem>>, vector<384x256xbf16>
    %cst = arith.constant dense<0.000000e+00> : vector<16x256xf32>
    %6 = tpu.matmul %4, %5, %cst {dimension_numbers = #tpu.dot_dimension_numbers<[1], [0], [0], [1], [0, 0, 1, 1], [], []>} : vector<16x384xbf16>, vector<384x256xbf16>, vector<16x256xf32> -> vector<16x256xf32>
    %7 = arith.addf %3, %6 : vector<16x256xf32>
    %c0_6 = arith.constant 0 : index
    %c0_7 = arith.constant 0 : index
    %8 = vector.load %arg8[%c0_6, %c0_7] : memref<16x256xf32, #tpu.memory_space<vmem>>, vector<16x256xf32>
    tpu.vector_store %arg8[%c0_6, %c0_7], %7 {strides = array<i32>} : memref<16x256xf32, #tpu.memory_space<vmem>>, vector<16x256xf32>,
    %c5_i32 = arith.constant 5 : i32
    %9 = arith.cmpi eq, %arg2, %c5_i32 : i32
    %10 = arith.extui %9 : i1 to i32
    %c0_i32_8 = arith.constant 0 : i32
    %11 = arith.cmpi ne, %10, %c0_i32_8 : i32
    scf.if %11 {
      %c0_9 = arith.constant 0 : index
      %c0_10 = arith.constant 0 : index
      %12 = vector.load %arg8[%c0_9, %c0_10] : memref<16x256xf32, #tpu.memory_space<vmem>>, vector<16x256xf32>
      %13 = arith.truncf %12 : vector<16x256xf32> to vector<16x256xbf16>
      %c0_11 = arith.constant 0 : index
      %c0_12 = arith.constant 0 : index
      %14 = vector.load %arg5[%c0_11, %c0_12] : memref<16x256xbf16, #tpu.memory_space<vmem>>, vector<16x256xbf16>
      tpu.vector_store %arg5[%c0_11, %c0_12], %13 {strides = array<i32>} : memref<16x256xbf16, #tpu.memory_space<vmem>>, vector<16x256xbf16>,
      %cst_13 = arith.constant dense<0.000000e+00> : vector<256xf32>
      %15 = vector.multi_reduction <add>, %12, %cst_13 [0] : vector<16x256xf32> to vector<256xf32>
      %16 = vector.shape_cast %15 : vector<256xf32> to vector<1x1x256xf32>
      %c0_14 = arith.constant 0 : index
      %c0_15 = arith.constant 0 : index
      %c0_16 = arith.constant 0 : index
      %17 = vector.load %arg6[%c0_14, %c0_15, %c0_16] : memref<1x1x256xf32, #tpu.memory_space<vmem>>, vector<1x1x256xf32>
      tpu.vector_store %arg6[%c0_14, %c0_15, %c0_16], %16 {strides = array<i32>} : memref<1x1x256xf32, #tpu.memory_space<vmem>>, vector<1x1x256xf32>,
      %18 = arith.mulf %12, %12 : vector<16x256xf32>
      %cst_17 = arith.constant dense<0.000000e+00> : vector<256xf32>
      %19 = vector.multi_reduction <add>, %18, %cst_17 [0] : vector<16x256xf32> to vector<256xf32>
      %20 = vector.shape_cast %19 : vector<256xf32> to vector<1x1x256xf32>
      %c0_18 = arith.constant 0 : index
      %c0_19 = arith.constant 0 : index
      %c0_20 = arith.constant 0 : index
      %21 = vector.load %arg7[%c0_18, %c0_19, %c0_20] : memref<1x1x256xf32, #tpu.memory_space<vmem>>, vector<1x1x256xf32>
      tpu.vector_store %arg7[%c0_18, %c0_19, %c0_20], %20 {strides = array<i32>} : memref<1x1x256xf32, #tpu.memory_space<vmem>>, vector<1x1x256xf32>,
    } else {
    }
    return
  }
  func.func @transform_0(%arg0: i32, %arg1: i32, %arg2: i32) -> (i32, i32) {
    %c0_i32 = arith.constant 0 : i32
    return %arg0, %arg2 : i32, i32
  }
  func.func @transform_1(%arg0: i32, %arg1: i32, %arg2: i32) -> (i32, i32) {
    %c0_i32 = arith.constant 0 : i32
    return %arg2, %arg1 : i32, i32
  }
  func.func @transform_2(%arg0: i32, %arg1: i32, %arg2: i32) -> (i32, i32) {
    %c0_i32 = arith.constant 0 : i32
    return %arg0, %arg1 : i32, i32
  }
  func.func @transform_3(%arg0: i32, %arg1: i32, %arg2: i32) -> (i32, i32, i32) {
    %c0_i32 = arith.constant 0 : i32
    %c0_i32_0 = arith.constant 0 : i32
    return %arg0, %c0_i32, %arg1 : i32, i32, i32
  }
  func.func @transform_4(%arg0: i32, %arg1: i32, %arg2: i32) -> (i32, i32, i32) {
    %c0_i32 = arith.constant 0 : i32
    %c0_i32_0 = arith.constant 0 : i32
    return %arg0, %c0_i32, %arg1 : i32, i32, i32
  }
}

module attributes {stable_mosaic.version = 11 : i64} {
  func.func @_bn_apply_res_kernel(%arg0: i32, %arg1: memref<8x256xbf16, #tpu.memory_space<vmem>>, %arg2: memref<1x256xf32, #tpu.memory_space<vmem>>, %arg3: memref<1x256xf32, #tpu.memory_space<vmem>>, %arg4: memref<8x256xbf16, #tpu.memory_space<vmem>>, %arg5: memref<8x256xbf16, #tpu.memory_space<vmem>>) attributes {dimension_semantics = [#tpu.dimension_semantics<parallel>], iteration_bounds = array<i64: 1>, scalar_prefetch = 0 : i64, scratch_operands = 0 : i64, tpu.core_type = #tpu.core_type<tc>, window_params = [{transform_indices = @transform_0, window_bounds = array<i64: 8, 256>}, {pipeline_mode = #tpu.pipeline_mode<synchronous>, transform_indices = @transform_1, window_bounds = array<i64: 1, 256>}, {pipeline_mode = #tpu.pipeline_mode<synchronous>, transform_indices = @transform_2, window_bounds = array<i64: 1, 256>}, {transform_indices = @transform_3, window_bounds = array<i64: 8, 256>}, {transform_indices = @transform_4, window_bounds = array<i64: 8, 256>}]} {
    %c0 = arith.constant 0 : index
    %c0_0 = arith.constant 0 : index
    %0 = vector.load %arg1[%c0, %c0_0] : memref<8x256xbf16, #tpu.memory_space<vmem>>, vector<8x256xbf16>
    %1 = arith.extf %0 : vector<8x256xbf16> to vector<8x256xf32>
    %c0_1 = arith.constant 0 : index
    %c0_2 = arith.constant 0 : index
    %2 = vector.load %arg2[%c0_1, %c0_2] : memref<1x256xf32, #tpu.memory_space<vmem>>, vector<1x256xf32>
    %3 = vector.broadcast %2 : vector<1x256xf32> to vector<8x256xf32>
    %4 = arith.mulf %1, %3 : vector<8x256xf32>
    %c0_3 = arith.constant 0 : index
    %c0_4 = arith.constant 0 : index
    %5 = vector.load %arg3[%c0_3, %c0_4] : memref<1x256xf32, #tpu.memory_space<vmem>>, vector<1x256xf32>
    %6 = vector.broadcast %5 : vector<1x256xf32> to vector<8x256xf32>
    %7 = arith.addf %4, %6 : vector<8x256xf32>
    %c0_5 = arith.constant 0 : index
    %c0_6 = arith.constant 0 : index
    %8 = vector.load %arg4[%c0_5, %c0_6] : memref<8x256xbf16, #tpu.memory_space<vmem>>, vector<8x256xbf16>
    %9 = arith.extf %8 : vector<8x256xbf16> to vector<8x256xf32>
    %10 = arith.addf %7, %9 : vector<8x256xf32>
    %cst = arith.constant 0.000000e+00 : f32
    %11 = vector.broadcast %cst : f32 to vector<8x256xf32>
    %12 = arith.maximumf %10, %11 : vector<8x256xf32>
    %13 = arith.truncf %12 : vector<8x256xf32> to vector<8x256xbf16>
    %c0_7 = arith.constant 0 : index
    %c0_8 = arith.constant 0 : index
    %14 = vector.load %arg5[%c0_7, %c0_8] : memref<8x256xbf16, #tpu.memory_space<vmem>>, vector<8x256xbf16>
    tpu.vector_store %arg5[%c0_7, %c0_8], %13 {strides = array<i32>} : memref<8x256xbf16, #tpu.memory_space<vmem>>, vector<8x256xbf16>,
    return
  }
  func.func @transform_0(%arg0: i32) -> (i32, i32) {
    %c0_i32 = arith.constant 0 : i32
    %c0_i32_0 = arith.constant 0 : i32
    return %arg0, %c0_i32 : i32, i32
  }
  func.func @transform_1(%arg0: i32) -> (i32, i32) {
    %c0_i32 = arith.constant 0 : i32
    %c0_i32_0 = arith.constant 0 : i32
    %c0_i32_1 = arith.constant 0 : i32
    return %c0_i32, %c0_i32_0 : i32, i32
  }
  func.func @transform_2(%arg0: i32) -> (i32, i32) {
    %c0_i32 = arith.constant 0 : i32
    %c0_i32_0 = arith.constant 0 : i32
    %c0_i32_1 = arith.constant 0 : i32
    return %c0_i32, %c0_i32_0 : i32, i32
  }
  func.func @transform_3(%arg0: i32) -> (i32, i32) {
    %c0_i32 = arith.constant 0 : i32
    %c0_i32_0 = arith.constant 0 : i32
    return %arg0, %c0_i32 : i32, i32
  }
  func.func @transform_4(%arg0: i32) -> (i32, i32) {
    %c0_i32 = arith.constant 0 : i32
    %c0_i32_0 = arith.constant 0 : i32
    return %arg0, %c0_i32 : i32, i32
  }
}

module attributes {stable_mosaic.version = 11 : i64} {
  func.func @_matmul_stats_kernel(%arg0: i32, %arg1: i32, %arg2: i32, %arg3: memref<16x256xbf16, #tpu.memory_space<vmem>>, %arg4: memref<256x256xbf16, #tpu.memory_space<vmem>>, %arg5: memref<16x256xbf16, #tpu.memory_space<vmem>>, %arg6: memref<1x1x256xf32, #tpu.memory_space<vmem>>, %arg7: memref<1x1x256xf32, #tpu.memory_space<vmem>>, %arg8: memref<16x256xf32, #tpu.memory_space<vmem>>) attributes {dimension_semantics = [#tpu.dimension_semantics<parallel>, #tpu.dimension_semantics<parallel>, #tpu.dimension_semantics<arbitrary>], iteration_bounds = array<i64: 1, 2, 1>, scalar_prefetch = 0 : i64, scratch_operands = 1 : i64, tpu.core_type = #tpu.core_type<tc>, window_params = [{transform_indices = @transform_0, window_bounds = array<i64: 16, 256>}, {transform_indices = @transform_1, window_bounds = array<i64: 256, 256>}, {transform_indices = @transform_2, window_bounds = array<i64: 16, 256>}, {transform_indices = @transform_3, window_bounds = array<i64: 1, 1, 256>}, {transform_indices = @transform_4, window_bounds = array<i64: 1, 1, 256>}]} {
    %c0_i32 = arith.constant 0 : i32
    %0 = arith.cmpi eq, %arg2, %c0_i32 : i32
    %1 = arith.extui %0 : i1 to i32
    %c0_i32_0 = arith.constant 0 : i32
    %2 = arith.cmpi ne, %1, %c0_i32_0 : i32
    scf.if %2 {
      %cst_10 = arith.constant 0.000000e+00 : f32
      %12 = vector.broadcast %cst_10 : f32 to vector<16x256xf32>
      %c0_11 = arith.constant 0 : index
      %c0_12 = arith.constant 0 : index
      %13 = vector.load %arg8[%c0_11, %c0_12] : memref<16x256xf32, #tpu.memory_space<vmem>>, vector<16x256xf32>
      tpu.vector_store %arg8[%c0_11, %c0_12], %12 {strides = array<i32>} : memref<16x256xf32, #tpu.memory_space<vmem>>, vector<16x256xf32>,
    } else {
    }
    %c0 = arith.constant 0 : index
    %c0_1 = arith.constant 0 : index
    %3 = vector.load %arg8[%c0, %c0_1] : memref<16x256xf32, #tpu.memory_space<vmem>>, vector<16x256xf32>
    %c0_2 = arith.constant 0 : index
    %c0_3 = arith.constant 0 : index
    %4 = vector.load %arg3[%c0_2, %c0_3] : memref<16x256xbf16, #tpu.memory_space<vmem>>, vector<16x256xbf16>
    %c0_4 = arith.constant 0 : index
    %c0_5 = arith.constant 0 : index
    %5 = vector.load %arg4[%c0_4, %c0_5] : memref<256x256xbf16, #tpu.memory_space<vmem>>, vector<256x256xbf16>
    %cst = arith.constant dense<0.000000e+00> : vector<16x256xf32>
    %6 = tpu.matmul %4, %5, %cst {dimension_numbers = #tpu.dot_dimension_numbers<[1], [0], [0], [1], [0, 0, 1, 1], [], []>} : vector<16x256xbf16>, vector<256x256xbf16>, vector<16x256xf32> -> vector<16x256xf32>
    %7 = arith.addf %3, %6 : vector<16x256xf32>
    %c0_6 = arith.constant 0 : index
    %c0_7 = arith.constant 0 : index
    %8 = vector.load %arg8[%c0_6, %c0_7] : memref<16x256xf32, #tpu.memory_space<vmem>>, vector<16x256xf32>
    tpu.vector_store %arg8[%c0_6, %c0_7], %7 {strides = array<i32>} : memref<16x256xf32, #tpu.memory_space<vmem>>, vector<16x256xf32>,
    %c0_i32_8 = arith.constant 0 : i32
    %9 = arith.cmpi eq, %arg2, %c0_i32_8 : i32
    %10 = arith.extui %9 : i1 to i32
    %c0_i32_9 = arith.constant 0 : i32
    %11 = arith.cmpi ne, %10, %c0_i32_9 : i32
    scf.if %11 {
      %c0_10 = arith.constant 0 : index
      %c0_11 = arith.constant 0 : index
      %12 = vector.load %arg8[%c0_10, %c0_11] : memref<16x256xf32, #tpu.memory_space<vmem>>, vector<16x256xf32>
      %13 = arith.truncf %12 : vector<16x256xf32> to vector<16x256xbf16>
      %c0_12 = arith.constant 0 : index
      %c0_13 = arith.constant 0 : index
      %14 = vector.load %arg5[%c0_12, %c0_13] : memref<16x256xbf16, #tpu.memory_space<vmem>>, vector<16x256xbf16>
      tpu.vector_store %arg5[%c0_12, %c0_13], %13 {strides = array<i32>} : memref<16x256xbf16, #tpu.memory_space<vmem>>, vector<16x256xbf16>,
      %cst_14 = arith.constant dense<0.000000e+00> : vector<256xf32>
      %15 = vector.multi_reduction <add>, %12, %cst_14 [0] : vector<16x256xf32> to vector<256xf32>
      %16 = vector.shape_cast %15 : vector<256xf32> to vector<1x1x256xf32>
      %c0_15 = arith.constant 0 : index
      %c0_16 = arith.constant 0 : index
      %c0_17 = arith.constant 0 : index
      %17 = vector.load %arg6[%c0_15, %c0_16, %c0_17] : memref<1x1x256xf32, #tpu.memory_space<vmem>>, vector<1x1x256xf32>
      tpu.vector_store %arg6[%c0_15, %c0_16, %c0_17], %16 {strides = array<i32>} : memref<1x1x256xf32, #tpu.memory_space<vmem>>, vector<1x1x256xf32>,
      %18 = arith.mulf %12, %12 : vector<16x256xf32>
      %cst_18 = arith.constant dense<0.000000e+00> : vector<256xf32>
      %19 = vector.multi_reduction <add>, %18, %cst_18 [0] : vector<16x256xf32> to vector<256xf32>
      %20 = vector.shape_cast %19 : vector<256xf32> to vector<1x1x256xf32>
      %c0_19 = arith.constant 0 : index
      %c0_20 = arith.constant 0 : index
      %c0_21 = arith.constant 0 : index
      %21 = vector.load %arg7[%c0_19, %c0_20, %c0_21] : memref<1x1x256xf32, #tpu.memory_space<vmem>>, vector<1x1x256xf32>
      tpu.vector_store %arg7[%c0_19, %c0_20, %c0_21], %20 {strides = array<i32>} : memref<1x1x256xf32, #tpu.memory_space<vmem>>, vector<1x1x256xf32>,
    } else {
    }
    return
  }
  func.func @transform_0(%arg0: i32, %arg1: i32, %arg2: i32) -> (i32, i32) {
    %c0_i32 = arith.constant 0 : i32
    return %arg0, %arg2 : i32, i32
  }
  func.func @transform_1(%arg0: i32, %arg1: i32, %arg2: i32) -> (i32, i32) {
    %c0_i32 = arith.constant 0 : i32
    return %arg2, %arg1 : i32, i32
  }
  func.func @transform_2(%arg0: i32, %arg1: i32, %arg2: i32) -> (i32, i32) {
    %c0_i32 = arith.constant 0 : i32
    return %arg0, %arg1 : i32, i32
  }
  func.func @transform_3(%arg0: i32, %arg1: i32, %arg2: i32) -> (i32, i32, i32) {
    %c0_i32 = arith.constant 0 : i32
    %c0_i32_0 = arith.constant 0 : i32
    return %arg0, %c0_i32, %arg1 : i32, i32, i32
  }
  func.func @transform_4(%arg0: i32, %arg1: i32, %arg2: i32) -> (i32, i32, i32) {
    %c0_i32 = arith.constant 0 : i32
    %c0_i32_0 = arith.constant 0 : i32
    return %arg0, %c0_i32, %arg1 : i32, i32, i32
  }
}

module attributes {stable_mosaic.version = 11 : i64} {
  func.func @_bn_apply_kernel(%arg0: i32, %arg1: memref<2x512xbf16, #tpu.memory_space<vmem>>, %arg2: memref<1x512xf32, #tpu.memory_space<vmem>>, %arg3: memref<1x512xf32, #tpu.memory_space<vmem>>, %arg4: memref<2x512xbf16, #tpu.memory_space<vmem>>) attributes {dimension_semantics = [#tpu.dimension_semantics<parallel>], iteration_bounds = array<i64: 1>, scalar_prefetch = 0 : i64, scratch_operands = 0 : i64, tpu.core_type = #tpu.core_type<tc>, window_params = [{transform_indices = @transform_0, window_bounds = array<i64: 2, 512>}, {pipeline_mode = #tpu.pipeline_mode<synchronous>, transform_indices = @transform_1, window_bounds = array<i64: 1, 512>}, {pipeline_mode = #tpu.pipeline_mode<synchronous>, transform_indices = @transform_2, window_bounds = array<i64: 1, 512>}, {transform_indices = @transform_3, window_bounds = array<i64: 2, 512>}]} {
    %c0 = arith.constant 0 : index
    %c0_0 = arith.constant 0 : index
    %0 = vector.load %arg1[%c0, %c0_0] : memref<2x512xbf16, #tpu.memory_space<vmem>>, vector<2x512xbf16>
    %1 = arith.extf %0 : vector<2x512xbf16> to vector<2x512xf32>
    %c0_1 = arith.constant 0 : index
    %c0_2 = arith.constant 0 : index
    %2 = vector.load %arg2[%c0_1, %c0_2] : memref<1x512xf32, #tpu.memory_space<vmem>>, vector<1x512xf32>
    %3 = vector.broadcast %2 : vector<1x512xf32> to vector<2x512xf32>
    %4 = arith.mulf %1, %3 : vector<2x512xf32>
    %c0_3 = arith.constant 0 : index
    %c0_4 = arith.constant 0 : index
    %5 = vector.load %arg3[%c0_3, %c0_4] : memref<1x512xf32, #tpu.memory_space<vmem>>, vector<1x512xf32>
    %6 = vector.broadcast %5 : vector<1x512xf32> to vector<2x512xf32>
    %7 = arith.addf %4, %6 : vector<2x512xf32>
    %8 = arith.truncf %7 : vector<2x512xf32> to vector<2x512xbf16>
    %c0_5 = arith.constant 0 : index
    %c0_6 = arith.constant 0 : index
    %9 = vector.load %arg4[%c0_5, %c0_6] : memref<2x512xbf16, #tpu.memory_space<vmem>>, vector<2x512xbf16>
    tpu.vector_store %arg4[%c0_5, %c0_6], %8 {strides = array<i32>} : memref<2x512xbf16, #tpu.memory_space<vmem>>, vector<2x512xbf16>,
    return
  }
  func.func @transform_0(%arg0: i32) -> (i32, i32) {
    %c0_i32 = arith.constant 0 : i32
    %c0_i32_0 = arith.constant 0 : i32
    return %arg0, %c0_i32 : i32, i32
  }
  func.func @transform_1(%arg0: i32) -> (i32, i32) {
    %c0_i32 = arith.constant 0 : i32
    %c0_i32_0 = arith.constant 0 : i32
    %c0_i32_1 = arith.constant 0 : i32
    return %c0_i32, %c0_i32_0 : i32, i32
  }
  func.func @transform_2(%arg0: i32) -> (i32, i32) {
    %c0_i32 = arith.constant 0 : i32
    %c0_i32_0 = arith.constant 0 : i32
    %c0_i32_1 = arith.constant 0 : i32
    return %c0_i32, %c0_i32_0 : i32, i32
  }
  func.func @transform_3(%arg0: i32) -> (i32, i32) {
    %c0_i32 = arith.constant 0 : i32
    %c0_i32_0 = arith.constant 0 : i32
    return %arg0, %c0_i32 : i32, i32
  }
}

module attributes {stable_mosaic.version = 11 : i64} {
  func.func @_matmul_stats_kernel(%arg0: i32, %arg1: i32, %arg2: i32, %arg3: memref<16x384xbf16, #tpu.memory_space<vmem>>, %arg4: memref<384x256xbf16, #tpu.memory_space<vmem>>, %arg5: memref<16x256xbf16, #tpu.memory_space<vmem>>, %arg6: memref<1x1x256xf32, #tpu.memory_space<vmem>>, %arg7: memref<1x1x256xf32, #tpu.memory_space<vmem>>, %arg8: memref<16x256xf32, #tpu.memory_space<vmem>>) attributes {dimension_semantics = [#tpu.dimension_semantics<parallel>, #tpu.dimension_semantics<parallel>, #tpu.dimension_semantics<arbitrary>], iteration_bounds = array<i64: 1, 2, 6>, scalar_prefetch = 0 : i64, scratch_operands = 1 : i64, tpu.core_type = #tpu.core_type<tc>, window_params = [{transform_indices = @transform_0, window_bounds = array<i64: 16, 384>}, {transform_indices = @transform_1, window_bounds = array<i64: 384, 256>}, {transform_indices = @transform_2, window_bounds = array<i64: 16, 256>}, {transform_indices = @transform_3, window_bounds = array<i64: 1, 1, 256>}, {transform_indices = @transform_4, window_bounds = array<i64: 1, 1, 256>}]} {
    %c0_i32 = arith.constant 0 : i32
    %0 = arith.cmpi eq, %arg2, %c0_i32 : i32
    %1 = arith.extui %0 : i1 to i32
    %c0_i32_0 = arith.constant 0 : i32
    %2 = arith.cmpi ne, %1, %c0_i32_0 : i32
    scf.if %2 {
      %cst_9 = arith.constant 0.000000e+00 : f32
      %12 = vector.broadcast %cst_9 : f32 to vector<16x256xf32>
      %c0_10 = arith.constant 0 : index
      %c0_11 = arith.constant 0 : index
      %13 = vector.load %arg8[%c0_10, %c0_11] : memref<16x256xf32, #tpu.memory_space<vmem>>, vector<16x256xf32>
      tpu.vector_store %arg8[%c0_10, %c0_11], %12 {strides = array<i32>} : memref<16x256xf32, #tpu.memory_space<vmem>>, vector<16x256xf32>,
    } else {
    }
    %c0 = arith.constant 0 : index
    %c0_1 = arith.constant 0 : index
    %3 = vector.load %arg8[%c0, %c0_1] : memref<16x256xf32, #tpu.memory_space<vmem>>, vector<16x256xf32>
    %c0_2 = arith.constant 0 : index
    %c0_3 = arith.constant 0 : index
    %4 = vector.load %arg3[%c0_2, %c0_3] : memref<16x384xbf16, #tpu.memory_space<vmem>>, vector<16x384xbf16>
    %c0_4 = arith.constant 0 : index
    %c0_5 = arith.constant 0 : index
    %5 = vector.load %arg4[%c0_4, %c0_5] : memref<384x256xbf16, #tpu.memory_space<vmem>>, vector<384x256xbf16>
    %cst = arith.constant dense<0.000000e+00> : vector<16x256xf32>
    %6 = tpu.matmul %4, %5, %cst {dimension_numbers = #tpu.dot_dimension_numbers<[1], [0], [0], [1], [0, 0, 1, 1], [], []>} : vector<16x384xbf16>, vector<384x256xbf16>, vector<16x256xf32> -> vector<16x256xf32>
    %7 = arith.addf %3, %6 : vector<16x256xf32>
    %c0_6 = arith.constant 0 : index
    %c0_7 = arith.constant 0 : index
    %8 = vector.load %arg8[%c0_6, %c0_7] : memref<16x256xf32, #tpu.memory_space<vmem>>, vector<16x256xf32>
    tpu.vector_store %arg8[%c0_6, %c0_7], %7 {strides = array<i32>} : memref<16x256xf32, #tpu.memory_space<vmem>>, vector<16x256xf32>,
    %c5_i32 = arith.constant 5 : i32
    %9 = arith.cmpi eq, %arg2, %c5_i32 : i32
    %10 = arith.extui %9 : i1 to i32
    %c0_i32_8 = arith.constant 0 : i32
    %11 = arith.cmpi ne, %10, %c0_i32_8 : i32
    scf.if %11 {
      %c0_9 = arith.constant 0 : index
      %c0_10 = arith.constant 0 : index
      %12 = vector.load %arg8[%c0_9, %c0_10] : memref<16x256xf32, #tpu.memory_space<vmem>>, vector<16x256xf32>
      %13 = arith.truncf %12 : vector<16x256xf32> to vector<16x256xbf16>
      %c0_11 = arith.constant 0 : index
      %c0_12 = arith.constant 0 : index
      %14 = vector.load %arg5[%c0_11, %c0_12] : memref<16x256xbf16, #tpu.memory_space<vmem>>, vector<16x256xbf16>
      tpu.vector_store %arg5[%c0_11, %c0_12], %13 {strides = array<i32>} : memref<16x256xbf16, #tpu.memory_space<vmem>>, vector<16x256xbf16>,
      %cst_13 = arith.constant dense<0.000000e+00> : vector<256xf32>
      %15 = vector.multi_reduction <add>, %12, %cst_13 [0] : vector<16x256xf32> to vector<256xf32>
      %16 = vector.shape_cast %15 : vector<256xf32> to vector<1x1x256xf32>
      %c0_14 = arith.constant 0 : index
      %c0_15 = arith.constant 0 : index
      %c0_16 = arith.constant 0 : index
      %17 = vector.load %arg6[%c0_14, %c0_15, %c0_16] : memref<1x1x256xf32, #tpu.memory_space<vmem>>, vector<1x1x256xf32>
      tpu.vector_store %arg6[%c0_14, %c0_15, %c0_16], %16 {strides = array<i32>} : memref<1x1x256xf32, #tpu.memory_space<vmem>>, vector<1x1x256xf32>,
      %18 = arith.mulf %12, %12 : vector<16x256xf32>
      %cst_17 = arith.constant dense<0.000000e+00> : vector<256xf32>
      %19 = vector.multi_reduction <add>, %18, %cst_17 [0] : vector<16x256xf32> to vector<256xf32>
      %20 = vector.shape_cast %19 : vector<256xf32> to vector<1x1x256xf32>
      %c0_18 = arith.constant 0 : index
      %c0_19 = arith.constant 0 : index
      %c0_20 = arith.constant 0 : index
      %21 = vector.load %arg7[%c0_18, %c0_19, %c0_20] : memref<1x1x256xf32, #tpu.memory_space<vmem>>, vector<1x1x256xf32>
      tpu.vector_store %arg7[%c0_18, %c0_19, %c0_20], %20 {strides = array<i32>} : memref<1x1x256xf32, #tpu.memory_space<vmem>>, vector<1x1x256xf32>,
    } else {
    }
    return
  }
  func.func @transform_0(%arg0: i32, %arg1: i32, %arg2: i32) -> (i32, i32) {
    %c0_i32 = arith.constant 0 : i32
    return %arg0, %arg2 : i32, i32
  }
  func.func @transform_1(%arg0: i32, %arg1: i32, %arg2: i32) -> (i32, i32) {
    %c0_i32 = arith.constant 0 : i32
    return %arg2, %arg1 : i32, i32
  }
  func.func @transform_2(%arg0: i32, %arg1: i32, %arg2: i32) -> (i32, i32) {
    %c0_i32 = arith.constant 0 : i32
    return %arg0, %arg1 : i32, i32
  }
  func.func @transform_3(%arg0: i32, %arg1: i32, %arg2: i32) -> (i32, i32, i32) {
    %c0_i32 = arith.constant 0 : i32
    %c0_i32_0 = arith.constant 0 : i32
    return %arg0, %c0_i32, %arg1 : i32, i32, i32
  }
  func.func @transform_4(%arg0: i32, %arg1: i32, %arg2: i32) -> (i32, i32, i32) {
    %c0_i32 = arith.constant 0 : i32
    %c0_i32_0 = arith.constant 0 : i32
    return %arg0, %c0_i32, %arg1 : i32, i32, i32
  }
}

module attributes {stable_mosaic.version = 11 : i64} {
  func.func @_bn_apply_kernel(%arg0: i32, %arg1: memref<2x512xbf16, #tpu.memory_space<vmem>>, %arg2: memref<1x512xf32, #tpu.memory_space<vmem>>, %arg3: memref<1x512xf32, #tpu.memory_space<vmem>>, %arg4: memref<2x512xbf16, #tpu.memory_space<vmem>>) attributes {dimension_semantics = [#tpu.dimension_semantics<parallel>], iteration_bounds = array<i64: 1>, scalar_prefetch = 0 : i64, scratch_operands = 0 : i64, tpu.core_type = #tpu.core_type<tc>, window_params = [{transform_indices = @transform_0, window_bounds = array<i64: 2, 512>}, {pipeline_mode = #tpu.pipeline_mode<synchronous>, transform_indices = @transform_1, window_bounds = array<i64: 1, 512>}, {pipeline_mode = #tpu.pipeline_mode<synchronous>, transform_indices = @transform_2, window_bounds = array<i64: 1, 512>}, {transform_indices = @transform_3, window_bounds = array<i64: 2, 512>}]} {
    %c0 = arith.constant 0 : index
    %c0_0 = arith.constant 0 : index
    %0 = vector.load %arg1[%c0, %c0_0] : memref<2x512xbf16, #tpu.memory_space<vmem>>, vector<2x512xbf16>
    %1 = arith.extf %0 : vector<2x512xbf16> to vector<2x512xf32>
    %c0_1 = arith.constant 0 : index
    %c0_2 = arith.constant 0 : index
    %2 = vector.load %arg2[%c0_1, %c0_2] : memref<1x512xf32, #tpu.memory_space<vmem>>, vector<1x512xf32>
    %3 = vector.broadcast %2 : vector<1x512xf32> to vector<2x512xf32>
    %4 = arith.mulf %1, %3 : vector<2x512xf32>
    %c0_3 = arith.constant 0 : index
    %c0_4 = arith.constant 0 : index
    %5 = vector.load %arg3[%c0_3, %c0_4] : memref<1x512xf32, #tpu.memory_space<vmem>>, vector<1x512xf32>
    %6 = vector.broadcast %5 : vector<1x512xf32> to vector<2x512xf32>
    %7 = arith.addf %4, %6 : vector<2x512xf32>
    %cst = arith.constant 0.000000e+00 : f32
    %8 = vector.broadcast %cst : f32 to vector<2x512xf32>
    %9 = arith.maximumf %7, %8 : vector<2x512xf32>
    %10 = arith.truncf %9 : vector<2x512xf32> to vector<2x512xbf16>
    %c0_5 = arith.constant 0 : index
    %c0_6 = arith.constant 0 : index
    %11 = vector.load %arg4[%c0_5, %c0_6] : memref<2x512xbf16, #tpu.memory_space<vmem>>, vector<2x512xbf16>
    tpu.vector_store %arg4[%c0_5, %c0_6], %10 {strides = array<i32>} : memref<2x512xbf16, #tpu.memory_space<vmem>>, vector<2x512xbf16>,
    return
  }
  func.func @transform_0(%arg0: i32) -> (i32, i32) {
    %c0_i32 = arith.constant 0 : i32
    %c0_i32_0 = arith.constant 0 : i32
    return %arg0, %c0_i32 : i32, i32
  }
  func.func @transform_1(%arg0: i32) -> (i32, i32) {
    %c0_i32 = arith.constant 0 : i32
    %c0_i32_0 = arith.constant 0 : i32
    %c0_i32_1 = arith.constant 0 : i32
    return %c0_i32, %c0_i32_0 : i32, i32
  }
  func.func @transform_2(%arg0: i32) -> (i32, i32) {
    %c0_i32 = arith.constant 0 : i32
    %c0_i32_0 = arith.constant 0 : i32
    %c0_i32_1 = arith.constant 0 : i32
    return %c0_i32, %c0_i32_0 : i32, i32
  }
  func.func @transform_3(%arg0: i32) -> (i32, i32) {
    %c0_i32 = arith.constant 0 : i32
    %c0_i32_0 = arith.constant 0 : i32
    return %arg0, %c0_i32 : i32, i32
  }
}

module attributes {stable_mosaic.version = 11 : i64} {
  func.func @_matmul_stats_kernel(%arg0: i32, %arg1: i32, %arg2: i32, %arg3: memref<16x512xbf16, #tpu.memory_space<vmem>>, %arg4: memref<512x256xbf16, #tpu.memory_space<vmem>>, %arg5: memref<16x256xbf16, #tpu.memory_space<vmem>>, %arg6: memref<1x1x256xf32, #tpu.memory_space<vmem>>, %arg7: memref<1x1x256xf32, #tpu.memory_space<vmem>>, %arg8: memref<16x256xf32, #tpu.memory_space<vmem>>) attributes {dimension_semantics = [#tpu.dimension_semantics<parallel>, #tpu.dimension_semantics<parallel>, #tpu.dimension_semantics<arbitrary>], iteration_bounds = array<i64: 1, 2, 9>, scalar_prefetch = 0 : i64, scratch_operands = 1 : i64, tpu.core_type = #tpu.core_type<tc>, window_params = [{transform_indices = @transform_0, window_bounds = array<i64: 16, 512>}, {transform_indices = @transform_1, window_bounds = array<i64: 512, 256>}, {transform_indices = @transform_2, window_bounds = array<i64: 16, 256>}, {transform_indices = @transform_3, window_bounds = array<i64: 1, 1, 256>}, {transform_indices = @transform_4, window_bounds = array<i64: 1, 1, 256>}]} {
    %c0_i32 = arith.constant 0 : i32
    %0 = arith.cmpi eq, %arg2, %c0_i32 : i32
    %1 = arith.extui %0 : i1 to i32
    %c0_i32_0 = arith.constant 0 : i32
    %2 = arith.cmpi ne, %1, %c0_i32_0 : i32
    scf.if %2 {
      %cst_9 = arith.constant 0.000000e+00 : f32
      %12 = vector.broadcast %cst_9 : f32 to vector<16x256xf32>
      %c0_10 = arith.constant 0 : index
      %c0_11 = arith.constant 0 : index
      %13 = vector.load %arg8[%c0_10, %c0_11] : memref<16x256xf32, #tpu.memory_space<vmem>>, vector<16x256xf32>
      tpu.vector_store %arg8[%c0_10, %c0_11], %12 {strides = array<i32>} : memref<16x256xf32, #tpu.memory_space<vmem>>, vector<16x256xf32>,
    } else {
    }
    %c0 = arith.constant 0 : index
    %c0_1 = arith.constant 0 : index
    %3 = vector.load %arg8[%c0, %c0_1] : memref<16x256xf32, #tpu.memory_space<vmem>>, vector<16x256xf32>
    %c0_2 = arith.constant 0 : index
    %c0_3 = arith.constant 0 : index
    %4 = vector.load %arg3[%c0_2, %c0_3] : memref<16x512xbf16, #tpu.memory_space<vmem>>, vector<16x512xbf16>
    %c0_4 = arith.constant 0 : index
    %c0_5 = arith.constant 0 : index
    %5 = vector.load %arg4[%c0_4, %c0_5] : memref<512x256xbf16, #tpu.memory_space<vmem>>, vector<512x256xbf16>
    %cst = arith.constant dense<0.000000e+00> : vector<16x256xf32>
    %6 = tpu.matmul %4, %5, %cst {dimension_numbers = #tpu.dot_dimension_numbers<[1], [0], [0], [1], [0, 0, 1, 1], [], []>} : vector<16x512xbf16>, vector<512x256xbf16>, vector<16x256xf32> -> vector<16x256xf32>
    %7 = arith.addf %3, %6 : vector<16x256xf32>
    %c0_6 = arith.constant 0 : index
    %c0_7 = arith.constant 0 : index
    %8 = vector.load %arg8[%c0_6, %c0_7] : memref<16x256xf32, #tpu.memory_space<vmem>>, vector<16x256xf32>
    tpu.vector_store %arg8[%c0_6, %c0_7], %7 {strides = array<i32>} : memref<16x256xf32, #tpu.memory_space<vmem>>, vector<16x256xf32>,
    %c8_i32 = arith.constant 8 : i32
    %9 = arith.cmpi eq, %arg2, %c8_i32 : i32
    %10 = arith.extui %9 : i1 to i32
    %c0_i32_8 = arith.constant 0 : i32
    %11 = arith.cmpi ne, %10, %c0_i32_8 : i32
    scf.if %11 {
      %c0_9 = arith.constant 0 : index
      %c0_10 = arith.constant 0 : index
      %12 = vector.load %arg8[%c0_9, %c0_10] : memref<16x256xf32, #tpu.memory_space<vmem>>, vector<16x256xf32>
      %13 = arith.truncf %12 : vector<16x256xf32> to vector<16x256xbf16>
      %c0_11 = arith.constant 0 : index
      %c0_12 = arith.constant 0 : index
      %14 = vector.load %arg5[%c0_11, %c0_12] : memref<16x256xbf16, #tpu.memory_space<vmem>>, vector<16x256xbf16>
      tpu.vector_store %arg5[%c0_11, %c0_12], %13 {strides = array<i32>} : memref<16x256xbf16, #tpu.memory_space<vmem>>, vector<16x256xbf16>,
      %cst_13 = arith.constant dense<0.000000e+00> : vector<256xf32>
      %15 = vector.multi_reduction <add>, %12, %cst_13 [0] : vector<16x256xf32> to vector<256xf32>
      %16 = vector.shape_cast %15 : vector<256xf32> to vector<1x1x256xf32>
      %c0_14 = arith.constant 0 : index
      %c0_15 = arith.constant 0 : index
      %c0_16 = arith.constant 0 : index
      %17 = vector.load %arg6[%c0_14, %c0_15, %c0_16] : memref<1x1x256xf32, #tpu.memory_space<vmem>>, vector<1x1x256xf32>
      tpu.vector_store %arg6[%c0_14, %c0_15, %c0_16], %16 {strides = array<i32>} : memref<1x1x256xf32, #tpu.memory_space<vmem>>, vector<1x1x256xf32>,
      %18 = arith.mulf %12, %12 : vector<16x256xf32>
      %cst_17 = arith.constant dense<0.000000e+00> : vector<256xf32>
      %19 = vector.multi_reduction <add>, %18, %cst_17 [0] : vector<16x256xf32> to vector<256xf32>
      %20 = vector.shape_cast %19 : vector<256xf32> to vector<1x1x256xf32>
      %c0_18 = arith.constant 0 : index
      %c0_19 = arith.constant 0 : index
      %c0_20 = arith.constant 0 : index
      %21 = vector.load %arg7[%c0_18, %c0_19, %c0_20] : memref<1x1x256xf32, #tpu.memory_space<vmem>>, vector<1x1x256xf32>
      tpu.vector_store %arg7[%c0_18, %c0_19, %c0_20], %20 {strides = array<i32>} : memref<1x1x256xf32, #tpu.memory_space<vmem>>, vector<1x1x256xf32>,
    } else {
    }
    return
  }
  func.func @transform_0(%arg0: i32, %arg1: i32, %arg2: i32) -> (i32, i32) {
    %c0_i32 = arith.constant 0 : i32
    return %arg0, %arg2 : i32, i32
  }
  func.func @transform_1(%arg0: i32, %arg1: i32, %arg2: i32) -> (i32, i32) {
    %c0_i32 = arith.constant 0 : i32
    return %arg2, %arg1 : i32, i32
  }
  func.func @transform_2(%arg0: i32, %arg1: i32, %arg2: i32) -> (i32, i32) {
    %c0_i32 = arith.constant 0 : i32
    return %arg0, %arg1 : i32, i32
  }
  func.func @transform_3(%arg0: i32, %arg1: i32, %arg2: i32) -> (i32, i32, i32) {
    %c0_i32 = arith.constant 0 : i32
    %c0_i32_0 = arith.constant 0 : i32
    return %arg0, %c0_i32, %arg1 : i32, i32, i32
  }
  func.func @transform_4(%arg0: i32, %arg1: i32, %arg2: i32) -> (i32, i32, i32) {
    %c0_i32 = arith.constant 0 : i32
    %c0_i32_0 = arith.constant 0 : i32
    return %arg0, %c0_i32, %arg1 : i32, i32, i32
  }
}

module attributes {stable_mosaic.version = 11 : i64} {
  func.func @_bn_apply_res_kernel(%arg0: i32, %arg1: memref<2x512xbf16, #tpu.memory_space<vmem>>, %arg2: memref<1x512xf32, #tpu.memory_space<vmem>>, %arg3: memref<1x512xf32, #tpu.memory_space<vmem>>, %arg4: memref<2x512xbf16, #tpu.memory_space<vmem>>, %arg5: memref<2x512xbf16, #tpu.memory_space<vmem>>) attributes {dimension_semantics = [#tpu.dimension_semantics<parallel>], iteration_bounds = array<i64: 1>, scalar_prefetch = 0 : i64, scratch_operands = 0 : i64, tpu.core_type = #tpu.core_type<tc>, window_params = [{transform_indices = @transform_0, window_bounds = array<i64: 2, 512>}, {pipeline_mode = #tpu.pipeline_mode<synchronous>, transform_indices = @transform_1, window_bounds = array<i64: 1, 512>}, {pipeline_mode = #tpu.pipeline_mode<synchronous>, transform_indices = @transform_2, window_bounds = array<i64: 1, 512>}, {transform_indices = @transform_3, window_bounds = array<i64: 2, 512>}, {transform_indices = @transform_4, window_bounds = array<i64: 2, 512>}]} {
    %c0 = arith.constant 0 : index
    %c0_0 = arith.constant 0 : index
    %0 = vector.load %arg1[%c0, %c0_0] : memref<2x512xbf16, #tpu.memory_space<vmem>>, vector<2x512xbf16>
    %1 = arith.extf %0 : vector<2x512xbf16> to vector<2x512xf32>
    %c0_1 = arith.constant 0 : index
    %c0_2 = arith.constant 0 : index
    %2 = vector.load %arg2[%c0_1, %c0_2] : memref<1x512xf32, #tpu.memory_space<vmem>>, vector<1x512xf32>
    %3 = vector.broadcast %2 : vector<1x512xf32> to vector<2x512xf32>
    %4 = arith.mulf %1, %3 : vector<2x512xf32>
    %c0_3 = arith.constant 0 : index
    %c0_4 = arith.constant 0 : index
    %5 = vector.load %arg3[%c0_3, %c0_4] : memref<1x512xf32, #tpu.memory_space<vmem>>, vector<1x512xf32>
    %6 = vector.broadcast %5 : vector<1x512xf32> to vector<2x512xf32>
    %7 = arith.addf %4, %6 : vector<2x512xf32>
    %c0_5 = arith.constant 0 : index
    %c0_6 = arith.constant 0 : index
    %8 = vector.load %arg4[%c0_5, %c0_6] : memref<2x512xbf16, #tpu.memory_space<vmem>>, vector<2x512xbf16>
    %9 = arith.extf %8 : vector<2x512xbf16> to vector<2x512xf32>
    %10 = arith.addf %7, %9 : vector<2x512xf32>
    %cst = arith.constant 0.000000e+00 : f32
    %11 = vector.broadcast %cst : f32 to vector<2x512xf32>
    %12 = arith.maximumf %10, %11 : vector<2x512xf32>
    %13 = arith.truncf %12 : vector<2x512xf32> to vector<2x512xbf16>
    %c0_7 = arith.constant 0 : index
    %c0_8 = arith.constant 0 : index
    %14 = vector.load %arg5[%c0_7, %c0_8] : memref<2x512xbf16, #tpu.memory_space<vmem>>, vector<2x512xbf16>
    tpu.vector_store %arg5[%c0_7, %c0_8], %13 {strides = array<i32>} : memref<2x512xbf16, #tpu.memory_space<vmem>>, vector<2x512xbf16>,
    return
  }
  func.func @transform_0(%arg0: i32) -> (i32, i32) {
    %c0_i32 = arith.constant 0 : i32
    %c0_i32_0 = arith.constant 0 : i32
    return %arg0, %c0_i32 : i32, i32
  }
  func.func @transform_1(%arg0: i32) -> (i32, i32) {
    %c0_i32 = arith.constant 0 : i32
    %c0_i32_0 = arith.constant 0 : i32
    %c0_i32_1 = arith.constant 0 : i32
    return %c0_i32, %c0_i32_0 : i32, i32
  }
  func.func @transform_2(%arg0: i32) -> (i32, i32) {
    %c0_i32 = arith.constant 0 : i32
    %c0_i32_0 = arith.constant 0 : i32
    %c0_i32_1 = arith.constant 0 : i32
    return %c0_i32, %c0_i32_0 : i32, i32
  }
  func.func @transform_3(%arg0: i32) -> (i32, i32) {
    %c0_i32 = arith.constant 0 : i32
    %c0_i32_0 = arith.constant 0 : i32
    return %arg0, %c0_i32 : i32, i32
  }
  func.func @transform_4(%arg0: i32) -> (i32, i32) {
    %c0_i32 = arith.constant 0 : i32
    %c0_i32_0 = arith.constant 0 : i32
    return %arg0, %c0_i32 : i32, i32
  }
}

module attributes {stable_mosaic.version = 11 : i64} {
  func.func @_avgpool_kernel(%arg0: i32, %arg1: memref<1x1x512xbf16, #tpu.memory_space<vmem>>, %arg2: memref<1x1x512xf32, #tpu.memory_space<vmem>>) attributes {dimension_semantics = [#tpu.dimension_semantics<parallel>], iteration_bounds = array<i64: 2>, scalar_prefetch = 0 : i64, scratch_operands = 0 : i64, tpu.core_type = #tpu.core_type<tc>, window_params = [{transform_indices = @transform_0, window_bounds = array<i64: 1, 1, 512>}, {transform_indices = @transform_1, window_bounds = array<i64: 1, 1, 512>}]} {
    %c0 = arith.constant 0 : index
    %c0_0 = arith.constant 0 : index
    %c0_1 = arith.constant 0 : index
    %0 = vector.load %arg1[%c0, %c0_0, %c0_1] : memref<1x1x512xbf16, #tpu.memory_space<vmem>>, vector<1x1x512xbf16>
    %1 = arith.extf %0 : vector<1x1x512xbf16> to vector<1x1x512xf32>
    %cst = arith.constant dense<0.000000e+00> : vector<1x512xf32>
    %2 = vector.multi_reduction <add>, %1, %cst [1] : vector<1x1x512xf32> to vector<1x512xf32>
    %3 = vector.shape_cast %2 : vector<1x512xf32> to vector<1x1x512xf32>
    %cst_2 = arith.constant 1.000000e+00 : f32
    %4 = vector.broadcast %cst_2 : f32 to vector<1x1x512xf32>
    %5 = arith.divf %3, %4 : vector<1x1x512xf32>
    %c0_3 = arith.constant 0 : index
    %c0_4 = arith.constant 0 : index
    %c0_5 = arith.constant 0 : index
    %6 = vector.load %arg2[%c0_3, %c0_4, %c0_5] : memref<1x1x512xf32, #tpu.memory_space<vmem>>, vector<1x1x512xf32>
    tpu.vector_store %arg2[%c0_3, %c0_4, %c0_5], %5 {strides = array<i32>} : memref<1x1x512xf32, #tpu.memory_space<vmem>>, vector<1x1x512xf32>,
    return
  }
  func.func @transform_0(%arg0: i32) -> (i32, i32, i32) {
    %c0_i32 = arith.constant 0 : i32
    %c0_i32_0 = arith.constant 0 : i32
    %c0_i32_1 = arith.constant 0 : i32
    return %arg0, %c0_i32, %c0_i32_0 : i32, i32, i32
  }
  func.func @transform_1(%arg0: i32) -> (i32, i32, i32) {
    %c0_i32 = arith.constant 0 : i32
    %c0_i32_0 = arith.constant 0 : i32
    %c0_i32_1 = arith.constant 0 : i32
    return %arg0, %c0_i32, %c0_i32_0 : i32, i32, i32
  }
}

module attributes {stable_mosaic.version = 11 : i64} {
  func.func @_matmul_kernel(%arg0: i32, %arg1: i32, %arg2: i32, %arg3: memref<16x512xbf16, #tpu.memory_space<vmem>>, %arg4: memref<512x128xbf16, #tpu.memory_space<vmem>>, %arg5: memref<16x128xf32, #tpu.memory_space<vmem>>, %arg6: memref<16x128xf32, #tpu.memory_space<vmem>>) attributes {dimension_semantics = [#tpu.dimension_semantics<parallel>, #tpu.dimension_semantics<parallel>, #tpu.dimension_semantics<arbitrary>], iteration_bounds = array<i64: 1, 1, 1>, scalar_prefetch = 0 : i64, scratch_operands = 1 : i64, tpu.core_type = #tpu.core_type<tc>, window_params = [{transform_indices = @transform_0, window_bounds = array<i64: 16, 512>}, {transform_indices = @transform_1, window_bounds = array<i64: 512, 128>}, {transform_indices = @transform_2, window_bounds = array<i64: 16, 128>}]} {
    %c0_i32 = arith.constant 0 : i32
    %0 = arith.cmpi eq, %arg2, %c0_i32 : i32
    %1 = arith.extui %0 : i1 to i32
    %c0_i32_0 = arith.constant 0 : i32
    %2 = arith.cmpi ne, %1, %c0_i32_0 : i32
    scf.if %2 {
      %cst_10 = arith.constant 0.000000e+00 : f32
      %12 = vector.broadcast %cst_10 : f32 to vector<16x128xf32>
      %c0_11 = arith.constant 0 : index
      %c0_12 = arith.constant 0 : index
      %13 = vector.load %arg6[%c0_11, %c0_12] : memref<16x128xf32, #tpu.memory_space<vmem>>, vector<16x128xf32>
      tpu.vector_store %arg6[%c0_11, %c0_12], %12 {strides = array<i32>} : memref<16x128xf32, #tpu.memory_space<vmem>>, vector<16x128xf32>,
    } else {
    }
    %c0 = arith.constant 0 : index
    %c0_1 = arith.constant 0 : index
    %3 = vector.load %arg6[%c0, %c0_1] : memref<16x128xf32, #tpu.memory_space<vmem>>, vector<16x128xf32>
    %c0_2 = arith.constant 0 : index
    %c0_3 = arith.constant 0 : index
    %4 = vector.load %arg3[%c0_2, %c0_3] : memref<16x512xbf16, #tpu.memory_space<vmem>>, vector<16x512xbf16>
    %c0_4 = arith.constant 0 : index
    %c0_5 = arith.constant 0 : index
    %5 = vector.load %arg4[%c0_4, %c0_5] : memref<512x128xbf16, #tpu.memory_space<vmem>>, vector<512x128xbf16>
    %cst = arith.constant dense<0.000000e+00> : vector<16x128xf32>
    %6 = tpu.matmul %4, %5, %cst {dimension_numbers = #tpu.dot_dimension_numbers<[1], [0], [0], [1], [0, 0, 1, 1], [], []>} : vector<16x512xbf16>, vector<512x128xbf16>, vector<16x128xf32> -> vector<16x128xf32>
    %7 = arith.addf %3, %6 : vector<16x128xf32>
    %c0_6 = arith.constant 0 : index
    %c0_7 = arith.constant 0 : index
    %8 = vector.load %arg6[%c0_6, %c0_7] : memref<16x128xf32, #tpu.memory_space<vmem>>, vector<16x128xf32>
    tpu.vector_store %arg6[%c0_6, %c0_7], %7 {strides = array<i32>} : memref<16x128xf32, #tpu.memory_space<vmem>>, vector<16x128xf32>,
    %c0_i32_8 = arith.constant 0 : i32
    %9 = arith.cmpi eq, %arg2, %c0_i32_8 : i32
    %10 = arith.extui %9 : i1 to i32
    %c0_i32_9 = arith.constant 0 : i32
    %11 = arith.cmpi ne, %10, %c0_i32_9 : i32
    scf.if %11 {
      %c0_10 = arith.constant 0 : index
      %c0_11 = arith.constant 0 : index
      %12 = vector.load %arg6[%c0_10, %c0_11] : memref<16x128xf32, #tpu.memory_space<vmem>>, vector<16x128xf32>
      %c0_12 = arith.constant 0 : index
      %c0_13 = arith.constant 0 : index
      %13 = vector.load %arg5[%c0_12, %c0_13] : memref<16x128xf32, #tpu.memory_space<vmem>>, vector<16x128xf32>
      tpu.vector_store %arg5[%c0_12, %c0_13], %12 {strides = array<i32>} : memref<16x128xf32, #tpu.memory_space<vmem>>, vector<16x128xf32>,
    } else {
    }
    return
  }
  func.func @transform_0(%arg0: i32, %arg1: i32, %arg2: i32) -> (i32, i32) {
    %c0_i32 = arith.constant 0 : i32
    return %arg0, %arg2 : i32, i32
  }
  func.func @transform_1(%arg0: i32, %arg1: i32, %arg2: i32) -> (i32, i32) {
    %c0_i32 = arith.constant 0 : i32
    return %arg2, %arg1 : i32, i32
  }
  func.func @transform_2(%arg0: i32, %arg1: i32, %arg2: i32) -> (i32, i32) {
    %c0_i32 = arith.constant 0 : i32
    return %arg0, %arg1 : i32, i32
  }
}

</mosaic_0001>

<bundles_post_ra>
// kernel: resnet_forward.29
= control target key start
LH: loop header
LB: loop body
LE: loop exit
PB: predicated region body
PF: predicated region fallthrough
CT: control target
= control target key end

     0   :  { %s782_s0 = inlined_call_operand.vmem [shape: bf16[256,128], index: 0, kind: input, shape index: {}]   ;;  %s783_s1 = inlined_call_operand.vmem [shape: f32[1,128], index: 1, kind: input, shape index: {}]   ;;  %s784_s2 = inlined_call_operand.vmem [shape: f32[1,128], index: 2, kind: input, shape index: {}]   ;;  %s785_s3 = inlined_call_operand.vmem [shape: bf16[256,128], index: 3, kind: output, shape index: {}]  }
   0x1   :  { %v419_v0 = vld [vmem:[%s782_s0] sm:$0xff]   ;;  %v562_v4 = vld [vmem:[%s782_s0 + $0x8] sm:$0xff]   ;;  %v563_v5 = vld [vmem:[%s782_s0 + $0x10] sm:$0xff]  }
   0x2   :  { %v618_v1 = vld [vmem:[%s783_s1] ss:$0 sm:$0xff]  ;;  %v420_v2 = vunpack.c.l.bf16 %v419_v0  ;;  %v421_v3 = vunpack.c.h.bf16 %v419_v0  ;;  %v564_v6 = vld [vmem:[%s782_s0 + $0x18] sm:$0xff]   ;;  %v424_v8 = vunpack.c.l.bf16 %v562_v4  ;;  %v425_v9 = vunpack.c.h.bf16 %v562_v4  ;;  %v566_v33 = vld [vmem:[%s782_s0 + $0x28] sm:$0xff]  }
   0x3   :  { %v632_v7 = vld [vmem:[%s784_s2] ss:$0 sm:$0xff]  ;;  %v428_v10 = vunpack.c.l.bf16 %v563_v5  ;;  %v429_v11 = vunpack.c.h.bf16 %v563_v5  ;;  %v432_v14 = vunpack.c.l.bf16 %v564_v6  ;;  %v433_v15 = vunpack.c.h.bf16 %v564_v6  ;;  %v567_v38 = vld [vmem:[%s782_s0 + $0x30] sm:$0xff]   ;;  %v568_v43 = vld [vmem:[%s782_s0 + $0x38] sm:$0xff]  }
   0x4   :  { %v85_v12 = vmul.f32 %v420_v2, %v618_v1  ;;  %v86_v13 = vmul.f32 %v421_v3, %v618_v1  ;;  %v87_v16 = vmul.f32 %v424_v8, %v618_v1  ;;  %v88_v17 = vmul.f32 %v425_v9, %v618_v1  ;;  %v565_v28 = vld [vmem:[%s782_s0 + $0x20] sm:$0xff]  }
   0x5   :  { %v89_v18 = vmul.f32 %v428_v10, %v618_v1  ;;  %v90_v19 = vmul.f32 %v429_v11, %v618_v1  ;;  %v91_v22 = vmul.f32 %v432_v14, %v618_v1  ;;  %v92_v23 = vmul.f32 %v433_v15, %v618_v1  ;;  %v569_v0 = vld [vmem:[%s782_s0 + $0x40] sm:$0xff]   ;;  %v570_v11 = vld [vmem:[%s782_s0 + $0x48] sm:$0xff]  }
   0x6   :  { %v124_v20 = vadd.f32 %v632_v7, %v85_v12  ;;  %v125_v21 = vadd.f32 %v632_v7, %v86_v13  ;;  %v126_v24 = vadd.f32 %v632_v7, %v87_v16  ;;  %v127_v25 = vadd.f32 %v632_v7, %v88_v17  ;;  %v571_v16 = vld [vmem:[%s782_s0 + $0x50] sm:$0xff]  }
   0x7   :  { %v128_v26 = vadd.f32 %v632_v7, %v89_v18  ;;  %v129_v27 = vadd.f32 %v632_v7, %v90_v19  ;;  %v130_v31 = vadd.f32 %v632_v7, %v91_v22  ;;  %v131_v32 = vadd.f32 %v632_v7, %v92_v23 }
   0x8   :  { %v156_v29 = vmax.f32 %v124_v20, 0.0  ;;  %v157_v30 = vmax.f32 %v125_v21, 0.0  ;;  %v158_v34 = vmax.f32 %v126_v24, 0.0  ;;  %v159_v35 = vmax.f32 %v127_v25, 0.0  ;;  %v572_v25 = vld [vmem:[%s782_s0 + $0x58] sm:$0xff]  }
   0x9   :  { %v160_v36 = vmax.f32 %v128_v26, 0.0  ;;  %v161_v37 = vmax.f32 %v129_v27, 0.0  ;;  %v162_v40 = vmax.f32 %v130_v31, 0.0  ;;  %v163_v41 = vmax.f32 %v131_v32, 0.0 }
   0xa   :  { %v485_v39 = vpack.c.bf16 %v157_v30, %v156_v29  ;;  %v436_v42 = vunpack.c.l.bf16 %v565_v28  ;;  %v490_v44 = vpack.c.bf16 %v159_v35, %v158_v34  ;;  %v437_v46 = vunpack.c.h.bf16 %v565_v28 }
   0xb   :  { %v495_v45 = vpack.c.bf16 %v161_v37, %v160_v36  ;;  %v440_v47 = vunpack.c.l.bf16 %v566_v33  ;;  %v500_v48 = vpack.c.bf16 %v163_v41, %v162_v40  ;;  %v441_v50 = vunpack.c.h.bf16 %v566_v33 }
   0xc   :  { %486 = vst [vmem:[%s785_s3] sm:$0xff] %v485_v39   ;;  %v93_v49 = vmul.f32 %v436_v42, %v618_v1  ;;  %v444_v51 = vunpack.c.l.bf16 %v567_v38  ;;  %577 = vst [vmem:[%s785_s3 + $0x8] sm:$0xff] %v490_v44   ;;  %v94_v52 = vmul.f32 %v437_v46, %v618_v1  ;;  %v445_v54 = vunpack.c.h.bf16 %v567_v38  ;;  %v573_v38 = vld [vmem:[%s782_s0 + $0x60] sm:$0xff]  }
   0xd   :  { %578 = vst [vmem:[%s785_s3 + $0x10] sm:$0xff] %v495_v45   ;;  %v95_v53 = vmul.f32 %v440_v47, %v618_v1  ;;  %v448_v55 = vunpack.c.l.bf16 %v568_v43  ;;  %579 = vst [vmem:[%s785_s3 + $0x18] sm:$0xff] %v500_v48   ;;  %v96_v57 = vmul.f32 %v441_v50, %v618_v1  ;;  %v449_v59 = vunpack.c.h.bf16 %v568_v43 }
   0xe   :  { %v132_v56 = vadd.f32 %v632_v7, %v93_v49  ;;  %v97_v58 = vmul.f32 %v444_v51, %v618_v1  ;;  %v133_v60 = vadd.f32 %v632_v7, %v94_v52  ;;  %v98_v62 = vmul.f32 %v445_v54, %v618_v1  ;;  %v574_v51 = vld [vmem:[%s782_s0 + $0x68] sm:$0xff]  }
   0xf   :  { %v134_v61 = vadd.f32 %v632_v7, %v95_v53  ;;  %v99_v63 = vmul.f32 %v448_v55, %v618_v1  ;;  %v135_v3 = vadd.f32 %v632_v7, %v96_v57  ;;  %v100_v5 = vmul.f32 %v449_v59, %v618_v1 }
  0x10   :  { %v164_v2 = vmax.f32 %v132_v56, 0.0  ;;  %v136_v4 = vadd.f32 %v632_v7, %v97_v58  ;;  %v165_v6 = vmax.f32 %v133_v60, 0.0  ;;  %v137_v9 = vadd.f32 %v632_v7, %v98_v62  ;;  %v575_v60 = vld [vmem:[%s782_s0 + $0x70] sm:$0xff]  }
  0x11   :  { %v166_v8 = vmax.f32 %v134_v61, 0.0  ;;  %v138_v10 = vadd.f32 %v632_v7, %v99_v63  ;;  %v167_v12 = vmax.f32 %v135_v3, 0.0  ;;  %v139_v14 = vadd.f32 %v632_v7, %v100_v5 }
  0x12   :  { %v168_v13 = vmax.f32 %v136_v4, 0.0  ;;  %v452_v15 = vunpack.c.l.bf16 %v569_v0  ;;  %v505_v17 = vpack.c.bf16 %v165_v6, %v164_v2  ;;  %v169_v18 = vmax.f32 %v137_v9, 0.0  ;;  %v576_v2 = vld [vmem:[%s782_s0 + $0x78] sm:$0xff]  }
  0x13   :  { %v170_v19 = vmax.f32 %v138_v10, 0.0  ;;  %v453_v20 = vunpack.c.h.bf16 %v569_v0  ;;  %v510_v21 = vpack.c.bf16 %v167_v12, %v166_v8  ;;  %v171_v22 = vmax.f32 %v139_v14, 0.0 }
  0x14   :  { %v101_v23 = vmul.f32 %v452_v15, %v618_v1  ;;  %v456_v24 = vunpack.c.l.bf16 %v570_v11  ;;  %580 = vst [vmem:[%s785_s3 + $0x20] sm:$0xff] %v505_v17   ;;  %v515_v26 = vpack.c.bf16 %v169_v18, %v168_v13  ;;  %v457_v28 = vunpack.c.h.bf16 %v570_v11 }
  0x15   :  { %v102_v27 = vmul.f32 %v453_v20, %v618_v1  ;;  %v460_v29 = vunpack.c.l.bf16 %v571_v16  ;;  %581 = vst [vmem:[%s785_s3 + $0x28] sm:$0xff] %v510_v21   ;;  %v520_v30 = vpack.c.bf16 %v171_v22, %v170_v19  ;;  %v461_v33 = vunpack.c.h.bf16 %v571_v16 }
  0x16   :  { %v140_v31 = vadd.f32 %v632_v7, %v101_v23  ;;  %v103_v32 = vmul.f32 %v456_v24, %v618_v1  ;;  %582 = vst [vmem:[%s785_s3 + $0x30] sm:$0xff] %v515_v26   ;;  %v104_v35 = vmul.f32 %v457_v28, %v618_v1  ;;  %v464_v37 = vunpack.c.l.bf16 %v572_v25 }
  0x17   :  { %v141_v34 = vadd.f32 %v632_v7, %v102_v27  ;;  %v105_v36 = vmul.f32 %v460_v29, %v618_v1  ;;  %583 = vst [vmem:[%s785_s3 + $0x38] sm:$0xff] %v520_v30   ;;  %v106_v41 = vmul.f32 %v461_v33, %v618_v1  ;;  %v465_v42 = vunpack.c.h.bf16 %v572_v25 }
  0x18   :  { %v172_v39 = vmax.f32 %v140_v31, 0.0  ;;  %v142_v40 = vadd.f32 %v632_v7, %v103_v32  ;;  %v143_v44 = vadd.f32 %v632_v7, %v104_v35  ;;  %v107_v46 = vmul.f32 %v464_v37, %v618_v1 }
  0x19   :  { %v173_v43 = vmax.f32 %v141_v34, 0.0  ;;  %v144_v45 = vadd.f32 %v632_v7, %v105_v36  ;;  %v145_v48 = vadd.f32 %v632_v7, %v106_v41  ;;  %v108_v49 = vmul.f32 %v465_v42, %v618_v1 }
  0x1a   :  { %v174_v47 = vmax.f32 %v142_v40, 0.0  ;;  %v468_v50 = vunpack.c.l.bf16 %v573_v38  ;;  %v175_v53 = vmax.f32 %v143_v44, 0.0  ;;  %v146_v55 = vadd.f32 %v632_v7, %v107_v46 }
  0x1b   :  { %v525_v52 = vpack.c.bf16 %v173_v43, %v172_v39  ;;  %v176_v54 = vmax.f32 %v144_v45, 0.0  ;;  %v177_v56 = vmax.f32 %v145_v48, 0.0  ;;  %v147_v57 = vadd.f32 %v632_v7, %v108_v49 }
  0x1c   :  { %v469_v58 = vunpack.c.h.bf16 %v573_v38  ;;  %v109_v59 = vmul.f32 %v468_v50, %v618_v1  ;;  %v530_v61 = vpack.c.bf16 %v175_v53, %v174_v47  ;;  %v178_v62 = vmax.f32 %v146_v55, 0.0 }
  0x1d   :  { %584 = vst [vmem:[%s785_s3 + $0x40] sm:$0xff] %v525_v52   ;;  %v472_v63 = vunpack.c.l.bf16 %v574_v51  ;;  %v473_v0 = vunpack.c.h.bf16 %v574_v51  ;;  %v535_v3 = vpack.c.bf16 %v177_v56, %v176_v54  ;;  %v179_v4 = vmax.f32 %v147_v57, 0.0 }
  0x1e   :  { %v110_v5 = vmul.f32 %v469_v58, %v618_v1  ;;  %v148_v6 = vadd.f32 %v632_v7, %v109_v59  ;;  %585 = vst [vmem:[%s785_s3 + $0x48] sm:$0xff] %v530_v61   ;;  %v476_v10 = vunpack.c.l.bf16 %v575_v60  ;;  %v477_v11 = vunpack.c.h.bf16 %v575_v60 }
  0x1f   :  { %v111_v8 = vmul.f32 %v472_v63, %v618_v1  ;;  %v112_v9 = vmul.f32 %v473_v0, %v618_v1  ;;  %586 = vst [vmem:[%s785_s3 + $0x50] sm:$0xff] %v535_v3   ;;  %v540_v12 = vpack.c.bf16 %v179_v4, %v178_v62  ;;  %v480_v15 = vunpack.c.l.bf16 %v576_v2 }
  0x20   :  { %v149_v13 = vadd.f32 %v632_v7, %v110_v5  ;;  %v180_v14 = vmax.f32 %v148_v6, 0.0  ;;  %v113_v18 = vmul.f32 %v476_v10, %v618_v1  ;;  %v114_v19 = vmul.f32 %v477_v11, %v618_v1 }
  0x21   :  { %v150_v16 = vadd.f32 %v632_v7, %v111_v8  ;;  %v151_v17 = vadd.f32 %v632_v7, %v112_v9  ;;  %587 = vst [vmem:[%s785_s3 + $0x58] sm:$0xff] %v540_v12   ;;  %v481_v21 = vunpack.c.h.bf16 %v576_v2  ;;  %v115_v22 = vmul.f32 %v480_v15, %v618_v1 }
  0x22   :  { %v181_v20 = vmax.f32 %v149_v13, 0.0  ;;  %v152_v25 = vadd.f32 %v632_v7, %v113_v18  ;;  %v153_v26 = vadd.f32 %v632_v7, %v114_v19 }
  0x23   :  { %v182_v23 = vmax.f32 %v150_v16, 0.0  ;;  %v183_v24 = vmax.f32 %v151_v17, 0.0  ;;  %v116_v28 = vmul.f32 %v481_v21, %v618_v1  ;;  %v154_v29 = vadd.f32 %v632_v7, %v115_v22 }
  0x24   :  { %v545_v27 = vpack.c.bf16 %v181_v20, %v180_v14  ;;  %v184_v31 = vmax.f32 %v152_v25, 0.0  ;;  %v185_v32 = vmax.f32 %v153_v26, 0.0 }
  0x25   :  { %v550_v30 = vpack.c.bf16 %v183_v24, %v182_v23  ;;  %v155_v33 = vadd.f32 %v632_v7, %v116_v28  ;;  %v186_v34 = vmax.f32 %v154_v29, 0.0 }
  0x26   :  { %588 = vst [vmem:[%s785_s3 + $0x60] sm:$0xff] %v545_v27   ;;  %v555_v35 = vpack.c.bf16 %v185_v32, %v184_v31 }
  0x27   :  { %589 = vst [vmem:[%s785_s3 + $0x68] sm:$0xff] %v550_v30   ;;  %v187_v36 = vmax.f32 %v155_v33, 0.0 }
  0x28   :  { %590 = vst [vmem:[%s785_s3 + $0x70] sm:$0xff] %v555_v35  }
  0x29   :  { %v560_v1 = vpack.c.bf16 %v187_v36, %v186_v34 }
  0x2b   :  { %591 = vst [vmem:[%s785_s3 + $0x78] sm:$0xff] %v560_v1  }

// kernel: resnet_forward.28
= control target key start
LH: loop header
LB: loop body
LE: loop exit
PB: predicated region body
PF: predicated region fallthrough
CT: control target
= control target key end

     0   :  { %s1888_s15 = smov 0   ;;  %s1890_s16 = smov 0   ;;  %s2120_s0 = inlined_call_operand.vmem [shape: bf16[512,256], index: 0, kind: input, shape index: {}]   ;;  %s2121_s1 = inlined_call_operand.vmem [shape: bf16[256,128], index: 1, kind: input, shape index: {}]   ;;  %s2122_s2 = inlined_call_operand.vmem [shape: bf16[512,128], index: 2, kind: output, shape index: {0}]   ;;  %s2123_s3 = inlined_call_operand.vmem [shape: f32[2,1,128], index: 3, kind: output, shape index: {1}]   ;;  %s2124_s4 = inlined_call_operand.vmem [shape: f32[2,1,128], index: 4, kind: output, shape index: {2}]  }
   0x1   :  { %s1892_s17 = smov 0  }
   0x2 LB: > { %s34_s18 = sadd.s32 1, %s1857_s16  ;;  %p1407_p0 = scmp.ge.s32.totalorder %s1861_s17, 1  ;;  %s1861_s17 = sphi %s1892_s17, %s15_s17   ;;  %s1857_s16 = sphi %s1890_s16, %s2126_s16   ;;  %s1853_s15 = sphi %s1888_s15, %s2125_s15  }
   0x3   : > { %p36_p1 = scmp.ge.s32.totalorder %s34_s18, 2  ;;  %p217_p2 = scmp.lt.s32.totalorder %s1861_s17, 3 }
   0x5   : > { %s2128_s18 = smov (%p36_p1, %s34_s18), 0  ;;  %p218_p3 = pnand %p1407_p0, %p217_p2 }
   0x6   : > { %v1775_v0 = vld [vmem:[%s2121_s1 + $0x40] sm:$0xff] (!%p218_p3)   ;;  %s1408_s21 = sshll.u32 (!%p218_p3), %s1853_s15, 5  ;;  %v1777_v2 = vld [vmem:[%s2121_s1 + $0x48] sm:$0xff] (!%p218_p3)   ;;  %v1779_v4 = vld [vmem:[%s2121_s1 + $0x50] sm:$0xff] (!%p218_p3)   ;;  %p301_p5 = scmp.lt.s32.totalorder (!%p218_p3), %s1853_s15, 1 }
   0x7   : > { %221 = sbr.rel (%p218_p3) target bundleno = 361 (0x169), region = 28  ;;  %v1776_v1 = vld [vmem:[%s2121_s1] sm:$0xff] (!%p218_p3)   ;;  %1623 = vmatprep.subr.bf16.mxu0 (!%p218_p3), %v1775_v0  ;;  %1735 = vmatprep.subr.bf16.mxu1 (!%p218_p3), %v1775_v0  ;;  %v1778_v3 = vld [vmem:[%s2121_s1 + $0x8] sm:$0xff] (!%p218_p3)   ;;  %p273_p4 = scmp.lt.s32.totalorder (!%p218_p3), %s1408_s21, 63  ;;  %v1780_v5 = vld [vmem:[%s2121_s1 + $0x10] sm:$0xff] (!%p218_p3)  }
   0x8   : > { %1624 = vmatpush3.bf16.msra.mxu0 (!%p218_p3), %v1776_v1  ;;  %1743 = vmatpush3.bf16.msra.mxu1 (!%p218_p3), %v1776_v1  ;;  %v1781_v6 = vld [vmem:[%s2121_s1 + $0x58] sm:$0xff] (!%p218_p3)   ;;  %v1783_v8 = vld [vmem:[%s2121_s1 + $0x60] sm:$0xff] (!%p218_p3)   ;;  %v1785_v10 = vld [vmem:[%s2121_s1 + $0x68] sm:$0xff] (!%p218_p3)  }
   0x9   : > { %1625 = vmatprep.subr.bf16.mxu0 (!%p218_p3), %v1777_v2  ;;  %1736 = vmatprep.subr.bf16.mxu1 (!%p218_p3), %v1777_v2  ;;  %v1782_v7 = vld [vmem:[%s2121_s1 + $0x18] sm:$0xff] (!%p218_p3)   ;;  %v1784_v9 = vld [vmem:[%s2121_s1 + $0x20] sm:$0xff] (!%p218_p3)   ;;  %v1786_v12 = vld [vmem:[%s2121_s1 + $0x28] sm:$0xff] (!%p218_p3)  }
   0xa   : > { %v1787_v13 = vld [vmem:[%s2121_s1 + $0x70] sm:$0xff] (!%p218_p3)   ;;  %v1789_v16 = vld [vmem:[%s2121_s1 + $0x78] sm:$0xff] (!%p218_p3)  }
   0xb   : > { %v1788_v15 = vld [vmem:[%s2121_s1 + $0x30] sm:$0xff] (!%p218_p3)   ;;  %v1790_v17 = vld [vmem:[%s2121_s1 + $0x38] sm:$0xff] (!%p218_p3)  }
   0xc   : > { %1626 = vmatpush3.bf16.msra.mxu0 (!%p218_p3), %v1778_v3  ;;  %1744 = vmatpush3.bf16.msra.mxu1 (!%p218_p3), %v1778_v3 }
   0xd   : > { %1627 = vmatprep.subr.bf16.mxu0 (!%p218_p3), %v1779_v4  ;;  %1737 = vmatprep.subr.bf16.mxu1 (!%p218_p3), %v1779_v4 }
   0xe   : > { %s2130_s21 = smov (!%p273_p4, %s1408_s21), 63  ;;  %s2132_s15 = smov (!%p301_p5, %s1853_s15), 1 }
   0xf   : > { %s1495_s10 = sshll.u32 %s2130_s21, 3  ;;  %s1412_s9 = sshll.u32 %s2130_s21, 2 }
  0x10   : > { %1628 = vmatpush3.bf16.msra.mxu0 %v1780_v5  ;;  %1745 = vmatpush3.bf16.msra.mxu1 %v1780_v5  ;;  %s1942_s19 = scalar_lea.vmem %s2120_s0, %s1495_s10  ;;  %s2003_s12 = scalar_lea.vmem %s2122_s2, %s1412_s9 }
  0x11   : > { %1629 = vmatprep.subr.bf16.mxu0 %v1781_v6  ;;  %1738 = vmatprep.subr.bf16.mxu1 %v1781_v6  ;;  %v1793_v11 = vld [vmem:[%s1942_s19 + $0x4] ss:$8 sps:$4 sm:$0xff]   ;;  %v1791_v18 = vld [vmem:[%s1942_s19] ss:$8 sps:$4 sm:$0xff]   ;;  %v1794_v19 = vld [vmem:[%s1942_s19 + $0x14] ss:$8 sps:$4 sm:$0xff]   ;;  %s306_s14 = scalar_lea.vmem %s2123_s3, %s2132_s15  ;;  %s312_s22 = scalar_lea.vmem %s2124_s4, %s2132_s15 }
  0x12   : > { %734 = vmatprep.mubr.bf16.mxu0 %v1793_v11  ;;  %v1805_v14 = vld [vmem:[%s1942_s19 + $0x84] ss:$8 sps:$4 sm:$0xff]   ;;  %v1803_v20 = vld [vmem:[%s1942_s19 + $0x80] ss:$8 sps:$4 sm:$0xff]   ;;  %v1809_v21 = vld [vmem:[%s1942_s19 + $0x94] ss:$8 sps:$4 sm:$0xff]  }
  0x13   : > { %798 = vmatprep.mubr.bf16.mxu1 %v1805_v14  ;;  %v1796_v22 = vld [vmem:[%s1942_s19 + $0x10] ss:$8 sps:$4 sm:$0xff]   ;;  %v1797_v23 = vld [vmem:[%s1942_s19 + $0x24] ss:$8 sps:$4 sm:$0xff]   ;;  %v1799_v26 = vld [vmem:[%s1942_s19 + $0x20] ss:$8 sps:$4 sm:$0xff]  }
  0x14   : > { %1630 = vmatpush3.bf16.msra.mxu0 %v1782_v7  ;;  %1746 = vmatpush3.bf16.msra.mxu1 %v1782_v7  ;;  %v1811_v24 = vld [vmem:[%s1942_s19 + $0x90] ss:$8 sps:$4 sm:$0xff]   ;;  %v1815_v25 = vld [vmem:[%s1942_s19 + $0xa4] ss:$8 sps:$4 sm:$0xff]   ;;  %v1800_v27 = vld [vmem:[%s1942_s19 + $0x34] ss:$8 sps:$4 sm:$0xff]  }
  0x15   : > { %1631 = vmatprep.subr.bf16.mxu0 %v1783_v8  ;;  %1739 = vmatprep.subr.bf16.mxu1 %v1783_v8  ;;  %v1817_v28 = vld [vmem:[%s1942_s19 + $0xa0] ss:$8 sps:$4 sm:$0xff]   ;;  %v1821_v29 = vld [vmem:[%s1942_s19 + $0xb4] ss:$8 sps:$4 sm:$0xff]   ;;  %v1802_v30 = vld [vmem:[%s1942_s19 + $0x30] ss:$8 sps:$4 sm:$0xff]  }
  0x16   : > { %v1806_v31 = vld [vmem:[%s1942_s19 + $0x44] ss:$8 sps:$4 sm:$0xff]   ;;  %v1823_v32 = vld [vmem:[%s1942_s19 + $0xb0] ss:$8 sps:$4 sm:$0xff]   ;;  %v1808_v34 = vld [vmem:[%s1942_s19 + $0x40] ss:$8 sps:$4 sm:$0xff]  }
  0x17   : > { %v1827_v33 = vld [vmem:[%s1942_s19 + $0xc4] ss:$8 sps:$4 sm:$0xff]   ;;  %v1812_v35 = vld [vmem:[%s1942_s19 + $0x54] ss:$8 sps:$4 sm:$0xff]   ;;  %v1829_v36 = vld [vmem:[%s1942_s19 + $0xc0] ss:$8 sps:$4 sm:$0xff]  }
  0x18   : > { %1632 = vmatpush3.bf16.msra.mxu0 %v1784_v9  ;;  %1747 = vmatpush3.bf16.msra.mxu1 %v1784_v9  ;;  %v1830_v37 = vld [vmem:[%s1942_s19 + $0xd4] ss:$8 sps:$4 sm:$0xff]   ;;  %v1814_v38 = vld [vmem:[%s1942_s19 + $0x50] ss:$8 sps:$4 sm:$0xff]   ;;  %v1818_v39 = vld [vmem:[%s1942_s19 + $0x64] ss:$8 sps:$4 sm:$0xff]  }
  0x19   : > { %1633 = vmatprep.subr.bf16.mxu0 %v1785_v10  ;;  %1740 = vmatprep.subr.bf16.mxu1 %v1785_v10  ;;  %v1832_v40 = vld [vmem:[%s1942_s19 + $0xd0] ss:$8 sps:$4 sm:$0xff]   ;;  %v1833_v41 = vld [vmem:[%s1942_s19 + $0xe4] ss:$8 sps:$4 sm:$0xff]   ;;  %v1820_v42 = vld [vmem:[%s1942_s19 + $0x60] ss:$8 sps:$4 sm:$0xff]  }
  0x1a   : > { %v1824_v43 = vld [vmem:[%s1942_s19 + $0x74] ss:$8 sps:$4 sm:$0xff]   ;;  %v1835_v44 = vld [vmem:[%s1942_s19 + $0xe0] ss:$8 sps:$4 sm:$0xff]   ;;  %v1826_v46 = vld [vmem:[%s1942_s19 + $0x70] ss:$8 sps:$4 sm:$0xff]  }
  0x1b   : > { %v1836_v45 = vld [vmem:[%s1942_s19 + $0xf4] ss:$8 sps:$4 sm:$0xff]   ;;  %v1838_v47 = vld [vmem:[%s1942_s19 + $0xf0] ss:$8 sps:$4 sm:$0xff]  }
  0x1c   : > { %1634 = vmatpush3.bf16.msra.mxu0 %v1786_v12  ;;  %1748 = vmatpush3.bf16.msra.mxu1 %v1786_v12 }
  0x1d   : > { %1635 = vmatprep.subr.bf16.mxu0 %v1787_v13  ;;  %1741 = vmatprep.subr.bf16.mxu1 %v1787_v13 }
  0x20   : > { %1636 = vmatpush3.bf16.msra.mxu0 %v1788_v15  ;;  %1749 = vmatpush3.bf16.msra.mxu1 %v1788_v15 }
  0x21   : > { %1637 = vmatprep.subr.bf16.mxu0 %v1789_v16  ;;  %1742 = vmatprep.subr.bf16.mxu1 %v1789_v16 }
  0x24   : > { %1638 = vmatpush3.bf16.msra.mxu0 %v1790_v17  ;;  %1750 = vmatpush3.bf16.msra.mxu1 %v1790_v17 }
  0x27   : > { %735 = vmatmul.mubr.bf16.vlgmr.msra.gmra.mrb[0].mxu0 %v1791_v18  ;;  %799 = vmatmul.mubr.bf16.vlgmr.msra.gmra.mrb[0].mxu1 %v1803_v20 }
  0x28   : > { %742 = vmatprep.mubr.bf16.mxu0 %v1794_v19  ;;  %806 = vmatprep.mubr.bf16.mxu1 %v1809_v21 }
  0x2f   : > { %743 = vmatmul.mubr.bf16.gmra.mrb[4].mxu0 %v1796_v22  ;;  %807 = vmatmul.mubr.bf16.gmra.mrb[4].mxu1 %v1811_v24 }
  0x30   : > { %750 = vmatprep.mubr.bf16.mxu0 %v1797_v23  ;;  %814 = vmatprep.mubr.bf16.mxu1 %v1815_v25 }
  0x37   : > { %751 = vmatmul.mubr.bf16.gmra.mrb[8].mxu0 %v1799_v26  ;;  %815 = vmatmul.mubr.bf16.gmra.mrb[8].mxu1 %v1817_v28 }
  0x38   : > { %758 = vmatprep.mubr.bf16.mxu0 %v1800_v27  ;;  %822 = vmatprep.mubr.bf16.mxu1 %v1821_v29 }
  0x3f   : > { %759 = vmatmul.mubr.bf16.gmra.mrb[12].mxu0 %v1802_v30  ;;  %823 = vmatmul.mubr.bf16.gmra.mrb[12].mxu1 %v1823_v32 }
  0x40   : > { %766 = vmatprep.mubr.bf16.mxu0 %v1806_v31  ;;  %830 = vmatprep.mubr.bf16.mxu1 %v1827_v33 }
  0x47   : > { %767 = vmatmul.mubr.bf16.gmra.mrb[16].mxu0 %v1808_v34  ;;  %831 = vmatmul.mubr.bf16.gmra.mrb[16].mxu1 %v1829_v36 }
  0x48   : > { %774 = vmatprep.mubr.bf16.mxu0 %v1812_v35  ;;  %838 = vmatprep.mubr.bf16.mxu1 %v1830_v37 }
  0x4f   : > { %775 = vmatmul.mubr.bf16.gmra.mrb[20].mxu0 %v1814_v38  ;;  %839 = vmatmul.mubr.bf16.gmra.mrb[20].mxu1 %v1832_v40 }
  0x50   : > { %782 = vmatprep.mubr.bf16.mxu0 %v1818_v39  ;;  %846 = vmatprep.mubr.bf16.mxu1 %v1833_v41 }
  0x57   : > { %783 = vmatmul.mubr.bf16.gmra.mrb[24].mxu0 %v1820_v42  ;;  %847 = vmatmul.mubr.bf16.gmra.mrb[24].mxu1 %v1835_v44 }
  0x58   : > { %790 = vmatprep.mubr.bf16.mxu0 %v1824_v43  ;;  %854 = vmatprep.mubr.bf16.mxu1 %v1836_v45 }
  0x5f   : > { %791 = vmatmul.mubr.bf16.gmra.mrb[28].mxu0 %v1826_v46  ;;  %855 = vmatmul.mubr.bf16.gmra.mrb[28].mxu1 %v1838_v47 }
  0xfa   : > { %v1639_v48 = vpop.f32.mrb[0].mxu0  ;;  %v1687_v50 = vpop.f32.mrb[0].mxu1 }
  0xfb   : > { %v1640_v49 = vpop.f32.mrb[1].mxu0  ;;  %v1688_v53 = vpop.f32.mrb[1].mxu1 }
  0xfc   : > { %v1641_v51 = vadd.f32 %v1640_v49, %v1639_v48  ;;  %v1642_v52 = vpop.f32.mrb[2].mxu0  ;;  %v1998_v55 = vadd.f32 %v1688_v53, %v1687_v50  ;;  %v1690_v56 = vpop.f32.mrb[2].mxu1 }
  0xfd   : > { %v1643_v54 = vpop.f32.mrb[3].mxu0  ;;  %v1691_v58 = vpop.f32.mrb[3].mxu1 }
  0xfe   : > { %v1644_v57 = vadd.f32 %v1643_v54, %v1642_v52  ;;  %v2005_v59 = vadd.f32 %v1691_v58, %v1690_v56  ;;  %v1160_v60 = vmul.f32 %v1641_v51, %v1641_v51 }
 0x100   : > { %v1531_v61 = vpack.c.bf16 %v1644_v57, %v1641_v51  ;;  %v1122_v62 = vadd.f32 %v1644_v57, %v1641_v51  ;;  %v1161_v63 = vmul.f32 %v1644_v57, %v1644_v57  ;;  %v1571_v0 = vpack.c.bf16 %v2005_v59, %v1998_v55 }
 0x102   : > { %1532 = vst [vmem:[%s2003_s12] sm:$0xff] %v1531_v61   ;;  %v1192_v1 = vadd.f32 %v1161_v63, %v1160_v60  ;;  %v1645_v2 = vpop.f32.mrb[4].mxu0  ;;  %1615 = vst [vmem:[%s2003_s12 + $0x40] sm:$0xff] %v1571_v0   ;;  %v1693_v4 = vpop.f32.mrb[4].mxu1 }
 0x103   : > { %v1646_v3 = vpop.f32.mrb[5].mxu0  ;;  %v1694_v7 = vpop.f32.mrb[5].mxu1 }
 0x104   : > { %v1647_v5 = vadd.f32 %v1646_v3, %v1645_v2  ;;  %v1648_v6 = vpop.f32.mrb[6].mxu0  ;;  %v2011_v9 = vadd.f32 %v1694_v7, %v1693_v4  ;;  %v1696_v10 = vpop.f32.mrb[6].mxu1 }
 0x105   : > { %v1649_v8 = vpop.f32.mrb[7].mxu0  ;;  %v1697_v14 = vpop.f32.mrb[7].mxu1 }
 0x106   : > { %v1123_v11 = vadd.f32 %v1647_v5, %v1122_v62  ;;  %v1162_v12 = vmul.f32 %v1647_v5, %v1647_v5  ;;  %v1650_v13 = vadd.f32 %v1649_v8, %v1648_v6  ;;  %v2013_v15 = vadd.f32 %v1697_v14, %v1696_v10 }
 0x108   : > { %v1193_v16 = vadd.f32 %v1192_v1, %v1162_v12  ;;  %v1536_v17 = vpack.c.bf16 %v1650_v13, %v1647_v5  ;;  %v1124_v18 = vadd.f32 %v1650_v13, %v1123_v11  ;;  %v1163_v19 = vmul.f32 %v1650_v13, %v1650_v13 }
 0x109   : > { %v1576_v20 = vpack.c.bf16 %v2013_v15, %v2011_v9 }
 0x10a   : > { %1608 = vst [vmem:[%s2003_s12 + $0x8] sm:$0xff] %v1536_v17   ;;  %v1194_v21 = vadd.f32 %v1193_v16, %v1163_v19  ;;  %v1651_v22 = vpop.f32.mrb[8].mxu0  ;;  %v1699_v24 = vpop.f32.mrb[8].mxu1 }
 0x10b   : > { %v1652_v23 = vpop.f32.mrb[9].mxu0  ;;  %1616 = vst [vmem:[%s2003_s12 + $0x48] sm:$0xff] %v1576_v20   ;;  %v1700_v27 = vpop.f32.mrb[9].mxu1 }
 0x10c   : > { %v1653_v25 = vadd.f32 %v1652_v23, %v1651_v22  ;;  %v1654_v26 = vpop.f32.mrb[10].mxu0  ;;  %v2019_v29 = vadd.f32 %v1700_v27, %v1699_v24  ;;  %v1702_v30 = vpop.f32.mrb[10].mxu1 }
 0x10d   : > { %v1655_v28 = vpop.f32.mrb[11].mxu0  ;;  %v1703_v34 = vpop.f32.mrb[11].mxu1 }
 0x10e   : > { %v1125_v31 = vadd.f32 %v1653_v25, %v1124_v18  ;;  %v1164_v32 = vmul.f32 %v1653_v25, %v1653_v25  ;;  %v1656_v33 = vadd.f32 %v1655_v28, %v1654_v26  ;;  %v2021_v35 = vadd.f32 %v1703_v34, %v1702_v30 }
 0x110   : > { %v1195_v36 = vadd.f32 %v1194_v21, %v1164_v32  ;;  %v1541_v37 = vpack.c.bf16 %v1656_v33, %v1653_v25  ;;  %v1126_v38 = vadd.f32 %v1656_v33, %v1125_v31  ;;  %v1165_v39 = vmul.f32 %v1656_v33, %v1656_v33 }
 0x111   : > { %v1581_v40 = vpack.c.bf16 %v2021_v35, %v2019_v29 }
 0x112   : > { %1609 = vst [vmem:[%s2003_s12 + $0x10] sm:$0xff] %v1541_v37   ;;  %v1196_v41 = vadd.f32 %v1195_v36, %v1165_v39  ;;  %v1657_v42 = vpop.f32.mrb[12].mxu0  ;;  %v1705_v44 = vpop.f32.mrb[12].mxu1 }
 0x113   : > { %v1658_v43 = vpop.f32.mrb[13].mxu0  ;;  %1617 = vst [vmem:[%s2003_s12 + $0x50] sm:$0xff] %v1581_v40   ;;  %v1706_v47 = vpop.f32.mrb[13].mxu1 }
 0x114   : > { %v1659_v45 = vadd.f32 %v1658_v43, %v1657_v42  ;;  %v1660_v46 = vpop.f32.mrb[14].mxu0  ;;  %v2027_v49 = vadd.f32 %v1706_v47, %v1705_v44  ;;  %v1708_v50 = vpop.f32.mrb[14].mxu1 }
 0x115   : > { %v1661_v48 = vpop.f32.mrb[15].mxu0  ;;  %v1709_v54 = vpop.f32.mrb[15].mxu1 }
 0x116   : > { %v1127_v51 = vadd.f32 %v1659_v45, %v1126_v38  ;;  %v1166_v52 = vmul.f32 %v1659_v45, %v1659_v45  ;;  %v1662_v53 = vadd.f32 %v1661_v48, %v1660_v46  ;;  %v2029_v56 = vadd.f32 %v1709_v54, %v1708_v50 }
 0x118   : > { %v1197_v57 = vadd.f32 %v1196_v41, %v1166_v52  ;;  %v1546_v58 = vpack.c.bf16 %v1662_v53, %v1659_v45  ;;  %v1128_v60 = vadd.f32 %v1662_v53, %v1127_v51  ;;  %v1167_v61 = vmul.f32 %v1662_v53, %v1662_v53 }
 0x119   : > { %v1586_v62 = vpack.c.bf16 %v2029_v56, %v2027_v49 }
 0x11a   : > { %1610 = vst [vmem:[%s2003_s12 + $0x18] sm:$0xff] %v1546_v58   ;;  %v1198_v63 = vadd.f32 %v1197_v57, %v1167_v61  ;;  %v1663_v0 = vpop.f32.mrb[16].mxu0  ;;  %v1711_v2 = vpop.f32.mrb[16].mxu1 }
 0x11b   : > { %v1664_v1 = vpop.f32.mrb[17].mxu0  ;;  %1618 = vst [vmem:[%s2003_s12 + $0x58] sm:$0xff] %v1586_v62   ;;  %v1712_v5 = vpop.f32.mrb[17].mxu1 }
 0x11c   : > { %v1665_v3 = vadd.f32 %v1664_v1, %v1663_v0  ;;  %v1666_v4 = vpop.f32.mrb[18].mxu0  ;;  %v2035_v7 = vadd.f32 %v1712_v5, %v1711_v2  ;;  %v1714_v8 = vpop.f32.mrb[18].mxu1 }
 0x11d   : > { %v1667_v6 = vpop.f32.mrb[19].mxu0  ;;  %v1715_v13 = vpop.f32.mrb[19].mxu1 }
 0x11e   : > { %v1129_v10 = vadd.f32 %v1665_v3, %v1128_v60  ;;  %v1168_v11 = vmul.f32 %v1665_v3, %v1665_v3  ;;  %v1668_v12 = vadd.f32 %v1667_v6, %v1666_v4  ;;  %v2037_v14 = vadd.f32 %v1715_v13, %v1714_v8 }
 0x120   : > { %v1199_v16 = vadd.f32 %v1198_v63, %v1168_v11  ;;  %v1551_v17 = vpack.c.bf16 %v1668_v12, %v1665_v3  ;;  %v1130_v18 = vadd.f32 %v1668_v12, %v1129_v10  ;;  %v1169_v19 = vmul.f32 %v1668_v12, %v1668_v12 }
 0x121   : > { %v1591_v20 = vpack.c.bf16 %v2037_v14, %v2035_v7 }
 0x122   : > { %1611 = vst [vmem:[%s2003_s12 + $0x20] sm:$0xff] %v1551_v17   ;;  %v1200_v21 = vadd.f32 %v1199_v16, %v1169_v19  ;;  %v1669_v22 = vpop.f32.mrb[20].mxu0  ;;  %v1717_v24 = vpop.f32.mrb[20].mxu1 }
 0x123   : > { %v1670_v23 = vpop.f32.mrb[21].mxu0  ;;  %1619 = vst [vmem:[%s2003_s12 + $0x60] sm:$0xff] %v1591_v20   ;;  %v1718_v27 = vpop.f32.mrb[21].mxu1 }
 0x124   : > { %v1671_v25 = vadd.f32 %v1670_v23, %v1669_v22  ;;  %v1672_v26 = vpop.f32.mrb[22].mxu0  ;;  %v2043_v30 = vadd.f32 %v1718_v27, %v1717_v24  ;;  %v1720_v31 = vpop.f32.mrb[22].mxu1  ;;  %v1176_v27 = vmul.f32 %v1998_v55, %v1998_v55 }
 0x125   : > { %v1673_v28 = vpop.f32.mrb[23].mxu0  ;;  %v1721_v36 = vpop.f32.mrb[23].mxu1 }
 0x126   : > { %v1131_v32 = vadd.f32 %v1671_v25, %v1130_v18  ;;  %v1170_v33 = vmul.f32 %v1671_v25, %v1671_v25  ;;  %v1674_v34 = vadd.f32 %v1673_v28, %v1672_v26  ;;  %v2045_v37 = vadd.f32 %v1721_v36, %v1720_v31 }
 0x127   : > { %v1178_v36 = vmul.f32 %v2011_v9, %v2011_v9 }
 0x128   : > { %v1201_v38 = vadd.f32 %v1200_v21, %v1170_v33  ;;  %v1556_v39 = vpack.c.bf16 %v1674_v34, %v1671_v25  ;;  %v1132_v40 = vadd.f32 %v1674_v34, %v1131_v32  ;;  %v1171_v41 = vmul.f32 %v1674_v34, %v1674_v34 }
 0x129   : > { %v1596_v42 = vpack.c.bf16 %v2045_v37, %v2043_v30  ;;  %v1177_v32 = vmul.f32 %v2005_v59, %v2005_v59 }
 0x12a   : > { %1612 = vst [vmem:[%s2003_s12 + $0x28] sm:$0xff] %v1556_v39   ;;  %v1202_v43 = vadd.f32 %v1201_v38, %v1171_v41  ;;  %v1675_v44 = vpop.f32.mrb[24].mxu0  ;;  %v1723_v46 = vpop.f32.mrb[24].mxu1 }
 0x12b   : > { %v1676_v45 = vpop.f32.mrb[25].mxu0  ;;  %1620 = vst [vmem:[%s2003_s12 + $0x68] sm:$0xff] %v1596_v42   ;;  %v1724_v50 = vpop.f32.mrb[25].mxu1  ;;  %v1180_v42 = vmul.f32 %v2019_v29, %v2019_v29 }
 0x12c   : > { %v1677_v47 = vadd.f32 %v1676_v45, %v1675_v44  ;;  %v1678_v48 = vpop.f32.mrb[26].mxu0  ;;  %v2051_v52 = vadd.f32 %v1724_v50, %v1723_v46  ;;  %v1726_v53 = vpop.f32.mrb[26].mxu1 }
 0x12d   : > { %v1679_v51 = vpop.f32.mrb[27].mxu0  ;;  %v1727_v60 = vpop.f32.mrb[27].mxu1 }
 0x12e   : > { %v1133_v54 = vadd.f32 %v1677_v47, %v1132_v40  ;;  %v1172_v57 = vmul.f32 %v1677_v47, %v1677_v47  ;;  %v1680_v58 = vadd.f32 %v1679_v51, %v1678_v48  ;;  %v2053_v61 = vadd.f32 %v1727_v60, %v1726_v53 }
 0x12f   : > { %v1179_v40 = vmul.f32 %v2013_v15, %v2013_v15  ;;  %v1184_v53 = vmul.f32 %v2035_v7, %v2035_v7 }
 0x130   : > { %v1203_v62 = vadd.f32 %v1202_v43, %v1172_v57  ;;  %v1561_v63 = vpack.c.bf16 %v1680_v58, %v1677_v47  ;;  %v1134_v0 = vadd.f32 %v1680_v58, %v1133_v54  ;;  %v1173_v1 = vmul.f32 %v1680_v58, %v1680_v58 }
 0x131   : > { %v1601_v2 = vpack.c.bf16 %v2053_v61, %v2051_v52  ;;  %v1185_v58 = vmul.f32 %v2037_v14, %v2037_v14 }
 0x132   : > { %1613 = vst [vmem:[%s2003_s12 + $0x30] sm:$0xff] %v1561_v63   ;;  %v1204_v3 = vadd.f32 %v1203_v62, %v1173_v1  ;;  %v1681_v4 = vpop.f32.mrb[28].mxu0  ;;  %v1729_v6 = vpop.f32.mrb[28].mxu1  ;;  %v1186_v62 = vmul.f32 %v2043_v30, %v2043_v30 }
 0x133   : > { %v1682_v5 = vpop.f32.mrb[29].mxu0  ;;  %1621 = vst [vmem:[%s2003_s12 + $0x70] sm:$0xff] %v1601_v2   ;;  %v1730_v11 = vpop.f32.mrb[29].mxu1  ;;  %v1188_v2 = vmul.f32 %v2051_v52, %v2051_v52 }
 0x134   : > { %v1683_v8 = vadd.f32 %v1682_v5, %v1681_v4  ;;  %v1684_v10 = vpop.f32.mrb[30].mxu0  ;;  %v1731_v13 = vadd.f32 %v1730_v11, %v1729_v6  ;;  %v1732_v16 = vpop.f32.mrb[30].mxu1 }
 0x135   : > { %v1685_v12 = vpop.f32.mrb[31].mxu0  ;;  %v1733_v20 = vpop.f32.mrb[31].mxu1 }
 0x136   : > { %v1135_v17 = vadd.f32 %v1683_v8, %v1134_v0  ;;  %v1174_v18 = vmul.f32 %v1683_v8, %v1683_v8  ;;  %v1686_v19 = vadd.f32 %v1685_v12, %v1684_v10  ;;  %v1734_v21 = vadd.f32 %v1733_v20, %v1732_v16 }
 0x137   : > { %v1190_v4 = vmul.f32 %v1731_v13, %v1731_v13 }
 0x138   : > { %v1205_v22 = vadd.f32 %v1204_v3, %v1174_v18  ;;  %v1566_v23 = vpack.c.bf16 %v1686_v19, %v1683_v8  ;;  %v1136_v24 = vadd.f32 %v1686_v19, %v1135_v17  ;;  %v1175_v25 = vmul.f32 %v1686_v19, %v1686_v19 }
 0x139   : > { %v1606_v26 = vpack.c.bf16 %v1734_v21, %v1731_v13  ;;  %v1191_v11 = vmul.f32 %v1734_v21, %v1734_v21 }
 0x13a   : > { %1614 = vst [vmem:[%s2003_s12 + $0x38] sm:$0xff] %v1566_v23   ;;  %v1137_v28 = vadd.f32 %v1998_v55, %v1136_v24  ;;  %v1206_v31 = vadd.f32 %v1205_v22, %v1175_v25 }
 0x13b   : > { %1622 = vst [vmem:[%s2003_s12 + $0x78] sm:$0xff] %v1606_v26  }
 0x13c   : > { %v1138_v33 = vadd.f32 %v2005_v59, %v1137_v28  ;;  %v1207_v34 = vadd.f32 %v1206_v31, %v1176_v27  ;;  %v1181_v59 = vmul.f32 %v2021_v35, %v2021_v35 }
 0x13e   : > { %v1139_v38 = vadd.f32 %v2011_v9, %v1138_v33  ;;  %v1208_v39 = vadd.f32 %v1207_v34, %v1177_v32  ;;  %v1182_v9 = vmul.f32 %v2027_v49, %v2027_v49 }
 0x140   : > { %v1140_v41 = vadd.f32 %v2013_v15, %v1139_v38  ;;  %v1209_v55 = vadd.f32 %v1208_v39, %v1178_v36  ;;  %v1183_v15 = vmul.f32 %v2029_v56, %v2029_v56 }
 0x142   : > { %v1210_v43 = vadd.f32 %v1209_v55, %v1179_v40  ;;  %v1141_v44 = vadd.f32 %v2019_v29, %v1140_v41 }
 0x144   : > { %v1142_v45 = vadd.f32 %v2021_v35, %v1141_v44  ;;  %v1211_v46 = vadd.f32 %v1210_v43, %v1180_v42 }
 0x146   : > { %v1143_v47 = vadd.f32 %v2027_v49, %v1142_v45  ;;  %v1212_v48 = vadd.f32 %v1211_v46, %v1181_v59 }
 0x148   : > { %v1144_v50 = vadd.f32 %v2029_v56, %v1143_v47  ;;  %v1213_v51 = vadd.f32 %v1212_v48, %v1182_v9 }
 0x14a   : > { %v1145_v29 = vadd.f32 %v2035_v7, %v1144_v50  ;;  %v1214_v54 = vadd.f32 %v1213_v51, %v1183_v15  ;;  %v1187_v7 = vmul.f32 %v2045_v37, %v2045_v37 }
 0x14c   : > { %v1215_v35 = vadd.f32 %v1214_v54, %v1184_v53  ;;  %v1146_v57 = vadd.f32 %v2037_v14, %v1145_v29 }
 0x14e   : > { %v1216_v49 = vadd.f32 %v1215_v35, %v1185_v58  ;;  %v1147_v60 = vadd.f32 %v2043_v30, %v1146_v57  ;;  %v1189_v30 = vmul.f32 %v2053_v61, %v2053_v61 }
 0x150   : > { %v1217_v56 = vadd.f32 %v1216_v49, %v1186_v62  ;;  %v1148_v63 = vadd.f32 %v2045_v37, %v1147_v60 }
 0x152   : > { %v1218_v0 = vadd.f32 %v1217_v56, %v1187_v7  ;;  %v1149_v1 = vadd.f32 %v2051_v52, %v1148_v63 }
 0x154   : > { %v1219_v14 = vadd.f32 %v1218_v0, %v1188_v2  ;;  %v1150_v3 = vadd.f32 %v2053_v61, %v1149_v1 }
 0x156   : > { %v1220_v5 = vadd.f32 %v1219_v14, %v1189_v30  ;;  %v1151_v6 = vadd.f32 %v1731_v13, %v1150_v3 }
 0x158   : > { %v1221_v8 = vadd.f32 %v1220_v5, %v1190_v4  ;;  %v1152_v10 = vadd.f32 %v1734_v21, %v1151_v6 }
 0x15a   : > { %v1153_v37 = vrot.slane %v1152_v10, 4  ;;  %v1222_v12 = vadd.f32 %v1221_v8, %v1191_v11 }
 0x15c   : > { %v1154_v16 = vadd.f32 %v1153_v37, %v1152_v10  ;;  %v1223_v17 = vrot.slane %v1222_v12, 4 }
 0x15e   : > { %v1155_v18 = vrot.slane %v1154_v16, 2  ;;  %v1224_v52 = vadd.f32 %v1223_v17, %v1222_v12 }
 0x160   : > { %v1156_v19 = vadd.f32 %v1155_v18, %v1154_v16  ;;  %v1225_v20 = vrot.slane %v1224_v52, 2 }
 0x162   : > { %v1157_v22 = vrot.slane %v1156_v19, 1  ;;  %v1226_v23 = vadd.f32 %v1225_v20, %v1224_v52 }
 0x164   : > { %v1158_v61 = vadd.f32 %v1157_v22, %v1156_v19  ;;  %v1227_v13 = vrot.slane %v1226_v23, 1 }
 0x166   : > { %1159 = vst [vmem:[%s306_s14] sm:$0x1] %v1158_v61  ;;  %v1228_v21 = vadd.f32 %v1227_v13, %v1226_v23 }
 0x168   : > { %1229 = vst [vmem:[%s312_s22] sm:$0x1] %v1228_v21 }
 0x169 PF: > { %s15_s17 = sadd.s32 1, %s1861_s17   ;;  %s2125_s15 = smov %s1857_s16 }
 0x16a   : > { %p12_p6 = scmp.ge.s32.totalorder %s15_s17, 4   ;;  %s2126_s16 = smov %s2128_s18 }
 0x16c   :  { %14 = sbr.rel (!%p12_p6) target bundleno = 2 (0x2), region = 93 }

// kernel: resnet_forward.30
= control target key start
LH: loop header
LB: loop body
LE: loop exit
PB: predicated region body
PF: predicated region fallthrough
CT: control target
= control target key end

     0   :  { %s485_s0 = inlined_call_operand.vmem [shape: bf16[64,128], index: 0, kind: input, shape index: {}]   ;;  %s486_s1 = inlined_call_operand.vmem [shape: bf16[64,128], index: 1, kind: input, shape index: {}]   ;;  %s487_s2 = inlined_call_operand.vmem [shape: bf16[64,128], index: 2, kind: input, shape index: {}]   ;;  %s488_s3 = inlined_call_operand.vmem [shape: bf16[64,128], index: 3, kind: input, shape index: {}]   ;;  %s489_s4 = inlined_call_operand.vmem [shape: bf16[64,128], index: 4, kind: input, shape index: {}]   ;;  %s490_s5 = inlined_call_operand.vmem [shape: bf16[64,128], index: 5, kind: input, shape index: {}]   ;;  %s491_s6 = inlined_call_operand.vmem [shape: bf16[64,128], index: 6, kind: input, shape index: {}]   ;;  %s492_s7 = inlined_call_operand.vmem [shape: bf16[64,128], index: 7, kind: input, shape index: {}]   ;;  %s493_s8 = inlined_call_operand.vmem [shape: bf16[64,128], index: 8, kind: input, shape index: {}]   ;;  %s494_s9 = inlined_call_operand.vmem [shape: bf16[64,128], index: 9, kind: output, shape index: {}]  }
   0x1   :  { %v32_v0 = vld [vmem:[%s485_s0] sm:$0xf]  ;;  %v33_v1 = vld [vmem:[%s485_s0 + $0x4] sm:$0xf]  ;;  %v34_v18 = vld [vmem:[%s485_s0 + $0x8] sm:$0xf] }
   0x2   :  { %v40_v2 = vld [vmem:[%s486_s1] sm:$0xf]  ;;  %v41_v3 = vld [vmem:[%s486_s1 + $0x4] sm:$0xf]  ;;  %v35_v19 = vld [vmem:[%s485_s0 + $0xc] sm:$0xf] }
   0x3   :  { %v48_v4 = vmax.bf16 %v40_v2, %v32_v0  ;;  %v56_v5 = vld [vmem:[%s487_s2] sm:$0xf]  ;;  %v57_v6 = vld [vmem:[%s487_s2 + $0x4] sm:$0xf]  ;;  %v49_v7 = vmax.bf16 %v41_v3, %v33_v1  ;;  %v42_v20 = vld [vmem:[%s486_s1 + $0x8] sm:$0xf] }
   0x4   :  { %v72_v8 = vld [vmem:[%s488_s3] sm:$0xf]  ;;  %v73_v10 = vld [vmem:[%s488_s3 + $0x4] sm:$0xf]  ;;  %v43_v22 = vld [vmem:[%s486_s1 + $0xc] sm:$0xf]  ;;  %v50_v23 = vmax.bf16 %v42_v20, %v34_v18 }
   0x5   :  { %v64_v9 = vmax.bf16 %v56_v5, %v48_v4  ;;  %v65_v11 = vmax.bf16 %v57_v6, %v49_v7  ;;  %v88_v12 = vld [vmem:[%s489_s4] sm:$0xf]  ;;  %v89_v14 = vld [vmem:[%s489_s4 + $0x4] sm:$0xf]  ;;  %v58_v24 = vld [vmem:[%s487_s2 + $0x8] sm:$0xf]  ;;  %v51_v28 = vmax.bf16 %v43_v22, %v35_v19 }
   0x6   :  { %v104_v15 = vld [vmem:[%s490_s5] sm:$0xf]  ;;  %v105_v16 = vld [vmem:[%s490_s5 + $0x4] sm:$0xf]  ;;  %v59_v25 = vld [vmem:[%s487_s2 + $0xc] sm:$0xf]  ;;  %v66_v33 = vmax.bf16 %v58_v24, %v50_v23 }
   0x7   :  { %v80_v13 = vmax.bf16 %v72_v8, %v64_v9  ;;  %v81_v17 = vmax.bf16 %v73_v10, %v65_v11  ;;  %v120_v27 = vld [vmem:[%s491_s6] sm:$0xf]  ;;  %v74_v29 = vld [vmem:[%s488_s3 + $0x8] sm:$0xf]  ;;  %v121_v31 = vld [vmem:[%s491_s6 + $0x4] sm:$0xf]  ;;  %v67_v38 = vmax.bf16 %v59_v25, %v51_v28 }
   0x8   :  { %v136_v32 = vld [vmem:[%s492_s7] sm:$0xf]  ;;  %v75_v34 = vld [vmem:[%s488_s3 + $0xc] sm:$0xf]  ;;  %v137_v36 = vld [vmem:[%s492_s7 + $0x4] sm:$0xf]  ;;  %v82_v42 = vmax.bf16 %v74_v29, %v66_v33 }
   0x9   :  { %v96_v21 = vmax.bf16 %v88_v12, %v80_v13  ;;  %v97_v26 = vmax.bf16 %v89_v14, %v81_v17  ;;  %v152_v37 = vld [vmem:[%s493_s8] sm:$0xf]  ;;  %v90_v39 = vld [vmem:[%s489_s4 + $0x8] sm:$0xf]  ;;  %v153_v41 = vld [vmem:[%s493_s8 + $0x4] sm:$0xf]  ;;  %v83_v47 = vmax.bf16 %v75_v34, %v67_v38 }
   0xa   :  { %v91_v43 = vld [vmem:[%s489_s4 + $0xc] sm:$0xf]  ;;  %v106_v44 = vld [vmem:[%s490_s5 + $0x8] sm:$0xf]  ;;  %v36_v48 = vld [vmem:[%s485_s0 + $0x10] sm:$0xf]  ;;  %v98_v52 = vmax.bf16 %v90_v39, %v82_v42 }
   0xb   :  { %v112_v30 = vmax.bf16 %v104_v15, %v96_v21  ;;  %v113_v35 = vmax.bf16 %v105_v16, %v97_v26  ;;  %v107_v45 = vld [vmem:[%s490_s5 + $0xc] sm:$0xf]  ;;  %v37_v49 = vld [vmem:[%s485_s0 + $0x14] sm:$0xf]  ;;  %v44_v50 = vld [vmem:[%s486_s1 + $0x10] sm:$0xf]  ;;  %v99_v58 = vmax.bf16 %v91_v43, %v83_v47 }
   0xc   :  { %v45_v53 = vld [vmem:[%s486_s1 + $0x14] sm:$0xf]  ;;  %v52_v54 = vmax.bf16 %v44_v50, %v36_v48  ;;  %v60_v55 = vld [vmem:[%s487_s2 + $0x10] sm:$0xf]  ;;  %v122_v59 = vld [vmem:[%s491_s6 + $0x8] sm:$0xf]  ;;  %v114_v63 = vmax.bf16 %v106_v44, %v98_v52 }
   0xd   :  { %v128_v40 = vmax.bf16 %v120_v27, %v112_v30  ;;  %v129_v46 = vmax.bf16 %v121_v31, %v113_v35  ;;  %v61_v56 = vld [vmem:[%s487_s2 + $0x14] sm:$0xf]  ;;  %v53_v60 = vmax.bf16 %v45_v53, %v37_v49  ;;  %v76_v61 = vld [vmem:[%s488_s3 + $0x10] sm:$0xf]  ;;  %v123_v0 = vld [vmem:[%s491_s6 + $0xc] sm:$0xf]  ;;  %v115_v5 = vmax.bf16 %v107_v45, %v99_v58 }
   0xe   :  { %v138_v1 = vld [vmem:[%s492_s7 + $0x8] sm:$0xf]  ;;  %v68_v2 = vmax.bf16 %v60_v55, %v52_v54  ;;  %v77_v3 = vld [vmem:[%s488_s3 + $0x14] sm:$0xf]  ;;  %v139_v6 = vld [vmem:[%s492_s7 + $0xc] sm:$0xf]  ;;  %v130_v10 = vmax.bf16 %v122_v59, %v114_v63 }
   0xf   :  { %v144_v51 = vmax.bf16 %v136_v32, %v128_v40  ;;  %v145_v57 = vmax.bf16 %v137_v36, %v129_v46  ;;  %v154_v7 = vld [vmem:[%s493_s8 + $0x8] sm:$0xf]  ;;  %v69_v8 = vmax.bf16 %v61_v56, %v53_v60  ;;  %v92_v9 = vld [vmem:[%s489_s4 + $0x10] sm:$0xf]  ;;  %v155_v11 = vld [vmem:[%s493_s8 + $0xc] sm:$0xf]  ;;  %v131_v17 = vmax.bf16 %v123_v0, %v115_v5 }
  0x10   :  { %v84_v12 = vmax.bf16 %v76_v61, %v68_v2  ;;  %v93_v13 = vld [vmem:[%s489_s4 + $0x14] sm:$0xf]  ;;  %v108_v14 = vld [vmem:[%s490_s5 + $0x10] sm:$0xf]  ;;  %v38_v19 = vld [vmem:[%s485_s0 + $0x18] sm:$0xf]  ;;  %v146_v22 = vmax.bf16 %v138_v1, %v130_v10 }
  0x11   :  { %v160_v62 = vmax.bf16 %v152_v37, %v144_v51  ;;  %v161_v4 = vmax.bf16 %v153_v41, %v145_v57  ;;  %v109_v15 = vld [vmem:[%s490_s5 + $0x14] sm:$0xf]  ;;  %v85_v18 = vmax.bf16 %v77_v3, %v69_v8  ;;  %v39_v20 = vld [vmem:[%s485_s0 + $0x1c] sm:$0xf]  ;;  %v46_v21 = vld [vmem:[%s486_s1 + $0x18] sm:$0xf]  ;;  %v147_v28 = vmax.bf16 %v139_v6, %v131_v17 }
  0x12   :  { %v100_v23 = vmax.bf16 %v92_v9, %v84_v12  ;;  %v47_v24 = vld [vmem:[%s486_s1 + $0x1c] sm:$0xf]  ;;  %v54_v25 = vmax.bf16 %v46_v21, %v38_v19  ;;  %v62_v26 = vld [vmem:[%s487_s2 + $0x18] sm:$0xf]  ;;  %v124_v30 = vld [vmem:[%s491_s6 + $0x10] sm:$0xf]  ;;  %v162_v33 = vmax.bf16 %v154_v7, %v146_v22 }
  0x13   :  { %v200_v16 = vcombine.low %v160_v62, %v161_v4  ;;  %v63_v27 = vld [vmem:[%s487_s2 + $0x1c] sm:$0xf]  ;;  %v101_v29 = vmax.bf16 %v93_v13, %v85_v18  ;;  %v55_v31 = vmax.bf16 %v47_v24, %v39_v20  ;;  %v78_v32 = vld [vmem:[%s488_s3 + $0x18] sm:$0xf]  ;;  %v125_v35 = vld [vmem:[%s491_s6 + $0x14] sm:$0xf]  ;;  %v163_v38 = vmax.bf16 %v155_v11, %v147_v28 }
  0x14   :  { %v116_v34 = vmax.bf16 %v108_v14, %v100_v23  ;;  %v70_v36 = vmax.bf16 %v62_v26, %v54_v25  ;;  %v79_v37 = vld [vmem:[%s488_s3 + $0x1c] sm:$0xf]  ;;  %v140_v40 = vld [vmem:[%s492_s7 + $0x10] sm:$0xf]  ;;  %v94_v42 = vld [vmem:[%s489_s4 + $0x18] sm:$0xf] }
  0x15   :  { %184 = vst [vmem:[%s494_s9] sm:$0xff] %v200_v16   ;;  %v117_v39 = vmax.bf16 %v109_v15, %v101_v29  ;;  %v71_v41 = vmax.bf16 %v63_v27, %v55_v31  ;;  %v141_v44 = vld [vmem:[%s492_s7 + $0x14] sm:$0xf]  ;;  %v95_v46 = vld [vmem:[%s489_s4 + $0x1c] sm:$0xf]  ;;  %v201_v47 = vcombine.low %v162_v33, %v163_v38  ;;  %v156_v49 = vld [vmem:[%s493_s8 + $0x10] sm:$0xf] }
  0x16   :  { %v132_v43 = vmax.bf16 %v124_v30, %v116_v34  ;;  %v86_v45 = vmax.bf16 %v78_v32, %v70_v36  ;;  %v110_v51 = vld [vmem:[%s490_s5 + $0x18] sm:$0xf]  ;;  %v157_v53 = vld [vmem:[%s493_s8 + $0x14] sm:$0xf]  ;;  %v111_v55 = vld [vmem:[%s490_s5 + $0x1c] sm:$0xf] }
  0x17   :  { %v133_v48 = vmax.bf16 %v125_v35, %v117_v39  ;;  %v87_v50 = vmax.bf16 %v79_v37, %v71_v41  ;;  %202 = vst [vmem:[%s494_s9 + $0x8] sm:$0xff] %v201_v47   ;;  %v126_v58 = vld [vmem:[%s491_s6 + $0x18] sm:$0xf]  ;;  %v127_v61 = vld [vmem:[%s491_s6 + $0x1c] sm:$0xf] }
  0x18   :  { %v148_v52 = vmax.bf16 %v140_v40, %v132_v43  ;;  %v102_v54 = vmax.bf16 %v94_v42, %v86_v45  ;;  %v142_v0 = vld [vmem:[%s492_s7 + $0x18] sm:$0xf]  ;;  %v143_v2 = vld [vmem:[%s492_s7 + $0x1c] sm:$0xf] }
  0x19   :  { %v149_v56 = vmax.bf16 %v141_v44, %v133_v48  ;;  %v103_v57 = vmax.bf16 %v95_v46, %v87_v50  ;;  %v158_v5 = vld [vmem:[%s493_s8 + $0x18] sm:$0xf]  ;;  %v159_v7 = vld [vmem:[%s493_s8 + $0x1c] sm:$0xf] }
  0x1a   :  { %v164_v59 = vmax.bf16 %v156_v49, %v148_v52  ;;  %v118_v60 = vmax.bf16 %v110_v51, %v102_v54 }
  0x1b   :  { %v165_v62 = vmax.bf16 %v157_v53, %v149_v56  ;;  %v119_v63 = vmax.bf16 %v111_v55, %v103_v57 }
  0x1c   :  { %v134_v1 = vmax.bf16 %v126_v58, %v118_v60 }
  0x1d   :  { %v203_v3 = vcombine.low %v164_v59, %v165_v62  ;;  %v135_v4 = vmax.bf16 %v127_v61, %v119_v63 }
  0x1e   :  { %v150_v6 = vmax.bf16 %v142_v0, %v134_v1 }
  0x1f   :  { %204 = vst [vmem:[%s494_s9 + $0x10] sm:$0xff] %v203_v3   ;;  %v151_v8 = vmax.bf16 %v143_v2, %v135_v4 }
  0x20   :  { %v166_v9 = vmax.bf16 %v158_v5, %v150_v6 }
  0x21   :  { %v167_v10 = vmax.bf16 %v159_v7, %v151_v8 }
  0x23   :  { %v205_v11 = vcombine.low %v166_v9, %v167_v10 }
  0x25   :  { %206 = vst [vmem:[%s494_s9 + $0x18] sm:$0xff] %v205_v11  }

// kernel: resnet_forward.32
= control target key start
LH: loop header
LB: loop body
LE: loop exit
PB: predicated region body
PF: predicated region fallthrough
CT: control target
= control target key end

     0   :  { %s222_s0 = inlined_call_operand.vmem [shape: bf16[64,128], index: 0, kind: input, shape index: {}]   ;;  %s223_s1 = inlined_call_operand.vmem [shape: f32[1,128], index: 1, kind: input, shape index: {}]   ;;  %s224_s2 = inlined_call_operand.vmem [shape: f32[1,128], index: 2, kind: input, shape index: {}]   ;;  %s225_s3 = inlined_call_operand.vmem [shape: bf16[64,128], index: 3, kind: output, shape index: {}]  }
   0x1   :  { %v131_v0 = vld [vmem:[%s222_s0] sm:$0xff]   ;;  %v166_v4 = vld [vmem:[%s222_s0 + $0x8] sm:$0xff]   ;;  %v167_v5 = vld [vmem:[%s222_s0 + $0x10] sm:$0xff]  }
   0x2   :  { %v112_v1 = vld [vmem:[%s223_s1] ss:$0 sm:$0xff]  ;;  %v132_v2 = vunpack.c.l.bf16 %v131_v0  ;;  %v133_v3 = vunpack.c.h.bf16 %v131_v0  ;;  %v168_v6 = vld [vmem:[%s222_s0 + $0x18] sm:$0xff]   ;;  %v136_v8 = vunpack.c.l.bf16 %v166_v4  ;;  %v137_v9 = vunpack.c.h.bf16 %v166_v4 }
   0x3   :  { %v113_v7 = vld [vmem:[%s224_s2] ss:$0 sm:$0xff]  ;;  %v140_v10 = vunpack.c.l.bf16 %v167_v5  ;;  %v141_v11 = vunpack.c.h.bf16 %v167_v5  ;;  %v144_v14 = vunpack.c.l.bf16 %v168_v6  ;;  %v145_v15 = vunpack.c.h.bf16 %v168_v6 }
   0x4   :  { %v37_v12 = vmul.f32 %v132_v2, %v112_v1  ;;  %v38_v13 = vmul.f32 %v133_v3, %v112_v1  ;;  %v39_v16 = vmul.f32 %v136_v8, %v112_v1  ;;  %v40_v17 = vmul.f32 %v137_v9, %v112_v1 }
   0x5   :  { %v41_v18 = vmul.f32 %v140_v10, %v112_v1  ;;  %v42_v19 = vmul.f32 %v141_v11, %v112_v1  ;;  %v43_v22 = vmul.f32 %v144_v14, %v112_v1  ;;  %v44_v23 = vmul.f32 %v145_v15, %v112_v1 }
   0x6   :  { %v52_v20 = vadd.f32 %v113_v7, %v37_v12  ;;  %v53_v21 = vadd.f32 %v113_v7, %v38_v13  ;;  %v54_v24 = vadd.f32 %v113_v7, %v39_v16  ;;  %v55_v25 = vadd.f32 %v113_v7, %v40_v17 }
   0x7   :  { %v56_v26 = vadd.f32 %v113_v7, %v41_v18  ;;  %v57_v27 = vadd.f32 %v113_v7, %v42_v19  ;;  %v58_v30 = vadd.f32 %v113_v7, %v43_v22  ;;  %v59_v31 = vadd.f32 %v113_v7, %v44_v23 }
   0x8   :  { %v60_v28 = vmax.f32 %v52_v20, 0.0  ;;  %v61_v29 = vmax.f32 %v53_v21, 0.0  ;;  %v62_v32 = vmax.f32 %v54_v24, 0.0  ;;  %v63_v33 = vmax.f32 %v55_v25, 0.0 }
   0x9   :  { %v64_v34 = vmax.f32 %v56_v26, 0.0  ;;  %v65_v35 = vmax.f32 %v57_v27, 0.0  ;;  %v66_v37 = vmax.f32 %v58_v30, 0.0  ;;  %v67_v38 = vmax.f32 %v59_v31, 0.0 }
   0xa   :  { %v149_v36 = vpack.c.bf16 %v61_v29, %v60_v28  ;;  %v154_v39 = vpack.c.bf16 %v63_v33, %v62_v32 }
   0xb   :  { %v159_v40 = vpack.c.bf16 %v65_v35, %v64_v34  ;;  %v164_v41 = vpack.c.bf16 %v67_v38, %v66_v37 }
   0xc   :  { %150 = vst [vmem:[%s225_s3] sm:$0xff] %v149_v36   ;;  %169 = vst [vmem:[%s225_s3 + $0x8] sm:$0xff] %v154_v39  }
   0xd   :  { %170 = vst [vmem:[%s225_s3 + $0x10] sm:$0xff] %v159_v40   ;;  %171 = vst [vmem:[%s225_s3 + $0x18] sm:$0xff] %v164_v41  }

// kernel: resnet_forward.34
= control target key start
LH: loop header
LB: loop body
LE: loop exit
PB: predicated region body
PF: predicated region fallthrough
CT: control target
= control target key end

     0   :  { %s285_s0 = inlined_call_operand.vmem [shape: bf16[64,128], index: 0, kind: input, shape index: {}]   ;;  %s286_s1 = inlined_call_operand.vmem [shape: f32[1,128], index: 1, kind: input, shape index: {}]   ;;  %s287_s2 = inlined_call_operand.vmem [shape: f32[1,128], index: 2, kind: input, shape index: {}]   ;;  %s288_s3 = inlined_call_operand.vmem [shape: bf16[64,128], index: 3, kind: input, shape index: {}]   ;;  %s289_s4 = inlined_call_operand.vmem [shape: bf16[64,128], index: 4, kind: output, shape index: {}]  }
   0x1   :  { %v158_v0 = vld [vmem:[%s285_s0] sm:$0xff]   ;;  %v209_v5 = vld [vmem:[%s285_s0 + $0x8] sm:$0xff]   ;;  %v210_v12 = vld [vmem:[%s285_s0 + $0x10] sm:$0xff]  }
   0x2   :  { %v139_v1 = vld [vmem:[%s286_s1] ss:$0 sm:$0xff]  ;;  %v159_v2 = vunpack.c.l.bf16 %v158_v0  ;;  %v160_v3 = vunpack.c.h.bf16 %v158_v0  ;;  %v212_v6 = vld [vmem:[%s288_s3 + $0x8] sm:$0xff]   ;;  %v163_v10 = vunpack.c.l.bf16 %v209_v5  ;;  %v164_v11 = vunpack.c.h.bf16 %v209_v5  ;;  %v213_v13 = vld [vmem:[%s288_s3 + $0x10] sm:$0xff]  }
   0x3   :  { %v174_v4 = vld [vmem:[%s288_s3] sm:$0xff]   ;;  %v179_v16 = vunpack.c.l.bf16 %v212_v6  ;;  %v180_v17 = vunpack.c.h.bf16 %v212_v6  ;;  %v167_v20 = vunpack.c.l.bf16 %v210_v12  ;;  %v168_v21 = vunpack.c.h.bf16 %v210_v12  ;;  %v211_v22 = vld [vmem:[%s285_s0 + $0x18] sm:$0xff]  }
   0x4   :  { %v140_v7 = vld [vmem:[%s287_s2] ss:$0 sm:$0xff]  ;;  %v175_v8 = vunpack.c.l.bf16 %v174_v4  ;;  %v176_v9 = vunpack.c.h.bf16 %v174_v4  ;;  %v40_v14 = vmul.f32 %v159_v2, %v139_v1  ;;  %v41_v15 = vmul.f32 %v160_v3, %v139_v1  ;;  %v214_v39 = vld [vmem:[%s288_s3 + $0x18] sm:$0xff]  }
   0x5   :  { %v42_v18 = vmul.f32 %v163_v10, %v139_v1  ;;  %v43_v19 = vmul.f32 %v164_v11, %v139_v1  ;;  %v183_v25 = vunpack.c.l.bf16 %v213_v13  ;;  %v184_v26 = vunpack.c.h.bf16 %v213_v13 }
   0x6   :  { %v55_v23 = vadd.f32 %v140_v7, %v40_v14  ;;  %v56_v24 = vadd.f32 %v140_v7, %v41_v15  ;;  %v44_v29 = vmul.f32 %v167_v20, %v139_v1  ;;  %v45_v30 = vmul.f32 %v168_v21, %v139_v1 }
   0x7   :  { %v57_v27 = vadd.f32 %v140_v7, %v42_v18  ;;  %v58_v28 = vadd.f32 %v140_v7, %v43_v19  ;;  %v171_v33 = vunpack.c.l.bf16 %v211_v22  ;;  %v172_v34 = vunpack.c.h.bf16 %v211_v22 }
   0x8   :  { %v79_v31 = vadd.f32 %v175_v8, %v55_v23  ;;  %v80_v32 = vadd.f32 %v176_v9, %v56_v24  ;;  %v59_v37 = vadd.f32 %v140_v7, %v44_v29  ;;  %v60_v38 = vadd.f32 %v140_v7, %v45_v30 }
   0x9   :  { %v81_v35 = vadd.f32 %v179_v16, %v57_v27  ;;  %v82_v36 = vadd.f32 %v180_v17, %v58_v28  ;;  %v46_v42 = vmul.f32 %v171_v33, %v139_v1  ;;  %v47_v43 = vmul.f32 %v172_v34, %v139_v1 }
   0xa   :  { %v87_v40 = vmax.f32 %v79_v31, 0.0  ;;  %v88_v41 = vmax.f32 %v80_v32, 0.0  ;;  %v83_v46 = vadd.f32 %v183_v25, %v59_v37  ;;  %v84_v47 = vadd.f32 %v184_v26, %v60_v38 }
   0xb   :  { %v89_v44 = vmax.f32 %v81_v35, 0.0  ;;  %v90_v45 = vmax.f32 %v82_v36, 0.0  ;;  %v61_v49 = vadd.f32 %v140_v7, %v46_v42  ;;  %v62_v50 = vadd.f32 %v140_v7, %v47_v43 }
   0xc   :  { %v192_v48 = vpack.c.bf16 %v88_v41, %v87_v40  ;;  %v187_v51 = vunpack.c.l.bf16 %v214_v39  ;;  %v91_v53 = vmax.f32 %v83_v46, 0.0  ;;  %v92_v54 = vmax.f32 %v84_v47, 0.0 }
   0xd   :  { %v197_v52 = vpack.c.bf16 %v90_v45, %v89_v44  ;;  %v188_v55 = vunpack.c.h.bf16 %v214_v39 }
   0xe   :  { %193 = vst [vmem:[%s289_s4] sm:$0xff] %v192_v48   ;;  %v85_v56 = vadd.f32 %v187_v51, %v61_v49  ;;  %v202_v57 = vpack.c.bf16 %v92_v54, %v91_v53 }
   0xf   :  { %215 = vst [vmem:[%s289_s4 + $0x8] sm:$0xff] %v197_v52   ;;  %v86_v58 = vadd.f32 %v188_v55, %v62_v50 }
  0x10   :  { %v93_v59 = vmax.f32 %v85_v56, 0.0  ;;  %216 = vst [vmem:[%s289_s4 + $0x10] sm:$0xff] %v202_v57  }
  0x11   :  { %v94_v60 = vmax.f32 %v86_v58, 0.0 }
  0x13   :  { %v207_v61 = vpack.c.bf16 %v94_v60, %v93_v59 }
  0x15   :  { %217 = vst [vmem:[%s289_s4 + $0x18] sm:$0xff] %v207_v61  }

// kernel: resnet_forward.37
= control target key start
LH: loop header
LB: loop body
LE: loop exit
PB: predicated region body
PF: predicated region fallthrough
CT: control target
= control target key end

     0   :  { %s363_s1 = inlined_call_operand.vmem [shape: bf16[128,128], index: 1, kind: input, shape index: {}]   ;;  %s364_s0 = inlined_call_operand.vmem [shape: bf16[32,128], index: 0, kind: input, shape index: {}]   ;;  %s365_s2 = inlined_call_operand.vmem [shape: bf16[32,128], index: 2, kind: output, shape index: {0}]   ;;  %s366_s3 = inlined_call_operand.vmem [shape: f32[1,1,128], index: 3, kind: output, shape index: {1}]   ;;  %s367_s4 = inlined_call_operand.vmem [shape: f32[1,1,128], index: 4, kind: output, shape index: {2}]  }
   0x1   :  { %v286_v0 = vld [vmem:[%s363_s1] sm:$0xff]   ;;  %v287_v1 = vld [vmem:[%s363_s1 + $0x8] sm:$0xff]   ;;  %v288_v2 = vld [vmem:[%s363_s1 + $0x10] sm:$0xff]  }
   0x2   :  { %266 = vmatprep.subr.bf16.mxu0 %v286_v0  ;;  %v289_v3 = vld [vmem:[%s363_s1 + $0x18] sm:$0xff]   ;;  %v294_v4 = vld [vmem:[%s364_s0] sm:$0xff]   ;;  %v291_v6 = vld [vmem:[%s363_s1 + $0x28] sm:$0xff]  }
   0x3   :  { %267 = vmatpush3.bf16.msra.mxu0 %v286_v0  ;;  %282 = vmatprep.mubr.bf16.mxu0 %v294_v4  ;;  %v290_v5 = vld [vmem:[%s363_s1 + $0x20] sm:$0xff]   ;;  %v292_v7 = vld [vmem:[%s363_s1 + $0x30] sm:$0xff]   ;;  %v293_v8 = vld [vmem:[%s363_s1 + $0x38] sm:$0xff]  }
   0x4   :  { %268 = vmatprep.subr.bf16.mxu0 %v287_v1  ;;  %v295_v9 = vld [vmem:[%s364_s0 + $0x8] sm:$0xff]  }
   0x7   :  { %269 = vmatpush3.bf16.msra.mxu0 %v287_v1 }
   0x8   :  { %270 = vmatprep.subr.bf16.mxu0 %v288_v2 }
   0xb   :  { %271 = vmatpush3.bf16.msra.mxu0 %v288_v2 }
   0xc   :  { %272 = vmatprep.subr.bf16.mxu0 %v289_v3 }
   0xf   :  { %273 = vmatpush3.bf16.msra.mxu0 %v289_v3 }
  0x10   :  { %274 = vmatprep.subr.bf16.mxu0 %v290_v5 }
  0x13   :  { %275 = vmatpush3.bf16.msra.mxu0 %v290_v5 }
  0x14   :  { %276 = vmatprep.subr.bf16.mxu0 %v291_v6 }
  0x17   :  { %277 = vmatpush3.bf16.msra.mxu0 %v291_v6 }
  0x18   :  { %278 = vmatprep.subr.bf16.mxu0 %v292_v7 }
  0x1b   :  { %279 = vmatpush3.bf16.msra.mxu0 %v292_v7 }
  0x1c   :  { %280 = vmatprep.subr.bf16.mxu0 %v293_v8 }
  0x1f   :  { %281 = vmatpush3.bf16.msra.mxu0 %v293_v8 }
  0x22   :  { %283 = vmatmul.mubr.bf16.vlgmr.msra.gmra.mrb[0].mxu0 %v295_v9 }
  0xf5   :  { %v284_v10 = vpop.f32.mrb[0].mxu0 }
  0xf6   :  { %v141_v11 = vpop.f32.mrb[1].mxu0  ;;  %v203_v19 = vmul.f32 %v284_v10, %v284_v10 }
  0xf7   :  { %v285_v12 = vpop.f32.mrb[2].mxu0  ;;  %v201_v15 = vmul.f32 %v141_v11, %v141_v11 }
  0xf8   :  { %v253_v13 = vpack.c.bf16 %v285_v12, %v284_v10  ;;  %v144_v14 = vpop.f32.mrb[3].mxu0  ;;  %v204_v22 = vmul.f32 %v285_v12, %v285_v12 }
  0xf9   :  { %v248_v16 = vpack.c.bf16 %v144_v14, %v141_v11  ;;  %v191_v17 = vadd.f32 %v144_v14, %v141_v11  ;;  %v202_v18 = vmul.f32 %v144_v14, %v144_v14 }
  0xfa   :  { %255 = vst [vmem:[%s365_s2 + $0x8] sm:$0xff] %v253_v13  }
  0xfb   :  { %249 = vst [vmem:[%s365_s2] sm:$0xff] %v248_v16   ;;  %v192_v20 = vadd.f32 %v284_v10, %v191_v17  ;;  %v205_v21 = vadd.f32 %v202_v18, %v201_v15 }
  0xfd   :  { %v193_v23 = vadd.f32 %v285_v12, %v192_v20  ;;  %v206_v24 = vadd.f32 %v205_v21, %v203_v19 }
  0xff   :  { %v194_v25 = vrot.slane %v193_v23, 4  ;;  %v207_v26 = vadd.f32 %v206_v24, %v204_v22 }
 0x101   :  { %v195_v27 = vadd.f32 %v194_v25, %v193_v23  ;;  %v208_v28 = vrot.slane %v207_v26, 4 }
 0x103   :  { %v196_v29 = vrot.slane %v195_v27, 2  ;;  %v209_v30 = vadd.f32 %v208_v28, %v207_v26 }
 0x105   :  { %v197_v31 = vadd.f32 %v196_v29, %v195_v27  ;;  %v210_v32 = vrot.slane %v209_v30, 2 }
 0x107   :  { %v198_v33 = vrot.slane %v197_v31, 1  ;;  %v211_v34 = vadd.f32 %v210_v32, %v209_v30 }
 0x109   :  { %v199_v35 = vadd.f32 %v198_v33, %v197_v31  ;;  %v212_v36 = vrot.slane %v211_v34, 1 }
 0x10b   :  { %200 = vst [vmem:[%s366_s3] sm:$0x1] %v199_v35  ;;  %v213_v37 = vadd.f32 %v212_v36, %v211_v34 }
 0x10d   :  { %214 = vst [vmem:[%s367_s4] sm:$0x1] %v213_v37 }

// kernel: resnet_forward.38
= control target key start
LH: loop header
LB: loop body
LE: loop exit
PB: predicated region body
PF: predicated region fallthrough
CT: control target
= control target key end

     0   :  { %s136_s0 = inlined_call_operand.vmem [shape: bf16[32,128], index: 0, kind: input, shape index: {}]   ;;  %s137_s1 = inlined_call_operand.vmem [shape: f32[1,128], index: 1, kind: input, shape index: {}]   ;;  %s138_s2 = inlined_call_operand.vmem [shape: f32[1,128], index: 2, kind: input, shape index: {}]   ;;  %s139_s3 = inlined_call_operand.vmem [shape: bf16[32,128], index: 3, kind: output, shape index: {}]  }
   0x1   :  { %v79_v0 = vld [vmem:[%s136_s0] sm:$0xff]   ;;  %v96_v4 = vld [vmem:[%s136_s0 + $0x8] sm:$0xff]  }
   0x2   :  { %v68_v1 = vld [vmem:[%s137_s1] ss:$0 sm:$0xff]  ;;  %v80_v2 = vunpack.c.l.bf16 %v79_v0  ;;  %v81_v3 = vunpack.c.h.bf16 %v79_v0  ;;  %v84_v6 = vunpack.c.l.bf16 %v96_v4  ;;  %v85_v7 = vunpack.c.h.bf16 %v96_v4 }
   0x3   :  { %v69_v5 = vld [vmem:[%s138_s2] ss:$0 sm:$0xff] }
   0x4   :  { %v29_v8 = vmul.f32 %v80_v2, %v68_v1  ;;  %v30_v9 = vmul.f32 %v81_v3, %v68_v1  ;;  %v31_v10 = vmul.f32 %v84_v6, %v68_v1  ;;  %v32_v11 = vmul.f32 %v85_v7, %v68_v1 }
   0x6   :  { %v40_v12 = vadd.f32 %v69_v5, %v29_v8  ;;  %v41_v13 = vadd.f32 %v69_v5, %v30_v9  ;;  %v42_v14 = vadd.f32 %v69_v5, %v31_v10  ;;  %v43_v15 = vadd.f32 %v69_v5, %v32_v11 }
   0x8   :  { %v89_v16 = vpack.c.bf16 %v41_v13, %v40_v12  ;;  %v94_v17 = vpack.c.bf16 %v43_v15, %v42_v14 }
   0xa   :  { %90 = vst [vmem:[%s139_s3] sm:$0xff] %v89_v16   ;;  %97 = vst [vmem:[%s139_s3 + $0x8] sm:$0xff] %v94_v17  }

// kernel: resnet_forward.31
= control target key start
LH: loop header
LB: loop body
LE: loop exit
PB: predicated region body
PF: predicated region fallthrough
CT: control target
= control target key end

     0   :  { %s1908_s1 = inlined_call_operand.vmem [shape: bf16[640,128], index: 1, kind: input, shape index: {}]   ;;  %s1909_s0 = inlined_call_operand.vmem [shape: bf16[128,640], index: 0, kind: input, shape index: {}]   ;;  %s1910_s2 = inlined_call_operand.vmem [shape: bf16[128,128], index: 2, kind: output, shape index: {0}]   ;;  %s1911_s3 = inlined_call_operand.vmem [shape: f32[1,1,128], index: 3, kind: output, shape index: {1}]   ;;  %s1912_s4 = inlined_call_operand.vmem [shape: f32[1,1,128], index: 4, kind: output, shape index: {2}]  }
   0x1   :  { %v1472_v0 = vld [vmem:[%s1908_s1 + $0x40] sm:$0xff]   ;;  %v1476_v4 = vld [vmem:[%s1908_s1 + $0x48] sm:$0xff]   ;;  %v1480_v8 = vld [vmem:[%s1908_s1 + $0x50] sm:$0xff]  }
   0x2   :  { %v1473_v1 = vld [vmem:[%s1908_s1 + $0xc0] sm:$0xff]   ;;  %1280 = vmatprep.subr.bf16.mxu0 %v1472_v0  ;;  %v1477_v5 = vld [vmem:[%s1908_s1 + $0xc8] sm:$0xff]   ;;  %v1481_v9 = vld [vmem:[%s1908_s1 + $0xd0] sm:$0xff]  }
   0x3   :  { %v1474_v2 = vld [vmem:[%s1908_s1] sm:$0xff]   ;;  %1344 = vmatprep.subr.bf16.mxu1 %v1473_v1  ;;  %v1478_v6 = vld [vmem:[%s1908_s1 + $0x8] sm:$0xff]   ;;  %v1482_v10 = vld [vmem:[%s1908_s1 + $0x10] sm:$0xff]  }
   0x4   :  { %v1475_v3 = vld [vmem:[%s1908_s1 + $0x80] sm:$0xff]   ;;  %1281 = vmatpush3.bf16.msra.mxu0 %v1474_v2  ;;  %v1479_v7 = vld [vmem:[%s1908_s1 + $0x88] sm:$0xff]   ;;  %v1483_v11 = vld [vmem:[%s1908_s1 + $0x90] sm:$0xff]  }
   0x5   :  { %1345 = vmatpush3.bf16.msra.mxu1 %v1475_v3  ;;  %1282 = vmatprep.subr.bf16.mxu0 %v1476_v4  ;;  %v1484_v12 = vld [vmem:[%s1908_s1 + $0x58] sm:$0xff]   ;;  %v1488_v16 = vld [vmem:[%s1908_s1 + $0x60] sm:$0xff]   ;;  %v1492_v20 = vld [vmem:[%s1908_s1 + $0x68] sm:$0xff]  }
   0x6   :  { %1346 = vmatprep.subr.bf16.mxu1 %v1477_v5  ;;  %v1485_v13 = vld [vmem:[%s1908_s1 + $0xd8] sm:$0xff]   ;;  %v1489_v17 = vld [vmem:[%s1908_s1 + $0xe0] sm:$0xff]   ;;  %v1493_v21 = vld [vmem:[%s1908_s1 + $0xe8] sm:$0xff]  }
   0x7   :  { %v1486_v14 = vld [vmem:[%s1908_s1 + $0x18] sm:$0xff]   ;;  %v1490_v18 = vld [vmem:[%s1908_s1 + $0x20] sm:$0xff]   ;;  %v1494_v22 = vld [vmem:[%s1908_s1 + $0x28] sm:$0xff]  }
   0x8   :  { %1283 = vmatpush3.bf16.msra.mxu0 %v1478_v6  ;;  %v1487_v15 = vld [vmem:[%s1908_s1 + $0x98] sm:$0xff]   ;;  %v1491_v19 = vld [vmem:[%s1908_s1 + $0xa0] sm:$0xff]   ;;  %v1495_v23 = vld [vmem:[%s1908_s1 + $0xa8] sm:$0xff]  }
   0x9   :  { %1347 = vmatpush3.bf16.msra.mxu1 %v1479_v7  ;;  %1284 = vmatprep.subr.bf16.mxu0 %v1480_v8  ;;  %v1496_v24 = vld [vmem:[%s1908_s1 + $0x70] sm:$0xff]   ;;  %v1500_v28 = vld [vmem:[%s1908_s1 + $0x78] sm:$0xff]   ;;  %v1509_v35 = vld [vmem:[%s1909_s0 + $0xc] ss:$20 sps:$4 sm:$0xff]  }
   0xa   :  { %1348 = vmatprep.subr.bf16.mxu1 %v1481_v9  ;;  %v1497_v25 = vld [vmem:[%s1908_s1 + $0xf0] sm:$0xff]   ;;  %v1501_v29 = vld [vmem:[%s1908_s1 + $0xf8] sm:$0xff]   ;;  %v1510_v36 = vld [vmem:[%s1908_s1 + $0x100] sm:$0xff]   ;;  %756 = vmatprep.mubr.bf16.mxu1 %v1509_v35 }
   0xb   :  { %v1498_v26 = vld [vmem:[%s1908_s1 + $0x30] sm:$0xff]   ;;  %v1502_v30 = vld [vmem:[%s1908_s1 + $0x38] sm:$0xff]   ;;  %v1511_v37 = vld [vmem:[%s1909_s0 + $0x2c] ss:$20 sps:$4 sm:$0xff]  }
   0xc   :  { %1285 = vmatpush3.bf16.msra.mxu0 %v1482_v10  ;;  %v1499_v27 = vld [vmem:[%s1908_s1 + $0xb0] sm:$0xff]   ;;  %v1503_v31 = vld [vmem:[%s1908_s1 + $0xb8] sm:$0xff]   ;;  %v1517_v39 = vld [vmem:[%s1908_s1 + $0x108] sm:$0xff]  }
   0xd   :  { %1349 = vmatpush3.bf16.msra.mxu1 %v1483_v11  ;;  %1286 = vmatprep.subr.bf16.mxu0 %v1484_v12  ;;  %v1504_v32 = vld [vmem:[%s1909_s0] ss:$20 sps:$4 sm:$0xff]   ;;  %v1506_v33 = vld [vmem:[%s1909_s0 + $0x4] ss:$20 sps:$4 sm:$0xff]   ;;  %v1507_v34 = vld [vmem:[%s1909_s0 + $0x8] ss:$20 sps:$4 sm:$0xff]  }
   0xe   :  { %1350 = vmatprep.subr.bf16.mxu1 %v1485_v13  ;;  %659 = vmatprep.mubr.bf16.mxu0 %v1506_v33  ;;  %v1513_v38 = vld [vmem:[%s1909_s0 + $0x34] ss:$20 sps:$4 sm:$0xff]   ;;  %v1516_v41 = vld [vmem:[%s1909_s0 + $0x30] ss:$20 sps:$4 sm:$0xff]   ;;  %v1531_v45 = vld [vmem:[%s1908_s1 + $0x118] sm:$0xff]  }
   0xf   :  { %v1515_v40 = vld [vmem:[%s1909_s0 + $0x28] ss:$20 sps:$4 sm:$0xff]   ;;  %v1524_v44 = vld [vmem:[%s1908_s1 + $0x110] sm:$0xff]   ;;  %v1523_v47 = vld [vmem:[%s1909_s0 + $0x58] ss:$20 sps:$4 sm:$0xff]  }
  0x10   :  { %1287 = vmatpush3.bf16.msra.mxu0 %v1486_v14  ;;  %v1518_v42 = vld [vmem:[%s1909_s0 + $0x54] ss:$20 sps:$4 sm:$0xff]   ;;  %v1520_v43 = vld [vmem:[%s1909_s0 + $0x5c] ss:$20 sps:$4 sm:$0xff]   ;;  %v1527_v49 = vld [vmem:[%s1909_s0 + $0x84] ss:$20 sps:$4 sm:$0xff]  }
  0x11   :  { %1351 = vmatpush3.bf16.msra.mxu1 %v1487_v15  ;;  %1288 = vmatprep.subr.bf16.mxu0 %v1488_v16  ;;  %v1522_v46 = vld [vmem:[%s1909_s0 + $0x50] ss:$20 sps:$4 sm:$0xff]   ;;  %v1545_v51 = vld [vmem:[%s1908_s1 + $0x128] sm:$0xff]   ;;  %v1530_v53 = vld [vmem:[%s1909_s0 + $0x80] ss:$20 sps:$4 sm:$0xff]  }
  0x12   :  { %1352 = vmatprep.subr.bf16.mxu1 %v1489_v17  ;;  %v1525_v48 = vld [vmem:[%s1909_s0 + $0x7c] ss:$20 sps:$4 sm:$0xff]   ;;  %v1538_v50 = vld [vmem:[%s1908_s1 + $0x120] sm:$0xff]   ;;  %v1529_v52 = vld [vmem:[%s1909_s0 + $0x78] ss:$20 sps:$4 sm:$0xff]  }
  0x13   :  { %v1532_v54 = vld [vmem:[%s1909_s0 + $0xa4] ss:$20 sps:$4 sm:$0xff]   ;;  %v1552_v55 = vld [vmem:[%s1908_s1 + $0x130] sm:$0xff]   ;;  %v1534_v56 = vld [vmem:[%s1909_s0 + $0xac] ss:$20 sps:$4 sm:$0xff]  }
  0x14   :  { %1289 = vmatpush3.bf16.msra.mxu0 %v1490_v18  ;;  %v1559_v57 = vld [vmem:[%s1908_s1 + $0x138] sm:$0xff]   ;;  %v1536_v58 = vld [vmem:[%s1909_s0 + $0xa0] ss:$20 sps:$4 sm:$0xff]   ;;  %v1544_v63 = vld [vmem:[%s1909_s0 + $0xd0] ss:$20 sps:$4 sm:$0xff]  }
  0x15   :  { %1353 = vmatpush3.bf16.msra.mxu1 %v1491_v19  ;;  %1290 = vmatprep.subr.bf16.mxu0 %v1492_v20  ;;  %v1537_v59 = vld [vmem:[%s1909_s0 + $0xa8] ss:$20 sps:$4 sm:$0xff]   ;;  %v1539_v60 = vld [vmem:[%s1909_s0 + $0xcc] ss:$20 sps:$4 sm:$0xff]   ;;  %v1550_v2 = vld [vmem:[%s1909_s0 + $0xf0] ss:$20 sps:$4 sm:$0xff]  }
  0x16   :  { %1354 = vmatprep.subr.bf16.mxu1 %v1493_v21  ;;  %v1541_v61 = vld [vmem:[%s1909_s0 + $0xd4] ss:$20 sps:$4 sm:$0xff]   ;;  %v1548_v1 = vld [vmem:[%s1909_s0 + $0xfc] ss:$20 sps:$4 sm:$0xff]   ;;  %v1551_v3 = vld [vmem:[%s1909_s0 + $0xf8] ss:$20 sps:$4 sm:$0xff]  }
  0x17   :  { %v1543_v62 = vld [vmem:[%s1909_s0 + $0xc8] ss:$20 sps:$4 sm:$0xff]   ;;  %v1555_v5 = vld [vmem:[%s1909_s0 + $0x124] ss:$20 sps:$4 sm:$0xff]   ;;  %v1558_v7 = vld [vmem:[%s1909_s0 + $0x120] ss:$20 sps:$4 sm:$0xff]  }
  0x18   :  { %1291 = vmatpush3.bf16.msra.mxu0 %v1494_v22  ;;  %v1546_v0 = vld [vmem:[%s1909_s0 + $0xf4] ss:$20 sps:$4 sm:$0xff]   ;;  %v1553_v4 = vld [vmem:[%s1909_s0 + $0x11c] ss:$20 sps:$4 sm:$0xff]   ;;  %v1557_v6 = vld [vmem:[%s1909_s0 + $0x118] ss:$20 sps:$4 sm:$0xff]  }
  0x19   :  { %1355 = vmatpush3.bf16.msra.mxu1 %v1495_v23  ;;  %1292 = vmatprep.subr.bf16.mxu0 %v1496_v24  ;;  %v1560_v8 = vld [vmem:[%s1909_s0 + $0x10] ss:$20 sps:$4 sm:$0xff]   ;;  %v1562_v10 = vld [vmem:[%s1909_s0 + $0x38] ss:$20 sps:$4 sm:$0xff]   ;;  %v1564_v12 = vld [vmem:[%s1909_s0 + $0x60] ss:$20 sps:$4 sm:$0xff]  }
  0x1a   :  { %1356 = vmatprep.subr.bf16.mxu1 %v1497_v25  ;;  %v1561_v9 = vld [vmem:[%s1909_s0 + $0xb0] ss:$20 sps:$4 sm:$0xff]   ;;  %v1563_v11 = vld [vmem:[%s1909_s0 + $0xd8] ss:$20 sps:$4 sm:$0xff]   ;;  %v1565_v13 = vld [vmem:[%s1909_s0 + $0x100] ss:$20 sps:$4 sm:$0xff]  }
  0x1b   :  { %v1566_v14 = vld [vmem:[%s1909_s0 + $0x88] ss:$20 sps:$4 sm:$0xff]  }
  0x1c   :  { %1293 = vmatpush3.bf16.msra.mxu0 %v1498_v26  ;;  %v1567_v15 = vld [vmem:[%s1909_s0 + $0x128] ss:$20 sps:$4 sm:$0xff]  }
  0x1d   :  { %1357 = vmatpush3.bf16.msra.mxu1 %v1499_v27  ;;  %1294 = vmatprep.subr.bf16.mxu0 %v1500_v28 }
  0x1e   :  { %1358 = vmatprep.subr.bf16.mxu1 %v1501_v29 }
  0x20   :  { %1295 = vmatpush3.bf16.msra.mxu0 %v1502_v30 }
  0x21   :  { %1359 = vmatpush3.bf16.msra.mxu1 %v1503_v31  ;;  %1424 = vmatprep.subr.bf16.mxu0 %v1510_v36 }
  0x22   :  { %1456 = vmatprep.subr.bf16.mxu1 %v1510_v36 }
  0x23   :  { %660 = vmatmul.mubr.bf16.vlgmr.msra.gmra.mrb[0].mxu0 %v1504_v32 }
  0x24   :  { %757 = vmatmul.mubr.bf16.vlgmr.msra.gmra.mrb[0].mxu1 %v1507_v34  ;;  %1425 = vmatpush3.bf16.msra.mxu0 %v1510_v36 }
  0x25   :  { %667 = vmatprep.mubr.bf16.mxu0 %v1511_v37  ;;  %764 = vmatprep.mubr.bf16.mxu1 %v1513_v38 }
  0x26   :  { %1464 = vmatpush3.bf16.msra.mxu1 %v1510_v36  ;;  %1426 = vmatprep.subr.bf16.mxu0 %v1517_v39 }
  0x27   :  { %1457 = vmatprep.subr.bf16.mxu1 %v1517_v39 }
  0x28   :  { %1427 = vmatpush3.bf16.msra.mxu0 %v1517_v39 }
  0x29   :  { %1428 = vmatprep.subr.bf16.mxu0 %v1524_v44 }
  0x2a   :  { %1465 = vmatpush3.bf16.msra.mxu1 %v1517_v39 }
  0x2b   :  { %668 = vmatmul.mubr.bf16.gmra.mrb[4].mxu0 %v1515_v40  ;;  %1458 = vmatprep.subr.bf16.mxu1 %v1524_v44 }
  0x2c   :  { %765 = vmatmul.mubr.bf16.gmra.mrb[4].mxu1 %v1516_v41  ;;  %675 = vmatprep.mubr.bf16.mxu0 %v1518_v42 }
  0x2d   :  { %772 = vmatprep.mubr.bf16.mxu1 %v1520_v43  ;;  %1429 = vmatpush3.bf16.msra.mxu0 %v1524_v44 }
  0x2e   :  { %1430 = vmatprep.subr.bf16.mxu0 %v1531_v45  ;;  %1466 = vmatpush3.bf16.msra.mxu1 %v1524_v44 }
  0x2f   :  { %1459 = vmatprep.subr.bf16.mxu1 %v1531_v45 }
  0x31   :  { %1431 = vmatpush3.bf16.msra.mxu0 %v1531_v45 }
  0x32   :  { %1432 = vmatprep.subr.bf16.mxu0 %v1538_v50  ;;  %1467 = vmatpush3.bf16.msra.mxu1 %v1531_v45 }
  0x33   :  { %676 = vmatmul.mubr.bf16.gmra.mrb[8].mxu0 %v1522_v46  ;;  %1460 = vmatprep.subr.bf16.mxu1 %v1538_v50 }
  0x34   :  { %773 = vmatmul.mubr.bf16.gmra.mrb[8].mxu1 %v1523_v47  ;;  %683 = vmatprep.mubr.bf16.mxu0 %v1525_v48 }
  0x35   :  { %780 = vmatprep.mubr.bf16.mxu1 %v1527_v49  ;;  %1433 = vmatpush3.bf16.msra.mxu0 %v1538_v50 }
  0x36   :  { %1434 = vmatprep.subr.bf16.mxu0 %v1545_v51  ;;  %1468 = vmatpush3.bf16.msra.mxu1 %v1538_v50 }
  0x37   :  { %1461 = vmatprep.subr.bf16.mxu1 %v1545_v51 }
  0x39   :  { %1435 = vmatpush3.bf16.msra.mxu0 %v1545_v51 }
  0x3a   :  { %1436 = vmatprep.subr.bf16.mxu0 %v1552_v55  ;;  %1469 = vmatpush3.bf16.msra.mxu1 %v1545_v51 }
  0x3b   :  { %684 = vmatmul.mubr.bf16.gmra.mrb[12].mxu0 %v1529_v52  ;;  %1462 = vmatprep.subr.bf16.mxu1 %v1552_v55 }
  0x3c   :  { %781 = vmatmul.mubr.bf16.gmra.mrb[12].mxu1 %v1530_v53  ;;  %691 = vmatprep.mubr.bf16.mxu0 %v1532_v54 }
  0x3d   :  { %788 = vmatprep.mubr.bf16.mxu1 %v1534_v56  ;;  %1437 = vmatpush3.bf16.msra.mxu0 %v1552_v55 }
  0x3e   :  { %1438 = vmatprep.subr.bf16.mxu0 %v1559_v57  ;;  %1470 = vmatpush3.bf16.msra.mxu1 %v1552_v55 }
  0x3f   :  { %1463 = vmatprep.subr.bf16.mxu1 %v1559_v57 }
  0x41   :  { %1439 = vmatpush3.bf16.msra.mxu0 %v1559_v57 }
  0x42   :  { %1471 = vmatpush3.bf16.msra.mxu1 %v1559_v57 }
  0x43   :  { %692 = vmatmul.mubr.bf16.gmra.mrb[16].mxu0 %v1536_v58 }
  0x44   :  { %789 = vmatmul.mubr.bf16.gmra.mrb[16].mxu1 %v1537_v59  ;;  %699 = vmatprep.mubr.bf16.mxu0 %v1539_v60 }
  0x45   :  { %796 = vmatprep.mubr.bf16.mxu1 %v1541_v61 }
  0x4b   :  { %700 = vmatmul.mubr.bf16.gmra.mrb[20].mxu0 %v1543_v62 }
  0x4c   :  { %797 = vmatmul.mubr.bf16.gmra.mrb[20].mxu1 %v1544_v63  ;;  %707 = vmatprep.mubr.bf16.mxu0 %v1546_v0 }
  0x4d   :  { %804 = vmatprep.mubr.bf16.mxu1 %v1548_v1 }
  0x53   :  { %708 = vmatmul.mubr.bf16.gmra.mrb[24].mxu0 %v1550_v2 }
  0x54   :  { %805 = vmatmul.mubr.bf16.gmra.mrb[24].mxu1 %v1551_v3  ;;  %715 = vmatprep.mubr.bf16.mxu0 %v1553_v4 }
  0x55   :  { %812 = vmatprep.mubr.bf16.mxu1 %v1555_v5 }
  0x5b   :  { %716 = vmatmul.mubr.bf16.gmra.mrb[28].mxu0 %v1557_v6 }
  0x5c   :  { %813 = vmatmul.mubr.bf16.gmra.mrb[28].mxu1 %v1558_v7  ;;  %1440 = vmatprep.mubr.bf16.mxu0 %v1560_v8 }
  0x5d   :  { %1448 = vmatprep.mubr.bf16.mxu1 %v1561_v9 }
  0x63   :  { %1441 = vmatmul.mubr.bf16.vlgmr.msra.gmra.mrb[32].mxu0 %v1562_v10 }
  0x64   :  { %1449 = vmatmul.mubr.bf16.vlgmr.msra.gmra.mrb[32].mxu1 %v1563_v11  ;;  %1444 = vmatprep.mubr.bf16.mxu0 %v1564_v12 }
  0x65   :  { %1452 = vmatprep.mubr.bf16.mxu1 %v1565_v13 }
  0x6b   :  { %1445 = vmatmul.mubr.bf16.gmra.mrb[36].mxu0 %v1566_v14 }
  0x6c   :  { %1453 = vmatmul.mubr.bf16.gmra.mrb[36].mxu1 %v1567_v15 }
  0xf6   :  { %v1296_v16 = vpop.f32.mrb[0].mxu0 }
  0xf7   :  { %v1360_v17 = vpop.f32.mrb[0].mxu1  ;;  %v1297_v18 = vpop.f32.mrb[1].mxu0 }
  0xf8   :  { %v1298_v19 = vadd.f32 %v1297_v18, %v1296_v16  ;;  %v1361_v20 = vpop.f32.mrb[1].mxu1  ;;  %v1299_v21 = vpop.f32.mrb[2].mxu0 }
  0xf9   :  { %v1362_v22 = vadd.f32 %v1361_v20, %v1360_v17  ;;  %v1363_v23 = vpop.f32.mrb[2].mxu1  ;;  %v1300_v24 = vpop.f32.mrb[3].mxu0 }
  0xfa   :  { %v1301_v25 = vadd.f32 %v1300_v24, %v1299_v21  ;;  %v1364_v26 = vpop.f32.mrb[3].mxu1 }
  0xfb   :  { %v1365_v27 = vadd.f32 %v1364_v26, %v1363_v23  ;;  %v1833_v28 = vadd.f32 %v1362_v22, %v1298_v19 }
  0xfd   :  { %v1835_v29 = vadd.f32 %v1365_v27, %v1301_v25 }
  0xfe   :  { %v1302_v30 = vpop.f32.mrb[4].mxu0 }
  0xff   :  { %v1366_v31 = vpop.f32.mrb[4].mxu1  ;;  %v1303_v32 = vpop.f32.mrb[5].mxu0 }
 0x100   :  { %v1304_v33 = vadd.f32 %v1303_v32, %v1302_v30  ;;  %v1367_v34 = vpop.f32.mrb[5].mxu1  ;;  %v1305_v35 = vpop.f32.mrb[6].mxu0 }
 0x101   :  { %v1368_v36 = vadd.f32 %v1367_v34, %v1366_v31  ;;  %v1369_v37 = vpop.f32.mrb[6].mxu1  ;;  %v1306_v38 = vpop.f32.mrb[7].mxu0 }
 0x102   :  { %v1307_v39 = vadd.f32 %v1306_v38, %v1305_v35  ;;  %v1370_v40 = vpop.f32.mrb[7].mxu1 }
 0x103   :  { %v1371_v41 = vadd.f32 %v1370_v40, %v1369_v37  ;;  %v1837_v42 = vadd.f32 %v1368_v36, %v1304_v33 }
 0x105   :  { %v1839_v43 = vadd.f32 %v1371_v41, %v1307_v39 }
 0x106   :  { %v1308_v44 = vpop.f32.mrb[8].mxu0 }
 0x107   :  { %v1372_v45 = vpop.f32.mrb[8].mxu1  ;;  %v1309_v46 = vpop.f32.mrb[9].mxu0 }
 0x108   :  { %v1310_v47 = vadd.f32 %v1309_v46, %v1308_v44  ;;  %v1373_v48 = vpop.f32.mrb[9].mxu1  ;;  %v1311_v49 = vpop.f32.mrb[10].mxu0 }
 0x109   :  { %v1374_v50 = vadd.f32 %v1373_v48, %v1372_v45  ;;  %v1375_v51 = vpop.f32.mrb[10].mxu1  ;;  %v1312_v52 = vpop.f32.mrb[11].mxu0 }
 0x10a   :  { %v1313_v53 = vadd.f32 %v1312_v52, %v1311_v49  ;;  %v1376_v54 = vpop.f32.mrb[11].mxu1 }
 0x10b   :  { %v1377_v55 = vadd.f32 %v1376_v54, %v1375_v51  ;;  %v1841_v56 = vadd.f32 %v1374_v50, %v1310_v47 }
 0x10d   :  { %v1843_v57 = vadd.f32 %v1377_v55, %v1313_v53 }
 0x10e   :  { %v1314_v58 = vpop.f32.mrb[12].mxu0 }
 0x10f   :  { %v1378_v59 = vpop.f32.mrb[12].mxu1  ;;  %v1315_v60 = vpop.f32.mrb[13].mxu0 }
 0x110   :  { %v1316_v61 = vadd.f32 %v1315_v60, %v1314_v58  ;;  %v1379_v62 = vpop.f32.mrb[13].mxu1  ;;  %v1317_v63 = vpop.f32.mrb[14].mxu0 }
 0x111   :  { %v1380_v0 = vadd.f32 %v1379_v62, %v1378_v59  ;;  %v1381_v1 = vpop.f32.mrb[14].mxu1  ;;  %v1318_v2 = vpop.f32.mrb[15].mxu0 }
 0x112   :  { %v1319_v3 = vadd.f32 %v1318_v2, %v1317_v63  ;;  %v1382_v4 = vpop.f32.mrb[15].mxu1 }
 0x113   :  { %v1383_v5 = vadd.f32 %v1382_v4, %v1381_v1  ;;  %v1845_v6 = vadd.f32 %v1380_v0, %v1316_v61 }
 0x115   :  { %v1847_v7 = vadd.f32 %v1383_v5, %v1319_v3 }
 0x116   :  { %v1320_v8 = vpop.f32.mrb[16].mxu0 }
 0x117   :  { %v1384_v9 = vpop.f32.mrb[16].mxu1  ;;  %v1321_v10 = vpop.f32.mrb[17].mxu0 }
 0x118   :  { %v1322_v11 = vadd.f32 %v1321_v10, %v1320_v8  ;;  %v1385_v12 = vpop.f32.mrb[17].mxu1  ;;  %v1323_v13 = vpop.f32.mrb[18].mxu0 }
 0x119   :  { %v1386_v14 = vadd.f32 %v1385_v12, %v1384_v9  ;;  %v1387_v15 = vpop.f32.mrb[18].mxu1  ;;  %v1324_v16 = vpop.f32.mrb[19].mxu0 }
 0x11a   :  { %v1325_v17 = vadd.f32 %v1324_v16, %v1323_v13  ;;  %v1388_v18 = vpop.f32.mrb[19].mxu1 }
 0x11b   :  { %v1389_v19 = vadd.f32 %v1388_v18, %v1387_v15  ;;  %v791_v20 = vadd.f32 %v1386_v14, %v1322_v11 }
 0x11d   :  { %v794_v21 = vadd.f32 %v1389_v19, %v1325_v17 }
 0x11e   :  { %v1326_v22 = vpop.f32.mrb[20].mxu0 }
 0x11f   :  { %v1390_v23 = vpop.f32.mrb[20].mxu1  ;;  %v1327_v24 = vpop.f32.mrb[21].mxu0 }
 0x120   :  { %v1328_v25 = vadd.f32 %v1327_v24, %v1326_v22  ;;  %v1391_v26 = vpop.f32.mrb[21].mxu1  ;;  %v1329_v27 = vpop.f32.mrb[22].mxu0 }
 0x121   :  { %v1392_v30 = vadd.f32 %v1391_v26, %v1390_v23  ;;  %v1393_v31 = vpop.f32.mrb[22].mxu1  ;;  %v1330_v32 = vpop.f32.mrb[23].mxu0 }
 0x122   :  { %v1331_v33 = vadd.f32 %v1330_v32, %v1329_v27  ;;  %v1394_v34 = vpop.f32.mrb[23].mxu1 }
 0x123   :  { %v1395_v35 = vadd.f32 %v1394_v34, %v1393_v31  ;;  %v799_v36 = vadd.f32 %v1392_v30, %v1328_v25 }
 0x125   :  { %v802_v37 = vadd.f32 %v1395_v35, %v1331_v33 }
 0x126   :  { %v1332_v38 = vpop.f32.mrb[24].mxu0 }
 0x127   :  { %v1396_v39 = vpop.f32.mrb[24].mxu1  ;;  %v1333_v40 = vpop.f32.mrb[25].mxu0 }
 0x128   :  { %v1334_v41 = vadd.f32 %v1333_v40, %v1332_v38  ;;  %v1397_v44 = vpop.f32.mrb[25].mxu1  ;;  %v1335_v45 = vpop.f32.mrb[26].mxu0 }
 0x129   :  { %v1398_v46 = vadd.f32 %v1397_v44, %v1396_v39  ;;  %v1399_v47 = vpop.f32.mrb[26].mxu1  ;;  %v1336_v48 = vpop.f32.mrb[27].mxu0 }
 0x12a   :  { %v1337_v49 = vadd.f32 %v1336_v48, %v1335_v45  ;;  %v1400_v50 = vpop.f32.mrb[27].mxu1 }
 0x12b   :  { %v1401_v51 = vadd.f32 %v1400_v50, %v1399_v47  ;;  %v807_v52 = vadd.f32 %v1398_v46, %v1334_v41 }
 0x12d   :  { %v1849_v53 = vadd.f32 %v1401_v51, %v1337_v49 }
 0x12e   :  { %v1338_v54 = vpop.f32.mrb[28].mxu0 }
 0x12f   :  { %v1402_v55 = vpop.f32.mrb[28].mxu1  ;;  %v1339_v58 = vpop.f32.mrb[29].mxu0 }
 0x130   :  { %v1340_v59 = vadd.f32 %v1339_v58, %v1338_v54  ;;  %v1403_v60 = vpop.f32.mrb[29].mxu1  ;;  %v1341_v61 = vpop.f32.mrb[30].mxu0 }
 0x131   :  { %v1404_v62 = vadd.f32 %v1403_v60, %v1402_v55  ;;  %v1405_v63 = vpop.f32.mrb[30].mxu1  ;;  %v1342_v0 = vpop.f32.mrb[31].mxu0 }
 0x132   :  { %v1343_v1 = vadd.f32 %v1342_v0, %v1341_v61  ;;  %v1406_v2 = vpop.f32.mrb[31].mxu1 }
 0x133   :  { %v1407_v3 = vadd.f32 %v1406_v2, %v1405_v63  ;;  %v815_v4 = vadd.f32 %v1404_v62, %v1340_v59 }
 0x135   :  { %v818_v5 = vadd.f32 %v1407_v3, %v1343_v1 }
 0x136   :  { %v1442_v8 = vpop.f32.mrb[32].mxu0 }
 0x137   :  { %v864_v9 = vadd.f32 %v1442_v8, %v1837_v42  ;;  %v1450_v10 = vpop.f32.mrb[32].mxu1  ;;  %v855_v11 = vpop.f32.mrb[33].mxu0 }
 0x138   :  { %v1852_v12 = vadd.f32 %v1450_v10, %v799_v36  ;;  %v856_v13 = vadd.f32 %v855_v11, %v1833_v28  ;;  %v887_v14 = vpop.f32.mrb[33].mxu1  ;;  %v1443_v15 = vpop.f32.mrb[34].mxu0 }
 0x139   :  { %v1855_v16 = vadd.f32 %v887_v14, %v791_v20  ;;  %v867_v17 = vadd.f32 %v1443_v15, %v1839_v43  ;;  %v1451_v18 = vpop.f32.mrb[34].mxu1  ;;  %v858_v19 = vpop.f32.mrb[35].mxu0  ;;  %v1073_v31 = vmul.f32 %v864_v9, %v864_v9 }
 0x13a   :  { %v1858_v22 = vadd.f32 %v1451_v18, %v802_v37  ;;  %v859_v23 = vadd.f32 %v858_v19, %v1835_v29  ;;  %v890_v24 = vpop.f32.mrb[35].mxu1  ;;  %v1071_v30 = vmul.f32 %v856_v13, %v856_v13  ;;  %v1081_v11 = vmul.f32 %v1852_v12, %v1852_v12 }
 0x13b   :  { %v1241_v42 = vpack.c.bf16 %v867_v17, %v864_v9  ;;  %v891_v25 = vadd.f32 %v890_v24, %v794_v21  ;;  %v1074_v41 = vmul.f32 %v867_v17, %v867_v17  ;;  %v1079_v3 = vmul.f32 %v1855_v16, %v1855_v16 }
 0x13c   :  { %v1261_v26 = vpack.c.bf16 %v1858_v22, %v1852_v12  ;;  %v1236_v27 = vpack.c.bf16 %v859_v23, %v856_v13  ;;  %v1049_v28 = vadd.f32 %v859_v23, %v856_v13  ;;  %v1072_v43 = vmul.f32 %v859_v23, %v859_v23 }
 0x13d   :  { %1273 = vst [vmem:[%s1910_s2 + $0x8] sm:$0xff] %v1241_v42   ;;  %v1256_v20 = vpack.c.bf16 %v891_v25, %v1855_v16  ;;  %v1080_v8 = vmul.f32 %v891_v25, %v891_v25  ;;  %v1082_v15 = vmul.f32 %v1858_v22, %v1858_v22 }
 0x13e   :  { %1277 = vst [vmem:[%s1910_s2 + $0x28] sm:$0xff] %v1261_v26   ;;  %1237 = vst [vmem:[%s1910_s2] sm:$0xff] %v1236_v27   ;;  %v1050_v29 = vadd.f32 %v1049_v28, %v864_v9  ;;  %v1446_v21 = vpop.f32.mrb[36].mxu0  ;;  %v1087_v32 = vadd.f32 %v1072_v43, %v1071_v30 }
 0x13f   :  { %1276 = vst [vmem:[%s1910_s2 + $0x20] sm:$0xff] %v1256_v20   ;;  %v880_v33 = vadd.f32 %v1446_v21, %v1845_v6  ;;  %v1454_v34 = vpop.f32.mrb[36].mxu1  ;;  %v871_v35 = vpop.f32.mrb[37].mxu0 }
 0x140   :  { %v912_v36 = vadd.f32 %v1454_v34, %v815_v4  ;;  %v872_v37 = vadd.f32 %v871_v35, %v1841_v56  ;;  %v1051_v38 = vadd.f32 %v1050_v29, %v867_v17  ;;  %v903_v39 = vpop.f32.mrb[37].mxu1  ;;  %v1447_v40 = vpop.f32.mrb[38].mxu0  ;;  %v1088_v44 = vadd.f32 %v1087_v32, %v1073_v31 }
 0x141   :  { %v904_v45 = vadd.f32 %v903_v39, %v807_v52  ;;  %v883_v46 = vadd.f32 %v1447_v40, %v1847_v7  ;;  %v1455_v47 = vpop.f32.mrb[38].mxu1  ;;  %v874_v48 = vpop.f32.mrb[39].mxu0  ;;  %v1077_v63 = vmul.f32 %v880_v33, %v880_v33 }
 0x142   :  { %v1052_v49 = vadd.f32 %v1051_v38, %v872_v37  ;;  %v1075_v50 = vmul.f32 %v872_v37, %v872_v37  ;;  %v915_v51 = vadd.f32 %v1455_v47, %v818_v5  ;;  %v906_v54 = vpop.f32.mrb[39].mxu1  ;;  %v1089_v6 = vadd.f32 %v1088_v44, %v1074_v41 }
 0x143   :  { %v1251_v55 = vpack.c.bf16 %v883_v46, %v880_v33  ;;  %v875_v59 = vadd.f32 %v874_v48, %v1843_v57  ;;  %v907_v56 = vadd.f32 %v906_v54, %v1849_v53  ;;  %v1078_v0 = vmul.f32 %v883_v46, %v883_v46 }
 0x144   :  { %v1271_v58 = vpack.c.bf16 %v915_v51, %v912_v36  ;;  %v1090_v60 = vadd.f32 %v1089_v6, %v1075_v50  ;;  %v1083_v19 = vmul.f32 %v904_v45, %v904_v45  ;;  %v1085_v27 = vmul.f32 %v912_v36, %v912_v36 }
 0x145   :  { %1275 = vst [vmem:[%s1910_s2 + $0x18] sm:$0xff] %v1251_v55   ;;  %v1246_v7 = vpack.c.bf16 %v875_v59, %v872_v37  ;;  %v1053_v52 = vadd.f32 %v1052_v49, %v875_v59  ;;  %v1076_v61 = vmul.f32 %v875_v59, %v875_v59  ;;  %v1266_v62 = vpack.c.bf16 %v907_v56, %v904_v45 }
 0x146   :  { %1279 = vst [vmem:[%s1910_s2 + $0x38] sm:$0xff] %v1271_v58   ;;  %v1084_v42 = vmul.f32 %v907_v56, %v907_v56  ;;  %v1086_v30 = vmul.f32 %v915_v51, %v915_v51 }
 0x147   :  { %1274 = vst [vmem:[%s1910_s2 + $0x10] sm:$0xff] %v1246_v7   ;;  %v1054_v57 = vadd.f32 %v1053_v52, %v880_v33  ;;  %v1091_v53 = vadd.f32 %v1090_v60, %v1076_v61  ;;  %1278 = vst [vmem:[%s1910_s2 + $0x30] sm:$0xff] %v1266_v62  }
 0x149   :  { %v1055_v1 = vadd.f32 %v1054_v57, %v883_v46  ;;  %v1092_v2 = vadd.f32 %v1091_v53, %v1077_v63 }
 0x14b   :  { %v1056_v4 = vadd.f32 %v1055_v1, %v1855_v16  ;;  %v1093_v5 = vadd.f32 %v1092_v2, %v1078_v0 }
 0x14d   :  { %v1094_v9 = vadd.f32 %v1093_v5, %v1079_v3  ;;  %v1057_v10 = vadd.f32 %v1056_v4, %v891_v25 }
 0x14f   :  { %v1058_v13 = vadd.f32 %v1057_v10, %v1852_v12  ;;  %v1095_v14 = vadd.f32 %v1094_v9, %v1080_v8 }
 0x151   :  { %v1059_v17 = vadd.f32 %v1058_v13, %v1858_v22  ;;  %v1096_v18 = vadd.f32 %v1095_v14, %v1081_v11 }
 0x153   :  { %v1060_v23 = vadd.f32 %v1059_v17, %v904_v45  ;;  %v1097_v24 = vadd.f32 %v1096_v18, %v1082_v15 }
 0x155   :  { %v1061_v16 = vadd.f32 %v1060_v23, %v907_v56  ;;  %v1098_v26 = vadd.f32 %v1097_v24, %v1083_v19 }
 0x157   :  { %v1062_v25 = vadd.f32 %v1061_v16, %v912_v36  ;;  %v1099_v28 = vadd.f32 %v1098_v26, %v1084_v42 }
 0x159   :  { %v1063_v43 = vadd.f32 %v1062_v25, %v915_v51  ;;  %v1100_v20 = vadd.f32 %v1099_v28, %v1085_v27 }
 0x15b   :  { %v1064_v12 = vrot.slane %v1063_v43, 4  ;;  %v1101_v29 = vadd.f32 %v1100_v20, %v1086_v30 }
 0x15d   :  { %v1065_v21 = vadd.f32 %v1064_v12, %v1063_v43  ;;  %v1102_v31 = vrot.slane %v1101_v29, 4 }
 0x15f   :  { %v1066_v32 = vrot.slane %v1065_v21, 2  ;;  %v1103_v33 = vadd.f32 %v1102_v31, %v1101_v29 }
 0x161   :  { %v1067_v22 = vadd.f32 %v1066_v32, %v1065_v21  ;;  %v1104_v34 = vrot.slane %v1103_v33, 2 }
 0x163   :  { %v1068_v35 = vrot.slane %v1067_v22, 1  ;;  %v1105_v37 = vadd.f32 %v1104_v34, %v1103_v33 }
 0x165   :  { %v1069_v38 = vadd.f32 %v1068_v35, %v1067_v22  ;;  %v1106_v39 = vrot.slane %v1105_v37, 1 }
 0x167   :  { %1070 = vst [vmem:[%s1911_s3] sm:$0x1] %v1069_v38  ;;  %v1107_v36 = vadd.f32 %v1106_v39, %v1105_v37 }
 0x169   :  { %1108 = vst [vmem:[%s1912_s4] sm:$0x1] %v1107_v36 }

// kernel: resnet_forward.36
= control target key start
LH: loop header
LB: loop body
LE: loop exit
PB: predicated region body
PF: predicated region fallthrough
CT: control target
= control target key end

     0   :  { %s140_s0 = inlined_call_operand.vmem [shape: bf16[32,128], index: 0, kind: input, shape index: {}]   ;;  %s141_s1 = inlined_call_operand.vmem [shape: f32[1,128], index: 1, kind: input, shape index: {}]   ;;  %s142_s2 = inlined_call_operand.vmem [shape: f32[1,128], index: 2, kind: input, shape index: {}]   ;;  %s143_s3 = inlined_call_operand.vmem [shape: bf16[32,128], index: 3, kind: output, shape index: {}]  }
   0x1   :  { %v83_v0 = vld [vmem:[%s140_s0] sm:$0xff]   ;;  %v100_v4 = vld [vmem:[%s140_s0 + $0x8] sm:$0xff]  }
   0x2   :  { %v72_v1 = vld [vmem:[%s141_s1] ss:$0 sm:$0xff]  ;;  %v84_v2 = vunpack.c.l.bf16 %v83_v0  ;;  %v85_v3 = vunpack.c.h.bf16 %v83_v0  ;;  %v88_v6 = vunpack.c.l.bf16 %v100_v4  ;;  %v89_v7 = vunpack.c.h.bf16 %v100_v4 }
   0x3   :  { %v73_v5 = vld [vmem:[%s142_s2] ss:$0 sm:$0xff] }
   0x4   :  { %v29_v8 = vmul.f32 %v84_v2, %v72_v1  ;;  %v30_v9 = vmul.f32 %v85_v3, %v72_v1  ;;  %v31_v10 = vmul.f32 %v88_v6, %v72_v1  ;;  %v32_v11 = vmul.f32 %v89_v7, %v72_v1 }
   0x6   :  { %v40_v12 = vadd.f32 %v73_v5, %v29_v8  ;;  %v41_v13 = vadd.f32 %v73_v5, %v30_v9  ;;  %v42_v14 = vadd.f32 %v73_v5, %v31_v10  ;;  %v43_v15 = vadd.f32 %v73_v5, %v32_v11 }
   0x8   :  { %v44_v16 = vmax.f32 %v40_v12, 0.0  ;;  %v45_v17 = vmax.f32 %v41_v13, 0.0  ;;  %v46_v18 = vmax.f32 %v42_v14, 0.0  ;;  %v47_v19 = vmax.f32 %v43_v15, 0.0 }
   0xa   :  { %v93_v20 = vpack.c.bf16 %v45_v17, %v44_v16  ;;  %v98_v21 = vpack.c.bf16 %v47_v19, %v46_v18 }
   0xc   :  { %94 = vst [vmem:[%s143_s3] sm:$0xff] %v93_v20   ;;  %101 = vst [vmem:[%s143_s3 + $0x8] sm:$0xff] %v98_v21  }

// kernel: resnet_forward.35
= control target key start
LH: loop header
LB: loop body
LE: loop exit
PB: predicated region body
PF: predicated region fallthrough
CT: control target
= control target key end

     0   :  { %s1025_s1 = inlined_call_operand.vmem [shape: bf16[640,128], index: 1, kind: input, shape index: {}]   ;;  %s1026_s0 = inlined_call_operand.vmem [shape: bf16[32,640], index: 0, kind: input, shape index: {}]   ;;  %s1027_s2 = inlined_call_operand.vmem [shape: bf16[32,128], index: 2, kind: output, shape index: {0}]   ;;  %s1028_s3 = inlined_call_operand.vmem [shape: f32[1,1,128], index: 3, kind: output, shape index: {1}]   ;;  %s1029_s4 = inlined_call_operand.vmem [shape: f32[1,1,128], index: 4, kind: output, shape index: {2}]  }
   0x1   :  { %v784_v0 = vld [vmem:[%s1025_s1 + $0x40] sm:$0xff]   ;;  %v788_v4 = vld [vmem:[%s1025_s1 + $0x48] sm:$0xff]   ;;  %v792_v8 = vld [vmem:[%s1025_s1 + $0x50] sm:$0xff]  }
   0x2   :  { %v785_v1 = vld [vmem:[%s1025_s1 + $0xc0] sm:$0xff]   ;;  %698 = vmatprep.subr.bf16.mxu0 %v784_v0  ;;  %v789_v5 = vld [vmem:[%s1025_s1 + $0xc8] sm:$0xff]   ;;  %v793_v9 = vld [vmem:[%s1025_s1 + $0xd0] sm:$0xff]  }
   0x3   :  { %v786_v2 = vld [vmem:[%s1025_s1] sm:$0xff]   ;;  %726 = vmatprep.subr.bf16.mxu1 %v785_v1  ;;  %v790_v6 = vld [vmem:[%s1025_s1 + $0x8] sm:$0xff]   ;;  %v794_v10 = vld [vmem:[%s1025_s1 + $0x10] sm:$0xff]  }
   0x4   :  { %v787_v3 = vld [vmem:[%s1025_s1 + $0x80] sm:$0xff]   ;;  %699 = vmatpush3.bf16.msra.mxu0 %v786_v2  ;;  %v791_v7 = vld [vmem:[%s1025_s1 + $0x88] sm:$0xff]   ;;  %v795_v11 = vld [vmem:[%s1025_s1 + $0x90] sm:$0xff]  }
   0x5   :  { %727 = vmatpush3.bf16.msra.mxu1 %v787_v3  ;;  %700 = vmatprep.subr.bf16.mxu0 %v788_v4  ;;  %v796_v12 = vld [vmem:[%s1025_s1 + $0x58] sm:$0xff]   ;;  %v800_v16 = vld [vmem:[%s1025_s1 + $0x60] sm:$0xff]   ;;  %v804_v20 = vld [vmem:[%s1025_s1 + $0x68] sm:$0xff]  }
   0x6   :  { %728 = vmatprep.subr.bf16.mxu1 %v789_v5  ;;  %v797_v13 = vld [vmem:[%s1025_s1 + $0xd8] sm:$0xff]   ;;  %v801_v17 = vld [vmem:[%s1025_s1 + $0xe0] sm:$0xff]   ;;  %v805_v21 = vld [vmem:[%s1025_s1 + $0xe8] sm:$0xff]  }
   0x7   :  { %v798_v14 = vld [vmem:[%s1025_s1 + $0x18] sm:$0xff]   ;;  %v802_v18 = vld [vmem:[%s1025_s1 + $0x20] sm:$0xff]   ;;  %v806_v22 = vld [vmem:[%s1025_s1 + $0x28] sm:$0xff]  }
   0x8   :  { %701 = vmatpush3.bf16.msra.mxu0 %v790_v6  ;;  %v799_v15 = vld [vmem:[%s1025_s1 + $0x98] sm:$0xff]   ;;  %v803_v19 = vld [vmem:[%s1025_s1 + $0xa0] sm:$0xff]   ;;  %v807_v23 = vld [vmem:[%s1025_s1 + $0xa8] sm:$0xff]  }
   0x9   :  { %729 = vmatpush3.bf16.msra.mxu1 %v791_v7  ;;  %702 = vmatprep.subr.bf16.mxu0 %v792_v8  ;;  %v808_v24 = vld [vmem:[%s1025_s1 + $0x70] sm:$0xff]   ;;  %v812_v28 = vld [vmem:[%s1025_s1 + $0x78] sm:$0xff]   ;;  %v821_v35 = vld [vmem:[%s1026_s0 + $0xc] ss:$20 sps:$4 sm:$0xff]  }
   0xa   :  { %730 = vmatprep.subr.bf16.mxu1 %v793_v9  ;;  %v809_v25 = vld [vmem:[%s1025_s1 + $0xf0] sm:$0xff]   ;;  %v813_v29 = vld [vmem:[%s1025_s1 + $0xf8] sm:$0xff]   ;;  %v822_v36 = vld [vmem:[%s1025_s1 + $0x100] sm:$0xff]   ;;  %492 = vmatprep.mubr.bf16.mxu1 %v821_v35 }
   0xb   :  { %v810_v26 = vld [vmem:[%s1025_s1 + $0x30] sm:$0xff]   ;;  %v814_v30 = vld [vmem:[%s1025_s1 + $0x38] sm:$0xff]   ;;  %v823_v37 = vld [vmem:[%s1025_s1 + $0x108] sm:$0xff]  }
   0xc   :  { %703 = vmatpush3.bf16.msra.mxu0 %v794_v10  ;;  %v811_v27 = vld [vmem:[%s1025_s1 + $0xb0] sm:$0xff]   ;;  %v815_v31 = vld [vmem:[%s1025_s1 + $0xb8] sm:$0xff]   ;;  %v827_v39 = vld [vmem:[%s1026_s0 + $0x2c] ss:$20 sps:$4 sm:$0xff]  }
   0xd   :  { %731 = vmatpush3.bf16.msra.mxu1 %v795_v11  ;;  %704 = vmatprep.subr.bf16.mxu0 %v796_v12  ;;  %v816_v32 = vld [vmem:[%s1026_s0] ss:$20 sps:$4 sm:$0xff]   ;;  %v818_v33 = vld [vmem:[%s1026_s0 + $0x4] ss:$20 sps:$4 sm:$0xff]   ;;  %v819_v34 = vld [vmem:[%s1026_s0 + $0x8] ss:$20 sps:$4 sm:$0xff]  }
   0xe   :  { %732 = vmatprep.subr.bf16.mxu1 %v797_v13  ;;  %443 = vmatprep.mubr.bf16.mxu0 %v818_v33  ;;  %v824_v38 = vld [vmem:[%s1025_s1 + $0x110] sm:$0xff]   ;;  %v825_v41 = vld [vmem:[%s1025_s1 + $0x118] sm:$0xff]   ;;  %v826_v45 = vld [vmem:[%s1025_s1 + $0x120] sm:$0xff]  }
   0xf   :  { %v829_v40 = vld [vmem:[%s1026_s0 + $0x34] ss:$20 sps:$4 sm:$0xff]   ;;  %v833_v43 = vld [vmem:[%s1026_s0 + $0x30] ss:$20 sps:$4 sm:$0xff]   ;;  %v835_v48 = vld [vmem:[%s1025_s1 + $0x138] sm:$0xff]  }
  0x10   :  { %705 = vmatpush3.bf16.msra.mxu0 %v798_v14  ;;  %v832_v42 = vld [vmem:[%s1026_s0 + $0x28] ss:$20 sps:$4 sm:$0xff]   ;;  %v836_v44 = vld [vmem:[%s1026_s0 + $0x10] ss:$20 sps:$4 sm:$0xff]   ;;  %v837_v49 = vld [vmem:[%s1026_s0 + $0x38] ss:$20 sps:$4 sm:$0xff]  }
  0x11   :  { %733 = vmatpush3.bf16.msra.mxu1 %v799_v15  ;;  %706 = vmatprep.subr.bf16.mxu0 %v800_v16  ;;  %v831_v46 = vld [vmem:[%s1025_s1 + $0x128] sm:$0xff]   ;;  %v834_v47 = vld [vmem:[%s1025_s1 + $0x130] sm:$0xff]  }
  0x12   :  { %734 = vmatprep.subr.bf16.mxu1 %v801_v17 }
  0x14   :  { %707 = vmatpush3.bf16.msra.mxu0 %v802_v18 }
  0x15   :  { %735 = vmatpush3.bf16.msra.mxu1 %v803_v19  ;;  %708 = vmatprep.subr.bf16.mxu0 %v804_v20 }
  0x16   :  { %736 = vmatprep.subr.bf16.mxu1 %v805_v21 }
  0x18   :  { %709 = vmatpush3.bf16.msra.mxu0 %v806_v22 }
  0x19   :  { %737 = vmatpush3.bf16.msra.mxu1 %v807_v23  ;;  %710 = vmatprep.subr.bf16.mxu0 %v808_v24 }
  0x1a   :  { %738 = vmatprep.subr.bf16.mxu1 %v809_v25 }
  0x1c   :  { %711 = vmatpush3.bf16.msra.mxu0 %v810_v26 }
  0x1d   :  { %739 = vmatpush3.bf16.msra.mxu1 %v811_v27  ;;  %712 = vmatprep.subr.bf16.mxu0 %v812_v28 }
  0x1e   :  { %740 = vmatprep.subr.bf16.mxu1 %v813_v29 }
  0x20   :  { %713 = vmatpush3.bf16.msra.mxu0 %v814_v30 }
  0x21   :  { %741 = vmatpush3.bf16.msra.mxu1 %v815_v31  ;;  %764 = vmatprep.subr.bf16.mxu0 %v822_v36 }
  0x23   :  { %444 = vmatmul.mubr.bf16.vlgmr.msra.gmra.mrb[0].mxu0 %v816_v32 }
  0x24   :  { %493 = vmatmul.mubr.bf16.vlgmr.msra.gmra.mrb[0].mxu1 %v819_v34  ;;  %765 = vmatpush3.bf16.msra.mxu0 %v822_v36 }
  0x25   :  { %766 = vmatprep.subr.bf16.mxu0 %v823_v37  ;;  %451 = vmatprep.mubr.bf16.mxu0 %v827_v39 }
  0x26   :  { %500 = vmatprep.mubr.bf16.mxu1 %v829_v40 }
  0x28   :  { %767 = vmatpush3.bf16.msra.mxu0 %v823_v37 }
  0x29   :  { %768 = vmatprep.subr.bf16.mxu0 %v824_v38 }
  0x2b   :  { %452 = vmatmul.mubr.bf16.gmra.mrb[4].mxu0 %v832_v42 }
  0x2c   :  { %501 = vmatmul.mubr.bf16.gmra.mrb[4].mxu1 %v833_v43  ;;  %769 = vmatpush3.bf16.msra.mxu0 %v824_v38 }
  0x2d   :  { %770 = vmatprep.subr.bf16.mxu0 %v825_v41  ;;  %780 = vmatprep.mubr.bf16.mxu0 %v836_v44 }
  0x30   :  { %771 = vmatpush3.bf16.msra.mxu0 %v825_v41 }
  0x31   :  { %772 = vmatprep.subr.bf16.mxu0 %v826_v45 }
  0x34   :  { %773 = vmatpush3.bf16.msra.mxu0 %v826_v45 }
  0x35   :  { %774 = vmatprep.subr.bf16.mxu0 %v831_v46 }
  0x38   :  { %775 = vmatpush3.bf16.msra.mxu0 %v831_v46 }
  0x39   :  { %776 = vmatprep.subr.bf16.mxu0 %v834_v47 }
  0x3c   :  { %777 = vmatpush3.bf16.msra.mxu0 %v834_v47 }
  0x3d   :  { %778 = vmatprep.subr.bf16.mxu0 %v835_v48 }
  0x40   :  { %779 = vmatpush3.bf16.msra.mxu0 %v835_v48 }
  0x43   :  { %781 = vmatmul.mubr.bf16.vlgmr.msra.gmra.mrb[8].mxu0 %v837_v49 }
  0xf6   :  { %v714_v50 = vpop.f32.mrb[0].mxu0 }
  0xf7   :  { %v742_v51 = vpop.f32.mrb[0].mxu1  ;;  %v715_v52 = vpop.f32.mrb[1].mxu0 }
  0xf8   :  { %v716_v53 = vadd.f32 %v715_v52, %v714_v50  ;;  %v743_v54 = vpop.f32.mrb[1].mxu1  ;;  %v717_v55 = vpop.f32.mrb[2].mxu0 }
  0xf9   :  { %v744_v56 = vadd.f32 %v743_v54, %v742_v51  ;;  %v745_v57 = vpop.f32.mrb[2].mxu1  ;;  %v718_v58 = vpop.f32.mrb[3].mxu0 }
  0xfa   :  { %v719_v59 = vadd.f32 %v718_v58, %v717_v55  ;;  %v746_v60 = vpop.f32.mrb[3].mxu1 }
  0xfb   :  { %v747_v61 = vadd.f32 %v746_v60, %v745_v57  ;;  %v495_v62 = vadd.f32 %v744_v56, %v716_v53 }
  0xfd   :  { %v498_v63 = vadd.f32 %v747_v61, %v719_v59 }
  0xfe   :  { %v720_v0 = vpop.f32.mrb[4].mxu0 }
  0xff   :  { %v748_v1 = vpop.f32.mrb[4].mxu1  ;;  %v721_v2 = vpop.f32.mrb[5].mxu0 }
 0x100   :  { %v722_v3 = vadd.f32 %v721_v2, %v720_v0  ;;  %v749_v4 = vpop.f32.mrb[5].mxu1  ;;  %v723_v5 = vpop.f32.mrb[6].mxu0 }
 0x101   :  { %v750_v6 = vadd.f32 %v749_v4, %v748_v1  ;;  %v751_v7 = vpop.f32.mrb[6].mxu1  ;;  %v724_v8 = vpop.f32.mrb[7].mxu0 }
 0x102   :  { %v725_v9 = vadd.f32 %v724_v8, %v723_v5  ;;  %v752_v10 = vpop.f32.mrb[7].mxu1 }
 0x103   :  { %v753_v11 = vadd.f32 %v752_v10, %v751_v7  ;;  %v503_v12 = vadd.f32 %v750_v6, %v722_v3 }
 0x105   :  { %v506_v13 = vadd.f32 %v753_v11, %v725_v9 }
 0x116   :  { %v782_v14 = vpop.f32.mrb[8].mxu0 }
 0x117   :  { %v552_v15 = vadd.f32 %v782_v14, %v503_v12  ;;  %v543_v16 = vpop.f32.mrb[9].mxu0 }
 0x118   :  { %v544_v17 = vadd.f32 %v543_v16, %v495_v62  ;;  %v783_v18 = vpop.f32.mrb[10].mxu0 }
 0x119   :  { %v555_v19 = vadd.f32 %v783_v18, %v506_v13  ;;  %v546_v20 = vpop.f32.mrb[11].mxu0  ;;  %v605_v27 = vmul.f32 %v552_v15, %v552_v15 }
 0x11a   :  { %v547_v21 = vadd.f32 %v546_v20, %v498_v63  ;;  %v603_v23 = vmul.f32 %v544_v17, %v544_v17 }
 0x11b   :  { %v695_v22 = vpack.c.bf16 %v555_v19, %v552_v15  ;;  %v606_v30 = vmul.f32 %v555_v19, %v555_v19 }
 0x11c   :  { %v690_v24 = vpack.c.bf16 %v547_v21, %v544_v17  ;;  %v593_v25 = vadd.f32 %v547_v21, %v544_v17  ;;  %v604_v26 = vmul.f32 %v547_v21, %v547_v21 }
 0x11d   :  { %697 = vst [vmem:[%s1027_s2 + $0x8] sm:$0xff] %v695_v22  }
 0x11e   :  { %691 = vst [vmem:[%s1027_s2] sm:$0xff] %v690_v24   ;;  %v594_v28 = vadd.f32 %v593_v25, %v552_v15  ;;  %v607_v29 = vadd.f32 %v604_v26, %v603_v23 }
 0x120   :  { %v595_v31 = vadd.f32 %v594_v28, %v555_v19  ;;  %v608_v32 = vadd.f32 %v607_v29, %v605_v27 }
 0x122   :  { %v596_v33 = vrot.slane %v595_v31, 4  ;;  %v609_v34 = vadd.f32 %v608_v32, %v606_v30 }
 0x124   :  { %v597_v35 = vadd.f32 %v596_v33, %v595_v31  ;;  %v610_v36 = vrot.slane %v609_v34, 4 }
 0x126   :  { %v598_v37 = vrot.slane %v597_v35, 2  ;;  %v611_v38 = vadd.f32 %v610_v36, %v609_v34 }
 0x128   :  { %v599_v39 = vadd.f32 %v598_v37, %v597_v35  ;;  %v612_v40 = vrot.slane %v611_v38, 2 }
 0x12a   :  { %v600_v41 = vrot.slane %v599_v39, 1  ;;  %v613_v42 = vadd.f32 %v612_v40, %v611_v38 }
 0x12c   :  { %v601_v43 = vadd.f32 %v600_v41, %v599_v39  ;;  %v614_v44 = vrot.slane %v613_v42, 1 }
 0x12e   :  { %602 = vst [vmem:[%s1028_s3] sm:$0x1] %v601_v43  ;;  %v615_v45 = vadd.f32 %v614_v44, %v613_v42 }
 0x130   :  { %616 = vst [vmem:[%s1029_s4] sm:$0x1] %v615_v45 }

// kernel: resnet_forward.39
= control target key start
LH: loop header
LB: loop body
LE: loop exit
PB: predicated region body
PF: predicated region fallthrough
CT: control target
= control target key end

     0   :  { %s1183_s15 = smov 0   ;;  %s1185_s16 = smov 0   ;;  %s1296_s0 = inlined_call_operand.vmem [shape: bf16[32,1152], index: 0, kind: input, shape index: {}]   ;;  %s1297_s1 = inlined_call_operand.vmem [shape: bf16[1152,128], index: 1, kind: input, shape index: {}]   ;;  %s1298_s2 = inlined_call_operand.vmem [shape: bf16[32,128], index: 2, kind: output, shape index: {0}]   ;;  %s1299_s3 = inlined_call_operand.vmem [shape: f32[1,1,128], index: 3, kind: output, shape index: {1}]   ;;  %s1300_s4 = inlined_call_operand.vmem [shape: f32[1,1,128], index: 4, kind: output, shape index: {2}]  }
   0x1   :  { %s1187_s17 = smov 0   ;;  %s1189_s18 = smov 0  }
   0x2   :  { %s1191_s19 = smov 0  }
   0x3 LB: > { %s27_s20 = sadd.s32 1, %s1151_s18  ;;  %p50_p1 = scmp.ne.s32.totalorder %s1143_s16, %s1139_s15  ;;  %s1155_s19 = sphi %s1191_s19, %s15_s19   ;;  %s1151_s18 = sphi %s1189_s18, %s1304_s18   ;;  %s1147_s17 = sphi %s1187_s17, %s1303_s17   ;;  %s1143_s16 = sphi %s1185_s16, %s1302_s16   ;;  %s1139_s15 = sphi %s1183_s15, %s1301_s15  }
   0x4   : > { %p28_p0 = scmp.ge.s32.totalorder %s27_s20, 3  ;;  %p51_p2 = scmp.eq.s32.totalorder %s1155_s19, 0 }
   0x5   : > { %s43_s22 = sadd.s32 1, %s1143_s16  ;;  %p914_p5 = scmp.ge.s32.totalorder %s1155_s19, 3 }
   0x6   : > { %s1306_s20 = smov (%p28_p0, %s27_s20), 0  ;;  %p52_p3 = por %p51_p2, %p50_p1 }
   0x7   : > { %s39_s21 = ssub.s32 %s1151_s18, %s1306_s20  ;;  %188 = sbr.rel (%p914_p5) target bundleno = 23 (0x17), region = 16 }
   0x8   : > { %p41_p4 = scmp.eq.s32.totalorder %s39_s21, 0 }
   0xa   : > { %s1218_s23 = scalar_select %p41_p4, %s1143_s16, %s43_s22  }
   0xe   : > { %191 = sbr.rel (!%p52_p3) target bundleno = 23 (0x17), region = 20  ;;  %s193_s24 = sand.u32 (%p52_p3), 1, %s1143_s16  }
   0xf   : > { %s968_s25 = smul.u32 (%p52_p3), 12, %s1151_s18 }
  0x10   : > { %s1042_s26 = smul.u32 (%p52_p3), 48, %s193_s24 }
  0x11   : > { %s201_s29 = scalar_lea.vmem (%p52_p3), %s1296_s0, %s968_s25 }
  0x12   : > { %v216_v0 = vld [vmem:[%s201_s29] sm:$0xff] (%p52_p3)  ;;  %v220_v2 = vld [vmem:[%s201_s29 + $0x48] sm:$0xff] (%p52_p3)  ;;  %s195_s30 = scalar_lea.vmem (%p52_p3), [#allocation3], %s1042_s26  ;;  %v920_v6 = vld [vmem:[%s201_s29 + $0x50] sm:$0xf] (%p52_p3) }
  0x13   : > { %v218_v1 = vld [vmem:[%s201_s29 + $0x24] sm:$0xff] (%p52_p3)  ;;  %217 = vst [vmem:[%s195_s30] sm:$0xff] (%p52_p3), %v216_v0  ;;  %221 = vst [vmem:[%s195_s30 + $0x18] sm:$0xff] (%p52_p3), %v220_v2  ;;  %v222_v3 = vld [vmem:[%s201_s29 + $0x6c] sm:$0xff] (%p52_p3) }
  0x14   : > { %219 = vst [vmem:[%s195_s30 + $0xc] sm:$0xff] (%p52_p3), %v218_v1  ;;  %v916_v4 = vld [vmem:[%s201_s29 + $0x8] sm:$0xf] (%p52_p3)  ;;  %v918_v5 = vld [vmem:[%s201_s29 + $0x2c] sm:$0xf] (%p52_p3)  ;;  %223 = vst [vmem:[%s195_s30 + $0x24] sm:$0xff] (%p52_p3), %v222_v3 }
  0x15   : > { %917 = vst [vmem:[%s195_s30 + $0x8] sm:$0xf] %v916_v4  ;;  %919 = vst [vmem:[%s195_s30 + $0x14] sm:$0xf] %v918_v5  ;;  %v922_v7 = vld [vmem:[%s201_s29 + $0x74] sm:$0xf] }
  0x16   : > { %921 = vst [vmem:[%s195_s30 + $0x20] sm:$0xf] %v920_v6  ;;  %923 = vst [vmem:[%s195_s30 + $0x2c] sm:$0xf] %v922_v7 }
  0x17 PF: > { %p924_p6 = scmp.ge.s32.totalorder %s1155_s19, 1  ;;  %p255_p7 = scmp.lt.s32.totalorder %s1155_s19, 4 }
  0x19   : > { %p256_p8 = pnand %p924_p6, %p255_p7 }
  0x1a   : > { %s262_s5 = sand.u32 (!%p256_p8), 1, %s1139_s15   ;;  %s312_s6 = smul.u32 (!%p256_p8), 48, %s1147_s17 }
  0x1b   : > { %259 = sbr.rel (%p256_p8) target bundleno = 328 (0x148), region = 50  ;;  %p926_p10 = scmp.ne.s32.totalorder (!%p256_p8), %s1147_s17, 0 }
  0x1c   : > { %s1043_s7 = smul.u32 (!%p256_p8), 48, %s262_s5  ;;  %p313_p9 = scmp.lt.s32.totalorder (!%p256_p8), %s312_s6, 143 }
  0x1e   : > { %s1235_s12 = scalar_lea.vmem (!%p256_p8), [#allocation3], %s1043_s7 }
  0x22   : > { %s1308_s6 = smov (!%p313_p9, %s312_s6), 143  ;;  %346 = sbr.rel (%p926_p10) target bundleno = 41 (0x29), region = 58 }
  0x23   : > { %s925_s8 = sshll.u32 %s1308_s6, 2  ;;  %v1157_v8 = vmov (!%p926_p10), 0.0  }
  0x24   : > { %s1233_s11 = scalar_lea.vmem %s1297_s1, %s925_s8  ;;  %347 = vst [vmem:[#allocation2] sm:$0xff] (!%p926_p10), %v1157_v8  ;;  %348 = vst [vmem:[#allocation2 + $0x8] sm:$0xff] (!%p926_p10), %v1157_v8 }
  0x25   : > { %349 = vst [vmem:[#allocation2 + $0x10] sm:$0xff] (!%p926_p10), %v1157_v8  ;;  %350 = vst [vmem:[#allocation2 + $0x18] sm:$0xff] (!%p926_p10), %v1157_v8 }
  0x29 PF: > { %v1085_v9 = vld [vmem:[%s1233_s11 + $0x40] sm:$0xff]   ;;  %v1088_v12 = vld [vmem:[%s1233_s11 + $0x48] sm:$0xff]   ;;  %v1091_v15 = vld [vmem:[%s1233_s11 + $0x50] sm:$0xff]   ;;  %p957_p11 = scmp.ne.s32.totalorder %s1147_s17, 2 }
  0x2a   : > { %v1086_v10 = vld [vmem:[%s1233_s11] sm:$0xff]   ;;  %984 = vmatprep.subr.bf16.mxu0 %v1085_v9  ;;  %v1089_v13 = vld [vmem:[%s1233_s11 + $0x8] sm:$0xff]   ;;  %v1092_v16 = vld [vmem:[%s1233_s11 + $0x10] sm:$0xff]  }
  0x2b   : > { %v1087_v11 = vld [vmem:[%s1233_s11 + $0x80] sm:$0xff]   ;;  %985 = vmatpush3.bf16.msra.mxu0 %v1086_v10  ;;  %v1090_v14 = vld [vmem:[%s1233_s11 + $0x88] sm:$0xff]   ;;  %v1093_v17 = vld [vmem:[%s1233_s11 + $0x90] sm:$0xff]  }
  0x2c   : > { %1022 = vmatprep.subr.bf16.mxu1 %v1087_v11  ;;  %986 = vmatprep.subr.bf16.mxu0 %v1088_v12  ;;  %v1094_v18 = vld [vmem:[%s1233_s11 + $0x58] sm:$0xff]   ;;  %v1097_v21 = vld [vmem:[%s1233_s11 + $0x60] sm:$0xff]   ;;  %v1100_v24 = vld [vmem:[%s1233_s11 + $0x68] sm:$0xff]  }
  0x2d   : > { %1023 = vmatpush3.bf16.msra.mxu1 %v1087_v11  ;;  %v1095_v19 = vld [vmem:[%s1233_s11 + $0x18] sm:$0xff]   ;;  %v1099_v22 = vld [vmem:[%s1233_s11 + $0xa0] sm:$0xff]   ;;  %v1102_v25 = vld [vmem:[%s1233_s11 + $0xa8] sm:$0xff]  }
  0x2e   : > { %1024 = vmatprep.subr.bf16.mxu1 %v1090_v14  ;;  %v1096_v20 = vld [vmem:[%s1233_s11 + $0x98] sm:$0xff]   ;;  %v1098_v23 = vld [vmem:[%s1233_s11 + $0x20] sm:$0xff]   ;;  %v1101_v26 = vld [vmem:[%s1233_s11 + $0x28] sm:$0xff]  }
  0x2f   : > { %987 = vmatpush3.bf16.msra.mxu0 %v1089_v13  ;;  %v1103_v27 = vld [vmem:[%s1233_s11 + $0x70] sm:$0xff]   ;;  %v1106_v30 = vld [vmem:[%s1233_s11 + $0x78] sm:$0xff]   ;;  %v351_v45 = vld [vmem:[#allocation2] sm:$0xff] }
  0x30   : > { %988 = vmatprep.subr.bf16.mxu0 %v1091_v15  ;;  %v1104_v28 = vld [vmem:[%s1233_s11 + $0x30] sm:$0xff]   ;;  %v1108_v31 = vld [vmem:[%s1233_s11 + $0xb8] sm:$0xff]   ;;  %v352_v50 = vld [vmem:[#allocation2 + $0x8] sm:$0xff] }
  0x31   : > { %1025 = vmatpush3.bf16.msra.mxu1 %v1090_v14  ;;  %v1105_v29 = vld [vmem:[%s1233_s11 + $0xb0] sm:$0xff]   ;;  %v1107_v34 = vld [vmem:[%s1233_s11 + $0x38] sm:$0xff]  }
  0x32   : > { %1026 = vmatprep.subr.bf16.mxu1 %v1093_v17  ;;  %v1111_v32 = vld [vmem:[%s1235_s12 + $0x4] ss:$12 sps:$4 sm:$0xff]   ;;  %v1112_v33 = vld [vmem:[%s1235_s12 + $0x8] ss:$12 sps:$4 sm:$0xff]   ;;  %v1109_v35 = vld [vmem:[%s1235_s12] ss:$12 sps:$4 sm:$0xff]  }
  0x33   : > { %989 = vmatpush3.bf16.msra.mxu0 %v1092_v16  ;;  %619 = vmatprep.mubr.bf16.mxu0 %v1111_v32  ;;  %v1114_v36 = vld [vmem:[%s1235_s12 + $0x1c] ss:$12 sps:$4 sm:$0xff]   ;;  %v1113_v37 = vld [vmem:[%s1235_s12 + $0x20] ss:$12 sps:$4 sm:$0xff]   ;;  %v1116_v38 = vld [vmem:[%s1235_s12 + $0x18] ss:$12 sps:$4 sm:$0xff]  }
  0x34   : > { %990 = vmatprep.subr.bf16.mxu0 %v1094_v18  ;;  %1038 = vmatprep.mubr.bf16.mxu1 %v1112_v33  ;;  %v353_v59 = vld [vmem:[#allocation2 + $0x10] sm:$0xff]  ;;  %v354_v63 = vld [vmem:[#allocation2 + $0x18] sm:$0xff] }
  0x35   : > { %1027 = vmatpush3.bf16.msra.mxu1 %v1093_v17 }
  0x36   : > { %1028 = vmatprep.subr.bf16.mxu1 %v1096_v20 }
  0x37   : > { %991 = vmatpush3.bf16.msra.mxu0 %v1095_v19 }
  0x38   : > { %992 = vmatprep.subr.bf16.mxu0 %v1097_v21 }
  0x39   : > { %1029 = vmatpush3.bf16.msra.mxu1 %v1096_v20 }
  0x3a   : > { %1030 = vmatprep.subr.bf16.mxu1 %v1099_v22 }
  0x3b   : > { %993 = vmatpush3.bf16.msra.mxu0 %v1098_v23 }
  0x3c   : > { %994 = vmatprep.subr.bf16.mxu0 %v1100_v24 }
  0x3d   : > { %1031 = vmatpush3.bf16.msra.mxu1 %v1099_v22 }
  0x3e   : > { %1032 = vmatprep.subr.bf16.mxu1 %v1102_v25 }
  0x3f   : > { %995 = vmatpush3.bf16.msra.mxu0 %v1101_v26 }
  0x40   : > { %996 = vmatprep.subr.bf16.mxu0 %v1103_v27 }
  0x41   : > { %1033 = vmatpush3.bf16.msra.mxu1 %v1102_v25 }
  0x42   : > { %1034 = vmatprep.subr.bf16.mxu1 %v1105_v29 }
  0x43   : > { %997 = vmatpush3.bf16.msra.mxu0 %v1104_v28 }
  0x44   : > { %998 = vmatprep.subr.bf16.mxu0 %v1106_v30 }
  0x45   : > { %1035 = vmatpush3.bf16.msra.mxu1 %v1105_v29 }
  0x46   : > { %1036 = vmatprep.subr.bf16.mxu1 %v1108_v31 }
  0x47   : > { %999 = vmatpush3.bf16.msra.mxu0 %v1107_v34 }
  0x49   : > { %1037 = vmatpush3.bf16.msra.mxu1 %v1108_v31 }
  0x4a   : > { %620 = vmatmul.mubr.bf16.vlgmr.msra.gmra.mrb[0].mxu0 %v1109_v35 }
  0x4b   : > { %627 = vmatprep.mubr.bf16.mxu0 %v1114_v36 }
  0x4c   : > { %1039 = vmatmul.mubr.bf16.vlgmr.msra.gmra.mrb[0].mxu1 %v1113_v37 }
  0x52   : > { %628 = vmatmul.mubr.bf16.gmra.mrb[4].mxu0 %v1116_v38 }
 0x11d   : > { %v1000_v39 = vpop.f32.mrb[0].mxu0 }
 0x11e   : > { %v1001_v40 = vpop.f32.mrb[1].mxu0 }
 0x11f   : > { %v1002_v41 = vadd.f32 %v1001_v40, %v1000_v39  ;;  %v1003_v42 = vpop.f32.mrb[2].mxu0  ;;  %v1040_v43 = vpop.f32.mrb[0].mxu1 }
 0x120   : > { %v1004_v44 = vpop.f32.mrb[3].mxu0  ;;  %v670_v46 = vpop.f32.mrb[1].mxu1 }
 0x121   : > { %v1005_v47 = vadd.f32 %v1004_v44, %v1003_v42  ;;  %v671_v48 = vadd.f32 %v1002_v41, %v670_v46  ;;  %v1041_v49 = vpop.f32.mrb[2].mxu1 }
 0x122   : > { %v673_v51 = vpop.f32.mrb[3].mxu1 }
 0x123   : > { %v685_v52 = vadd.f32 %v671_v48, %v351_v45  ;;  %v674_v53 = vadd.f32 %v1005_v47, %v673_v51 }
 0x125   : > { %689 = vst [vmem:[#allocation2] sm:$0xff] %v685_v52  ;;  %v686_v54 = vadd.f32 %v674_v53, %v352_v50  ;;  %v1006_v55 = vpop.f32.mrb[4].mxu0 }
 0x126   : > { %v1007_v56 = vpop.f32.mrb[5].mxu0 }
 0x127   : > { %690 = vst [vmem:[#allocation2 + $0x8] sm:$0xff] %v686_v54  ;;  %v1008_v57 = vadd.f32 %v1007_v56, %v1006_v55  ;;  %v1009_v58 = vpop.f32.mrb[6].mxu0 }
 0x128   : > { %v1010_v60 = vpop.f32.mrb[7].mxu0 }
 0x129   : > { %v679_v61 = vadd.f32 %v1040_v43, %v1008_v57  ;;  %v1011_v62 = vadd.f32 %v1010_v60, %v1009_v58  ;;  %696 = sbr.rel (%p957_p11) target bundleno = 328 (0x148), region = 62 }
 0x12b   : > { %v687_v0 = vadd.f32 %v679_v61, %v353_v59  ;;  %v682_v1 = vadd.f32 %v1041_v49, %v1011_v62 }
 0x12c   : > { %v697_v3 = vld [vmem:[#allocation2] sm:$0xff] (!%p957_p11) }
 0x12d   : > { %691 = vst [vmem:[#allocation2 + $0x10] sm:$0xff] %v687_v0  ;;  %v688_v2 = vadd.f32 %v682_v1, %v354_v63  ;;  %v731_v8 = vmul.f32 (!%p957_p11), %v697_v3, %v697_v3 }
 0x12e   : > { %v698_v4 = vld [vmem:[#allocation2 + $0x8] sm:$0xff] (!%p957_p11) }
 0x12f   : > { %692 = vst [vmem:[#allocation2 + $0x18] sm:$0xff] %v688_v2  ;;  %v976_v6 = vpack.c.bf16 (!%p957_p11), %v698_v4, %v697_v3  ;;  %v721_v7 = vadd.f32 (!%p957_p11), %v698_v4, %v697_v3  ;;  %v732_v9 = vmul.f32 (!%p957_p11), %v698_v4, %v698_v4 }
 0x131   : > { %977 = vst [vmem:[%s1298_s2] sm:$0xff] %v976_v6   ;;  %v735_v13 = vadd.f32 %v732_v9, %v731_v8 }
 0x134   : > { %v699_v5 = vld [vmem:[#allocation2 + $0x10] sm:$0xff] }
 0x135   : > { %v733_v12 = vmul.f32 %v699_v5, %v699_v5  ;;  %v722_v14 = vadd.f32 %v721_v7, %v699_v5 }
 0x136   : > { %v700_v10 = vld [vmem:[#allocation2 + $0x18] sm:$0xff] }
 0x137   : > { %v981_v11 = vpack.c.bf16 %v700_v10, %v699_v5  ;;  %v734_v15 = vmul.f32 %v700_v10, %v700_v10  ;;  %v723_v16 = vadd.f32 %v722_v14, %v700_v10  ;;  %v736_v17 = vadd.f32 %v735_v13, %v733_v12 }
 0x139   : > { %983 = vst [vmem:[%s1298_s2 + $0x8] sm:$0xff] %v981_v11   ;;  %v724_v18 = vrot.slane %v723_v16, 4  ;;  %v737_v19 = vadd.f32 %v736_v17, %v734_v15 }
 0x13b   : > { %v725_v20 = vadd.f32 %v724_v18, %v723_v16  ;;  %v738_v21 = vrot.slane %v737_v19, 4 }
 0x13d   : > { %v726_v22 = vrot.slane %v725_v20, 2  ;;  %v739_v23 = vadd.f32 %v738_v21, %v737_v19 }
 0x13f   : > { %v727_v24 = vadd.f32 %v726_v22, %v725_v20  ;;  %v740_v25 = vrot.slane %v739_v23, 2 }
 0x141   : > { %v728_v26 = vrot.slane %v727_v24, 1  ;;  %v741_v27 = vadd.f32 %v740_v25, %v739_v23 }
 0x143   : > { %v729_v28 = vadd.f32 %v728_v26, %v727_v24  ;;  %v742_v29 = vrot.slane %v741_v27, 1 }
 0x145   : > { %730 = vst [vmem:[%s1299_s3] sm:$0x1] %v729_v28  ;;  %v743_v30 = vadd.f32 %v742_v29, %v741_v27 }
 0x147   : > { %744 = vst [vmem:[%s1300_s4] sm:$0x1] %v743_v30 }
 0x148 PF: > { %s15_s19 = sadd.s32 1, %s1155_s19   ;;  %s1301_s15 = smov %s1143_s16 }
 0x149   : > { %p12_p12 = scmp.ge.s32.totalorder %s15_s19, 5   ;;  %s1302_s16 = smov %s1218_s23 }
 0x14a   : > { %s1303_s17 = smov %s1151_s18  ;;  %s1304_s18 = smov %s1306_s20 }
 0x14b   :  { %14 = sbr.rel (!%p12_p12) target bundleno = 3 (0x3), region = 130 }

// kernel: resnet_forward.40
= control target key start
LH: loop header
LB: loop body
LE: loop exit
PB: predicated region body
PF: predicated region fallthrough
CT: control target
= control target key end

     0   :  { %s175_s0 = inlined_call_operand.vmem [shape: bf16[32,128], index: 0, kind: input, shape index: {}]   ;;  %s176_s1 = inlined_call_operand.vmem [shape: f32[1,128], index: 1, kind: input, shape index: {}]   ;;  %s177_s2 = inlined_call_operand.vmem [shape: f32[1,128], index: 2, kind: input, shape index: {}]   ;;  %s178_s3 = inlined_call_operand.vmem [shape: bf16[32,128], index: 3, kind: input, shape index: {}]   ;;  %s179_s4 = inlined_call_operand.vmem [shape: bf16[32,128], index: 4, kind: output, shape index: {}]  }
   0x1   :  { %v98_v0 = vld [vmem:[%s175_s0] sm:$0xff]   ;;  %v123_v5 = vld [vmem:[%s175_s0 + $0x8] sm:$0xff]  }
   0x2   :  { %v87_v1 = vld [vmem:[%s176_s1] ss:$0 sm:$0xff]  ;;  %v99_v2 = vunpack.c.l.bf16 %v98_v0  ;;  %v100_v3 = vunpack.c.h.bf16 %v98_v0  ;;  %v124_v6 = vld [vmem:[%s178_s3 + $0x8] sm:$0xff]   ;;  %v103_v8 = vunpack.c.l.bf16 %v123_v5  ;;  %v104_v9 = vunpack.c.h.bf16 %v123_v5 }
   0x3   :  { %v106_v4 = vld [vmem:[%s178_s3] sm:$0xff]   ;;  %v111_v16 = vunpack.c.l.bf16 %v124_v6  ;;  %v112_v17 = vunpack.c.h.bf16 %v124_v6 }
   0x4   :  { %v88_v7 = vld [vmem:[%s177_s2] ss:$0 sm:$0xff]  ;;  %v32_v10 = vmul.f32 %v99_v2, %v87_v1  ;;  %v33_v11 = vmul.f32 %v100_v3, %v87_v1  ;;  %v107_v12 = vunpack.c.l.bf16 %v106_v4  ;;  %v108_v13 = vunpack.c.h.bf16 %v106_v4 }
   0x5   :  { %v34_v14 = vmul.f32 %v103_v8, %v87_v1  ;;  %v35_v15 = vmul.f32 %v104_v9, %v87_v1 }
   0x6   :  { %v43_v18 = vadd.f32 %v88_v7, %v32_v10  ;;  %v44_v19 = vadd.f32 %v88_v7, %v33_v11 }
   0x7   :  { %v45_v20 = vadd.f32 %v88_v7, %v34_v14  ;;  %v46_v21 = vadd.f32 %v88_v7, %v35_v15 }
   0x8   :  { %v55_v22 = vadd.f32 %v107_v12, %v43_v18  ;;  %v56_v23 = vadd.f32 %v108_v13, %v44_v19 }
   0x9   :  { %v57_v24 = vadd.f32 %v111_v16, %v45_v20  ;;  %v58_v25 = vadd.f32 %v112_v17, %v46_v21 }
   0xa   :  { %v59_v26 = vmax.f32 %v55_v22, 0.0  ;;  %v60_v27 = vmax.f32 %v56_v23, 0.0 }
   0xb   :  { %v61_v28 = vmax.f32 %v57_v24, 0.0  ;;  %v62_v29 = vmax.f32 %v58_v25, 0.0 }
   0xc   :  { %v116_v30 = vpack.c.bf16 %v60_v27, %v59_v26 }
   0xd   :  { %v121_v31 = vpack.c.bf16 %v62_v29, %v61_v28 }
   0xe   :  { %117 = vst [vmem:[%s179_s4] sm:$0xff] %v116_v30  }
   0xf   :  { %125 = vst [vmem:[%s179_s4 + $0x8] sm:$0xff] %v121_v31  }

// kernel: resnet_forward.44
= control target key start
LH: loop header
LB: loop body
LE: loop exit
PB: predicated region body
PF: predicated region fallthrough
CT: control target
= control target key end

     0   :  { %v19_v0 = vlaneseq  ;;  %s92_s0 = inlined_call_operand.vmem [shape: bf16[8,256], index: 0, kind: input, shape index: {}]   ;;  %s93_s1 = inlined_call_operand.vmem [shape: f32[1,256], index: 1, kind: input, shape index: {}]   ;;  %s94_s2 = inlined_call_operand.vmem [shape: f32[1,256], index: 2, kind: input, shape index: {}]   ;;  %s95_s3 = inlined_call_operand.vmem [shape: bf16[8,256], index: 3, kind: output, shape index: {}]  }
   0x1   :  { %v14_v1 = vld [vmem:[%s92_s0] sm:$0xff] }
   0x2   :  { %v20_v2 = vshrl.u32 %v19_v0, 7  ;;  %v17_v3 = vld [vmem:[%s93_s1] sm:$0x3]  ;;  %v15_v5 = vunpack.c.l.bf16 %v14_v1  ;;  %v16_v6 = vunpack.c.h.bf16 %v14_v1 }
   0x3   :  { %v31_v4 = vld [vmem:[%s94_s2] sm:$0x3] }
   0x4   :  { %v21_v7 = vsub.s32 0, %v20_v2  ;;  %v25_v8 = vsub.s32 1, %v20_v2 }
   0x6   :  { %v22_v9 = vrot.slane %v17_v3, %v21_v7  ;;  %v26_v10 = vrot.slane %v17_v3, %v25_v8  ;;  %v36_v11 = vrot.slane %v31_v4, %v21_v7  ;;  %v40_v12 = vrot.slane %v31_v4, %v25_v8 }
   0x8   :  { %v29_v13 = vmul.f32 %v22_v9, %v15_v5  ;;  %v30_v14 = vmul.f32 %v26_v10, %v16_v6 }
   0xa   :  { %v43_v15 = vadd.f32 %v36_v11, %v29_v13  ;;  %v44_v16 = vadd.f32 %v40_v12, %v30_v14 }
   0xc   :  { %v59_v17 = vpack.c.bf16 %v44_v16, %v43_v15 }
   0xe   :  { %53 = vst [vmem:[%s95_s3] sm:$0xff] %v59_v17 }

// kernel: resnet_forward.43
= control target key start
LH: loop header
LB: loop body
LE: loop exit
PB: predicated region body
PF: predicated region fallthrough
CT: control target
= control target key end

     0   :  { %v337_v1 = vmov 0   ;;  %v338_v37 = vmov 1966171168   ;;  %v223_v39 = vlaneseq  ;;  %s427_s1 = inlined_call_operand.vmem [shape: bf16[128,256], index: 1, kind: input, shape index: {}]   ;;  %s428_s0 = inlined_call_operand.vmem [shape: bf16[16,128], index: 0, kind: input, shape index: {}]   ;;  %s429_s2 = inlined_call_operand.vmem [shape: bf16[16,256], index: 2, kind: output, shape index: {0}]   ;;  %s430_s3 = inlined_call_operand.vmem [shape: f32[1,1,256], index: 3, kind: output, shape index: {1}]   ;;  %s431_s4 = inlined_call_operand.vmem [shape: f32[1,1,256], index: 4, kind: output, shape index: {2}]  }
   0x1   :  { %v312_v0 = vld [vmem:[%s427_s1 + $0x4] ss:$8 sps:$4 sm:$0xff]   ;;  %163 = vmatprep.mubr.bf16.mxu0 %v337_v1  ;;  %v314_v2 = vld [vmem:[%s427_s1] ss:$8 sps:$4 sm:$0xff]   ;;  %v315_v3 = vld [vmem:[%s427_s1 + $0x14] ss:$8 sps:$4 sm:$0xff]   ;;  %v221_v38 = vunpack.c.l.s4 %v338_v37 }
   0x2   :  { %131 = vmatprep.subr.bf16.mxu0 %v312_v0  ;;  %v317_v4 = vld [vmem:[%s427_s1 + $0x10] ss:$8 sps:$4 sm:$0xff]   ;;  %v318_v5 = vld [vmem:[%s427_s1 + $0x24] ss:$8 sps:$4 sm:$0xff]   ;;  %v320_v6 = vld [vmem:[%s427_s1 + $0x20] ss:$8 sps:$4 sm:$0xff]  }
   0x3   :  { %132 = vmatpush1.bf16.msra.mxu0 %v314_v2  ;;  %v321_v7 = vld [vmem:[%s427_s1 + $0x34] ss:$8 sps:$4 sm:$0xff]   ;;  %v323_v8 = vld [vmem:[%s427_s1 + $0x30] ss:$8 sps:$4 sm:$0xff]   ;;  %v324_v9 = vld [vmem:[%s427_s1 + $0x44] ss:$8 sps:$4 sm:$0xff]   ;;  %v222_v48 = vunpack.c.0.s8 %v221_v38 }
   0x4   :  { %133 = vmatprep.subr.bf16.mxu0 %v315_v3  ;;  %v326_v10 = vld [vmem:[%s427_s1 + $0x40] ss:$8 sps:$4 sm:$0xff]   ;;  %v327_v11 = vld [vmem:[%s427_s1 + $0x54] ss:$8 sps:$4 sm:$0xff]   ;;  %v329_v12 = vld [vmem:[%s427_s1 + $0x50] ss:$8 sps:$4 sm:$0xff]  }
   0x5   :  { %v330_v13 = vld [vmem:[%s427_s1 + $0x64] ss:$8 sps:$4 sm:$0xff]   ;;  %v332_v14 = vld [vmem:[%s427_s1 + $0x60] ss:$8 sps:$4 sm:$0xff]   ;;  %v333_v15 = vld [vmem:[%s427_s1 + $0x74] ss:$8 sps:$4 sm:$0xff]  }
   0x6   :  { %v335_v16 = vld [vmem:[%s427_s1 + $0x70] ss:$8 sps:$4 sm:$0xff]   ;;  %v336_v17 = vld [vmem:[%s428_s0] sm:$0xff]   ;;  %v224_v49 = vshrl.u32 %v223_v39, 7  ;;  %vm237_vm0 = vcmp.lt.s32.totalorder %v223_v39, 256 }
   0x7   :  { %134 = vmatpush1.bf16.msra.mxu0 %v317_v4 }
   0x8   :  { %135 = vmatprep.subr.bf16.mxu0 %v318_v5  ;;  %v225_v58 = vsub.s32 %v222_v48, %v224_v49 }
   0xb   :  { %136 = vmatpush1.bf16.msra.mxu0 %v320_v6 }
   0xc   :  { %137 = vmatprep.subr.bf16.mxu0 %v321_v7 }
   0xf   :  { %138 = vmatpush1.bf16.msra.mxu0 %v323_v8 }
  0x10   :  { %139 = vmatprep.subr.bf16.mxu0 %v324_v9 }
  0x13   :  { %140 = vmatpush1.bf16.msra.mxu0 %v326_v10 }
  0x14   :  { %141 = vmatprep.subr.bf16.mxu0 %v327_v11 }
  0x17   :  { %142 = vmatpush1.bf16.msra.mxu0 %v329_v12 }
  0x18   :  { %143 = vmatprep.subr.bf16.mxu0 %v330_v13 }
  0x1b   :  { %144 = vmatpush1.bf16.msra.mxu0 %v332_v14 }
  0x1c   :  { %145 = vmatprep.subr.bf16.mxu0 %v333_v15 }
  0x1f   :  { %146 = vmatpush1.bf16.msra.mxu0 %v335_v16 }
  0x22   :  { %164 = vmatmul.mubr.bf16.vlgmr.msra.gmra.mrb[0].mxu0 %v336_v17 }
  0xf5   :  { %v165_v18 = vpop.f32.mrb[0].mxu0 }
  0xf6   :  { %v167_v19 = vpop.f32.mrb[1].mxu0  ;;  %v240_v22 = vmul.f32 %v165_v18, %v165_v18 }
  0xf7   :  { %v308_v20 = vpack.c.bf16 %v167_v19, %v165_v18  ;;  %v169_v21 = vpop.f32.mrb[2].mxu0  ;;  %v241_v26 = vmul.f32 %v167_v19, %v167_v19 }
  0xf8   :  { %v203_v23 = vadd.f32 %v169_v21, %v165_v18  ;;  %v242_v24 = vmul.f32 %v169_v21, %v169_v21  ;;  %v171_v25 = vpop.f32.mrb[3].mxu0 }
  0xf9   :  { %v309_v27 = vpack.c.bf16 %v171_v25, %v169_v21  ;;  %201 = vst [vmem:[%s429_s2] sm:$0xff] %v308_v20  ;;  %v210_v28 = vadd.f32 %v171_v25, %v167_v19  ;;  %v243_v29 = vmul.f32 %v171_v25, %v171_v25 }
  0xfa   :  { %v204_v30 = vrot.slane %v203_v23, 4  ;;  %v244_v31 = vadd.f32 %v242_v24, %v240_v22 }
  0xfb   :  { %202 = vst [vmem:[%s429_s2 + $0x8] sm:$0xff] %v309_v27  ;;  %v211_v32 = vrot.slane %v210_v28, 4  ;;  %v251_v33 = vadd.f32 %v243_v29, %v241_v26 }
  0xfc   :  { %v205_v34 = vadd.f32 %v204_v30, %v203_v23  ;;  %v245_v35 = vrot.slane %v244_v31, 4 }
  0xfd   :  { %v212_v36 = vadd.f32 %v211_v32, %v210_v28  ;;  %v252_v40 = vrot.slane %v251_v33, 4 }
  0xfe   :  { %v206_v41 = vrot.slane %v205_v34, 2  ;;  %v246_v42 = vadd.f32 %v245_v35, %v244_v31 }
  0xff   :  { %v213_v43 = vrot.slane %v212_v36, 2  ;;  %v253_v44 = vadd.f32 %v252_v40, %v251_v33 }
 0x100   :  { %v207_v45 = vadd.f32 %v206_v41, %v205_v34  ;;  %v247_v46 = vrot.slane %v246_v42, 2 }
 0x101   :  { %v214_v47 = vadd.f32 %v213_v43, %v212_v36  ;;  %v254_v50 = vrot.slane %v253_v44, 2 }
 0x102   :  { %v208_v51 = vrot.slane %v207_v45, 1  ;;  %v248_v52 = vadd.f32 %v247_v46, %v246_v42 }
 0x103   :  { %v215_v53 = vrot.slane %v214_v47, 1  ;;  %v255_v54 = vadd.f32 %v254_v50, %v253_v44 }
 0x104   :  { %v209_v55 = vadd.f32 %v208_v51, %v207_v45  ;;  %v249_v56 = vrot.slane %v248_v52, 1 }
 0x105   :  { %v216_v57 = vadd.f32 %v215_v53, %v214_v47  ;;  %v256_v59 = vrot.slane %v255_v54, 1 }
 0x106   :  { %v250_v60 = vadd.f32 %v249_v56, %v248_v52 }
 0x107   :  { %v219_v61 = vcombine.low %v209_v55, %v216_v57  ;;  %v257_v62 = vadd.f32 %v256_v59, %v255_v54 }
 0x109   :  { %v226_v63 = vrot.slane %v219_v61, %v225_v58  ;;  %v260_v0 = vcombine.low %v250_v60, %v257_v62 }
 0x10b   :  { %v233_v1 = vrot.slane %v226_v63, %v225_v58  ;;  %v267_v2 = vrot.slane %v260_v0, %v225_v58 }
 0x10d   :  { %239 = vst.msk [vmem:[%s430_s3] sm:$0x3] %vm237_vm0, %v233_v1  ;;  %v274_v3 = vrot.slane %v267_v2, %v225_v58 }
 0x10f   :  { %276 = vst.msk [vmem:[%s431_s4] sm:$0x3] %vm237_vm0, %v274_v3 }

// kernel: resnet_forward.41
= control target key start
LH: loop header
LB: loop body
LE: loop exit
PB: predicated region body
PF: predicated region fallthrough
CT: control target
= control target key end

     0   :  { %s1336_s15 = smov 0   ;;  %s1338_s16 = smov 0   ;;  %s1470_s0 = inlined_call_operand.vmem [shape: bf16[16,1152], index: 0, kind: input, shape index: {}]   ;;  %s1471_s1 = inlined_call_operand.vmem [shape: bf16[1152,256], index: 1, kind: input, shape index: {}]   ;;  %s1472_s2 = inlined_call_operand.vmem [shape: bf16[16,256], index: 2, kind: output, shape index: {0}]   ;;  %s1473_s3 = inlined_call_operand.vmem [shape: f32[1,1,256], index: 3, kind: output, shape index: {1}]   ;;  %s1474_s4 = inlined_call_operand.vmem [shape: f32[1,1,256], index: 4, kind: output, shape index: {2}]  }
   0x1   :  { %s1340_s17 = smov 0   ;;  %s1342_s18 = smov 0  }
   0x2   :  { %s1344_s19 = smov 0  }
   0x3 LB: > { %s27_s20 = sadd.s32 1, %s1302_s18  ;;  %p50_p1 = scmp.ne.s32.totalorder %s1294_s16, %s1290_s15  ;;  %s1306_s19 = sphi %s1344_s19, %s15_s19   ;;  %s1302_s18 = sphi %s1342_s18, %s1478_s18   ;;  %s1298_s17 = sphi %s1340_s17, %s1477_s17   ;;  %s1294_s16 = sphi %s1338_s16, %s1476_s16   ;;  %s1290_s15 = sphi %s1336_s15, %s1475_s15  }
   0x4   : > { %p28_p0 = scmp.ge.s32.totalorder %s27_s20, 3  ;;  %p51_p2 = scmp.eq.s32.totalorder %s1306_s19, 0 }
   0x5   : > { %s43_s22 = sadd.s32 1, %s1294_s16  ;;  %p1067_p5 = scmp.ge.s32.totalorder %s1306_s19, 3 }
   0x6   : > { %s1480_s20 = smov (%p28_p0, %s27_s20), 0  ;;  %p52_p3 = por %p51_p2, %p50_p1 }
   0x7   : > { %s39_s21 = ssub.s32 %s1302_s18, %s1480_s20  ;;  %188 = sbr.rel (%p1067_p5) target bundleno = 21 (0x15), region = 16 }
   0x8   : > { %p41_p4 = scmp.eq.s32.totalorder %s39_s21, 0 }
   0xa   : > { %s1371_s23 = scalar_select %p41_p4, %s1294_s16, %s43_s22  }
   0xe   : > { %191 = sbr.rel (!%p52_p3) target bundleno = 21 (0x15), region = 20  ;;  %s193_s24 = sand.u32 (%p52_p3), 1, %s1294_s16  }
   0xf   : > { %s1139_s25 = smul.u32 (%p52_p3), 12, %s1302_s18 }
  0x10   : > { %s1147_s26 = smul.u32 (%p52_p3), 24, %s193_s24 }
  0x11   : > { %s201_s29 = scalar_lea.vmem (%p52_p3), %s1470_s0, %s1139_s25 }
  0x12   : > { %v216_v0 = vld [vmem:[%s201_s29] sm:$0xff] (%p52_p3)  ;;  %v1069_v2 = vld [vmem:[%s201_s29 + $0x8] sm:$0xf] (%p52_p3)  ;;  %s195_s30 = scalar_lea.vmem (%p52_p3), [#allocation3], %s1147_s26  ;;  %v1071_v3 = vld [vmem:[%s201_s29 + $0x2c] sm:$0xf] (%p52_p3) }
  0x13   : > { %v218_v1 = vld [vmem:[%s201_s29 + $0x24] sm:$0xff] (%p52_p3)  ;;  %217 = vst [vmem:[%s195_s30] sm:$0xff] (%p52_p3), %v216_v0  ;;  %1070 = vst [vmem:[%s195_s30 + $0x8] sm:$0xf] (%p52_p3), %v1069_v2 }
  0x14   : > { %219 = vst [vmem:[%s195_s30 + $0xc] sm:$0xff] (%p52_p3), %v218_v1  ;;  %1072 = vst [vmem:[%s195_s30 + $0x14] sm:$0xf] (%p52_p3), %v1071_v3 }
  0x15 PF: > { %p1073_p6 = scmp.ge.s32.totalorder %s1306_s19, 1  ;;  %p250_p7 = scmp.lt.s32.totalorder %s1306_s19, 4 }
  0x17   : > { %p251_p8 = pnand %p1073_p6, %p250_p7 }
  0x18   : > { %s257_s5 = sand.u32 (!%p251_p8), 1, %s1290_s15   ;;  %s315_s6 = smul.u32 (!%p251_p8), 48, %s1298_s17 }
  0x19   : > { %254 = sbr.rel (%p251_p8) target bundleno = 354 (0x162), region = 50  ;;  %p1076_p10 = scmp.ne.s32.totalorder (!%p251_p8), %s1298_s17, 0 }
  0x1a   : > { %s1148_s7 = smul.u32 (!%p251_p8), 24, %s257_s5  ;;  %p317_p9 = scmp.lt.s32.totalorder (!%p251_p8), %s315_s6, 143 }
  0x1c   : > { %s1388_s12 = scalar_lea.vmem (!%p251_p8), [#allocation3], %s1148_s7 }
  0x20   : > { %s1482_s6 = smov (!%p317_p9, %s315_s6), 143  ;;  %361 = sbr.rel (%p1076_p10) target bundleno = 39 (0x27), region = 58 }
  0x21   : > { %s1140_s8 = sshll.u32 %s1482_s6, 3  ;;  %v1308_v4 = vmov (!%p1076_p10), 0.0  }
  0x22   : > { %s1386_s11 = scalar_lea.vmem %s1471_s1, %s1140_s8  ;;  %362 = vst [vmem:[#allocation2] sm:$0xff] (!%p1076_p10), %v1308_v4  ;;  %363 = vst [vmem:[#allocation2 + $0x8] sm:$0xff] (!%p1076_p10), %v1308_v4 }
  0x23   : > { %364 = vst [vmem:[#allocation2 + $0x10] sm:$0xff] (!%p1076_p10), %v1308_v4  ;;  %365 = vst [vmem:[#allocation2 + $0x18] sm:$0xff] (!%p1076_p10), %v1308_v4 }
  0x27 PF: > { %v1192_v5 = vld [vmem:[%s1386_s11 + $0x4] ss:$8 sps:$4 sm:$0xff]   ;;  %v1194_v6 = vld [vmem:[%s1386_s11] ss:$8 sps:$4 sm:$0xff]   ;;  %v1309_v7 = vmov 0   ;;  %p1128_p11 = scmp.ne.s32.totalorder %s1298_s17, 2 }
  0x28   : > { %753 = vmatprep.mubr.bf16.mxu0 %v1309_v7  ;;  %678 = vmatprep.subr.bf16.mxu1 %v1192_v5  ;;  %v1195_v8 = vld [vmem:[%s1386_s11 + $0x14] ss:$8 sps:$4 sm:$0xff]   ;;  %v1197_v9 = vld [vmem:[%s1386_s11 + $0x10] ss:$8 sps:$4 sm:$0xff]   ;;  %v1198_v10 = vld [vmem:[%s1386_s11 + $0x24] ss:$8 sps:$4 sm:$0xff]  }
  0x29   : > { %679 = vmatpush1.bf16.msra.mxu1 %v1194_v6  ;;  %v1200_v11 = vld [vmem:[%s1386_s11 + $0x20] ss:$8 sps:$4 sm:$0xff]   ;;  %v1201_v12 = vld [vmem:[%s1386_s11 + $0x34] ss:$8 sps:$4 sm:$0xff]   ;;  %v1203_v13 = vld [vmem:[%s1386_s11 + $0x30] ss:$8 sps:$4 sm:$0xff]  }
  0x2a   : > { %680 = vmatprep.subr.bf16.mxu1 %v1195_v8  ;;  %v1216_v14 = vld [vmem:[%s1386_s11 + $0x104] ss:$8 sps:$4 sm:$0xff]   ;;  %v1218_v15 = vld [vmem:[%s1386_s11 + $0x100] ss:$8 sps:$4 sm:$0xff]   ;;  %v1222_v17 = vld [vmem:[%s1386_s11 + $0x114] ss:$8 sps:$4 sm:$0xff]  }
  0x2b   : > { %v1204_v16 = vld [vmem:[%s1386_s11 + $0x44] ss:$8 sps:$4 sm:$0xff]   ;;  %721 = vmatprep.subr.bf16.mxu0 %v1216_v14  ;;  %v1224_v18 = vld [vmem:[%s1386_s11 + $0x110] ss:$8 sps:$4 sm:$0xff]   ;;  %v1206_v19 = vld [vmem:[%s1386_s11 + $0x40] ss:$8 sps:$4 sm:$0xff]  }
  0x2c   : > { %722 = vmatpush1.bf16.msra.mxu0 %v1218_v15  ;;  %v1207_v20 = vld [vmem:[%s1386_s11 + $0x54] ss:$8 sps:$4 sm:$0xff]   ;;  %v1228_v21 = vld [vmem:[%s1386_s11 + $0x124] ss:$8 sps:$4 sm:$0xff]   ;;  %v1230_v22 = vld [vmem:[%s1386_s11 + $0x120] ss:$8 sps:$4 sm:$0xff]  }
  0x2d   : > { %681 = vmatpush1.bf16.msra.mxu1 %v1197_v9  ;;  %723 = vmatprep.subr.bf16.mxu0 %v1222_v17  ;;  %v1209_v23 = vld [vmem:[%s1386_s11 + $0x50] ss:$8 sps:$4 sm:$0xff]   ;;  %v1234_v24 = vld [vmem:[%s1386_s11 + $0x134] ss:$8 sps:$4 sm:$0xff]   ;;  %v1210_v25 = vld [vmem:[%s1386_s11 + $0x64] ss:$8 sps:$4 sm:$0xff]  }
  0x2e   : > { %682 = vmatprep.subr.bf16.mxu1 %v1198_v10  ;;  %v1236_v26 = vld [vmem:[%s1386_s11 + $0x130] ss:$8 sps:$4 sm:$0xff]   ;;  %v1212_v27 = vld [vmem:[%s1386_s11 + $0x60] ss:$8 sps:$4 sm:$0xff]   ;;  %v1240_v28 = vld [vmem:[%s1386_s11 + $0x144] ss:$8 sps:$4 sm:$0xff]  }
  0x2f   : > { %v1213_v29 = vld [vmem:[%s1386_s11 + $0x74] ss:$8 sps:$4 sm:$0xff]   ;;  %v1242_v30 = vld [vmem:[%s1386_s11 + $0x140] ss:$8 sps:$4 sm:$0xff]   ;;  %v1215_v31 = vld [vmem:[%s1386_s11 + $0x70] ss:$8 sps:$4 sm:$0xff]  }
  0x30   : > { %724 = vmatpush1.bf16.msra.mxu0 %v1224_v18  ;;  %v1246_v32 = vld [vmem:[%s1386_s11 + $0x154] ss:$8 sps:$4 sm:$0xff]   ;;  %v1219_v33 = vld [vmem:[%s1386_s11 + $0x84] ss:$8 sps:$4 sm:$0xff]   ;;  %v1248_v34 = vld [vmem:[%s1386_s11 + $0x150] ss:$8 sps:$4 sm:$0xff]  }
  0x31   : > { %683 = vmatpush1.bf16.msra.mxu1 %v1200_v11  ;;  %725 = vmatprep.subr.bf16.mxu0 %v1228_v21  ;;  %v1221_v35 = vld [vmem:[%s1386_s11 + $0x80] ss:$8 sps:$4 sm:$0xff]   ;;  %v1252_v36 = vld [vmem:[%s1386_s11 + $0x164] ss:$8 sps:$4 sm:$0xff]   ;;  %v1225_v37 = vld [vmem:[%s1386_s11 + $0x94] ss:$8 sps:$4 sm:$0xff]  }
  0x32   : > { %684 = vmatprep.subr.bf16.mxu1 %v1201_v12  ;;  %v1254_v38 = vld [vmem:[%s1386_s11 + $0x160] ss:$8 sps:$4 sm:$0xff]   ;;  %v1227_v40 = vld [vmem:[%s1386_s11 + $0x90] ss:$8 sps:$4 sm:$0xff]   ;;  %v1258_v41 = vld [vmem:[%s1386_s11 + $0x174] ss:$8 sps:$4 sm:$0xff]  }
  0x33   : > { %v1267_v39 = vld [vmem:[%s1388_s12 + $0x4] ss:$12 sps:$4 sm:$0xff]   ;;  %v1264_v46 = vld [vmem:[%s1388_s12 + $0x8] ss:$12 sps:$4 sm:$0xff]   ;;  %v1265_v56 = vld [vmem:[%s1388_s12] ss:$12 sps:$4 sm:$0xff]  }
  0x34   : > { %726 = vmatpush1.bf16.msra.mxu0 %v1230_v22  ;;  %v1231_v42 = vld [vmem:[%s1386_s11 + $0xa4] ss:$8 sps:$4 sm:$0xff]   ;;  %710 = vmatprep.mubr.bf16.mxu1 %v1267_v39  ;;  %v1260_v43 = vld [vmem:[%s1386_s11 + $0x170] ss:$8 sps:$4 sm:$0xff]   ;;  %v1233_v44 = vld [vmem:[%s1386_s11 + $0xa0] ss:$8 sps:$4 sm:$0xff]  }
  0x35   : > { %685 = vmatpush1.bf16.msra.mxu1 %v1203_v13  ;;  %727 = vmatprep.subr.bf16.mxu0 %v1234_v24  ;;  %v1237_v45 = vld [vmem:[%s1386_s11 + $0xb4] ss:$8 sps:$4 sm:$0xff]   ;;  %v1239_v47 = vld [vmem:[%s1386_s11 + $0xb0] ss:$8 sps:$4 sm:$0xff]   ;;  %v1243_v48 = vld [vmem:[%s1386_s11 + $0xc4] ss:$8 sps:$4 sm:$0xff]  }
  0x36   : > { %686 = vmatprep.subr.bf16.mxu1 %v1204_v16  ;;  %v1245_v49 = vld [vmem:[%s1386_s11 + $0xc0] ss:$8 sps:$4 sm:$0xff]   ;;  %v1249_v50 = vld [vmem:[%s1386_s11 + $0xd4] ss:$8 sps:$4 sm:$0xff]   ;;  %v1251_v51 = vld [vmem:[%s1386_s11 + $0xd0] ss:$8 sps:$4 sm:$0xff]  }
  0x37   : > { %v1255_v52 = vld [vmem:[%s1386_s11 + $0xe4] ss:$8 sps:$4 sm:$0xff]   ;;  %v1257_v53 = vld [vmem:[%s1386_s11 + $0xe0] ss:$8 sps:$4 sm:$0xff]   ;;  %v1261_v54 = vld [vmem:[%s1386_s11 + $0xf4] ss:$8 sps:$4 sm:$0xff]  }
  0x38   : > { %728 = vmatpush1.bf16.msra.mxu0 %v1236_v26  ;;  %v1263_v55 = vld [vmem:[%s1386_s11 + $0xf0] ss:$8 sps:$4 sm:$0xff]   ;;  %v366_v61 = vld [vmem:[#allocation2] sm:$0xff]  ;;  %v367_v0 = vld [vmem:[#allocation2 + $0x8] sm:$0xff] }
  0x39   : > { %687 = vmatpush1.bf16.msra.mxu1 %v1206_v19  ;;  %729 = vmatprep.subr.bf16.mxu0 %v1240_v28  ;;  %v368_v3 = vld [vmem:[#allocation2 + $0x10] sm:$0xff]  ;;  %v369_v7 = vld [vmem:[#allocation2 + $0x18] sm:$0xff] }
  0x3a   : > { %688 = vmatprep.subr.bf16.mxu1 %v1207_v20 }
  0x3c   : > { %730 = vmatpush1.bf16.msra.mxu0 %v1242_v30  ;;  %v814_v30 = vlaneseq (!%p1128_p11) }
  0x3d   : > { %689 = vmatpush1.bf16.msra.mxu1 %v1209_v23  ;;  %731 = vmatprep.subr.bf16.mxu0 %v1246_v32 }
  0x3e   : > { %690 = vmatprep.subr.bf16.mxu1 %v1210_v25  ;;  %vm828_vm0 = vcmp.lt.s32.totalorder (!%p1128_p11), %v814_v30, 256 }
  0x40   : > { %732 = vmatpush1.bf16.msra.mxu0 %v1248_v34  ;;  %v1310_v34 = vmov (!%p1128_p11), 1966171168  }
  0x41   : > { %691 = vmatpush1.bf16.msra.mxu1 %v1212_v27  ;;  %733 = vmatprep.subr.bf16.mxu0 %v1252_v36 }
  0x42   : > { %692 = vmatprep.subr.bf16.mxu1 %v1213_v29 }
  0x44   : > { %734 = vmatpush1.bf16.msra.mxu0 %v1254_v38 }
  0x45   : > { %693 = vmatpush1.bf16.msra.mxu1 %v1215_v31  ;;  %735 = vmatprep.subr.bf16.mxu0 %v1258_v41  ;;  %v815_v41 = vshrl.u32 (!%p1128_p11), %v814_v30, 7 }
  0x46   : > { %694 = vmatprep.subr.bf16.mxu1 %v1219_v33 }
  0x48   : > { %736 = vmatpush1.bf16.msra.mxu0 %v1260_v43 }
  0x49   : > { %695 = vmatpush1.bf16.msra.mxu1 %v1221_v35  ;;  %v812_v35 = vunpack.c.l.s4 (!%p1128_p11), %v1310_v34 }
  0x4a   : > { %696 = vmatprep.subr.bf16.mxu1 %v1225_v37 }
  0x4b   : > { %754 = vmatmul.mubr.bf16.vlgmr.msra.gmra.mrb[0].mxu0 %v1264_v46 }
  0x4d   : > { %697 = vmatpush1.bf16.msra.mxu1 %v1227_v40 }
  0x4e   : > { %698 = vmatprep.subr.bf16.mxu1 %v1231_v42 }
  0x51   : > { %699 = vmatpush1.bf16.msra.mxu1 %v1233_v44 }
  0x52   : > { %700 = vmatprep.subr.bf16.mxu1 %v1237_v45  ;;  %v813_v45 = vunpack.c.0.s8 (!%p1128_p11), %v812_v35 }
  0x55   : > { %701 = vmatpush1.bf16.msra.mxu1 %v1239_v47 }
  0x56   : > { %702 = vmatprep.subr.bf16.mxu1 %v1243_v48 }
  0x59   : > { %703 = vmatpush1.bf16.msra.mxu1 %v1245_v49 }
  0x5a   : > { %704 = vmatprep.subr.bf16.mxu1 %v1249_v50 }
  0x5d   : > { %705 = vmatpush1.bf16.msra.mxu1 %v1251_v51 }
  0x5e   : > { %706 = vmatprep.subr.bf16.mxu1 %v1255_v52  ;;  %v816_v52 = vsub.s32 (!%p1128_p11), %v813_v45, %v815_v41 }
  0x61   : > { %707 = vmatpush1.bf16.msra.mxu1 %v1257_v53 }
  0x62   : > { %708 = vmatprep.subr.bf16.mxu1 %v1261_v54 }
  0x65   : > { %709 = vmatpush1.bf16.msra.mxu1 %v1263_v55 }
  0x68   : > { %711 = vmatmul.mubr.bf16.vlgmr.msra.gmra.mrb[0].mxu1 %v1265_v56 }
 0x11e   : > { %v755_v57 = vpop.f32.mrb[0].mxu0 }
 0x11f   : > { %v757_v58 = vpop.f32.mrb[1].mxu0 }
 0x120   : > { %v759_v59 = vpop.f32.mrb[2].mxu0 }
 0x121   : > { %v761_v60 = vpop.f32.mrb[3].mxu0 }
 0x13b   : > { %v712_v62 = vpop.f32.mrb[0].mxu1 }
 0x13c   : > { %v756_v63 = vadd.f32 %v755_v57, %v712_v62  ;;  %v714_v1 = vpop.f32.mrb[1].mxu1 }
 0x13d   : > { %v758_v2 = vadd.f32 %v757_v58, %v714_v1  ;;  %v716_v4 = vpop.f32.mrb[2].mxu1  ;;  %775 = sbr.rel (%p1128_p11) target bundleno = 354 (0x162), region = 62 }
 0x13e   : > { %v764_v5 = vadd.f32 %v756_v63, %v366_v61  ;;  %v760_v6 = vadd.f32 %v759_v59, %v716_v4  ;;  %v718_v8 = vpop.f32.mrb[3].mxu1 }
 0x13f   : > { %v765_v9 = vadd.f32 %v758_v2, %v367_v0  ;;  %v762_v10 = vadd.f32 %v761_v60, %v718_v8 }
 0x140   : > { %768 = vst [vmem:[#allocation2] sm:$0xff] %v764_v5  ;;  %v766_v11 = vadd.f32 %v760_v6, %v368_v3 }
 0x141   : > { %769 = vst [vmem:[#allocation2 + $0x8] sm:$0xff] %v765_v9  ;;  %v767_v12 = vadd.f32 %v762_v10, %v369_v7 }
 0x142   : > { %770 = vst [vmem:[#allocation2 + $0x10] sm:$0xff] %v766_v11 }
 0x143   : > { %771 = vst [vmem:[#allocation2 + $0x18] sm:$0xff] %v767_v12 }
 0x147   : > { %v776_v13 = vld [vmem:[#allocation2] sm:$0xff] }
 0x148   : > { %v777_v14 = vld [vmem:[#allocation2 + $0x8] sm:$0xff]  ;;  %v831_v17 = vmul.f32 %v776_v13, %v776_v13 }
 0x149   : > { %v778_v15 = vld [vmem:[#allocation2 + $0x10] sm:$0xff]  ;;  %v1141_v16 = vpack.c.bf16 %v777_v14, %v776_v13  ;;  %v832_v18 = vmul.f32 %v777_v14, %v777_v14 }
 0x14a   : > { %v779_v19 = vld [vmem:[#allocation2 + $0x18] sm:$0xff]  ;;  %v794_v20 = vadd.f32 %v778_v15, %v776_v13  ;;  %v833_v23 = vmul.f32 %v778_v15, %v778_v15 }
 0x14b   : > { %v1142_v21 = vpack.c.bf16 %v779_v19, %v778_v15  ;;  %v801_v22 = vadd.f32 %v779_v19, %v777_v14  ;;  %v834_v24 = vmul.f32 %v779_v19, %v779_v19  ;;  %792 = vst [vmem:[%s1472_s2] sm:$0xff] %v1141_v16 }
 0x14c   : > { %v795_v25 = vrot.slane %v794_v20, 4  ;;  %v835_v27 = vadd.f32 %v833_v23, %v831_v17 }
 0x14d   : > { %793 = vst [vmem:[%s1472_s2 + $0x8] sm:$0xff] %v1142_v21  ;;  %v802_v26 = vrot.slane %v801_v22, 4  ;;  %v842_v28 = vadd.f32 %v834_v24, %v832_v18 }
 0x14e   : > { %v796_v29 = vadd.f32 %v795_v25, %v794_v20  ;;  %v836_v32 = vrot.slane %v835_v27, 4 }
 0x14f   : > { %v803_v31 = vadd.f32 %v802_v26, %v801_v22  ;;  %v843_v33 = vrot.slane %v842_v28, 4 }
 0x150   : > { %v797_v36 = vrot.slane %v796_v29, 2  ;;  %v837_v38 = vadd.f32 %v836_v32, %v835_v27 }
 0x151   : > { %v804_v37 = vrot.slane %v803_v31, 2  ;;  %v844_v39 = vadd.f32 %v843_v33, %v842_v28 }
 0x152   : > { %v798_v40 = vadd.f32 %v797_v36, %v796_v29  ;;  %v838_v43 = vrot.slane %v837_v38, 2 }
 0x153   : > { %v805_v42 = vadd.f32 %v804_v37, %v803_v31  ;;  %v845_v44 = vrot.slane %v844_v39, 2 }
 0x154   : > { %v799_v46 = vrot.slane %v798_v40, 1  ;;  %v839_v48 = vadd.f32 %v838_v43, %v837_v38 }
 0x155   : > { %v806_v47 = vrot.slane %v805_v42, 1  ;;  %v846_v49 = vadd.f32 %v845_v44, %v844_v39 }
 0x156   : > { %v800_v50 = vadd.f32 %v799_v46, %v798_v40  ;;  %v840_v53 = vrot.slane %v839_v48, 1 }
 0x157   : > { %v807_v51 = vadd.f32 %v806_v47, %v805_v42  ;;  %v847_v54 = vrot.slane %v846_v49, 1 }
 0x158   : > { %v841_v56 = vadd.f32 %v840_v53, %v839_v48 }
 0x159   : > { %v810_v55 = vcombine.low %v800_v50, %v807_v51  ;;  %v848_v57 = vadd.f32 %v847_v54, %v846_v49 }
 0x15b   : > { %v817_v58 = vrot.slane %v810_v55, %v816_v52  ;;  %v851_v59 = vcombine.low %v841_v56, %v848_v57 }
 0x15d   : > { %v824_v60 = vrot.slane %v817_v58, %v816_v52  ;;  %v858_v61 = vrot.slane %v851_v59, %v816_v52 }
 0x15f   : > { %830 = vst.msk [vmem:[%s1473_s3] sm:$0x3] %vm828_vm0, %v824_v60  ;;  %v865_v62 = vrot.slane %v858_v61, %v816_v52 }
 0x161   : > { %867 = vst.msk [vmem:[%s1474_s4] sm:$0x3] %vm828_vm0, %v865_v62 }
 0x162 PF: > { %s15_s19 = sadd.s32 1, %s1306_s19   ;;  %s1475_s15 = smov %s1294_s16 }
 0x163   : > { %p12_p12 = scmp.ge.s32.totalorder %s15_s19, 5   ;;  %s1476_s16 = smov %s1371_s23 }
 0x164   : > { %s1477_s17 = smov %s1302_s18  ;;  %s1478_s18 = smov %s1480_s20 }
 0x165   :  { %14 = sbr.rel (!%p12_p12) target bundleno = 3 (0x3), region = 130 }

// kernel: resnet_forward.42
= control target key start
LH: loop header
LB: loop body
LE: loop exit
PB: predicated region body
PF: predicated region fallthrough
CT: control target
= control target key end

     0   :  { %v19_v0 = vlaneseq  ;;  %s94_s0 = inlined_call_operand.vmem [shape: bf16[8,256], index: 0, kind: input, shape index: {}]   ;;  %s95_s1 = inlined_call_operand.vmem [shape: f32[1,256], index: 1, kind: input, shape index: {}]   ;;  %s96_s2 = inlined_call_operand.vmem [shape: f32[1,256], index: 2, kind: input, shape index: {}]   ;;  %s97_s3 = inlined_call_operand.vmem [shape: bf16[8,256], index: 3, kind: output, shape index: {}]  }
   0x1   :  { %v14_v1 = vld [vmem:[%s94_s0] sm:$0xff] }
   0x2   :  { %v20_v2 = vshrl.u32 %v19_v0, 7  ;;  %v17_v3 = vld [vmem:[%s95_s1] sm:$0x3]  ;;  %v15_v5 = vunpack.c.l.bf16 %v14_v1  ;;  %v16_v6 = vunpack.c.h.bf16 %v14_v1 }
   0x3   :  { %v31_v4 = vld [vmem:[%s96_s2] sm:$0x3] }
   0x4   :  { %v21_v7 = vsub.s32 0, %v20_v2  ;;  %v25_v8 = vsub.s32 1, %v20_v2 }
   0x6   :  { %v22_v9 = vrot.slane %v17_v3, %v21_v7  ;;  %v26_v10 = vrot.slane %v17_v3, %v25_v8  ;;  %v36_v11 = vrot.slane %v31_v4, %v21_v7  ;;  %v40_v12 = vrot.slane %v31_v4, %v25_v8 }
   0x8   :  { %v29_v13 = vmul.f32 %v22_v9, %v15_v5  ;;  %v30_v14 = vmul.f32 %v26_v10, %v16_v6 }
   0xa   :  { %v43_v15 = vadd.f32 %v36_v11, %v29_v13  ;;  %v44_v16 = vadd.f32 %v40_v12, %v30_v14 }
   0xc   :  { %v45_v17 = vmax.f32 %v43_v15, 0.0  ;;  %v46_v18 = vmax.f32 %v44_v16, 0.0 }
   0xe   :  { %v61_v19 = vpack.c.bf16 %v46_v18, %v45_v17 }
  0x10   :  { %55 = vst [vmem:[%s97_s3] sm:$0xff] %v61_v19 }

// kernel: resnet_forward.45
= control target key start
LH: loop header
LB: loop body
LE: loop exit
PB: predicated region body
PF: predicated region fallthrough
CT: control target
= control target key end

     0   :  { %s1336_s15 = smov 0   ;;  %s1338_s16 = smov 0   ;;  %s1470_s0 = inlined_call_operand.vmem [shape: bf16[16,2304], index: 0, kind: input, shape index: {}]   ;;  %s1471_s1 = inlined_call_operand.vmem [shape: bf16[2304,256], index: 1, kind: input, shape index: {}]   ;;  %s1472_s2 = inlined_call_operand.vmem [shape: bf16[16,256], index: 2, kind: output, shape index: {0}]   ;;  %s1473_s3 = inlined_call_operand.vmem [shape: f32[1,1,256], index: 3, kind: output, shape index: {1}]   ;;  %s1474_s4 = inlined_call_operand.vmem [shape: f32[1,1,256], index: 4, kind: output, shape index: {2}]  }
   0x1   :  { %s1340_s17 = smov 0   ;;  %s1342_s18 = smov 0  }
   0x2   :  { %s1344_s19 = smov 0  }
   0x3 LB: > { %s27_s20 = sadd.s32 1, %s1302_s18  ;;  %p50_p1 = scmp.ne.s32.totalorder %s1294_s16, %s1290_s15  ;;  %s1306_s19 = sphi %s1344_s19, %s15_s19   ;;  %s1302_s18 = sphi %s1342_s18, %s1478_s18   ;;  %s1298_s17 = sphi %s1340_s17, %s1477_s17   ;;  %s1294_s16 = sphi %s1338_s16, %s1476_s16   ;;  %s1290_s15 = sphi %s1336_s15, %s1475_s15  }
   0x4   : > { %p28_p0 = scmp.ge.s32.totalorder %s27_s20, 6  ;;  %p51_p2 = scmp.eq.s32.totalorder %s1306_s19, 0 }
   0x5   : > { %s43_s22 = sadd.s32 1, %s1294_s16  ;;  %p1067_p5 = scmp.ge.s32.totalorder %s1306_s19, 6 }
   0x6   : > { %s1480_s20 = smov (%p28_p0, %s27_s20), 0  ;;  %p52_p3 = por %p51_p2, %p50_p1 }
   0x7   : > { %s39_s21 = ssub.s32 %s1302_s18, %s1480_s20  ;;  %188 = sbr.rel (%p1067_p5) target bundleno = 21 (0x15), region = 16 }
   0x8   : > { %p41_p4 = scmp.eq.s32.totalorder %s39_s21, 0 }
   0xa   : > { %s1371_s23 = scalar_select %p41_p4, %s1294_s16, %s43_s22  }
   0xe   : > { %191 = sbr.rel (!%p52_p3) target bundleno = 21 (0x15), region = 20  ;;  %s193_s24 = sand.u32 (%p52_p3), 1, %s1294_s16  }
   0xf   : > { %s1139_s25 = smul.u32 (%p52_p3), 12, %s1302_s18 }
  0x10   : > { %s1147_s26 = smul.u32 (%p52_p3), 24, %s193_s24 }
  0x11   : > { %s201_s29 = scalar_lea.vmem (%p52_p3), %s1470_s0, %s1139_s25 }
  0x12   : > { %v216_v0 = vld [vmem:[%s201_s29] sm:$0xff] (%p52_p3)  ;;  %v218_v1 = vld [vmem:[%s201_s29 + $0x48] sm:$0xff] (%p52_p3)  ;;  %s195_s30 = scalar_lea.vmem (%p52_p3), [#allocation3], %s1147_s26  ;;  %v1071_v3 = vld [vmem:[%s201_s29 + $0x50] sm:$0xf] (%p52_p3) }
  0x13   : > { %v1069_v2 = vld [vmem:[%s201_s29 + $0x8] sm:$0xf] (%p52_p3)  ;;  %217 = vst [vmem:[%s195_s30] sm:$0xff] (%p52_p3), %v216_v0  ;;  %219 = vst [vmem:[%s195_s30 + $0xc] sm:$0xff] (%p52_p3), %v218_v1 }
  0x14   : > { %1070 = vst [vmem:[%s195_s30 + $0x8] sm:$0xf] (%p52_p3), %v1069_v2  ;;  %1072 = vst [vmem:[%s195_s30 + $0x14] sm:$0xf] (%p52_p3), %v1071_v3 }
  0x15 PF: > { %p1073_p6 = scmp.ge.s32.totalorder %s1306_s19, 1  ;;  %p250_p7 = scmp.lt.s32.totalorder %s1306_s19, 7 }
  0x17   : > { %p251_p8 = pnand %p1073_p6, %p250_p7 }
  0x18   : > { %s257_s5 = sand.u32 (!%p251_p8), 1, %s1290_s15   ;;  %s315_s6 = smul.u32 (!%p251_p8), 48, %s1298_s17 }
  0x19   : > { %254 = sbr.rel (%p251_p8) target bundleno = 354 (0x162), region = 50  ;;  %p1076_p10 = scmp.ne.s32.totalorder (!%p251_p8), %s1298_s17, 0 }
  0x1a   : > { %s1148_s7 = smul.u32 (!%p251_p8), 24, %s257_s5  ;;  %p317_p9 = scmp.lt.s32.totalorder (!%p251_p8), %s315_s6, 287 }
  0x1c   : > { %s1388_s12 = scalar_lea.vmem (!%p251_p8), [#allocation3], %s1148_s7 }
  0x20   : > { %s1482_s6 = smov (!%p317_p9, %s315_s6), 287  ;;  %361 = sbr.rel (%p1076_p10) target bundleno = 39 (0x27), region = 58 }
  0x21   : > { %s1140_s8 = sshll.u32 %s1482_s6, 3  ;;  %v1308_v4 = vmov (!%p1076_p10), 0.0  }
  0x22   : > { %s1386_s11 = scalar_lea.vmem %s1471_s1, %s1140_s8  ;;  %362 = vst [vmem:[#allocation2] sm:$0xff] (!%p1076_p10), %v1308_v4  ;;  %363 = vst [vmem:[#allocation2 + $0x8] sm:$0xff] (!%p1076_p10), %v1308_v4 }
  0x23   : > { %364 = vst [vmem:[#allocation2 + $0x10] sm:$0xff] (!%p1076_p10), %v1308_v4  ;;  %365 = vst [vmem:[#allocation2 + $0x18] sm:$0xff] (!%p1076_p10), %v1308_v4 }
  0x27 PF: > { %v1192_v5 = vld [vmem:[%s1386_s11 + $0x4] ss:$8 sps:$4 sm:$0xff]   ;;  %v1194_v6 = vld [vmem:[%s1386_s11] ss:$8 sps:$4 sm:$0xff]   ;;  %v1309_v7 = vmov 0   ;;  %p1128_p11 = scmp.ne.s32.totalorder %s1298_s17, 5 }
  0x28   : > { %753 = vmatprep.mubr.bf16.mxu0 %v1309_v7  ;;  %678 = vmatprep.subr.bf16.mxu1 %v1192_v5  ;;  %v1195_v8 = vld [vmem:[%s1386_s11 + $0x14] ss:$8 sps:$4 sm:$0xff]   ;;  %v1197_v9 = vld [vmem:[%s1386_s11 + $0x10] ss:$8 sps:$4 sm:$0xff]   ;;  %v1198_v10 = vld [vmem:[%s1386_s11 + $0x24] ss:$8 sps:$4 sm:$0xff]  }
  0x29   : > { %679 = vmatpush1.bf16.msra.mxu1 %v1194_v6  ;;  %v1200_v11 = vld [vmem:[%s1386_s11 + $0x20] ss:$8 sps:$4 sm:$0xff]   ;;  %v1201_v12 = vld [vmem:[%s1386_s11 + $0x34] ss:$8 sps:$4 sm:$0xff]   ;;  %v1203_v13 = vld [vmem:[%s1386_s11 + $0x30] ss:$8 sps:$4 sm:$0xff]  }
  0x2a   : > { %680 = vmatprep.subr.bf16.mxu1 %v1195_v8  ;;  %v1216_v14 = vld [vmem:[%s1386_s11 + $0x104] ss:$8 sps:$4 sm:$0xff]   ;;  %v1218_v15 = vld [vmem:[%s1386_s11 + $0x100] ss:$8 sps:$4 sm:$0xff]   ;;  %v1222_v17 = vld [vmem:[%s1386_s11 + $0x114] ss:$8 sps:$4 sm:$0xff]  }
  0x2b   : > { %v1204_v16 = vld [vmem:[%s1386_s11 + $0x44] ss:$8 sps:$4 sm:$0xff]   ;;  %721 = vmatprep.subr.bf16.mxu0 %v1216_v14  ;;  %v1224_v18 = vld [vmem:[%s1386_s11 + $0x110] ss:$8 sps:$4 sm:$0xff]   ;;  %v1206_v19 = vld [vmem:[%s1386_s11 + $0x40] ss:$8 sps:$4 sm:$0xff]  }
  0x2c   : > { %722 = vmatpush1.bf16.msra.mxu0 %v1218_v15  ;;  %v1207_v20 = vld [vmem:[%s1386_s11 + $0x54] ss:$8 sps:$4 sm:$0xff]   ;;  %v1228_v21 = vld [vmem:[%s1386_s11 + $0x124] ss:$8 sps:$4 sm:$0xff]   ;;  %v1230_v22 = vld [vmem:[%s1386_s11 + $0x120] ss:$8 sps:$4 sm:$0xff]  }
  0x2d   : > { %681 = vmatpush1.bf16.msra.mxu1 %v1197_v9  ;;  %723 = vmatprep.subr.bf16.mxu0 %v1222_v17  ;;  %v1209_v23 = vld [vmem:[%s1386_s11 + $0x50] ss:$8 sps:$4 sm:$0xff]   ;;  %v1234_v24 = vld [vmem:[%s1386_s11 + $0x134] ss:$8 sps:$4 sm:$0xff]   ;;  %v1210_v25 = vld [vmem:[%s1386_s11 + $0x64] ss:$8 sps:$4 sm:$0xff]  }
  0x2e   : > { %682 = vmatprep.subr.bf16.mxu1 %v1198_v10  ;;  %v1236_v26 = vld [vmem:[%s1386_s11 + $0x130] ss:$8 sps:$4 sm:$0xff]   ;;  %v1212_v27 = vld [vmem:[%s1386_s11 + $0x60] ss:$8 sps:$4 sm:$0xff]   ;;  %v1240_v28 = vld [vmem:[%s1386_s11 + $0x144] ss:$8 sps:$4 sm:$0xff]  }
  0x2f   : > { %v1213_v29 = vld [vmem:[%s1386_s11 + $0x74] ss:$8 sps:$4 sm:$0xff]   ;;  %v1242_v30 = vld [vmem:[%s1386_s11 + $0x140] ss:$8 sps:$4 sm:$0xff]   ;;  %v1215_v31 = vld [vmem:[%s1386_s11 + $0x70] ss:$8 sps:$4 sm:$0xff]  }
  0x30   : > { %724 = vmatpush1.bf16.msra.mxu0 %v1224_v18  ;;  %v1246_v32 = vld [vmem:[%s1386_s11 + $0x154] ss:$8 sps:$4 sm:$0xff]   ;;  %v1219_v33 = vld [vmem:[%s1386_s11 + $0x84] ss:$8 sps:$4 sm:$0xff]   ;;  %v1248_v34 = vld [vmem:[%s1386_s11 + $0x150] ss:$8 sps:$4 sm:$0xff]  }
  0x31   : > { %683 = vmatpush1.bf16.msra.mxu1 %v1200_v11  ;;  %725 = vmatprep.subr.bf16.mxu0 %v1228_v21  ;;  %v1221_v35 = vld [vmem:[%s1386_s11 + $0x80] ss:$8 sps:$4 sm:$0xff]   ;;  %v1252_v36 = vld [vmem:[%s1386_s11 + $0x164] ss:$8 sps:$4 sm:$0xff]   ;;  %v1225_v37 = vld [vmem:[%s1386_s11 + $0x94] ss:$8 sps:$4 sm:$0xff]  }
  0x32   : > { %684 = vmatprep.subr.bf16.mxu1 %v1201_v12  ;;  %v1254_v38 = vld [vmem:[%s1386_s11 + $0x160] ss:$8 sps:$4 sm:$0xff]   ;;  %v1227_v40 = vld [vmem:[%s1386_s11 + $0x90] ss:$8 sps:$4 sm:$0xff]   ;;  %v1258_v41 = vld [vmem:[%s1386_s11 + $0x174] ss:$8 sps:$4 sm:$0xff]  }
  0x33   : > { %v1267_v39 = vld [vmem:[%s1388_s12 + $0x4] ss:$12 sps:$4 sm:$0xff]   ;;  %v1264_v46 = vld [vmem:[%s1388_s12 + $0x8] ss:$12 sps:$4 sm:$0xff]   ;;  %v1265_v56 = vld [vmem:[%s1388_s12] ss:$12 sps:$4 sm:$0xff]  }
  0x34   : > { %726 = vmatpush1.bf16.msra.mxu0 %v1230_v22  ;;  %v1231_v42 = vld [vmem:[%s1386_s11 + $0xa4] ss:$8 sps:$4 sm:$0xff]   ;;  %710 = vmatprep.mubr.bf16.mxu1 %v1267_v39  ;;  %v1260_v43 = vld [vmem:[%s1386_s11 + $0x170] ss:$8 sps:$4 sm:$0xff]   ;;  %v1233_v44 = vld [vmem:[%s1386_s11 + $0xa0] ss:$8 sps:$4 sm:$0xff]  }
  0x35   : > { %685 = vmatpush1.bf16.msra.mxu1 %v1203_v13  ;;  %727 = vmatprep.subr.bf16.mxu0 %v1234_v24  ;;  %v1237_v45 = vld [vmem:[%s1386_s11 + $0xb4] ss:$8 sps:$4 sm:$0xff]   ;;  %v1239_v47 = vld [vmem:[%s1386_s11 + $0xb0] ss:$8 sps:$4 sm:$0xff]   ;;  %v1243_v48 = vld [vmem:[%s1386_s11 + $0xc4] ss:$8 sps:$4 sm:$0xff]  }
  0x36   : > { %686 = vmatprep.subr.bf16.mxu1 %v1204_v16  ;;  %v1245_v49 = vld [vmem:[%s1386_s11 + $0xc0] ss:$8 sps:$4 sm:$0xff]   ;;  %v1249_v50 = vld [vmem:[%s1386_s11 + $0xd4] ss:$8 sps:$4 sm:$0xff]   ;;  %v1251_v51 = vld [vmem:[%s1386_s11 + $0xd0] ss:$8 sps:$4 sm:$0xff]  }
  0x37   : > { %v1255_v52 = vld [vmem:[%s1386_s11 + $0xe4] ss:$8 sps:$4 sm:$0xff]   ;;  %v1257_v53 = vld [vmem:[%s1386_s11 + $0xe0] ss:$8 sps:$4 sm:$0xff]   ;;  %v1261_v54 = vld [vmem:[%s1386_s11 + $0xf4] ss:$8 sps:$4 sm:$0xff]  }
  0x38   : > { %728 = vmatpush1.bf16.msra.mxu0 %v1236_v26  ;;  %v1263_v55 = vld [vmem:[%s1386_s11 + $0xf0] ss:$8 sps:$4 sm:$0xff]   ;;  %v366_v61 = vld [vmem:[#allocation2] sm:$0xff]  ;;  %v367_v0 = vld [vmem:[#allocation2 + $0x8] sm:$0xff] }
  0x39   : > { %687 = vmatpush1.bf16.msra.mxu1 %v1206_v19  ;;  %729 = vmatprep.subr.bf16.mxu0 %v1240_v28  ;;  %v368_v3 = vld [vmem:[#allocation2 + $0x10] sm:$0xff]  ;;  %v369_v7 = vld [vmem:[#allocation2 + $0x18] sm:$0xff] }
  0x3a   : > { %688 = vmatprep.subr.bf16.mxu1 %v1207_v20 }
  0x3c   : > { %730 = vmatpush1.bf16.msra.mxu0 %v1242_v30  ;;  %v814_v30 = vlaneseq (!%p1128_p11) }
  0x3d   : > { %689 = vmatpush1.bf16.msra.mxu1 %v1209_v23  ;;  %731 = vmatprep.subr.bf16.mxu0 %v1246_v32 }
  0x3e   : > { %690 = vmatprep.subr.bf16.mxu1 %v1210_v25  ;;  %vm828_vm0 = vcmp.lt.s32.totalorder (!%p1128_p11), %v814_v30, 256 }
  0x40   : > { %732 = vmatpush1.bf16.msra.mxu0 %v1248_v34  ;;  %v1310_v34 = vmov (!%p1128_p11), 1966171168  }
  0x41   : > { %691 = vmatpush1.bf16.msra.mxu1 %v1212_v27  ;;  %733 = vmatprep.subr.bf16.mxu0 %v1252_v36 }
  0x42   : > { %692 = vmatprep.subr.bf16.mxu1 %v1213_v29 }
  0x44   : > { %734 = vmatpush1.bf16.msra.mxu0 %v1254_v38 }
  0x45   : > { %693 = vmatpush1.bf16.msra.mxu1 %v1215_v31  ;;  %735 = vmatprep.subr.bf16.mxu0 %v1258_v41  ;;  %v815_v41 = vshrl.u32 (!%p1128_p11), %v814_v30, 7 }
  0x46   : > { %694 = vmatprep.subr.bf16.mxu1 %v1219_v33 }
  0x48   : > { %736 = vmatpush1.bf16.msra.mxu0 %v1260_v43 }
  0x49   : > { %695 = vmatpush1.bf16.msra.mxu1 %v1221_v35  ;;  %v812_v35 = vunpack.c.l.s4 (!%p1128_p11), %v1310_v34 }
  0x4a   : > { %696 = vmatprep.subr.bf16.mxu1 %v1225_v37 }
  0x4b   : > { %754 = vmatmul.mubr.bf16.vlgmr.msra.gmra.mrb[0].mxu0 %v1264_v46 }
  0x4d   : > { %697 = vmatpush1.bf16.msra.mxu1 %v1227_v40 }
  0x4e   : > { %698 = vmatprep.subr.bf16.mxu1 %v1231_v42 }
  0x51   : > { %699 = vmatpush1.bf16.msra.mxu1 %v1233_v44 }
  0x52   : > { %700 = vmatprep.subr.bf16.mxu1 %v1237_v45  ;;  %v813_v45 = vunpack.c.0.s8 (!%p1128_p11), %v812_v35 }
  0x55   : > { %701 = vmatpush1.bf16.msra.mxu1 %v1239_v47 }
  0x56   : > { %702 = vmatprep.subr.bf16.mxu1 %v1243_v48 }
  0x59   : > { %703 = vmatpush1.bf16.msra.mxu1 %v1245_v49 }
  0x5a   : > { %704 = vmatprep.subr.bf16.mxu1 %v1249_v50 }
  0x5d   : > { %705 = vmatpush1.bf16.msra.mxu1 %v1251_v51 }
  0x5e   : > { %706 = vmatprep.subr.bf16.mxu1 %v1255_v52  ;;  %v816_v52 = vsub.s32 (!%p1128_p11), %v813_v45, %v815_v41 }
  0x61   : > { %707 = vmatpush1.bf16.msra.mxu1 %v1257_v53 }
  0x62   : > { %708 = vmatprep.subr.bf16.mxu1 %v1261_v54 }
  0x65   : > { %709 = vmatpush1.bf16.msra.mxu1 %v1263_v55 }
  0x68   : > { %711 = vmatmul.mubr.bf16.vlgmr.msra.gmra.mrb[0].mxu1 %v1265_v56 }
 0x11e   : > { %v755_v57 = vpop.f32.mrb[0].mxu0 }
 0x11f   : > { %v757_v58 = vpop.f32.mrb[1].mxu0 }
 0x120   : > { %v759_v59 = vpop.f32.mrb[2].mxu0 }
 0x121   : > { %v761_v60 = vpop.f32.mrb[3].mxu0 }
 0x13b   : > { %v712_v62 = vpop.f32.mrb[0].mxu1 }
 0x13c   : > { %v756_v63 = vadd.f32 %v755_v57, %v712_v62  ;;  %v714_v1 = vpop.f32.mrb[1].mxu1 }
 0x13d   : > { %v758_v2 = vadd.f32 %v757_v58, %v714_v1  ;;  %v716_v4 = vpop.f32.mrb[2].mxu1  ;;  %775 = sbr.rel (%p1128_p11) target bundleno = 354 (0x162), region = 62 }
 0x13e   : > { %v764_v5 = vadd.f32 %v756_v63, %v366_v61  ;;  %v760_v6 = vadd.f32 %v759_v59, %v716_v4  ;;  %v718_v8 = vpop.f32.mrb[3].mxu1 }
 0x13f   : > { %v765_v9 = vadd.f32 %v758_v2, %v367_v0  ;;  %v762_v10 = vadd.f32 %v761_v60, %v718_v8 }
 0x140   : > { %768 = vst [vmem:[#allocation2] sm:$0xff] %v764_v5  ;;  %v766_v11 = vadd.f32 %v760_v6, %v368_v3 }
 0x141   : > { %769 = vst [vmem:[#allocation2 + $0x8] sm:$0xff] %v765_v9  ;;  %v767_v12 = vadd.f32 %v762_v10, %v369_v7 }
 0x142   : > { %770 = vst [vmem:[#allocation2 + $0x10] sm:$0xff] %v766_v11 }
 0x143   : > { %771 = vst [vmem:[#allocation2 + $0x18] sm:$0xff] %v767_v12 }
 0x147   : > { %v776_v13 = vld [vmem:[#allocation2] sm:$0xff] }
 0x148   : > { %v777_v14 = vld [vmem:[#allocation2 + $0x8] sm:$0xff]  ;;  %v831_v17 = vmul.f32 %v776_v13, %v776_v13 }
 0x149   : > { %v778_v15 = vld [vmem:[#allocation2 + $0x10] sm:$0xff]  ;;  %v1141_v16 = vpack.c.bf16 %v777_v14, %v776_v13  ;;  %v832_v18 = vmul.f32 %v777_v14, %v777_v14 }
 0x14a   : > { %v779_v19 = vld [vmem:[#allocation2 + $0x18] sm:$0xff]  ;;  %v794_v20 = vadd.f32 %v778_v15, %v776_v13  ;;  %v833_v23 = vmul.f32 %v778_v15, %v778_v15 }
 0x14b   : > { %v1142_v21 = vpack.c.bf16 %v779_v19, %v778_v15  ;;  %v801_v22 = vadd.f32 %v779_v19, %v777_v14  ;;  %v834_v24 = vmul.f32 %v779_v19, %v779_v19  ;;  %792 = vst [vmem:[%s1472_s2] sm:$0xff] %v1141_v16 }
 0x14c   : > { %v795_v25 = vrot.slane %v794_v20, 4  ;;  %v835_v27 = vadd.f32 %v833_v23, %v831_v17 }
 0x14d   : > { %793 = vst [vmem:[%s1472_s2 + $0x8] sm:$0xff] %v1142_v21  ;;  %v802_v26 = vrot.slane %v801_v22, 4  ;;  %v842_v28 = vadd.f32 %v834_v24, %v832_v18 }
 0x14e   : > { %v796_v29 = vadd.f32 %v795_v25, %v794_v20  ;;  %v836_v32 = vrot.slane %v835_v27, 4 }
 0x14f   : > { %v803_v31 = vadd.f32 %v802_v26, %v801_v22  ;;  %v843_v33 = vrot.slane %v842_v28, 4 }
 0x150   : > { %v797_v36 = vrot.slane %v796_v29, 2  ;;  %v837_v38 = vadd.f32 %v836_v32, %v835_v27 }
 0x151   : > { %v804_v37 = vrot.slane %v803_v31, 2  ;;  %v844_v39 = vadd.f32 %v843_v33, %v842_v28 }
 0x152   : > { %v798_v40 = vadd.f32 %v797_v36, %v796_v29  ;;  %v838_v43 = vrot.slane %v837_v38, 2 }
 0x153   : > { %v805_v42 = vadd.f32 %v804_v37, %v803_v31  ;;  %v845_v44 = vrot.slane %v844_v39, 2 }
 0x154   : > { %v799_v46 = vrot.slane %v798_v40, 1  ;;  %v839_v48 = vadd.f32 %v838_v43, %v837_v38 }
 0x155   : > { %v806_v47 = vrot.slane %v805_v42, 1  ;;  %v846_v49 = vadd.f32 %v845_v44, %v844_v39 }
 0x156   : > { %v800_v50 = vadd.f32 %v799_v46, %v798_v40  ;;  %v840_v53 = vrot.slane %v839_v48, 1 }
 0x157   : > { %v807_v51 = vadd.f32 %v806_v47, %v805_v42  ;;  %v847_v54 = vrot.slane %v846_v49, 1 }
 0x158   : > { %v841_v56 = vadd.f32 %v840_v53, %v839_v48 }
 0x159   : > { %v810_v55 = vcombine.low %v800_v50, %v807_v51  ;;  %v848_v57 = vadd.f32 %v847_v54, %v846_v49 }
 0x15b   : > { %v817_v58 = vrot.slane %v810_v55, %v816_v52  ;;  %v851_v59 = vcombine.low %v841_v56, %v848_v57 }
 0x15d   : > { %v824_v60 = vrot.slane %v817_v58, %v816_v52  ;;  %v858_v61 = vrot.slane %v851_v59, %v816_v52 }
 0x15f   : > { %830 = vst.msk [vmem:[%s1473_s3] sm:$0x3] %vm828_vm0, %v824_v60  ;;  %v865_v62 = vrot.slane %v858_v61, %v816_v52 }
 0x161   : > { %867 = vst.msk [vmem:[%s1474_s4] sm:$0x3] %vm828_vm0, %v865_v62 }
 0x162 PF: > { %s15_s19 = sadd.s32 1, %s1306_s19   ;;  %s1475_s15 = smov %s1294_s16 }
 0x163   : > { %p12_p12 = scmp.ge.s32.totalorder %s15_s19, 8   ;;  %s1476_s16 = smov %s1371_s23 }
 0x164   : > { %s1477_s17 = smov %s1302_s18  ;;  %s1478_s18 = smov %s1480_s20 }
 0x165   :  { %14 = sbr.rel (!%p12_p12) target bundleno = 3 (0x3), region = 130 }

// kernel: resnet_forward.46
= control target key start
LH: loop header
LB: loop body
LE: loop exit
PB: predicated region body
PF: predicated region fallthrough
CT: control target
= control target key end

     0   :  { %v22_v0 = vlaneseq  ;;  %s110_s0 = inlined_call_operand.vmem [shape: bf16[8,256], index: 0, kind: input, shape index: {}]   ;;  %s111_s1 = inlined_call_operand.vmem [shape: f32[1,256], index: 1, kind: input, shape index: {}]   ;;  %s112_s2 = inlined_call_operand.vmem [shape: f32[1,256], index: 2, kind: input, shape index: {}]   ;;  %s113_s3 = inlined_call_operand.vmem [shape: bf16[8,256], index: 3, kind: input, shape index: {}]   ;;  %s114_s4 = inlined_call_operand.vmem [shape: bf16[8,256], index: 4, kind: output, shape index: {}]  }
   0x1   :  { %v17_v1 = vld [vmem:[%s110_s0] sm:$0xff] }
   0x2   :  { %v23_v2 = vshrl.u32 %v22_v0, 7  ;;  %v20_v3 = vld [vmem:[%s111_s1] sm:$0x3]  ;;  %v18_v5 = vunpack.c.l.bf16 %v17_v1  ;;  %v19_v6 = vunpack.c.h.bf16 %v17_v1 }
   0x3   :  { %v34_v4 = vld [vmem:[%s112_s2] sm:$0x3] }
   0x4   :  { %v24_v7 = vsub.s32 0, %v23_v2  ;;  %v28_v8 = vsub.s32 1, %v23_v2  ;;  %v48_v9 = vld [vmem:[%s113_s3] sm:$0xff] }
   0x5   :  { %v49_v16 = vunpack.c.l.bf16 %v48_v9  ;;  %v50_v17 = vunpack.c.h.bf16 %v48_v9 }
   0x6   :  { %v25_v10 = vrot.slane %v20_v3, %v24_v7  ;;  %v29_v11 = vrot.slane %v20_v3, %v28_v8  ;;  %v39_v12 = vrot.slane %v34_v4, %v24_v7  ;;  %v43_v13 = vrot.slane %v34_v4, %v28_v8 }
   0x8   :  { %v32_v14 = vmul.f32 %v25_v10, %v18_v5  ;;  %v33_v15 = vmul.f32 %v29_v11, %v19_v6 }
   0xa   :  { %v46_v18 = vadd.f32 %v39_v12, %v32_v14  ;;  %v47_v19 = vadd.f32 %v43_v13, %v33_v15 }
   0xc   :  { %v51_v20 = vadd.f32 %v49_v16, %v46_v18  ;;  %v52_v21 = vadd.f32 %v50_v17, %v47_v19 }
   0xe   :  { %v53_v22 = vmax.f32 %v51_v20, 0.0  ;;  %v54_v23 = vmax.f32 %v52_v21, 0.0 }
  0x10   :  { %v69_v24 = vpack.c.bf16 %v54_v23, %v53_v22 }
  0x12   :  { %63 = vst [vmem:[%s114_s4] sm:$0xff] %v69_v24 }

// kernel: resnet_forward.48
= control target key start
LH: loop header
LB: loop body
LE: loop exit
PB: predicated region body
PF: predicated region fallthrough
CT: control target
= control target key end

     0   :  { %s1275_s15 = smov 0   ;;  %s1277_s16 = smov 0   ;;  %s1472_s0 = inlined_call_operand.vmem [shape: bf16[16,256], index: 0, kind: input, shape index: {}]   ;;  %s1473_s1 = inlined_call_operand.vmem [shape: bf16[256,512], index: 1, kind: input, shape index: {}]   ;;  %s1474_s2 = inlined_call_operand.vmem [shape: bf16[16,512], index: 2, kind: output, shape index: {0}]   ;;  %s1475_s3 = inlined_call_operand.vmem [shape: f32[1,1,512], index: 3, kind: output, shape index: {1}]   ;;  %s1476_s4 = inlined_call_operand.vmem [shape: f32[1,1,512], index: 4, kind: output, shape index: {2}]  }
   0x1   :  { %s1279_s17 = smov 0   ;;  %s1281_s18 = smov 0  }
   0x2   :  { %s1283_s19 = smov 0  }
   0x3 LB: > { %s30_s20 = sadd.s32 1, %s1243_s18  ;;  %s1059_s21 = sadd.s32 4294967295, %s1247_s19   ;;  %s1247_s19 = sphi %s1283_s19, %s15_s19   ;;  %s1243_s18 = sphi %s1281_s18, %s1481_s18   ;;  %s1239_s17 = sphi %s1279_s17, %s1480_s17   ;;  %s1235_s16 = sphi %s1277_s16, %s1479_s16   ;;  %s1231_s15 = sphi %s1275_s15, %s1478_s15  }
   0x4   : > { %p32_p0 = scmp.ge.s32.totalorder %s30_s20, 2  ;;  %p78_p1 = scmp.ne.s32.totalorder %s1235_s16, %s1231_s15 }
   0x5   : > { %p79_p2 = scmp.eq.s32.totalorder %s1247_s19, 0  ;;  %p110_p4 = scmp.eq.s32.totalorder %s1059_s21, 1 }
   0x6   : > { %s1483_s20 = smov (%p32_p0, %s30_s20), 0  ;;  %s71_s23 = sadd.s32 1, %s1235_s16 }
   0x7   : > { %p80_p3 = por %p79_p2, %p78_p1  ;;  %s67_s22 = ssub.s32 %s1243_s18, %s1483_s20 }
   0x8   : > { %p69_p5 = scmp.eq.s32.totalorder %s67_s22, 0  ;;  %p1310_p6 = por %p110_p4, %p78_p1 }
   0x9   : > { %p1063_p7 = scmp.ge.s32.totalorder %s1247_s19, 2 }
   0xa   : > { %s1315_s25 = scalar_select %p69_p5, %s1235_s16, %s71_s23  }
   0xb   : > { %203 = sbr.rel (%p1063_p7) target bundleno = 38 (0x26), region = 20 }
  0x12   : > { %206 = sbr.rel (!%p80_p3) target bundleno = 38 (0x26), region = 24  ;;  %s208_s26 = sand.u32 (%p80_p3), 1, %s1235_s16  }
  0x13   : > { %s1113_s27 = sshll.u32 (%p80_p3), %s1243_s18, 3  ;;  %s1064_s28 = sshll.u32 (%p80_p3), %s208_s26, 8 }
  0x14   : > { %s1323_s5 = scalar_lea.vmem (%p80_p3), %s1473_s1, %s1113_s27  ;;  %s1328_s6 = scalar_lea.vmem (%p80_p3), [#allocation3], %s1064_s28 }
  0x15   : > { %v306_v0 = vld [vmem:[%s1323_s5] sm:$0xff] (%p80_p3)  ;;  %v308_v1 = vld [vmem:[%s1323_s5 + $0x10] sm:$0xff] (%p80_p3) }
  0x16   : > { %v310_v2 = vld [vmem:[%s1323_s5 + $0x20] sm:$0xff] (%p80_p3)  ;;  %307 = vst [vmem:[%s1328_s6] sm:$0xff] (%p80_p3), %v306_v0  ;;  %309 = vst [vmem:[%s1328_s6 + $0x8] sm:$0xff] (%p80_p3), %v308_v1  ;;  %v312_v3 = vld [vmem:[%s1323_s5 + $0x30] sm:$0xff] (%p80_p3) }
  0x17   : > { %311 = vst [vmem:[%s1328_s6 + $0x10] sm:$0xff] (%p80_p3), %v310_v2  ;;  %v314_v4 = vld [vmem:[%s1323_s5 + $0x40] sm:$0xff] (%p80_p3)  ;;  %v316_v5 = vld [vmem:[%s1323_s5 + $0x50] sm:$0xff] (%p80_p3)  ;;  %313 = vst [vmem:[%s1328_s6 + $0x18] sm:$0xff] (%p80_p3), %v312_v3 }
  0x18   : > { %315 = vst [vmem:[%s1328_s6 + $0x20] sm:$0xff] (%p80_p3), %v314_v4  ;;  %317 = vst [vmem:[%s1328_s6 + $0x28] sm:$0xff] (%p80_p3), %v316_v5  ;;  %v318_v6 = vld [vmem:[%s1323_s5 + $0x60] sm:$0xff] (%p80_p3)  ;;  %v320_v7 = vld [vmem:[%s1323_s5 + $0x70] sm:$0xff] (%p80_p3) }
  0x19   : > { %v322_v8 = vld [vmem:[%s1323_s5 + $0x80] sm:$0xff]  ;;  %319 = vst [vmem:[%s1328_s6 + $0x30] sm:$0xff] %v318_v6  ;;  %321 = vst [vmem:[%s1328_s6 + $0x38] sm:$0xff] %v320_v7  ;;  %v324_v9 = vld [vmem:[%s1323_s5 + $0x90] sm:$0xff] }
  0x1a   : > { %323 = vst [vmem:[%s1328_s6 + $0x40] sm:$0xff] %v322_v8  ;;  %v326_v10 = vld [vmem:[%s1323_s5 + $0xa0] sm:$0xff]  ;;  %v328_v11 = vld [vmem:[%s1323_s5 + $0xb0] sm:$0xff]  ;;  %325 = vst [vmem:[%s1328_s6 + $0x48] sm:$0xff] %v324_v9 }
  0x1b   : > { %327 = vst [vmem:[%s1328_s6 + $0x50] sm:$0xff] %v326_v10  ;;  %329 = vst [vmem:[%s1328_s6 + $0x58] sm:$0xff] %v328_v11  ;;  %v330_v12 = vld [vmem:[%s1323_s5 + $0xc0] sm:$0xff]  ;;  %v332_v13 = vld [vmem:[%s1323_s5 + $0xd0] sm:$0xff] }
  0x1c   : > { %v334_v14 = vld [vmem:[%s1323_s5 + $0xe0] sm:$0xff]  ;;  %331 = vst [vmem:[%s1328_s6 + $0x60] sm:$0xff] %v330_v12  ;;  %333 = vst [vmem:[%s1328_s6 + $0x68] sm:$0xff] %v332_v13  ;;  %v336_v15 = vld [vmem:[%s1323_s5 + $0xf0] sm:$0xff] }
  0x1d   : > { %335 = vst [vmem:[%s1328_s6 + $0x70] sm:$0xff] %v334_v14  ;;  %v338_v16 = vld [vmem:[%s1323_s5 + $0x100] sm:$0xff]  ;;  %v340_v17 = vld [vmem:[%s1323_s5 + $0x110] sm:$0xff]  ;;  %337 = vst [vmem:[%s1328_s6 + $0x78] sm:$0xff] %v336_v15 }
  0x1e   : > { %339 = vst [vmem:[%s1328_s6 + $0x80] sm:$0xff] %v338_v16  ;;  %341 = vst [vmem:[%s1328_s6 + $0x88] sm:$0xff] %v340_v17  ;;  %v342_v18 = vld [vmem:[%s1323_s5 + $0x120] sm:$0xff]  ;;  %v344_v19 = vld [vmem:[%s1323_s5 + $0x130] sm:$0xff] }
  0x1f   : > { %v346_v20 = vld [vmem:[%s1323_s5 + $0x140] sm:$0xff]  ;;  %343 = vst [vmem:[%s1328_s6 + $0x90] sm:$0xff] %v342_v18  ;;  %345 = vst [vmem:[%s1328_s6 + $0x98] sm:$0xff] %v344_v19  ;;  %v348_v21 = vld [vmem:[%s1323_s5 + $0x150] sm:$0xff] }
  0x20   : > { %347 = vst [vmem:[%s1328_s6 + $0xa0] sm:$0xff] %v346_v20  ;;  %v350_v22 = vld [vmem:[%s1323_s5 + $0x160] sm:$0xff]  ;;  %v352_v23 = vld [vmem:[%s1323_s5 + $0x170] sm:$0xff]  ;;  %349 = vst [vmem:[%s1328_s6 + $0xa8] sm:$0xff] %v348_v21 }
  0x21   : > { %351 = vst [vmem:[%s1328_s6 + $0xb0] sm:$0xff] %v350_v22  ;;  %353 = vst [vmem:[%s1328_s6 + $0xb8] sm:$0xff] %v352_v23  ;;  %v354_v24 = vld [vmem:[%s1323_s5 + $0x180] sm:$0xff]  ;;  %v356_v25 = vld [vmem:[%s1323_s5 + $0x190] sm:$0xff] }
  0x22   : > { %v358_v26 = vld [vmem:[%s1323_s5 + $0x1a0] sm:$0xff]  ;;  %355 = vst [vmem:[%s1328_s6 + $0xc0] sm:$0xff] %v354_v24  ;;  %357 = vst [vmem:[%s1328_s6 + $0xc8] sm:$0xff] %v356_v25  ;;  %v360_v27 = vld [vmem:[%s1323_s5 + $0x1b0] sm:$0xff] }
  0x23   : > { %359 = vst [vmem:[%s1328_s6 + $0xd0] sm:$0xff] %v358_v26  ;;  %v362_v28 = vld [vmem:[%s1323_s5 + $0x1c0] sm:$0xff]  ;;  %v364_v29 = vld [vmem:[%s1323_s5 + $0x1d0] sm:$0xff]  ;;  %361 = vst [vmem:[%s1328_s6 + $0xd8] sm:$0xff] %v360_v27 }
  0x24   : > { %363 = vst [vmem:[%s1328_s6 + $0xe0] sm:$0xff] %v362_v28  ;;  %365 = vst [vmem:[%s1328_s6 + $0xe8] sm:$0xff] %v364_v29  ;;  %v366_v30 = vld [vmem:[%s1323_s5 + $0x1e0] sm:$0xff]  ;;  %v368_v31 = vld [vmem:[%s1323_s5 + $0x1f0] sm:$0xff] }
  0x25   : > { %367 = vst [vmem:[%s1328_s6 + $0xf0] sm:$0xff] %v366_v30  ;;  %369 = vst [vmem:[%s1328_s6 + $0xf8] sm:$0xff] %v368_v31 }
  0x26 PF: > { %p1067_p8 = scmp.ge.s32.totalorder %s1247_s19, 1  ;;  %p374_p9 = scmp.lt.s32.totalorder %s1247_s19, 3 }
  0x28   : > { %p375_p10 = pnand %p1067_p8, %p374_p9 }
  0x29   : > { %s381_s7 = sand.u32 (!%p375_p10), 1, %s1231_s15   ;;  %v1208_v32 = vld [vmem:[%s1472_s0 + $0x4] ss:$8 sps:$4 sm:$0xff] (!%p375_p10)   ;;  %v1206_v1 = vld [vmem:[%s1472_s0] ss:$8 sps:$4 sm:$0xff] (!%p375_p10)   ;;  %v773_v23 = vlaneseq (!%p375_p10)  ;;  %s1070_s15 = sshll.u32 (!%p375_p10), %s1239_s17, 1 }
  0x2a   : > { %378 = sbr.rel (%p375_p10) target bundleno = 347 (0x15b), region = 62  ;;  %s1068_s8 = sshll.u32 (!%p375_p10), %s381_s7, 8  ;;  %713 = vmatprep.mubr.bf16.mxu0 (!%p375_p10), %v1208_v32  ;;  %v1249_v21 = vmov (!%p375_p10), 1966171168  }
  0x2b   : > { %s1399_s11 = scalar_lea.vmem (!%p375_p10), [#allocation3], %s1068_s8  ;;  %s1069_s14 = sshll.u32 (!%p375_p10), %s381_s7, 4  ;;  %v771_v22 = vunpack.c.l.s4 (!%p375_p10), %v1249_v21  ;;  %vm787_vm0 = vcmp.lt.s32.totalorder (!%p375_p10), %v773_v23, 256 }
  0x2c   : > { %v1158_v33 = vld [vmem:[%s1399_s11 + $0x4] ss:$8 sps:$4 sm:$0xff] (!%p375_p10)   ;;  %v1160_v34 = vld [vmem:[%s1399_s11] ss:$8 sps:$4 sm:$0xff] (!%p375_p10)   ;;  %v1161_v35 = vld [vmem:[%s1399_s11 + $0x14] ss:$8 sps:$4 sm:$0xff] (!%p375_p10)  }
  0x2d   : > { %681 = vmatprep.subr.bf16.mxu0 (!%p375_p10), %v1158_v33  ;;  %v1163_v36 = vld [vmem:[%s1399_s11 + $0x10] ss:$8 sps:$4 sm:$0xff] (!%p375_p10)   ;;  %v1164_v37 = vld [vmem:[%s1399_s11 + $0x24] ss:$8 sps:$4 sm:$0xff] (!%p375_p10)   ;;  %v1166_v38 = vld [vmem:[%s1399_s11 + $0x20] ss:$8 sps:$4 sm:$0xff] (!%p375_p10)   ;;  %v772_v32 = vunpack.c.0.s8 (!%p375_p10), %v771_v22 }
  0x2e   : > { %682 = vmatpush1.bf16.msra.mxu0 (!%p375_p10), %v1160_v34  ;;  %v1167_v39 = vld [vmem:[%s1399_s11 + $0x34] ss:$8 sps:$4 sm:$0xff] (!%p375_p10)   ;;  %v1169_v40 = vld [vmem:[%s1399_s11 + $0x30] ss:$8 sps:$4 sm:$0xff] (!%p375_p10)   ;;  %v1170_v41 = vld [vmem:[%s1399_s11 + $0x44] ss:$8 sps:$4 sm:$0xff] (!%p375_p10)  }
  0x2f   : > { %683 = vmatprep.subr.bf16.mxu0 (!%p375_p10), %v1161_v35  ;;  %v1172_v42 = vld [vmem:[%s1399_s11 + $0x40] ss:$8 sps:$4 sm:$0xff] (!%p375_p10)   ;;  %v1173_v43 = vld [vmem:[%s1399_s11 + $0x54] ss:$8 sps:$4 sm:$0xff] (!%p375_p10)   ;;  %v1175_v44 = vld [vmem:[%s1399_s11 + $0x50] ss:$8 sps:$4 sm:$0xff] (!%p375_p10)  }
  0x30   : > { %v1176_v45 = vld [vmem:[%s1399_s11 + $0x64] ss:$8 sps:$4 sm:$0xff] (!%p375_p10)   ;;  %v1178_v46 = vld [vmem:[%s1399_s11 + $0x60] ss:$8 sps:$4 sm:$0xff] (!%p375_p10)   ;;  %v1179_v47 = vld [vmem:[%s1399_s11 + $0x74] ss:$8 sps:$4 sm:$0xff] (!%p375_p10)  }
  0x31   : > { %v1181_v48 = vld [vmem:[%s1399_s11 + $0x70] ss:$8 sps:$4 sm:$0xff]   ;;  %v1182_v49 = vld [vmem:[%s1399_s11 + $0x84] ss:$8 sps:$4 sm:$0xff]   ;;  %v1184_v50 = vld [vmem:[%s1399_s11 + $0x80] ss:$8 sps:$4 sm:$0xff]  }
  0x32   : > { %684 = vmatpush1.bf16.msra.mxu0 %v1163_v36  ;;  %v1185_v51 = vld [vmem:[%s1399_s11 + $0x94] ss:$8 sps:$4 sm:$0xff]   ;;  %v1187_v52 = vld [vmem:[%s1399_s11 + $0x90] ss:$8 sps:$4 sm:$0xff]   ;;  %v1188_v53 = vld [vmem:[%s1399_s11 + $0xa4] ss:$8 sps:$4 sm:$0xff]  }
  0x33   : > { %685 = vmatprep.subr.bf16.mxu0 %v1164_v37  ;;  %v1190_v54 = vld [vmem:[%s1399_s11 + $0xa0] ss:$8 sps:$4 sm:$0xff]   ;;  %v1191_v55 = vld [vmem:[%s1399_s11 + $0xb4] ss:$8 sps:$4 sm:$0xff]   ;;  %v1193_v56 = vld [vmem:[%s1399_s11 + $0xb0] ss:$8 sps:$4 sm:$0xff]  }
  0x34   : > { %v1194_v57 = vld [vmem:[%s1399_s11 + $0xc4] ss:$8 sps:$4 sm:$0xff]   ;;  %v1196_v58 = vld [vmem:[%s1399_s11 + $0xc0] ss:$8 sps:$4 sm:$0xff]   ;;  %v1197_v59 = vld [vmem:[%s1399_s11 + $0xd4] ss:$8 sps:$4 sm:$0xff]  }
  0x35   : > { %v1199_v60 = vld [vmem:[%s1399_s11 + $0xd0] ss:$8 sps:$4 sm:$0xff]   ;;  %v1200_v61 = vld [vmem:[%s1399_s11 + $0xe4] ss:$8 sps:$4 sm:$0xff]   ;;  %v1202_v62 = vld [vmem:[%s1399_s11 + $0xe0] ss:$8 sps:$4 sm:$0xff]  }
  0x36   : > { %686 = vmatpush1.bf16.msra.mxu0 %v1166_v38  ;;  %v1203_v63 = vld [vmem:[%s1399_s11 + $0xf4] ss:$8 sps:$4 sm:$0xff]   ;;  %v1205_v0 = vld [vmem:[%s1399_s11 + $0xf0] ss:$8 sps:$4 sm:$0xff]   ;;  %s1438_s21 = scalar_lea.vmem [#allocation4], %s1069_s14  ;;  %v774_v33 = vshrl.u32 %v773_v23, 7 }
  0x37   : > { %687 = vmatprep.subr.bf16.mxu0 %v1167_v39  ;;  %p450_p11 = scmp.lt.s32.totalorder %s1070_s15, 3  ;;  %s1116_s30 = sshll.u32 (%p1310_p6), %s1239_s17, 3 }
  0x38   : > { %s855_s7 = scalar_lea.vmem (%p1310_p6), %s1474_s2, %s1116_s30 }
  0x39   : > { %s1485_s15 = smov (!%p450_p11, %s1070_s15), 3 }
  0x3a   : > { %688 = vmatpush1.bf16.msra.mxu0 %v1169_v40  ;;  %s454_s26 = scalar_lea.vmem %s1475_s3, %s1485_s15  ;;  %s463_s29 = scalar_lea.vmem %s1476_s4, %s1485_s15 }
  0x3b   : > { %689 = vmatprep.subr.bf16.mxu0 %v1170_v41 }
  0x3e   : > { %690 = vmatpush1.bf16.msra.mxu0 %v1172_v42  ;;  %v775_v42 = vsub.s32 %v772_v32, %v774_v33 }
  0x3f   : > { %691 = vmatprep.subr.bf16.mxu0 %v1173_v43 }
  0x42   : > { %692 = vmatpush1.bf16.msra.mxu0 %v1175_v44 }
  0x43   : > { %693 = vmatprep.subr.bf16.mxu0 %v1176_v45 }
  0x46   : > { %694 = vmatpush1.bf16.msra.mxu0 %v1178_v46 }
  0x47   : > { %695 = vmatprep.subr.bf16.mxu0 %v1179_v47 }
  0x4a   : > { %696 = vmatpush1.bf16.msra.mxu0 %v1181_v48 }
  0x4b   : > { %697 = vmatprep.subr.bf16.mxu0 %v1182_v49 }
  0x4e   : > { %698 = vmatpush1.bf16.msra.mxu0 %v1184_v50 }
  0x4f   : > { %699 = vmatprep.subr.bf16.mxu0 %v1185_v51 }
  0x52   : > { %700 = vmatpush1.bf16.msra.mxu0 %v1187_v52 }
  0x53   : > { %701 = vmatprep.subr.bf16.mxu0 %v1188_v53 }
  0x56   : > { %702 = vmatpush1.bf16.msra.mxu0 %v1190_v54 }
  0x57   : > { %703 = vmatprep.subr.bf16.mxu0 %v1191_v55 }
  0x5a   : > { %704 = vmatpush1.bf16.msra.mxu0 %v1193_v56 }
  0x5b   : > { %705 = vmatprep.subr.bf16.mxu0 %v1194_v57 }
  0x5e   : > { %706 = vmatpush1.bf16.msra.mxu0 %v1196_v58 }
  0x5f   : > { %707 = vmatprep.subr.bf16.mxu0 %v1197_v59 }
  0x62   : > { %708 = vmatpush1.bf16.msra.mxu0 %v1199_v60 }
  0x63   : > { %709 = vmatprep.subr.bf16.mxu0 %v1200_v61 }
  0x66   : > { %710 = vmatpush1.bf16.msra.mxu0 %v1202_v62 }
  0x67   : > { %711 = vmatprep.subr.bf16.mxu0 %v1203_v63 }
  0x6a   : > { %712 = vmatpush1.bf16.msra.mxu0 %v1205_v0 }
  0x6d   : > { %714 = vmatmul.mubr.bf16.vlgmr.msra.gmra.mrb[0].mxu0 %v1206_v1 }
 0x140   : > { %v715_v2 = vpop.f32.mrb[0].mxu0 }
 0x141   : > { %v717_v3 = vpop.f32.mrb[1].mxu0  ;;  %v790_v6 = vmul.f32 %v715_v2, %v715_v2 }
 0x142   : > { %v1114_v4 = vpack.c.bf16 %v717_v3, %v715_v2  ;;  %v719_v5 = vpop.f32.mrb[2].mxu0  ;;  %v791_v10 = vmul.f32 %v717_v3, %v717_v3 }
 0x143   : > { %v753_v7 = vadd.f32 %v719_v5, %v715_v2  ;;  %v792_v8 = vmul.f32 %v719_v5, %v719_v5  ;;  %v721_v9 = vpop.f32.mrb[3].mxu0 }
 0x144   : > { %v1115_v11 = vpack.c.bf16 %v721_v9, %v719_v5  ;;  %751 = vst [vmem:[%s1438_s21] sm:$0xff] %v1114_v4  ;;  %v760_v12 = vadd.f32 %v721_v9, %v717_v3  ;;  %v793_v13 = vmul.f32 %v721_v9, %v721_v9 }
 0x145   : > { %v754_v14 = vrot.slane %v753_v7, 4  ;;  %v794_v15 = vadd.f32 %v792_v8, %v790_v6 }
 0x146   : > { %752 = vst [vmem:[%s1438_s21 + $0x8] sm:$0xff] %v1115_v11  ;;  %v761_v16 = vrot.slane %v760_v12, 4  ;;  %v801_v17 = vadd.f32 %v793_v13, %v791_v10 }
 0x147   : > { %v755_v18 = vadd.f32 %v754_v14, %v753_v7  ;;  %v795_v19 = vrot.slane %v794_v15, 4 }
 0x148   : > { %v762_v20 = vadd.f32 %v761_v16, %v760_v12  ;;  %v802_v24 = vrot.slane %v801_v17, 4 }
 0x149   : > { %v756_v25 = vrot.slane %v755_v18, 2  ;;  %v796_v26 = vadd.f32 %v795_v19, %v794_v15 }
 0x14a   : > { %v763_v27 = vrot.slane %v762_v20, 2  ;;  %v803_v28 = vadd.f32 %v802_v24, %v801_v17 }
 0x14b   : > { %v757_v29 = vadd.f32 %v756_v25, %v755_v18  ;;  %v797_v30 = vrot.slane %v796_v26, 2  ;;  %v885_v52 = vld [vmem:[%s1438_s21] sm:$0xff] (%p1310_p6) }
 0x14c   : > { %v764_v31 = vadd.f32 %v763_v27, %v762_v20  ;;  %v804_v34 = vrot.slane %v803_v28, 2  ;;  %886 = vst [vmem:[%s855_s7] sm:$0xff] (%p1310_p6), %v885_v52 }
 0x14d   : > { %v758_v35 = vrot.slane %v757_v29, 1  ;;  %v798_v36 = vadd.f32 %v797_v30, %v796_v26  ;;  %v887_v53 = vld [vmem:[%s1438_s21 + $0x8] sm:$0xff] (%p1310_p6) }
 0x14e   : > { %v765_v37 = vrot.slane %v764_v31, 1  ;;  %v805_v38 = vadd.f32 %v804_v34, %v803_v28  ;;  %888 = vst [vmem:[%s855_s7 + $0x10] sm:$0xff] (%p1310_p6), %v887_v53 }
 0x14f   : > { %v759_v39 = vadd.f32 %v758_v35, %v757_v29  ;;  %v799_v40 = vrot.slane %v798_v36, 1 }
 0x150   : > { %v766_v41 = vadd.f32 %v765_v37, %v764_v31  ;;  %v806_v43 = vrot.slane %v805_v38, 1 }
 0x151   : > { %v800_v44 = vadd.f32 %v799_v40, %v798_v36 }
 0x152   : > { %v769_v45 = vcombine.low %v759_v39, %v766_v41  ;;  %v807_v46 = vadd.f32 %v806_v43, %v805_v38 }
 0x154   : > { %v776_v47 = vrot.slane %v769_v45, %v775_v42  ;;  %v810_v48 = vcombine.low %v800_v44, %v807_v46  ;;  %849 = sbr.rel (!%p1310_p6) target bundleno = 347 (0x15b), region = 78 }
 0x156   : > { %v783_v49 = vrot.slane %v776_v47, %v775_v42  ;;  %v817_v50 = vrot.slane %v810_v48, %v775_v42 }
 0x158   : > { %789 = vst.msk [vmem:[%s454_s26] sm:$0x3] %vm787_vm0, %v783_v49  ;;  %v824_v51 = vrot.slane %v817_v50, %v775_v42 }
 0x15a   : > { %826 = vst.msk [vmem:[%s463_s29] sm:$0x3] %vm787_vm0, %v824_v51 }
 0x15b PF: > { %s15_s19 = sadd.s32 1, %s1247_s19   ;;  %s1478_s15 = smov %s1235_s16 }
 0x15c   : > { %p12_p12 = scmp.ge.s32.totalorder %s15_s19, 4   ;;  %s1479_s16 = smov %s1315_s25 }
 0x15d   : > { %s1480_s17 = smov %s1243_s18  ;;  %s1481_s18 = smov %s1483_s20 }
 0x15e   :  { %14 = sbr.rel (!%p12_p12) target bundleno = 3 (0x3), region = 174 }

// kernel: resnet_forward.49
= control target key start
LH: loop header
LB: loop body
LE: loop exit
PB: predicated region body
PF: predicated region fallthrough
CT: control target
= control target key end

     0   :  { %v18_v0 = vlaneseq  ;;  %v155_v1 = vmov 1983009808   ;;  %v156_v31 = vmov 1966171168   ;;  %s189_s1 = inlined_call_operand.vmem [shape: f32[1,512], index: 1, kind: input, shape index: {}]   ;;  %s190_s2 = inlined_call_operand.vmem [shape: f32[1,512], index: 2, kind: input, shape index: {}]   ;;  %s191_s0 = inlined_call_operand.vmem [shape: bf16[2,512], index: 0, kind: input, shape index: {}]   ;;  %s192_s3 = inlined_call_operand.vmem [shape: bf16[2,512], index: 3, kind: output, shape index: {}]  }
   0x1   :  { %v37_v2 = vunpack.c.l.s4 %v155_v1  ;;  %v16_v4 = vld [vmem:[%s189_s1] sm:$0xf]  ;;  %v123_v32 = vunpack.c.l.s4 %v156_v31 }
   0x2   :  { %v19_v3 = vshrl.u32 %v18_v0, 7  ;;  %v53_v10 = vld [vmem:[%s190_s2] sm:$0xf] }
   0x3   :  { %v38_v5 = vunpack.c.0.s8 %v37_v2  ;;  %v14_v16 = vld [vmem:[%s191_s0] sm:$0xf]  ;;  %v124_v36 = vunpack.c.0.s8 %v123_v32 }
   0x4   :  { %v20_v6 = vsub.s32 0, %v19_v3  ;;  %v24_v7 = vsub.s32 1, %v19_v3  ;;  %v28_v8 = vsub.s32 2, %v19_v3  ;;  %v32_v9 = vsub.s32 3, %v19_v3 }
   0x5   :  { %v41_v11 = vsub.s32 %v38_v5, %v19_v3  ;;  %v15_v25 = vunpack.c.l.bf16 %v14_v16  ;;  %v127_v41 = vsub.s32 %v124_v36, %v19_v3 }
   0x6   :  { %v21_v12 = vrot.slane %v16_v4, %v20_v6  ;;  %v25_v13 = vrot.slane %v16_v4, %v24_v7  ;;  %v29_v14 = vrot.slane %v16_v4, %v28_v8  ;;  %v33_v15 = vrot.slane %v16_v4, %v32_v9 }
   0x7   :  { %v58_v17 = vrot.slane %v53_v10, %v20_v6  ;;  %v62_v18 = vrot.slane %v53_v10, %v24_v7  ;;  %v66_v19 = vrot.slane %v53_v10, %v28_v8  ;;  %v70_v20 = vrot.slane %v53_v10, %v32_v9 }
   0x8   :  { %v34_v21 = vcombine.low %v21_v12, %v25_v13  ;;  %v35_v22 = vcombine.low %v29_v14, %v33_v15 }
   0x9   :  { %v71_v23 = vcombine.low %v58_v17, %v62_v18  ;;  %v72_v24 = vcombine.low %v66_v19, %v70_v20 }
   0xa   :  { %v42_v26 = vrot.slane %v34_v21, %v41_v11  ;;  %v49_v27 = vrot.slane %v35_v22, %v41_v11 }
   0xb   :  { %v79_v28 = vrot.slane %v71_v23, %v41_v11  ;;  %v86_v29 = vrot.slane %v72_v24, %v41_v11 }
   0xc   :  { %v50_v30 = vcombine.low %v42_v26, %v49_v27 }
   0xd   :  { %v87_v33 = vcombine.low %v79_v28, %v86_v29 }
   0xe   :  { %v52_v34 = vmul.f32 %v50_v30, %v15_v25 }
  0x10   :  { %v89_v35 = vadd.f32 %v87_v33, %v52_v34 }
  0x12   :  { %v91_v37 = vcombine.high %v89_v35, %v89_v35  ;;  %v98_v38 = vrot.slane %v89_v35, %v41_v11 }
  0x14   :  { %v105_v39 = vrot.slane %v91_v37, %v41_v11  ;;  %v106_v40 = vcombine.high %v98_v38, %v98_v38 }
  0x16   :  { %v107_v42 = vcombine.high %v105_v39, %v105_v39  ;;  %v150_v43 = vpack.c.bf16 %v106_v40, %v98_v38 }
  0x18   :  { %v151_v44 = vpack.c.bf16 %v107_v42, %v105_v39  ;;  %v128_v45 = vrot.slane %v150_v43, %v127_v41 }
  0x1a   :  { %v135_v46 = vrot.slane %v151_v44, %v127_v41 }
  0x1c   :  { %v136_v47 = vcombine.low %v128_v45, %v135_v46 }
  0x1e   :  { %152 = vst.sshfl [vmem:[%s192_s3] sm:$0x55 pattern:$0x73625140] %v136_v47 }

// kernel: resnet_forward.47
= control target key start
LH: loop header
LB: loop body
LE: loop exit
PB: predicated region body
PF: predicated region fallthrough
CT: control target
= control target key end

     0   :  { %s2014_s0 = inlined_call_operand.vmem [shape: bf16[16,2304], index: 0, kind: input, shape index: {}]   ;;  %s2015_s1 = inlined_call_operand.vmem [shape: bf16[2304,512], index: 1, kind: input, shape index: {}]   ;;  %s2016_s2 = inlined_call_operand.vmem [shape: bf16[16,512], index: 2, kind: output, shape index: {0}]   ;;  %s2017_s3 = inlined_call_operand.vmem [shape: f32[1,1,512], index: 3, kind: output, shape index: {1}]   ;;  %s2018_s4 = inlined_call_operand.vmem [shape: f32[1,1,512], index: 4, kind: output, shape index: {2}]  }
   0x1   :  { %2021 = sst [smem:[#allocation8_spill]] %s2014_s0 }
   0x2   :  { %2022 = sst [smem:[#allocation9_spill]] %s2015_s1 }
   0x3   :  { %s1672_s15 = smov 0   ;;  %s1674_s16 = smov 0  }
   0x4   :  { %s1676_s17 = smov 0   ;;  %s1678_s18 = smov 0  }
   0x5   :  { %s1680_s19 = smov 0   ;;  %s1682_s20 = smov 0  }
   0x6   :  { %s1684_s21 = smov 0   ;;  %s1686_s22 = smov 0  }
   0x7   :  { %s1688_s23 = smov 0   ;;  %s1690_s24 = smov 0  }
   0x8   :  { %s1692_s25 = smov 0  }
   0x9 LB: > { %s1300_s26 = sadd.s32 4294967295, %s1642_s25   ;;  %s27_s27 = sadd.s32 1, %s1634_s23  ;;  %s1642_s25 = sphi %s1692_s25, %s15_s25   ;;  %s1638_s24 = sphi %s1690_s24, %s2041_s24   ;;  %s1634_s23 = sphi %s1688_s23, %s2040_s23   ;;  %s1630_s22 = sphi %s1686_s22, %s2039_s22   ;;  %s1626_s21 = sphi %s1684_s21, %s2038_s21   ;;  %s1622_s20 = sphi %s1682_s20, %s2037_s20   ;;  %s1618_s19 = sphi %s1680_s19, %s2036_s19   ;;  %s1614_s18 = sphi %s1678_s18, %s2035_s18   ;;  %s1610_s17 = sphi %s1676_s17, %s2034_s17   ;;  %s1606_s16 = sphi %s1674_s16, %s2033_s16   ;;  %s1602_s15 = sphi %s1672_s15, %s2032_s15  }
   0xa   : > { %p28_p0 = scmp.ge.s32.totalorder %s27_s27, 6  ;;  %s30_s28 = sadd.s32 1, %s1638_s24 }
   0xb   : > { %s43_s29 = sadd.s32 1, %s1622_s20  ;;  %p50_p1 = scmp.ne.s32.totalorder %s1622_s20, %s1618_s19 }
   0xc   : > { %s2043_s27 = smov (%p28_p0, %s27_s27), 0  ;;  %s2045_s28 = smov (!%p28_p0, %s30_s28), %s1638_s24 }
   0xd   : > { %2023 = sst [smem:[#allocation6_spill]] %s2043_s27  ;;  %s39_s30 = ssub.s32 %s1634_s23, %s2043_s27 }
   0xe   : > { %p51_p2 = scmp.eq.s32.totalorder %s1642_s25, 0  ;;  %p32_p3 = scmp.ge.s32.totalorder %s2045_s28, 2 }
   0xf   : > { %p41_p4 = scmp.eq.s32.totalorder %s39_s30, 0  ;;  %s71_s6 = sadd.s32 1, %s1614_s18 }
  0x10   : > { %p1739_p5 = por %p51_p2, %p50_p1  ;;  %s2047_s28 = smov (%p32_p3, %s2045_s28), 0 }
  0x11   : > { %2025 = sst [smem:[#allocation7_spill]] %s2047_s28  ;;  %s67_s8 = ssub.s32 %s1638_s24, %s2047_s28 }
  0x12   : > { %s1747_s7 = scalar_select %p41_p4, %s1622_s20, %s43_s29  }
  0x13   : > { %p78_p6 = scmp.ne.s32.totalorder %s1614_s18, %s1610_s17  ;;  %s68_s9 = sor.u32 %s67_s8, %s39_s30 }
  0x14   : > { %p97_p7 = scmp.eq.s32.totalorder %s67_s8, 0  ;;  %p69_p8 = scmp.eq.s32.totalorder %s68_s9, 0 }
  0x15   : > { %p1753_p9 = por %p78_p6, %p51_p2  ;;  %s99_s11 = sadd.s32 1, %s1606_s16 }
  0x16   : > { %p109_p10 = scmp.ne.s32.totalorder %s1606_s16, %s1602_s15  ;;  %p110_p11 = scmp.eq.s32.totalorder %s1300_s26, 11 }
  0x17   : > { %s1761_s12 = scalar_select %p69_p8, %s1614_s18, %s71_s6  }
  0x18   : > { %s1764_s13 = scalar_select %p97_p7, %s1606_s16, %s99_s11  }
  0x19   : > { %p1766_p12 = por %p110_p11, %p109_p10  ;;  %p1303_p13 = scmp.ge.s32.totalorder %s1642_s25, 12 }
  0x1b   : > { %188 = sbr.rel (%p1303_p13) target bundleno = 79 (0x4f), region = 16 }
  0x22   : > { %191 = sbr.rel (!%p1739_p5) target bundleno = 45 (0x2d), region = 20  ;;  %s193_s29 = sand.u32 (%p1739_p5), 1, %s1622_s20  }
  0x23   : > { %s1376_s30 = smul.u32 (%p1739_p5), 12, %s1634_s23  ;;  %s2028_s0 = sld [smem:[#allocation8_spill]] (%p1739_p5) }
  0x24   : > { %s1385_s8 = smul.u32 (%p1739_p5), 24, %s193_s29 }
  0x26   : > { %s195_s26 = scalar_lea.vmem (%p1739_p5), [#allocation3], %s1385_s8 }
  0x29   : > { %s201_s11 = scalar_lea.vmem %s2028_s0, %s1376_s30 }
  0x2a   : > { %v216_v0 = vld [vmem:[%s201_s11] sm:$0xff]  ;;  %v218_v1 = vld [vmem:[%s201_s11 + $0x48] sm:$0xff]  ;;  %v1307_v3 = vld [vmem:[%s201_s11 + $0x50] sm:$0xf] }
  0x2b   : > { %v1305_v2 = vld [vmem:[%s201_s11 + $0x8] sm:$0xf]  ;;  %217 = vst [vmem:[%s195_s26] sm:$0xff] %v216_v0  ;;  %219 = vst [vmem:[%s195_s26 + $0xc] sm:$0xff] %v218_v1 }
  0x2c   : > { %1306 = vst [vmem:[%s195_s26 + $0x8] sm:$0xf] %v1305_v2  ;;  %1308 = vst [vmem:[%s195_s26 + $0x14] sm:$0xf] %v1307_v3 }
  0x2d PF: > { %236 = sbr.rel (!%p1753_p9) target bundleno = 79 (0x4f), region = 46  ;;  %s238_s5 = sand.u32 (%p1753_p9), 1, %s1614_s18  }
  0x2e   : > { %s1386_s29 = smul.u32 (%p1753_p9), 384, %s238_s5  ;;  %s1309_s6 = sshll.u32 (%p1753_p9), %s1638_s24, 1 }
  0x2f   : > { %s1377_s30 = smul.u32 (%p1753_p9), 192, %s1634_s23  ;;  %s2029_s1 = sld [smem:[#allocation9_spill]] (%p1753_p9) }
  0x30   : > { %s1791_s10 = scalar_lea.vmem (%p1753_p9), [#allocation4], %s1386_s29 }
  0x31   : > { %s244_s9 = sadd.s32 (%p1753_p9), %s1377_s30, %s1309_s6 }
  0x32   : > { %s1311_s0 = sshll.u32 (%p1753_p9), %s244_s9, 2 }
  0x35   : > { %s1786_s27 = scalar_lea.vmem %s2029_s1, %s1311_s0 }
  0x36   : > { %v368_v4 = vld [vmem:[%s1786_s27] sm:$0xff]  ;;  %v370_v5 = vld [vmem:[%s1786_s27 + $0x10] sm:$0xff] }
  0x37   : > { %v372_v6 = vld [vmem:[%s1786_s27 + $0x20] sm:$0xff]  ;;  %369 = vst [vmem:[%s1791_s10] sm:$0xff] %v368_v4  ;;  %371 = vst [vmem:[%s1791_s10 + $0x8] sm:$0xff] %v370_v5  ;;  %v374_v7 = vld [vmem:[%s1786_s27 + $0x30] sm:$0xff] }
  0x38   : > { %373 = vst [vmem:[%s1791_s10 + $0x10] sm:$0xff] %v372_v6  ;;  %v376_v8 = vld [vmem:[%s1786_s27 + $0x40] sm:$0xff]  ;;  %v378_v9 = vld [vmem:[%s1786_s27 + $0x50] sm:$0xff]  ;;  %375 = vst [vmem:[%s1791_s10 + $0x18] sm:$0xff] %v374_v7 }
  0x39   : > { %377 = vst [vmem:[%s1791_s10 + $0x20] sm:$0xff] %v376_v8  ;;  %379 = vst [vmem:[%s1791_s10 + $0x28] sm:$0xff] %v378_v9  ;;  %v380_v10 = vld [vmem:[%s1786_s27 + $0x60] sm:$0xff]  ;;  %v382_v11 = vld [vmem:[%s1786_s27 + $0x70] sm:$0xff] }
  0x3a   : > { %v384_v12 = vld [vmem:[%s1786_s27 + $0x80] sm:$0xff]  ;;  %381 = vst [vmem:[%s1791_s10 + $0x30] sm:$0xff] %v380_v10  ;;  %383 = vst [vmem:[%s1791_s10 + $0x38] sm:$0xff] %v382_v11  ;;  %v386_v13 = vld [vmem:[%s1786_s27 + $0x90] sm:$0xff] }
  0x3b   : > { %385 = vst [vmem:[%s1791_s10 + $0x40] sm:$0xff] %v384_v12  ;;  %v388_v14 = vld [vmem:[%s1786_s27 + $0xa0] sm:$0xff]  ;;  %v390_v15 = vld [vmem:[%s1786_s27 + $0xb0] sm:$0xff]  ;;  %387 = vst [vmem:[%s1791_s10 + $0x48] sm:$0xff] %v386_v13 }
  0x3c   : > { %389 = vst [vmem:[%s1791_s10 + $0x50] sm:$0xff] %v388_v14  ;;  %391 = vst [vmem:[%s1791_s10 + $0x58] sm:$0xff] %v390_v15  ;;  %v392_v16 = vld [vmem:[%s1786_s27 + $0xc0] sm:$0xff]  ;;  %v394_v17 = vld [vmem:[%s1786_s27 + $0xd0] sm:$0xff] }
  0x3d   : > { %v396_v18 = vld [vmem:[%s1786_s27 + $0xe0] sm:$0xff]  ;;  %393 = vst [vmem:[%s1791_s10 + $0x60] sm:$0xff] %v392_v16  ;;  %395 = vst [vmem:[%s1791_s10 + $0x68] sm:$0xff] %v394_v17  ;;  %v398_v19 = vld [vmem:[%s1786_s27 + $0xf0] sm:$0xff] }
  0x3e   : > { %397 = vst [vmem:[%s1791_s10 + $0x70] sm:$0xff] %v396_v18  ;;  %v400_v20 = vld [vmem:[%s1786_s27 + $0x100] sm:$0xff]  ;;  %v402_v21 = vld [vmem:[%s1786_s27 + $0x110] sm:$0xff]  ;;  %399 = vst [vmem:[%s1791_s10 + $0x78] sm:$0xff] %v398_v19 }
  0x3f   : > { %401 = vst [vmem:[%s1791_s10 + $0x80] sm:$0xff] %v400_v20  ;;  %403 = vst [vmem:[%s1791_s10 + $0x88] sm:$0xff] %v402_v21  ;;  %v404_v22 = vld [vmem:[%s1786_s27 + $0x120] sm:$0xff]  ;;  %v406_v23 = vld [vmem:[%s1786_s27 + $0x130] sm:$0xff] }
  0x40   : > { %v408_v24 = vld [vmem:[%s1786_s27 + $0x140] sm:$0xff]  ;;  %405 = vst [vmem:[%s1791_s10 + $0x90] sm:$0xff] %v404_v22  ;;  %407 = vst [vmem:[%s1791_s10 + $0x98] sm:$0xff] %v406_v23  ;;  %v410_v25 = vld [vmem:[%s1786_s27 + $0x150] sm:$0xff] }
  0x41   : > { %409 = vst [vmem:[%s1791_s10 + $0xa0] sm:$0xff] %v408_v24  ;;  %v412_v26 = vld [vmem:[%s1786_s27 + $0x160] sm:$0xff]  ;;  %v414_v27 = vld [vmem:[%s1786_s27 + $0x170] sm:$0xff]  ;;  %411 = vst [vmem:[%s1791_s10 + $0xa8] sm:$0xff] %v410_v25 }
  0x42   : > { %413 = vst [vmem:[%s1791_s10 + $0xb0] sm:$0xff] %v412_v26  ;;  %415 = vst [vmem:[%s1791_s10 + $0xb8] sm:$0xff] %v414_v27  ;;  %v416_v28 = vld [vmem:[%s1786_s27 + $0x180] sm:$0xff]  ;;  %v418_v29 = vld [vmem:[%s1786_s27 + $0x190] sm:$0xff] }
  0x43   : > { %v420_v30 = vld [vmem:[%s1786_s27 + $0x1a0] sm:$0xff]  ;;  %417 = vst [vmem:[%s1791_s10 + $0xc0] sm:$0xff] %v416_v28  ;;  %419 = vst [vmem:[%s1791_s10 + $0xc8] sm:$0xff] %v418_v29  ;;  %v422_v31 = vld [vmem:[%s1786_s27 + $0x1b0] sm:$0xff] }
  0x44   : > { %421 = vst [vmem:[%s1791_s10 + $0xd0] sm:$0xff] %v420_v30  ;;  %v424_v32 = vld [vmem:[%s1786_s27 + $0x1c0] sm:$0xff]  ;;  %v426_v33 = vld [vmem:[%s1786_s27 + $0x1d0] sm:$0xff]  ;;  %423 = vst [vmem:[%s1791_s10 + $0xd8] sm:$0xff] %v422_v31 }
  0x45   : > { %425 = vst [vmem:[%s1791_s10 + $0xe0] sm:$0xff] %v424_v32  ;;  %427 = vst [vmem:[%s1791_s10 + $0xe8] sm:$0xff] %v426_v33  ;;  %v428_v34 = vld [vmem:[%s1786_s27 + $0x1e0] sm:$0xff]  ;;  %v430_v35 = vld [vmem:[%s1786_s27 + $0x1f0] sm:$0xff] }
  0x46   : > { %v432_v36 = vld [vmem:[%s1786_s27 + $0x200] sm:$0xff]  ;;  %429 = vst [vmem:[%s1791_s10 + $0xf0] sm:$0xff] %v428_v34  ;;  %431 = vst [vmem:[%s1791_s10 + $0xf8] sm:$0xff] %v430_v35  ;;  %v434_v37 = vld [vmem:[%s1786_s27 + $0x210] sm:$0xff] }
  0x47   : > { %433 = vst [vmem:[%s1791_s10 + $0x100] sm:$0xff] %v432_v36  ;;  %v436_v38 = vld [vmem:[%s1786_s27 + $0x220] sm:$0xff]  ;;  %v438_v39 = vld [vmem:[%s1786_s27 + $0x230] sm:$0xff]  ;;  %435 = vst [vmem:[%s1791_s10 + $0x108] sm:$0xff] %v434_v37 }
  0x48   : > { %437 = vst [vmem:[%s1791_s10 + $0x110] sm:$0xff] %v436_v38  ;;  %439 = vst [vmem:[%s1791_s10 + $0x118] sm:$0xff] %v438_v39  ;;  %v440_v40 = vld [vmem:[%s1786_s27 + $0x240] sm:$0xff]  ;;  %v442_v41 = vld [vmem:[%s1786_s27 + $0x250] sm:$0xff] }
  0x49   : > { %v444_v42 = vld [vmem:[%s1786_s27 + $0x260] sm:$0xff]  ;;  %441 = vst [vmem:[%s1791_s10 + $0x120] sm:$0xff] %v440_v40  ;;  %443 = vst [vmem:[%s1791_s10 + $0x128] sm:$0xff] %v442_v41  ;;  %v446_v43 = vld [vmem:[%s1786_s27 + $0x270] sm:$0xff] }
  0x4a   : > { %445 = vst [vmem:[%s1791_s10 + $0x130] sm:$0xff] %v444_v42  ;;  %v448_v44 = vld [vmem:[%s1786_s27 + $0x280] sm:$0xff]  ;;  %v450_v45 = vld [vmem:[%s1786_s27 + $0x290] sm:$0xff]  ;;  %447 = vst [vmem:[%s1791_s10 + $0x138] sm:$0xff] %v446_v43 }
  0x4b   : > { %449 = vst [vmem:[%s1791_s10 + $0x140] sm:$0xff] %v448_v44  ;;  %451 = vst [vmem:[%s1791_s10 + $0x148] sm:$0xff] %v450_v45  ;;  %v452_v46 = vld [vmem:[%s1786_s27 + $0x2a0] sm:$0xff]  ;;  %v454_v47 = vld [vmem:[%s1786_s27 + $0x2b0] sm:$0xff] }
  0x4c   : > { %v456_v48 = vld [vmem:[%s1786_s27 + $0x2c0] sm:$0xff]  ;;  %453 = vst [vmem:[%s1791_s10 + $0x150] sm:$0xff] %v452_v46  ;;  %455 = vst [vmem:[%s1791_s10 + $0x158] sm:$0xff] %v454_v47  ;;  %v458_v49 = vld [vmem:[%s1786_s27 + $0x2d0] sm:$0xff] }
  0x4d   : > { %457 = vst [vmem:[%s1791_s10 + $0x160] sm:$0xff] %v456_v48  ;;  %v460_v50 = vld [vmem:[%s1786_s27 + $0x2e0] sm:$0xff]  ;;  %v462_v51 = vld [vmem:[%s1786_s27 + $0x2f0] sm:$0xff]  ;;  %459 = vst [vmem:[%s1791_s10 + $0x168] sm:$0xff] %v458_v49 }
  0x4e   : > { %461 = vst [vmem:[%s1791_s10 + $0x170] sm:$0xff] %v460_v50  ;;  %463 = vst [vmem:[%s1791_s10 + $0x178] sm:$0xff] %v462_v51 }
  0x4f PF: > { %p1312_p0 = scmp.ge.s32.totalorder %s1642_s25, 1  ;;  %p468_p1 = scmp.lt.s32.totalorder %s1642_s25, 13 }
  0x51   : > { %p469_p2 = pnand %p1312_p0, %p468_p1 }
  0x52   : > { %s475_s0 = sand.u32 (!%p469_p2), 1, %s1618_s19   ;;  %s482_s28 = sand.u32 (!%p469_p2), 1, %s1610_s17  }
  0x53   : > { %472 = sbr.rel (%p469_p2) target bundleno = 419 (0x1a3), region = 84  ;;  %s503_s26 = sand.u32 (!%p469_p2), 1, %s1602_s15  }
  0x54   : > { %s1387_s11 = smul.u32 (!%p469_p2), 24, %s475_s0  ;;  %s1313_s5 = sshll.u32 (!%p469_p2), %s503_s26, 4 }
  0x55   : > { %s1388_s27 = smul.u32 (!%p469_p2), 384, %s482_s28  ;;  %s1314_s29 = sshll.u32 (!%p469_p2), %s1630_s22, 1 }
  0x56   : > { %p535_p3 = scmp.lt.s32.totalorder (!%p469_p2), %s1314_s29, 3  ;;  %s1902_s19 = scalar_lea.vmem (!%p469_p2), [#allocation3], %s1387_s11 }
  0x57   : > { %s1904_s17 = scalar_lea.vmem (!%p469_p2), [#allocation4], %s1388_s27  ;;  %s1906_s15 = scalar_lea.vmem (!%p469_p2), [#allocation5], %s1313_s5 }
  0x58   : > { %p1316_p4 = scmp.ne.s32.totalorder (!%p469_p2), %s1626_s21, 0 }
  0x5a   : > { %s2049_s29 = smov (!%p535_p3, %s1314_s29), 3  ;;  %554 = sbr.rel (%p1316_p4) target bundleno = 97 (0x61), region = 96 }
  0x5b   : > { %s539_s9 = scalar_lea.vmem %s2017_s3, %s2049_s29  ;;  %s548_s1 = scalar_lea.vmem %s2018_s4, %s2049_s29  ;;  %v1644_v52 = vmov (!%p1316_p4), 0.0  }
  0x5c   : > { %555 = vst [vmem:[#allocation2] sm:$0xff] (!%p1316_p4), %v1644_v52  ;;  %556 = vst [vmem:[#allocation2 + $0x8] sm:$0xff] (!%p1316_p4), %v1644_v52 }
  0x5d   : > { %557 = vst [vmem:[#allocation2 + $0x10] sm:$0xff] (!%p1316_p4), %v1644_v52  ;;  %558 = vst [vmem:[#allocation2 + $0x18] sm:$0xff] (!%p1316_p4), %v1644_v52 }
  0x61 PF: > { %v1480_v53 = vld [vmem:[%s1904_s17 + $0x4] ss:$8 sps:$4 sm:$0xff]   ;;  %v1482_v54 = vld [vmem:[%s1904_s17] ss:$8 sps:$4 sm:$0xff]   ;;  %v1645_v55 = vmov 0   ;;  %p1368_p5 = scmp.ne.s32.totalorder %s1626_s21, 5 }
  0x62   : > { %946 = vmatprep.mubr.bf16.mxu0 %v1645_v55  ;;  %871 = vmatprep.subr.bf16.mxu1 %v1480_v53  ;;  %v1483_v56 = vld [vmem:[%s1904_s17 + $0x14] ss:$8 sps:$4 sm:$0xff]   ;;  %v1485_v57 = vld [vmem:[%s1904_s17 + $0x10] ss:$8 sps:$4 sm:$0xff]   ;;  %v1486_v58 = vld [vmem:[%s1904_s17 + $0x24] ss:$8 sps:$4 sm:$0xff]  }
  0x63   : > { %872 = vmatpush1.bf16.msra.mxu1 %v1482_v54  ;;  %v1488_v59 = vld [vmem:[%s1904_s17 + $0x20] ss:$8 sps:$4 sm:$0xff]   ;;  %v1489_v60 = vld [vmem:[%s1904_s17 + $0x34] ss:$8 sps:$4 sm:$0xff]   ;;  %v1491_v61 = vld [vmem:[%s1904_s17 + $0x30] ss:$8 sps:$4 sm:$0xff]  }
  0x64   : > { %873 = vmatprep.subr.bf16.mxu1 %v1483_v56  ;;  %v1504_v62 = vld [vmem:[%s1904_s17 + $0x104] ss:$8 sps:$4 sm:$0xff]   ;;  %v1506_v63 = vld [vmem:[%s1904_s17 + $0x100] ss:$8 sps:$4 sm:$0xff]   ;;  %v1510_v1 = vld [vmem:[%s1904_s17 + $0x114] ss:$8 sps:$4 sm:$0xff]  }
  0x65   : > { %v1492_v0 = vld [vmem:[%s1904_s17 + $0x44] ss:$8 sps:$4 sm:$0xff]   ;;  %914 = vmatprep.subr.bf16.mxu0 %v1504_v62  ;;  %v1512_v2 = vld [vmem:[%s1904_s17 + $0x110] ss:$8 sps:$4 sm:$0xff]   ;;  %v1494_v3 = vld [vmem:[%s1904_s17 + $0x40] ss:$8 sps:$4 sm:$0xff]  }
  0x66   : > { %915 = vmatpush1.bf16.msra.mxu0 %v1506_v63  ;;  %v1495_v4 = vld [vmem:[%s1904_s17 + $0x54] ss:$8 sps:$4 sm:$0xff]   ;;  %v1516_v5 = vld [vmem:[%s1904_s17 + $0x124] ss:$8 sps:$4 sm:$0xff]   ;;  %v1518_v6 = vld [vmem:[%s1904_s17 + $0x120] ss:$8 sps:$4 sm:$0xff]  }
  0x67   : > { %874 = vmatpush1.bf16.msra.mxu1 %v1485_v57  ;;  %916 = vmatprep.subr.bf16.mxu0 %v1510_v1  ;;  %v1497_v7 = vld [vmem:[%s1904_s17 + $0x50] ss:$8 sps:$4 sm:$0xff]   ;;  %v1522_v8 = vld [vmem:[%s1904_s17 + $0x134] ss:$8 sps:$4 sm:$0xff]   ;;  %v1498_v9 = vld [vmem:[%s1904_s17 + $0x64] ss:$8 sps:$4 sm:$0xff]  }
  0x68   : > { %875 = vmatprep.subr.bf16.mxu1 %v1486_v58  ;;  %v1524_v10 = vld [vmem:[%s1904_s17 + $0x130] ss:$8 sps:$4 sm:$0xff]   ;;  %v1500_v11 = vld [vmem:[%s1904_s17 + $0x60] ss:$8 sps:$4 sm:$0xff]   ;;  %v1528_v12 = vld [vmem:[%s1904_s17 + $0x144] ss:$8 sps:$4 sm:$0xff]  }
  0x69   : > { %v1501_v13 = vld [vmem:[%s1904_s17 + $0x74] ss:$8 sps:$4 sm:$0xff]   ;;  %v1530_v14 = vld [vmem:[%s1904_s17 + $0x140] ss:$8 sps:$4 sm:$0xff]   ;;  %v1503_v15 = vld [vmem:[%s1904_s17 + $0x70] ss:$8 sps:$4 sm:$0xff]  }
  0x6a   : > { %917 = vmatpush1.bf16.msra.mxu0 %v1512_v2  ;;  %v1534_v16 = vld [vmem:[%s1904_s17 + $0x154] ss:$8 sps:$4 sm:$0xff]   ;;  %v1507_v17 = vld [vmem:[%s1904_s17 + $0x84] ss:$8 sps:$4 sm:$0xff]   ;;  %v1536_v18 = vld [vmem:[%s1904_s17 + $0x150] ss:$8 sps:$4 sm:$0xff]  }
  0x6b   : > { %876 = vmatpush1.bf16.msra.mxu1 %v1488_v59  ;;  %918 = vmatprep.subr.bf16.mxu0 %v1516_v5  ;;  %v1509_v19 = vld [vmem:[%s1904_s17 + $0x80] ss:$8 sps:$4 sm:$0xff]   ;;  %v1540_v20 = vld [vmem:[%s1904_s17 + $0x164] ss:$8 sps:$4 sm:$0xff]   ;;  %v1513_v21 = vld [vmem:[%s1904_s17 + $0x94] ss:$8 sps:$4 sm:$0xff]  }
  0x6c   : > { %877 = vmatprep.subr.bf16.mxu1 %v1489_v60  ;;  %v1542_v22 = vld [vmem:[%s1904_s17 + $0x160] ss:$8 sps:$4 sm:$0xff]   ;;  %v1515_v24 = vld [vmem:[%s1904_s17 + $0x90] ss:$8 sps:$4 sm:$0xff]   ;;  %v1546_v25 = vld [vmem:[%s1904_s17 + $0x174] ss:$8 sps:$4 sm:$0xff]  }
  0x6d   : > { %v1555_v23 = vld [vmem:[%s1902_s19 + $0x4] ss:$12 sps:$4 sm:$0xff]   ;;  %v1552_v30 = vld [vmem:[%s1902_s19 + $0x8] ss:$12 sps:$4 sm:$0xff]   ;;  %v1553_v40 = vld [vmem:[%s1902_s19] ss:$12 sps:$4 sm:$0xff]  }
  0x6e   : > { %919 = vmatpush1.bf16.msra.mxu0 %v1518_v6  ;;  %v1519_v26 = vld [vmem:[%s1904_s17 + $0xa4] ss:$8 sps:$4 sm:$0xff]   ;;  %903 = vmatprep.mubr.bf16.mxu1 %v1555_v23  ;;  %v1548_v27 = vld [vmem:[%s1904_s17 + $0x170] ss:$8 sps:$4 sm:$0xff]   ;;  %v1521_v28 = vld [vmem:[%s1904_s17 + $0xa0] ss:$8 sps:$4 sm:$0xff]  }
  0x6f   : > { %878 = vmatpush1.bf16.msra.mxu1 %v1491_v61  ;;  %920 = vmatprep.subr.bf16.mxu0 %v1522_v8  ;;  %v1525_v29 = vld [vmem:[%s1904_s17 + $0xb4] ss:$8 sps:$4 sm:$0xff]   ;;  %v1527_v31 = vld [vmem:[%s1904_s17 + $0xb0] ss:$8 sps:$4 sm:$0xff]   ;;  %v1531_v32 = vld [vmem:[%s1904_s17 + $0xc4] ss:$8 sps:$4 sm:$0xff]  }
  0x70   : > { %879 = vmatprep.subr.bf16.mxu1 %v1492_v0  ;;  %v1533_v33 = vld [vmem:[%s1904_s17 + $0xc0] ss:$8 sps:$4 sm:$0xff]   ;;  %v1537_v34 = vld [vmem:[%s1904_s17 + $0xd4] ss:$8 sps:$4 sm:$0xff]   ;;  %v1539_v35 = vld [vmem:[%s1904_s17 + $0xd0] ss:$8 sps:$4 sm:$0xff]  }
  0x71   : > { %v1543_v36 = vld [vmem:[%s1904_s17 + $0xe4] ss:$8 sps:$4 sm:$0xff]   ;;  %v1545_v37 = vld [vmem:[%s1904_s17 + $0xe0] ss:$8 sps:$4 sm:$0xff]   ;;  %v1549_v38 = vld [vmem:[%s1904_s17 + $0xf4] ss:$8 sps:$4 sm:$0xff]  }
  0x72   : > { %921 = vmatpush1.bf16.msra.mxu0 %v1524_v10  ;;  %v1551_v39 = vld [vmem:[%s1904_s17 + $0xf0] ss:$8 sps:$4 sm:$0xff]   ;;  %v561_v51 = vld [vmem:[#allocation2 + $0x10] sm:$0xff]  ;;  %v562_v55 = vld [vmem:[#allocation2 + $0x18] sm:$0xff] }
  0x73   : > { %880 = vmatpush1.bf16.msra.mxu1 %v1494_v3  ;;  %922 = vmatprep.subr.bf16.mxu0 %v1528_v12  ;;  %v559_v45 = vld [vmem:[#allocation2] sm:$0xff]  ;;  %v560_v48 = vld [vmem:[#allocation2 + $0x8] sm:$0xff] }
  0x74   : > { %881 = vmatprep.subr.bf16.mxu1 %v1495_v4 }
  0x76   : > { %923 = vmatpush1.bf16.msra.mxu0 %v1530_v14  ;;  %v1007_v14 = vlaneseq (!%p1368_p5) }
  0x77   : > { %882 = vmatpush1.bf16.msra.mxu1 %v1497_v7  ;;  %924 = vmatprep.subr.bf16.mxu0 %v1534_v16 }
  0x78   : > { %883 = vmatprep.subr.bf16.mxu1 %v1498_v9  ;;  %vm1021_vm0 = vcmp.lt.s32.totalorder (!%p1368_p5), %v1007_v14, 256 }
  0x7a   : > { %925 = vmatpush1.bf16.msra.mxu0 %v1536_v18  ;;  %v1646_v18 = vmov (!%p1368_p5), 1966171168  }
  0x7b   : > { %884 = vmatpush1.bf16.msra.mxu1 %v1500_v11  ;;  %926 = vmatprep.subr.bf16.mxu0 %v1540_v20 }
  0x7c   : > { %885 = vmatprep.subr.bf16.mxu1 %v1501_v13 }
  0x7e   : > { %927 = vmatpush1.bf16.msra.mxu0 %v1542_v22 }
  0x7f   : > { %886 = vmatpush1.bf16.msra.mxu1 %v1503_v15  ;;  %928 = vmatprep.subr.bf16.mxu0 %v1546_v25  ;;  %v1008_v25 = vshrl.u32 (!%p1368_p5), %v1007_v14, 7 }
  0x80   : > { %887 = vmatprep.subr.bf16.mxu1 %v1507_v17 }
  0x82   : > { %929 = vmatpush1.bf16.msra.mxu0 %v1548_v27 }
  0x83   : > { %888 = vmatpush1.bf16.msra.mxu1 %v1509_v19  ;;  %v1005_v19 = vunpack.c.l.s4 (!%p1368_p5), %v1646_v18 }
  0x84   : > { %889 = vmatprep.subr.bf16.mxu1 %v1513_v21 }
  0x85   : > { %947 = vmatmul.mubr.bf16.vlgmr.msra.gmra.mrb[0].mxu0 %v1552_v30 }
  0x87   : > { %890 = vmatpush1.bf16.msra.mxu1 %v1515_v24 }
  0x88   : > { %891 = vmatprep.subr.bf16.mxu1 %v1519_v26 }
  0x8b   : > { %892 = vmatpush1.bf16.msra.mxu1 %v1521_v28 }
  0x8c   : > { %893 = vmatprep.subr.bf16.mxu1 %v1525_v29  ;;  %v1006_v29 = vunpack.c.0.s8 (!%p1368_p5), %v1005_v19 }
  0x8f   : > { %894 = vmatpush1.bf16.msra.mxu1 %v1527_v31 }
  0x90   : > { %895 = vmatprep.subr.bf16.mxu1 %v1531_v32 }
  0x93   : > { %896 = vmatpush1.bf16.msra.mxu1 %v1533_v33 }
  0x94   : > { %897 = vmatprep.subr.bf16.mxu1 %v1537_v34 }
  0x97   : > { %898 = vmatpush1.bf16.msra.mxu1 %v1539_v35 }
  0x98   : > { %899 = vmatprep.subr.bf16.mxu1 %v1543_v36  ;;  %v1009_v36 = vsub.s32 (!%p1368_p5), %v1006_v29, %v1008_v25 }
  0x9b   : > { %900 = vmatpush1.bf16.msra.mxu1 %v1545_v37 }
  0x9c   : > { %901 = vmatprep.subr.bf16.mxu1 %v1549_v38 }
  0x9f   : > { %902 = vmatpush1.bf16.msra.mxu1 %v1551_v39 }
  0xa2   : > { %904 = vmatmul.mubr.bf16.vlgmr.msra.gmra.mrb[0].mxu1 %v1553_v40 }
 0x158   : > { %v948_v41 = vpop.f32.mrb[0].mxu0 }
 0x159   : > { %v950_v42 = vpop.f32.mrb[1].mxu0 }
 0x15a   : > { %v952_v43 = vpop.f32.mrb[2].mxu0 }
 0x15b   : > { %v954_v44 = vpop.f32.mrb[3].mxu0 }
 0x175   : > { %v905_v46 = vpop.f32.mrb[0].mxu1 }
 0x176   : > { %v949_v47 = vadd.f32 %v948_v41, %v905_v46  ;;  %v907_v49 = vpop.f32.mrb[1].mxu1 }
 0x177   : > { %v951_v50 = vadd.f32 %v950_v42, %v907_v49  ;;  %v909_v52 = vpop.f32.mrb[2].mxu1  ;;  %968 = sbr.rel (%p1368_p5) target bundleno = 412 (0x19c), region = 100 }
 0x178   : > { %v957_v53 = vadd.f32 %v949_v47, %v559_v45  ;;  %v953_v54 = vadd.f32 %v952_v43, %v909_v52  ;;  %v911_v56 = vpop.f32.mrb[3].mxu1 }
 0x179   : > { %v958_v57 = vadd.f32 %v951_v50, %v560_v48  ;;  %v955_v58 = vadd.f32 %v954_v44, %v911_v56 }
 0x17a   : > { %961 = vst [vmem:[#allocation2] sm:$0xff] %v957_v53  ;;  %v959_v59 = vadd.f32 %v953_v54, %v561_v51 }
 0x17b   : > { %962 = vst [vmem:[#allocation2 + $0x8] sm:$0xff] %v958_v57  ;;  %v960_v60 = vadd.f32 %v955_v58, %v562_v55 }
 0x17c   : > { %963 = vst [vmem:[#allocation2 + $0x10] sm:$0xff] %v959_v59 }
 0x17d   : > { %964 = vst [vmem:[#allocation2 + $0x18] sm:$0xff] %v960_v60 }
 0x181   : > { %v969_v61 = vld [vmem:[#allocation2] sm:$0xff] }
 0x182   : > { %v970_v62 = vld [vmem:[#allocation2 + $0x8] sm:$0xff]  ;;  %v1024_v1 = vmul.f32 %v969_v61, %v969_v61 }
 0x183   : > { %v971_v63 = vld [vmem:[#allocation2 + $0x10] sm:$0xff]  ;;  %v1378_v0 = vpack.c.bf16 %v970_v62, %v969_v61  ;;  %v1025_v2 = vmul.f32 %v970_v62, %v970_v62 }
 0x184   : > { %v972_v3 = vld [vmem:[#allocation2 + $0x18] sm:$0xff]  ;;  %v987_v4 = vadd.f32 %v971_v63, %v969_v61  ;;  %v1026_v7 = vmul.f32 %v971_v63, %v971_v63 }
 0x185   : > { %v1379_v5 = vpack.c.bf16 %v972_v3, %v971_v63  ;;  %v994_v6 = vadd.f32 %v972_v3, %v970_v62  ;;  %v1027_v8 = vmul.f32 %v972_v3, %v972_v3  ;;  %985 = vst [vmem:[%s1906_s15] sm:$0xff] %v1378_v0 }
 0x186   : > { %v988_v9 = vrot.slane %v987_v4, 4  ;;  %v1028_v11 = vadd.f32 %v1026_v7, %v1024_v1 }
 0x187   : > { %986 = vst [vmem:[%s1906_s15 + $0x8] sm:$0xff] %v1379_v5  ;;  %v995_v10 = vrot.slane %v994_v6, 4  ;;  %v1035_v12 = vadd.f32 %v1027_v8, %v1025_v2 }
 0x188   : > { %v989_v13 = vadd.f32 %v988_v9, %v987_v4  ;;  %v1029_v16 = vrot.slane %v1028_v11, 4 }
 0x189   : > { %v996_v15 = vadd.f32 %v995_v10, %v994_v6  ;;  %v1036_v17 = vrot.slane %v1035_v12, 4 }
 0x18a   : > { %v990_v20 = vrot.slane %v989_v13, 2  ;;  %v1030_v22 = vadd.f32 %v1029_v16, %v1028_v11 }
 0x18b   : > { %v997_v21 = vrot.slane %v996_v15, 2  ;;  %v1037_v23 = vadd.f32 %v1036_v17, %v1035_v12 }
 0x18c   : > { %v991_v24 = vadd.f32 %v990_v20, %v989_v13  ;;  %v1031_v27 = vrot.slane %v1030_v22, 2 }
 0x18d   : > { %v998_v26 = vadd.f32 %v997_v21, %v996_v15  ;;  %v1038_v28 = vrot.slane %v1037_v23, 2 }
 0x18e   : > { %v992_v30 = vrot.slane %v991_v24, 1  ;;  %v1032_v32 = vadd.f32 %v1031_v27, %v1030_v22 }
 0x18f   : > { %v999_v31 = vrot.slane %v998_v26, 1  ;;  %v1039_v33 = vadd.f32 %v1038_v28, %v1037_v23 }
 0x190   : > { %v993_v34 = vadd.f32 %v992_v30, %v991_v24  ;;  %v1033_v37 = vrot.slane %v1032_v32, 1 }
 0x191   : > { %v1000_v35 = vadd.f32 %v999_v31, %v998_v26  ;;  %v1040_v38 = vrot.slane %v1039_v33, 1 }
 0x192   : > { %v1034_v40 = vadd.f32 %v1033_v37, %v1032_v32 }
 0x193   : > { %v1003_v39 = vcombine.low %v993_v34, %v1000_v35  ;;  %v1041_v41 = vadd.f32 %v1040_v38, %v1039_v33 }
 0x195   : > { %v1010_v42 = vrot.slane %v1003_v39, %v1009_v36  ;;  %v1044_v43 = vcombine.low %v1034_v40, %v1041_v41 }
 0x197   : > { %v1017_v44 = vrot.slane %v1010_v42, %v1009_v36  ;;  %v1051_v45 = vrot.slane %v1044_v43, %v1009_v36 }
 0x199   : > { %1023 = vst.msk [vmem:[%s539_s9] sm:$0x3] %vm1021_vm0, %v1017_v44  ;;  %v1058_v46 = vrot.slane %v1051_v45, %v1009_v36 }
 0x19b   : > { %1060 = vst.msk [vmem:[%s548_s1] sm:$0x3] %vm1021_vm0, %v1058_v46 }
 0x19c PF: > { %1083 = sbr.rel (!%p1766_p12) target bundleno = 419 (0x1a3), region = 104  ;;  %s1380_s26 = sshll.u32 (%p1766_p12), %s1630_s22, 3  ;;  %v1119_v47 = vld [vmem:[%s1906_s15] sm:$0xff] (%p1766_p12)  ;;  %v1121_v48 = vld [vmem:[%s1906_s15 + $0x8] sm:$0xff] (%p1766_p12) }
 0x19d   : > { %s1089_s6 = scalar_lea.vmem (%p1766_p12), %s2016_s2, %s1380_s26 }
 0x19e   : > { %1120 = vst [vmem:[%s1089_s6] sm:$0xff] (%p1766_p12), %v1119_v47  ;;  %1122 = vst [vmem:[%s1089_s6 + $0x10] sm:$0xff] (%p1766_p12), %v1121_v48 }
 0x1a3 PF: > { %s15_s25 = sadd.s32 1, %s1642_s25   ;;  %s2030_s1 = sld [smem:[#allocation6_spill]] }
 0x1a4   : > { %p12_p6 = scmp.ge.s32.totalorder %s15_s25, 14   ;;  %s2031_s14 = sld [smem:[#allocation7_spill]] }
 0x1a5   : > { %s2032_s15 = smov %s1606_s16  ;;  %s2033_s16 = smov %s1764_s13 }
 0x1a6   : > { %s2034_s17 = smov %s1614_s18  ;;  %s2035_s18 = smov %s1761_s12 }
 0x1a7   : > { %s2036_s19 = smov %s1622_s20  ;;  %s2037_s20 = smov %s1747_s7 }
 0x1a8   : > { %s2038_s21 = smov %s1634_s23  ;;  %s2039_s22 = smov %s1638_s24 }
 0x1a9   : > { %s2040_s23 = smov %s2030_s1  ;;  %14 = sbr.rel (!%p12_p6) target bundleno = 9 (0x9), region = 211 }
 0x1aa   : > { %s2041_s24 = smov %s2031_s14 }

// kernel: resnet_forward.54
= control target key start
LH: loop header
LB: loop body
LE: loop exit
PB: predicated region body
PF: predicated region fallthrough
CT: control target
= control target key end

     0   :  { %v20_v0 = vlaneseq  ;;  %v194_v1 = vmov 1983009808   ;;  %v195_v33 = vmov 1966171168   ;;  %s233_s0 = inlined_call_operand.vmem [shape: bf16[2,1,1,9,512], index: 0, kind: input, shape index: {}, may-alias: {0,4}]   ;;  %s234_s1 = inlined_call_operand.vmem [shape: bf16[2,512], index: 1, kind: input, shape index: {}]   ;;  %s235_s2 = inlined_call_operand.vmem [shape: f32[1,512], index: 2, kind: input, shape index: {}]   ;;  %s236_s3 = inlined_call_operand.vmem [shape: f32[1,512], index: 3, kind: input, shape index: {}]   ;;  %s237_s4 = inlined_call_operand.vmem [shape: bf16[2,1,1,9,512], index: 4, kind: output, shape index: {}, may-alias: {0,4}]  }
   0x1   :  { %v39_v2 = vunpack.c.l.s4 %v194_v1  ;;  %v18_v4 = vld [vmem:[%s235_s2] sm:$0xf]  ;;  %v126_v34 = vunpack.c.l.s4 %v195_v33 }
   0x2   :  { %v21_v3 = vshrl.u32 %v20_v0, 7  ;;  %v55_v10 = vld [vmem:[%s236_s3] sm:$0xf] }
   0x3   :  { %v40_v5 = vunpack.c.0.s8 %v39_v2  ;;  %v16_v16 = vld [vmem:[%s234_s1] sm:$0xf]  ;;  %v127_v37 = vunpack.c.0.s8 %v126_v34 }
   0x4   :  { %v22_v6 = vsub.s32 0, %v21_v3  ;;  %v26_v7 = vsub.s32 1, %v21_v3  ;;  %v30_v8 = vsub.s32 2, %v21_v3  ;;  %v34_v9 = vsub.s32 3, %v21_v3 }
   0x5   :  { %v43_v11 = vsub.s32 %v40_v5, %v21_v3  ;;  %v17_v25 = vunpack.c.l.bf16 %v16_v16  ;;  %v130_v42 = vsub.s32 %v127_v37, %v21_v3 }
   0x6   :  { %v23_v12 = vrot.slane %v18_v4, %v22_v6  ;;  %v27_v13 = vrot.slane %v18_v4, %v26_v7  ;;  %v31_v14 = vrot.slane %v18_v4, %v30_v8  ;;  %v35_v15 = vrot.slane %v18_v4, %v34_v9 }
   0x7   :  { %v60_v17 = vrot.slane %v55_v10, %v22_v6  ;;  %v64_v18 = vrot.slane %v55_v10, %v26_v7  ;;  %v68_v19 = vrot.slane %v55_v10, %v30_v8  ;;  %v72_v20 = vrot.slane %v55_v10, %v34_v9 }
   0x8   :  { %v36_v21 = vcombine.low %v23_v12, %v27_v13  ;;  %v37_v22 = vcombine.low %v31_v14, %v35_v15 }
   0x9   :  { %v73_v23 = vcombine.low %v60_v17, %v64_v18  ;;  %v74_v24 = vcombine.low %v68_v19, %v72_v20 }
   0xa   :  { %v44_v26 = vrot.slane %v36_v21, %v43_v11  ;;  %v51_v27 = vrot.slane %v37_v22, %v43_v11 }
   0xb   :  { %v81_v28 = vrot.slane %v73_v23, %v43_v11  ;;  %v88_v29 = vrot.slane %v74_v24, %v43_v11 }
   0xc   :  { %v52_v30 = vcombine.low %v44_v26, %v51_v27 }
   0xd   :  { %v89_v31 = vcombine.low %v81_v28, %v88_v29 }
   0xe   :  { %v54_v32 = vmul.f32 %v52_v30, %v17_v25 }
  0x10   :  { %v91_v35 = vadd.f32 %v89_v31, %v54_v32 }
  0x12   :  { %v92_v36 = vmax.f32 %v91_v35, 0.0 }
  0x14   :  { %v94_v38 = vcombine.high %v92_v36, %v92_v36  ;;  %v101_v39 = vrot.slane %v92_v36, %v43_v11 }
  0x16   :  { %v108_v40 = vrot.slane %v94_v38, %v43_v11  ;;  %v109_v41 = vcombine.high %v101_v39, %v101_v39 }
  0x18   :  { %v110_v43 = vcombine.high %v108_v40, %v108_v40  ;;  %v188_v44 = vpack.c.bf16 %v109_v41, %v101_v39 }
  0x1a   :  { %v189_v45 = vpack.c.bf16 %v110_v43, %v108_v40  ;;  %v131_v46 = vrot.slane %v188_v44, %v130_v42 }
  0x1c   :  { %v138_v47 = vrot.slane %v189_v45, %v130_v42 }
  0x1e   :  { %v139_v48 = vcombine.low %v131_v46, %v138_v47 }
  0x20   :  { %190 = vst.sshfl [vmem:[#allocation2] sm:$0x55 pattern:$0x73625140] %v139_v48 }
  0x27   :  { %v166_v49 = vld [vmem:[#allocation2] sm:$0xf] }
  0x28   :  { %191 = vst [vmem:[%s237_s4 + $0x10] sm:$0xf] %v166_v49 }

// kernel: resnet_forward.50
= control target key start
LH: loop header
LB: loop body
LE: loop exit
PB: predicated region body
PF: predicated region fallthrough
CT: control target
= control target key end

     0   :  { %s2252_s0 = inlined_call_operand.vmem [shape: bf16[16,4608], index: 0, kind: input, shape index: {}]   ;;  %s2253_s1 = inlined_call_operand.vmem [shape: bf16[4608,512], index: 1, kind: input, shape index: {}]   ;;  %s2254_s2 = inlined_call_operand.vmem [shape: bf16[16,512], index: 2, kind: output, shape index: {0}]   ;;  %s2255_s3 = inlined_call_operand.vmem [shape: f32[1,1,512], index: 3, kind: output, shape index: {1}]   ;;  %s2256_s4 = inlined_call_operand.vmem [shape: f32[1,1,512], index: 4, kind: output, shape index: {2}]  }
   0x1   :  { %2259 = sst [smem:[#allocation8_spill]] %s2252_s0 }
   0x2   :  { %2260 = sst [smem:[#allocation9_spill]] %s2253_s1 }
   0x3   :  { %s1861_s15 = smov 0   ;;  %s1863_s16 = smov 0  }
   0x4   :  { %s1865_s17 = smov 0   ;;  %s1867_s18 = smov 0  }
   0x5   :  { %s1869_s19 = smov 0   ;;  %s1871_s20 = smov 0  }
   0x6   :  { %s1873_s21 = smov 0   ;;  %s1875_s22 = smov 0  }
   0x7   :  { %s1877_s23 = smov 0   ;;  %s1879_s24 = smov 0  }
   0x8   :  { %s1881_s25 = smov 0  }
   0x9 LB: > { %s1450_s26 = sadd.s32 4294967295, %s1832_s25   ;;  %s27_s27 = sadd.s32 1, %s1824_s23  ;;  %s1832_s25 = sphi %s1881_s25, %s15_s25   ;;  %s1828_s24 = sphi %s1879_s24, %s2279_s24   ;;  %s1824_s23 = sphi %s1877_s23, %s2278_s23   ;;  %s1820_s22 = sphi %s1875_s22, %s2277_s22   ;;  %s1816_s21 = sphi %s1873_s21, %s2276_s21   ;;  %s1812_s20 = sphi %s1871_s20, %s2275_s20   ;;  %s1808_s19 = sphi %s1869_s19, %s2274_s19   ;;  %s1804_s18 = sphi %s1867_s18, %s2273_s18   ;;  %s1800_s17 = sphi %s1865_s17, %s2272_s17   ;;  %s1796_s16 = sphi %s1863_s16, %s2271_s16   ;;  %s1792_s15 = sphi %s1861_s15, %s2270_s15  }
   0xa   : > { %p28_p0 = scmp.ge.s32.totalorder %s27_s27, 9  ;;  %s30_s28 = sadd.s32 1, %s1828_s24 }
   0xb   : > { %s43_s29 = sadd.s32 1, %s1812_s20  ;;  %p50_p1 = scmp.ne.s32.totalorder %s1812_s20, %s1808_s19 }
   0xc   : > { %s2281_s27 = smov (%p28_p0, %s27_s27), 0  ;;  %s2283_s28 = smov (!%p28_p0, %s30_s28), %s1828_s24 }
   0xd   : > { %2261 = sst [smem:[#allocation6_spill]] %s2281_s27  ;;  %s39_s30 = ssub.s32 %s1824_s23, %s2281_s27 }
   0xe   : > { %p51_p2 = scmp.eq.s32.totalorder %s1832_s25, 0  ;;  %p32_p3 = scmp.ge.s32.totalorder %s2283_s28, 2 }
   0xf   : > { %p41_p4 = scmp.eq.s32.totalorder %s39_s30, 0  ;;  %s71_s6 = sadd.s32 1, %s1804_s18 }
  0x10   : > { %p1928_p5 = por %p51_p2, %p50_p1  ;;  %s2285_s28 = smov (%p32_p3, %s2283_s28), 0 }
  0x11   : > { %2263 = sst [smem:[#allocation7_spill]] %s2285_s28  ;;  %s67_s8 = ssub.s32 %s1828_s24, %s2285_s28 }
  0x12   : > { %s1936_s7 = scalar_select %p41_p4, %s1812_s20, %s43_s29  }
  0x13   : > { %p78_p6 = scmp.ne.s32.totalorder %s1804_s18, %s1800_s17  ;;  %s68_s9 = sor.u32 %s67_s8, %s39_s30 }
  0x14   : > { %p97_p7 = scmp.eq.s32.totalorder %s67_s8, 0  ;;  %p69_p8 = scmp.eq.s32.totalorder %s68_s9, 0 }
  0x15   : > { %p1942_p9 = por %p78_p6, %p51_p2  ;;  %s99_s11 = sadd.s32 1, %s1796_s16 }
  0x16   : > { %p109_p10 = scmp.ne.s32.totalorder %s1796_s16, %s1792_s15  ;;  %p110_p11 = scmp.eq.s32.totalorder %s1450_s26, 17 }
  0x17   : > { %s1950_s12 = scalar_select %p69_p8, %s1804_s18, %s71_s6  }
  0x18   : > { %s1953_s13 = scalar_select %p97_p7, %s1796_s16, %s99_s11  }
  0x19   : > { %p1955_p12 = por %p110_p11, %p109_p10  ;;  %p1453_p13 = scmp.ge.s32.totalorder %s1832_s25, 18 }
  0x1b   : > { %188 = sbr.rel (%p1453_p13) target bundleno = 88 (0x58), region = 16 }
  0x22   : > { %191 = sbr.rel (!%p1928_p5) target bundleno = 46 (0x2e), region = 20  ;;  %s193_s29 = sand.u32 (%p1928_p5), 1, %s1812_s20  }
  0x23   : > { %s1545_s30 = sshll.u32 (%p1928_p5), %s1824_s23, 4  ;;  %s1454_s8 = sshll.u32 (%p1928_p5), %s193_s29, 5 }
  0x24   : > { %s2266_s0 = sld [smem:[#allocation8_spill]] (%p1928_p5)  ;;  %s195_s26 = scalar_lea.vmem (%p1928_p5), [#allocation3], %s1454_s8 }
  0x2a   : > { %s201_s11 = scalar_lea.vmem %s2266_s0, %s1545_s30 }
  0x2b   : > { %v214_v0 = vld [vmem:[%s201_s11] sm:$0xff]  ;;  %v216_v1 = vld [vmem:[%s201_s11 + $0x8] sm:$0xff]  ;;  %v218_v2 = vld [vmem:[%s201_s11 + $0x90] sm:$0xff] }
  0x2c   : > { %215 = vst [vmem:[%s195_s26] sm:$0xff] %v214_v0  ;;  %217 = vst [vmem:[%s195_s26 + $0x8] sm:$0xff] %v216_v1  ;;  %v220_v3 = vld [vmem:[%s201_s11 + $0x98] sm:$0xff] }
  0x2d   : > { %219 = vst [vmem:[%s195_s26 + $0x10] sm:$0xff] %v218_v2  ;;  %221 = vst [vmem:[%s195_s26 + $0x18] sm:$0xff] %v220_v3 }
  0x2e PF: > { %227 = sbr.rel (!%p1942_p9) target bundleno = 88 (0x58), region = 43  ;;  %s229_s5 = sand.u32 (%p1942_p9), 1, %s1804_s18  }
  0x2f   : > { %s1459_s29 = sshll.u32 (%p1942_p9), %s1828_s24, 1  ;;  %s1457_s6 = sshll.u32 (%p1942_p9), %s229_s5, 9 }
  0x30   : > { %s1546_s30 = sshll.u32 (%p1942_p9), %s1824_s23, 8  ;;  %s2267_s1 = sld [smem:[#allocation9_spill]] (%p1942_p9) }
  0x31   : > { %s235_s9 = sadd.s32 (%p1942_p9), %s1546_s30, %s1459_s29  ;;  %s1980_s10 = scalar_lea.vmem (%p1942_p9), [#allocation4], %s1457_s6 }
  0x32   : > { %s1461_s0 = sshll.u32 (%p1942_p9), %s235_s9, 2 }
  0x36   : > { %s1975_s27 = scalar_lea.vmem %s2267_s1, %s1461_s0 }
  0x37   : > { %v391_v4 = vld [vmem:[%s1975_s27] sm:$0xff]  ;;  %v393_v5 = vld [vmem:[%s1975_s27 + $0x10] sm:$0xff] }
  0x38   : > { %v395_v6 = vld [vmem:[%s1975_s27 + $0x20] sm:$0xff]  ;;  %392 = vst [vmem:[%s1980_s10] sm:$0xff] %v391_v4  ;;  %394 = vst [vmem:[%s1980_s10 + $0x8] sm:$0xff] %v393_v5  ;;  %v397_v7 = vld [vmem:[%s1975_s27 + $0x30] sm:$0xff] }
  0x39   : > { %396 = vst [vmem:[%s1980_s10 + $0x10] sm:$0xff] %v395_v6  ;;  %v399_v8 = vld [vmem:[%s1975_s27 + $0x40] sm:$0xff]  ;;  %v401_v9 = vld [vmem:[%s1975_s27 + $0x50] sm:$0xff]  ;;  %398 = vst [vmem:[%s1980_s10 + $0x18] sm:$0xff] %v397_v7 }
  0x3a   : > { %400 = vst [vmem:[%s1980_s10 + $0x20] sm:$0xff] %v399_v8  ;;  %402 = vst [vmem:[%s1980_s10 + $0x28] sm:$0xff] %v401_v9  ;;  %v403_v10 = vld [vmem:[%s1975_s27 + $0x60] sm:$0xff]  ;;  %v405_v11 = vld [vmem:[%s1975_s27 + $0x70] sm:$0xff] }
  0x3b   : > { %v407_v12 = vld [vmem:[%s1975_s27 + $0x80] sm:$0xff]  ;;  %404 = vst [vmem:[%s1980_s10 + $0x30] sm:$0xff] %v403_v10  ;;  %406 = vst [vmem:[%s1980_s10 + $0x38] sm:$0xff] %v405_v11  ;;  %v409_v13 = vld [vmem:[%s1975_s27 + $0x90] sm:$0xff] }
  0x3c   : > { %408 = vst [vmem:[%s1980_s10 + $0x40] sm:$0xff] %v407_v12  ;;  %v411_v14 = vld [vmem:[%s1975_s27 + $0xa0] sm:$0xff]  ;;  %v413_v15 = vld [vmem:[%s1975_s27 + $0xb0] sm:$0xff]  ;;  %410 = vst [vmem:[%s1980_s10 + $0x48] sm:$0xff] %v409_v13 }
  0x3d   : > { %412 = vst [vmem:[%s1980_s10 + $0x50] sm:$0xff] %v411_v14  ;;  %414 = vst [vmem:[%s1980_s10 + $0x58] sm:$0xff] %v413_v15  ;;  %v415_v16 = vld [vmem:[%s1975_s27 + $0xc0] sm:$0xff]  ;;  %v417_v17 = vld [vmem:[%s1975_s27 + $0xd0] sm:$0xff] }
  0x3e   : > { %v419_v18 = vld [vmem:[%s1975_s27 + $0xe0] sm:$0xff]  ;;  %416 = vst [vmem:[%s1980_s10 + $0x60] sm:$0xff] %v415_v16  ;;  %418 = vst [vmem:[%s1980_s10 + $0x68] sm:$0xff] %v417_v17  ;;  %v421_v19 = vld [vmem:[%s1975_s27 + $0xf0] sm:$0xff] }
  0x3f   : > { %420 = vst [vmem:[%s1980_s10 + $0x70] sm:$0xff] %v419_v18  ;;  %v423_v20 = vld [vmem:[%s1975_s27 + $0x100] sm:$0xff]  ;;  %v425_v21 = vld [vmem:[%s1975_s27 + $0x110] sm:$0xff]  ;;  %422 = vst [vmem:[%s1980_s10 + $0x78] sm:$0xff] %v421_v19 }
  0x40   : > { %424 = vst [vmem:[%s1980_s10 + $0x80] sm:$0xff] %v423_v20  ;;  %426 = vst [vmem:[%s1980_s10 + $0x88] sm:$0xff] %v425_v21  ;;  %v427_v22 = vld [vmem:[%s1975_s27 + $0x120] sm:$0xff]  ;;  %v429_v23 = vld [vmem:[%s1975_s27 + $0x130] sm:$0xff] }
  0x41   : > { %v431_v24 = vld [vmem:[%s1975_s27 + $0x140] sm:$0xff]  ;;  %428 = vst [vmem:[%s1980_s10 + $0x90] sm:$0xff] %v427_v22  ;;  %430 = vst [vmem:[%s1980_s10 + $0x98] sm:$0xff] %v429_v23  ;;  %v433_v25 = vld [vmem:[%s1975_s27 + $0x150] sm:$0xff] }
  0x42   : > { %432 = vst [vmem:[%s1980_s10 + $0xa0] sm:$0xff] %v431_v24  ;;  %v435_v26 = vld [vmem:[%s1975_s27 + $0x160] sm:$0xff]  ;;  %v437_v27 = vld [vmem:[%s1975_s27 + $0x170] sm:$0xff]  ;;  %434 = vst [vmem:[%s1980_s10 + $0xa8] sm:$0xff] %v433_v25 }
  0x43   : > { %436 = vst [vmem:[%s1980_s10 + $0xb0] sm:$0xff] %v435_v26  ;;  %438 = vst [vmem:[%s1980_s10 + $0xb8] sm:$0xff] %v437_v27  ;;  %v439_v28 = vld [vmem:[%s1975_s27 + $0x180] sm:$0xff]  ;;  %v441_v29 = vld [vmem:[%s1975_s27 + $0x190] sm:$0xff] }
  0x44   : > { %v443_v30 = vld [vmem:[%s1975_s27 + $0x1a0] sm:$0xff]  ;;  %440 = vst [vmem:[%s1980_s10 + $0xc0] sm:$0xff] %v439_v28  ;;  %442 = vst [vmem:[%s1980_s10 + $0xc8] sm:$0xff] %v441_v29  ;;  %v445_v31 = vld [vmem:[%s1975_s27 + $0x1b0] sm:$0xff] }
  0x45   : > { %444 = vst [vmem:[%s1980_s10 + $0xd0] sm:$0xff] %v443_v30  ;;  %v447_v32 = vld [vmem:[%s1975_s27 + $0x1c0] sm:$0xff]  ;;  %v449_v33 = vld [vmem:[%s1975_s27 + $0x1d0] sm:$0xff]  ;;  %446 = vst [vmem:[%s1980_s10 + $0xd8] sm:$0xff] %v445_v31 }
  0x46   : > { %448 = vst [vmem:[%s1980_s10 + $0xe0] sm:$0xff] %v447_v32  ;;  %450 = vst [vmem:[%s1980_s10 + $0xe8] sm:$0xff] %v449_v33  ;;  %v451_v34 = vld [vmem:[%s1975_s27 + $0x1e0] sm:$0xff]  ;;  %v453_v35 = vld [vmem:[%s1975_s27 + $0x1f0] sm:$0xff] }
  0x47   : > { %v455_v36 = vld [vmem:[%s1975_s27 + $0x200] sm:$0xff]  ;;  %452 = vst [vmem:[%s1980_s10 + $0xf0] sm:$0xff] %v451_v34  ;;  %454 = vst [vmem:[%s1980_s10 + $0xf8] sm:$0xff] %v453_v35  ;;  %v457_v37 = vld [vmem:[%s1975_s27 + $0x210] sm:$0xff] }
  0x48   : > { %456 = vst [vmem:[%s1980_s10 + $0x100] sm:$0xff] %v455_v36  ;;  %v459_v38 = vld [vmem:[%s1975_s27 + $0x220] sm:$0xff]  ;;  %v461_v39 = vld [vmem:[%s1975_s27 + $0x230] sm:$0xff]  ;;  %458 = vst [vmem:[%s1980_s10 + $0x108] sm:$0xff] %v457_v37 }
  0x49   : > { %460 = vst [vmem:[%s1980_s10 + $0x110] sm:$0xff] %v459_v38  ;;  %462 = vst [vmem:[%s1980_s10 + $0x118] sm:$0xff] %v461_v39  ;;  %v463_v40 = vld [vmem:[%s1975_s27 + $0x240] sm:$0xff]  ;;  %v465_v41 = vld [vmem:[%s1975_s27 + $0x250] sm:$0xff] }
  0x4a   : > { %v467_v42 = vld [vmem:[%s1975_s27 + $0x260] sm:$0xff]  ;;  %464 = vst [vmem:[%s1980_s10 + $0x120] sm:$0xff] %v463_v40  ;;  %466 = vst [vmem:[%s1980_s10 + $0x128] sm:$0xff] %v465_v41  ;;  %v469_v43 = vld [vmem:[%s1975_s27 + $0x270] sm:$0xff] }
  0x4b   : > { %468 = vst [vmem:[%s1980_s10 + $0x130] sm:$0xff] %v467_v42  ;;  %v471_v44 = vld [vmem:[%s1975_s27 + $0x280] sm:$0xff]  ;;  %v473_v45 = vld [vmem:[%s1975_s27 + $0x290] sm:$0xff]  ;;  %470 = vst [vmem:[%s1980_s10 + $0x138] sm:$0xff] %v469_v43 }
  0x4c   : > { %472 = vst [vmem:[%s1980_s10 + $0x140] sm:$0xff] %v471_v44  ;;  %474 = vst [vmem:[%s1980_s10 + $0x148] sm:$0xff] %v473_v45  ;;  %v475_v46 = vld [vmem:[%s1975_s27 + $0x2a0] sm:$0xff]  ;;  %v477_v47 = vld [vmem:[%s1975_s27 + $0x2b0] sm:$0xff] }
  0x4d   : > { %v479_v48 = vld [vmem:[%s1975_s27 + $0x2c0] sm:$0xff]  ;;  %476 = vst [vmem:[%s1980_s10 + $0x150] sm:$0xff] %v475_v46  ;;  %478 = vst [vmem:[%s1980_s10 + $0x158] sm:$0xff] %v477_v47  ;;  %v481_v49 = vld [vmem:[%s1975_s27 + $0x2d0] sm:$0xff] }
  0x4e   : > { %480 = vst [vmem:[%s1980_s10 + $0x160] sm:$0xff] %v479_v48  ;;  %v483_v50 = vld [vmem:[%s1975_s27 + $0x2e0] sm:$0xff]  ;;  %v485_v51 = vld [vmem:[%s1975_s27 + $0x2f0] sm:$0xff]  ;;  %482 = vst [vmem:[%s1980_s10 + $0x168] sm:$0xff] %v481_v49 }
  0x4f   : > { %484 = vst [vmem:[%s1980_s10 + $0x170] sm:$0xff] %v483_v50  ;;  %486 = vst [vmem:[%s1980_s10 + $0x178] sm:$0xff] %v485_v51  ;;  %v487_v52 = vld [vmem:[%s1975_s27 + $0x300] sm:$0xff]  ;;  %v489_v53 = vld [vmem:[%s1975_s27 + $0x310] sm:$0xff] }
  0x50   : > { %v491_v54 = vld [vmem:[%s1975_s27 + $0x320] sm:$0xff]  ;;  %488 = vst [vmem:[%s1980_s10 + $0x180] sm:$0xff] %v487_v52  ;;  %490 = vst [vmem:[%s1980_s10 + $0x188] sm:$0xff] %v489_v53  ;;  %v493_v55 = vld [vmem:[%s1975_s27 + $0x330] sm:$0xff] }
  0x51   : > { %492 = vst [vmem:[%s1980_s10 + $0x190] sm:$0xff] %v491_v54  ;;  %v495_v56 = vld [vmem:[%s1975_s27 + $0x340] sm:$0xff]  ;;  %v497_v57 = vld [vmem:[%s1975_s27 + $0x350] sm:$0xff]  ;;  %494 = vst [vmem:[%s1980_s10 + $0x198] sm:$0xff] %v493_v55 }
  0x52   : > { %496 = vst [vmem:[%s1980_s10 + $0x1a0] sm:$0xff] %v495_v56  ;;  %498 = vst [vmem:[%s1980_s10 + $0x1a8] sm:$0xff] %v497_v57  ;;  %v499_v58 = vld [vmem:[%s1975_s27 + $0x360] sm:$0xff]  ;;  %v501_v59 = vld [vmem:[%s1975_s27 + $0x370] sm:$0xff] }
  0x53   : > { %v503_v60 = vld [vmem:[%s1975_s27 + $0x380] sm:$0xff]  ;;  %500 = vst [vmem:[%s1980_s10 + $0x1b0] sm:$0xff] %v499_v58  ;;  %502 = vst [vmem:[%s1980_s10 + $0x1b8] sm:$0xff] %v501_v59  ;;  %v505_v61 = vld [vmem:[%s1975_s27 + $0x390] sm:$0xff] }
  0x54   : > { %504 = vst [vmem:[%s1980_s10 + $0x1c0] sm:$0xff] %v503_v60  ;;  %v507_v62 = vld [vmem:[%s1975_s27 + $0x3a0] sm:$0xff]  ;;  %v509_v63 = vld [vmem:[%s1975_s27 + $0x3b0] sm:$0xff]  ;;  %506 = vst [vmem:[%s1980_s10 + $0x1c8] sm:$0xff] %v505_v61 }
  0x55   : > { %508 = vst [vmem:[%s1980_s10 + $0x1d0] sm:$0xff] %v507_v62  ;;  %510 = vst [vmem:[%s1980_s10 + $0x1d8] sm:$0xff] %v509_v63  ;;  %v511_v0 = vld [vmem:[%s1975_s27 + $0x3c0] sm:$0xff]  ;;  %v513_v1 = vld [vmem:[%s1975_s27 + $0x3d0] sm:$0xff] }
  0x56   : > { %v515_v2 = vld [vmem:[%s1975_s27 + $0x3e0] sm:$0xff]  ;;  %512 = vst [vmem:[%s1980_s10 + $0x1e0] sm:$0xff] %v511_v0  ;;  %514 = vst [vmem:[%s1980_s10 + $0x1e8] sm:$0xff] %v513_v1  ;;  %v517_v3 = vld [vmem:[%s1975_s27 + $0x3f0] sm:$0xff] }
  0x57   : > { %516 = vst [vmem:[%s1980_s10 + $0x1f0] sm:$0xff] %v515_v2  ;;  %518 = vst [vmem:[%s1980_s10 + $0x1f8] sm:$0xff] %v517_v3 }
  0x58 PF: > { %p1462_p0 = scmp.ge.s32.totalorder %s1832_s25, 1  ;;  %p523_p1 = scmp.lt.s32.totalorder %s1832_s25, 19 }
  0x5a   : > { %p524_p2 = pnand %p1462_p0, %p523_p1 }
  0x5b   : > { %s530_s0 = sand.u32 (!%p524_p2), 1, %s1808_s19   ;;  %s537_s28 = sand.u32 (!%p524_p2), 1, %s1800_s17  }
  0x5c   : > { %527 = sbr.rel (%p524_p2) target bundleno = 429 (0x1ad), region = 81  ;;  %s1463_s11 = sshll.u32 (!%p524_p2), %s530_s0, 5 }
  0x5d   : > { %s1464_s26 = sshll.u32 (!%p524_p2), %s537_s28, 9  ;;  %s558_s5 = sand.u32 (!%p524_p2), 1, %s1792_s15  }
  0x5e   : > { %s1466_s29 = sshll.u32 (!%p524_p2), %s1820_s22, 1  ;;  %s1465_s27 = sshll.u32 (!%p524_p2), %s558_s5, 4 }
  0x5f   : > { %p590_p3 = scmp.lt.s32.totalorder (!%p524_p2), %s1466_s29, 3  ;;  %s2123_s19 = scalar_lea.vmem (!%p524_p2), [#allocation3], %s1463_s11 }
  0x60   : > { %s2125_s17 = scalar_lea.vmem (!%p524_p2), [#allocation4], %s1464_s26  ;;  %s2127_s15 = scalar_lea.vmem (!%p524_p2), [#allocation5], %s1465_s27 }
  0x61   : > { %p1468_p4 = scmp.ne.s32.totalorder (!%p524_p2), %s1816_s21, 0 }
  0x63   : > { %s2287_s29 = smov (!%p590_p3, %s1466_s29), 3  ;;  %608 = sbr.rel (%p1468_p4) target bundleno = 106 (0x6a), region = 93 }
  0x64   : > { %s594_s9 = scalar_lea.vmem %s2255_s3, %s2287_s29  ;;  %s603_s1 = scalar_lea.vmem %s2256_s4, %s2287_s29  ;;  %v1834_v4 = vmov (!%p1468_p4), 0.0  }
  0x65   : > { %609 = vst [vmem:[#allocation2] sm:$0xff] (!%p1468_p4), %v1834_v4  ;;  %610 = vst [vmem:[#allocation2 + $0x8] sm:$0xff] (!%p1468_p4), %v1834_v4 }
  0x66   : > { %611 = vst [vmem:[#allocation2 + $0x10] sm:$0xff] (!%p1468_p4), %v1834_v4  ;;  %612 = vst [vmem:[#allocation2 + $0x18] sm:$0xff] (!%p1468_p4), %v1834_v4 }
  0x6a PF: > { %v1644_v5 = vld [vmem:[%s2125_s17 + $0x4] ss:$8 sps:$4 sm:$0xff]   ;;  %v1648_v7 = vld [vmem:[%s2125_s17] ss:$8 sps:$4 sm:$0xff]   ;;  %v1650_v9 = vld [vmem:[%s2125_s17 + $0x14] ss:$8 sps:$4 sm:$0xff]  }
  0x6b   : > { %v1646_v6 = vld [vmem:[%s2125_s17 + $0x104] ss:$8 sps:$4 sm:$0xff]   ;;  %1025 = vmatprep.subr.bf16.mxu1 %v1644_v5  ;;  %v1649_v8 = vld [vmem:[%s2125_s17 + $0x100] ss:$8 sps:$4 sm:$0xff]   ;;  %v1652_v10 = vld [vmem:[%s2125_s17 + $0x114] ss:$8 sps:$4 sm:$0xff]  }
  0x6c   : > { %1068 = vmatprep.subr.bf16.mxu0 %v1646_v6  ;;  %1026 = vmatpush1.bf16.msra.mxu1 %v1648_v7  ;;  %v1654_v11 = vld [vmem:[%s2125_s17 + $0x10] ss:$8 sps:$4 sm:$0xff]   ;;  %v1656_v13 = vld [vmem:[%s2125_s17 + $0x24] ss:$8 sps:$4 sm:$0xff]   ;;  %v1660_v15 = vld [vmem:[%s2125_s17 + $0x20] ss:$8 sps:$4 sm:$0xff]  }
  0x6d   : > { %1069 = vmatpush1.bf16.msra.mxu0 %v1649_v8  ;;  %1027 = vmatprep.subr.bf16.mxu1 %v1650_v9  ;;  %v1655_v12 = vld [vmem:[%s2125_s17 + $0x110] ss:$8 sps:$4 sm:$0xff]   ;;  %v1658_v14 = vld [vmem:[%s2125_s17 + $0x124] ss:$8 sps:$4 sm:$0xff]   ;;  %v1661_v16 = vld [vmem:[%s2125_s17 + $0x120] ss:$8 sps:$4 sm:$0xff]  }
  0x6e   : > { %1070 = vmatprep.subr.bf16.mxu0 %v1652_v10  ;;  %v1662_v17 = vld [vmem:[%s2125_s17 + $0x34] ss:$8 sps:$4 sm:$0xff]   ;;  %v1666_v19 = vld [vmem:[%s2125_s17 + $0x30] ss:$8 sps:$4 sm:$0xff]   ;;  %v1668_v21 = vld [vmem:[%s2125_s17 + $0x44] ss:$8 sps:$4 sm:$0xff]  }
  0x6f   : > { %v1664_v18 = vld [vmem:[%s2125_s17 + $0x134] ss:$8 sps:$4 sm:$0xff]   ;;  %v1667_v20 = vld [vmem:[%s2125_s17 + $0x130] ss:$8 sps:$4 sm:$0xff]   ;;  %v1670_v22 = vld [vmem:[%s2125_s17 + $0x144] ss:$8 sps:$4 sm:$0xff]  }
  0x70   : > { %1028 = vmatpush1.bf16.msra.mxu1 %v1654_v11  ;;  %v1672_v23 = vld [vmem:[%s2125_s17 + $0x40] ss:$8 sps:$4 sm:$0xff]   ;;  %v1674_v25 = vld [vmem:[%s2125_s17 + $0x54] ss:$8 sps:$4 sm:$0xff]   ;;  %v1678_v27 = vld [vmem:[%s2125_s17 + $0x50] ss:$8 sps:$4 sm:$0xff]  }
  0x71   : > { %1071 = vmatpush1.bf16.msra.mxu0 %v1655_v12  ;;  %1029 = vmatprep.subr.bf16.mxu1 %v1656_v13  ;;  %v1673_v24 = vld [vmem:[%s2125_s17 + $0x140] ss:$8 sps:$4 sm:$0xff]   ;;  %v1676_v26 = vld [vmem:[%s2125_s17 + $0x154] ss:$8 sps:$4 sm:$0xff]   ;;  %v1679_v28 = vld [vmem:[%s2125_s17 + $0x150] ss:$8 sps:$4 sm:$0xff]  }
  0x72   : > { %1072 = vmatprep.subr.bf16.mxu0 %v1658_v14  ;;  %v1680_v29 = vld [vmem:[%s2125_s17 + $0x64] ss:$8 sps:$4 sm:$0xff]   ;;  %v1684_v31 = vld [vmem:[%s2125_s17 + $0x60] ss:$8 sps:$4 sm:$0xff]   ;;  %v1686_v33 = vld [vmem:[%s2125_s17 + $0x74] ss:$8 sps:$4 sm:$0xff]  }
  0x73   : > { %v1682_v30 = vld [vmem:[%s2125_s17 + $0x164] ss:$8 sps:$4 sm:$0xff]   ;;  %v1685_v32 = vld [vmem:[%s2125_s17 + $0x160] ss:$8 sps:$4 sm:$0xff]   ;;  %v1688_v34 = vld [vmem:[%s2125_s17 + $0x174] ss:$8 sps:$4 sm:$0xff]  }
  0x74   : > { %1030 = vmatpush1.bf16.msra.mxu1 %v1660_v15  ;;  %v1690_v35 = vld [vmem:[%s2125_s17 + $0x70] ss:$8 sps:$4 sm:$0xff]   ;;  %v1692_v37 = vld [vmem:[%s2125_s17 + $0x84] ss:$8 sps:$4 sm:$0xff]   ;;  %v1696_v39 = vld [vmem:[%s2125_s17 + $0x80] ss:$8 sps:$4 sm:$0xff]  }
  0x75   : > { %1073 = vmatpush1.bf16.msra.mxu0 %v1661_v16  ;;  %1031 = vmatprep.subr.bf16.mxu1 %v1662_v17  ;;  %v1691_v36 = vld [vmem:[%s2125_s17 + $0x170] ss:$8 sps:$4 sm:$0xff]   ;;  %v1694_v38 = vld [vmem:[%s2125_s17 + $0x184] ss:$8 sps:$4 sm:$0xff]   ;;  %v1697_v40 = vld [vmem:[%s2125_s17 + $0x180] ss:$8 sps:$4 sm:$0xff]  }
  0x76   : > { %1074 = vmatprep.subr.bf16.mxu0 %v1664_v18  ;;  %v1698_v41 = vld [vmem:[%s2125_s17 + $0x94] ss:$8 sps:$4 sm:$0xff]   ;;  %v1702_v43 = vld [vmem:[%s2125_s17 + $0x90] ss:$8 sps:$4 sm:$0xff]   ;;  %v1704_v45 = vld [vmem:[%s2125_s17 + $0xa4] ss:$8 sps:$4 sm:$0xff]  }
  0x77   : > { %v1700_v42 = vld [vmem:[%s2125_s17 + $0x194] ss:$8 sps:$4 sm:$0xff]   ;;  %v1703_v44 = vld [vmem:[%s2125_s17 + $0x190] ss:$8 sps:$4 sm:$0xff]   ;;  %v1706_v46 = vld [vmem:[%s2125_s17 + $0x1a4] ss:$8 sps:$4 sm:$0xff]  }
  0x78   : > { %1032 = vmatpush1.bf16.msra.mxu1 %v1666_v19  ;;  %v1708_v47 = vld [vmem:[%s2125_s17 + $0xa0] ss:$8 sps:$4 sm:$0xff]   ;;  %v1710_v49 = vld [vmem:[%s2125_s17 + $0xb4] ss:$8 sps:$4 sm:$0xff]   ;;  %v1714_v51 = vld [vmem:[%s2125_s17 + $0xb0] ss:$8 sps:$4 sm:$0xff]  }
  0x79   : > { %1075 = vmatpush1.bf16.msra.mxu0 %v1667_v20  ;;  %1033 = vmatprep.subr.bf16.mxu1 %v1668_v21  ;;  %v1709_v48 = vld [vmem:[%s2125_s17 + $0x1a0] ss:$8 sps:$4 sm:$0xff]   ;;  %v1712_v50 = vld [vmem:[%s2125_s17 + $0x1b4] ss:$8 sps:$4 sm:$0xff]   ;;  %v1715_v53 = vld [vmem:[%s2125_s17 + $0x1b0] ss:$8 sps:$4 sm:$0xff]  }
  0x7a   : > { %1076 = vmatprep.subr.bf16.mxu0 %v1670_v22  ;;  %v1742_v52 = vld [vmem:[%s2123_s19 + $0x4] ss:$16 sps:$4 sm:$0xff]   ;;  %v1745_v56 = vld [vmem:[%s2123_s19 + $0xc] ss:$16 sps:$4 sm:$0xff]   ;;  %v1720_v57 = vld [vmem:[%s2125_s17 + $0xc0] ss:$8 sps:$4 sm:$0xff]  }
  0x7b   : > { %v1716_v54 = vld [vmem:[%s2125_s17 + $0xc4] ss:$8 sps:$4 sm:$0xff]   ;;  %1057 = vmatprep.mubr.bf16.mxu1 %v1742_v52  ;;  %1100 = vmatprep.mubr.bf16.mxu0 %v1745_v56  ;;  %v1721_v58 = vld [vmem:[%s2125_s17 + $0x1c0] ss:$8 sps:$4 sm:$0xff]   ;;  %v1722_v59 = vld [vmem:[%s2125_s17 + $0xd4] ss:$8 sps:$4 sm:$0xff]  }
  0x7c   : > { %1034 = vmatpush1.bf16.msra.mxu1 %v1672_v23  ;;  %v1718_v55 = vld [vmem:[%s2125_s17 + $0x1c4] ss:$8 sps:$4 sm:$0xff]   ;;  %v1724_v60 = vld [vmem:[%s2125_s17 + $0x1d4] ss:$8 sps:$4 sm:$0xff]   ;;  %v1726_v61 = vld [vmem:[%s2125_s17 + $0xd0] ss:$8 sps:$4 sm:$0xff]  }
  0x7d   : > { %1077 = vmatpush1.bf16.msra.mxu0 %v1673_v24  ;;  %1035 = vmatprep.subr.bf16.mxu1 %v1674_v25  ;;  %v1727_v62 = vld [vmem:[%s2125_s17 + $0x1d0] ss:$8 sps:$4 sm:$0xff]   ;;  %v1728_v63 = vld [vmem:[%s2125_s17 + $0xe4] ss:$8 sps:$4 sm:$0xff]   ;;  %v1732_v1 = vld [vmem:[%s2125_s17 + $0xe0] ss:$8 sps:$4 sm:$0xff]  }
  0x7e   : > { %1078 = vmatprep.subr.bf16.mxu0 %v1676_v26  ;;  %v1730_v0 = vld [vmem:[%s2125_s17 + $0x1e4] ss:$8 sps:$4 sm:$0xff]   ;;  %v1733_v2 = vld [vmem:[%s2125_s17 + $0x1e0] ss:$8 sps:$4 sm:$0xff]   ;;  %v1734_v3 = vld [vmem:[%s2125_s17 + $0xf4] ss:$8 sps:$4 sm:$0xff]  }
  0x7f   : > { %v1736_v4 = vld [vmem:[%s2125_s17 + $0x1f4] ss:$8 sps:$4 sm:$0xff]   ;;  %v1738_v5 = vld [vmem:[%s2125_s17 + $0xf0] ss:$8 sps:$4 sm:$0xff]   ;;  %v613_v10 = vld [vmem:[#allocation2] sm:$0xff]  ;;  %p1537_p5 = scmp.ne.s32.totalorder %s1816_s21, 8 }
  0x80   : > { %1036 = vmatpush1.bf16.msra.mxu1 %v1678_v27  ;;  %v1739_v6 = vld [vmem:[%s2125_s17 + $0x1f0] ss:$8 sps:$4 sm:$0xff]   ;;  %v614_v14 = vld [vmem:[#allocation2 + $0x8] sm:$0xff] }
  0x81   : > { %1079 = vmatpush1.bf16.msra.mxu0 %v1679_v28  ;;  %1037 = vmatprep.subr.bf16.mxu1 %v1680_v29  ;;  %v1740_v7 = vld [vmem:[%s2123_s19] ss:$16 sps:$4 sm:$0xff]   ;;  %v1743_v8 = vld [vmem:[%s2123_s19 + $0x8] ss:$16 sps:$4 sm:$0xff]  }
  0x82   : > { %1080 = vmatprep.subr.bf16.mxu0 %v1682_v30  ;;  %v615_v18 = vld [vmem:[#allocation2 + $0x10] sm:$0xff]  ;;  %v616_v23 = vld [vmem:[#allocation2 + $0x18] sm:$0xff] }
  0x84   : > { %1038 = vmatpush1.bf16.msra.mxu1 %v1684_v31 }
  0x85   : > { %1081 = vmatpush1.bf16.msra.mxu0 %v1685_v32  ;;  %1039 = vmatprep.subr.bf16.mxu1 %v1686_v33 }
  0x86   : > { %1082 = vmatprep.subr.bf16.mxu0 %v1688_v34 }
  0x88   : > { %1040 = vmatpush1.bf16.msra.mxu1 %v1690_v35 }
  0x89   : > { %1083 = vmatpush1.bf16.msra.mxu0 %v1691_v36  ;;  %1041 = vmatprep.subr.bf16.mxu1 %v1692_v37 }
  0x8a   : > { %1084 = vmatprep.subr.bf16.mxu0 %v1694_v38 }
  0x8c   : > { %1042 = vmatpush1.bf16.msra.mxu1 %v1696_v39 }
  0x8d   : > { %1085 = vmatpush1.bf16.msra.mxu0 %v1697_v40  ;;  %1043 = vmatprep.subr.bf16.mxu1 %v1698_v41 }
  0x8e   : > { %1086 = vmatprep.subr.bf16.mxu0 %v1700_v42 }
  0x90   : > { %1044 = vmatpush1.bf16.msra.mxu1 %v1702_v43 }
  0x91   : > { %1087 = vmatpush1.bf16.msra.mxu0 %v1703_v44  ;;  %1045 = vmatprep.subr.bf16.mxu1 %v1704_v45 }
  0x92   : > { %1088 = vmatprep.subr.bf16.mxu0 %v1706_v46  ;;  %v1161_v46 = vlaneseq (!%p1537_p5) }
  0x94   : > { %1046 = vmatpush1.bf16.msra.mxu1 %v1708_v47  ;;  %vm1175_vm0 = vcmp.lt.s32.totalorder (!%p1537_p5), %v1161_v46, 256 }
  0x95   : > { %1089 = vmatpush1.bf16.msra.mxu0 %v1709_v48  ;;  %1047 = vmatprep.subr.bf16.mxu1 %v1710_v49 }
  0x96   : > { %1090 = vmatprep.subr.bf16.mxu0 %v1712_v50  ;;  %v1835_v50 = vmov (!%p1537_p5), 1966171168  }
  0x98   : > { %1048 = vmatpush1.bf16.msra.mxu1 %v1714_v51  ;;  %v1159_v51 = vunpack.c.l.s4 (!%p1537_p5), %v1835_v50 }
  0x99   : > { %1091 = vmatpush1.bf16.msra.mxu0 %v1715_v53  ;;  %1049 = vmatprep.subr.bf16.mxu1 %v1716_v54 }
  0x9a   : > { %1092 = vmatprep.subr.bf16.mxu0 %v1718_v55 }
  0x9c   : > { %1050 = vmatpush1.bf16.msra.mxu1 %v1720_v57  ;;  %v1162_v57 = vshrl.u32 (!%p1537_p5), %v1161_v46, 7 }
  0x9d   : > { %1093 = vmatpush1.bf16.msra.mxu0 %v1721_v58  ;;  %1051 = vmatprep.subr.bf16.mxu1 %v1722_v59 }
  0x9e   : > { %1094 = vmatprep.subr.bf16.mxu0 %v1724_v60 }
  0xa0   : > { %1052 = vmatpush1.bf16.msra.mxu1 %v1726_v61  ;;  %v1160_v61 = vunpack.c.0.s8 (!%p1537_p5), %v1159_v51 }
  0xa1   : > { %1095 = vmatpush1.bf16.msra.mxu0 %v1727_v62  ;;  %1053 = vmatprep.subr.bf16.mxu1 %v1728_v63 }
  0xa2   : > { %1096 = vmatprep.subr.bf16.mxu0 %v1730_v0 }
  0xa4   : > { %1054 = vmatpush1.bf16.msra.mxu1 %v1732_v1 }
  0xa5   : > { %1097 = vmatpush1.bf16.msra.mxu0 %v1733_v2  ;;  %1055 = vmatprep.subr.bf16.mxu1 %v1734_v3 }
  0xa6   : > { %1098 = vmatprep.subr.bf16.mxu0 %v1736_v4  ;;  %v1163_v4 = vsub.s32 (!%p1537_p5), %v1160_v61, %v1162_v57 }
  0xa8   : > { %1056 = vmatpush1.bf16.msra.mxu1 %v1738_v5 }
  0xa9   : > { %1099 = vmatpush1.bf16.msra.mxu0 %v1739_v6 }
  0xab   : > { %1058 = vmatmul.mubr.bf16.vlgmr.msra.gmra.mrb[0].mxu1 %v1740_v7 }
  0xac   : > { %1101 = vmatmul.mubr.bf16.vlgmr.msra.gmra.mrb[0].mxu0 %v1743_v8 }
 0x17e   : > { %v1059_v9 = vpop.f32.mrb[0].mxu1 }
 0x17f   : > { %v1102_v11 = vpop.f32.mrb[0].mxu0  ;;  %v1061_v13 = vpop.f32.mrb[1].mxu1 }
 0x180   : > { %v1103_v12 = vadd.f32 %v1102_v11, %v1059_v9  ;;  %v1104_v15 = vpop.f32.mrb[1].mxu0  ;;  %v1063_v17 = vpop.f32.mrb[2].mxu1 }
 0x181   : > { %v1105_v16 = vadd.f32 %v1104_v15, %v1061_v13  ;;  %v1106_v19 = vpop.f32.mrb[2].mxu0  ;;  %v1065_v22 = vpop.f32.mrb[3].mxu1  ;;  %1122 = sbr.rel (%p1537_p5) target bundleno = 422 (0x1a6), region = 97 }
 0x182   : > { %v1111_v20 = vadd.f32 %v1103_v12, %v613_v10  ;;  %v1107_v21 = vadd.f32 %v1106_v19, %v1063_v17  ;;  %v1108_v24 = vpop.f32.mrb[3].mxu0 }
 0x183   : > { %v1112_v25 = vadd.f32 %v1105_v16, %v614_v14  ;;  %v1109_v26 = vadd.f32 %v1108_v24, %v1065_v22 }
 0x184   : > { %1115 = vst [vmem:[#allocation2] sm:$0xff] %v1111_v20  ;;  %v1113_v27 = vadd.f32 %v1107_v21, %v615_v18 }
 0x185   : > { %1116 = vst [vmem:[#allocation2 + $0x8] sm:$0xff] %v1112_v25  ;;  %v1114_v28 = vadd.f32 %v1109_v26, %v616_v23 }
 0x186   : > { %1117 = vst [vmem:[#allocation2 + $0x10] sm:$0xff] %v1113_v27 }
 0x187   : > { %1118 = vst [vmem:[#allocation2 + $0x18] sm:$0xff] %v1114_v28 }
 0x18b   : > { %v1123_v29 = vld [vmem:[#allocation2] sm:$0xff] }
 0x18c   : > { %v1124_v30 = vld [vmem:[#allocation2 + $0x8] sm:$0xff]  ;;  %v1178_v33 = vmul.f32 %v1123_v29, %v1123_v29 }
 0x18d   : > { %v1125_v31 = vld [vmem:[#allocation2 + $0x10] sm:$0xff]  ;;  %v1547_v32 = vpack.c.bf16 %v1124_v30, %v1123_v29  ;;  %v1179_v34 = vmul.f32 %v1124_v30, %v1124_v30 }
 0x18e   : > { %v1126_v35 = vld [vmem:[#allocation2 + $0x18] sm:$0xff]  ;;  %v1141_v36 = vadd.f32 %v1125_v31, %v1123_v29  ;;  %v1180_v39 = vmul.f32 %v1125_v31, %v1125_v31 }
 0x18f   : > { %v1548_v37 = vpack.c.bf16 %v1126_v35, %v1125_v31  ;;  %v1148_v38 = vadd.f32 %v1126_v35, %v1124_v30  ;;  %v1181_v40 = vmul.f32 %v1126_v35, %v1126_v35  ;;  %1139 = vst [vmem:[%s2127_s15] sm:$0xff] %v1547_v32 }
 0x190   : > { %v1142_v41 = vrot.slane %v1141_v36, 4  ;;  %v1182_v43 = vadd.f32 %v1180_v39, %v1178_v33 }
 0x191   : > { %1140 = vst [vmem:[%s2127_s15 + $0x8] sm:$0xff] %v1548_v37  ;;  %v1149_v42 = vrot.slane %v1148_v38, 4  ;;  %v1189_v44 = vadd.f32 %v1181_v40, %v1179_v34 }
 0x192   : > { %v1143_v45 = vadd.f32 %v1142_v41, %v1141_v36  ;;  %v1183_v48 = vrot.slane %v1182_v43, 4 }
 0x193   : > { %v1150_v47 = vadd.f32 %v1149_v42, %v1148_v38  ;;  %v1190_v49 = vrot.slane %v1189_v44, 4 }
 0x194   : > { %v1144_v52 = vrot.slane %v1143_v45, 2  ;;  %v1184_v54 = vadd.f32 %v1183_v48, %v1182_v43 }
 0x195   : > { %v1151_v53 = vrot.slane %v1150_v47, 2  ;;  %v1191_v55 = vadd.f32 %v1190_v49, %v1189_v44 }
 0x196   : > { %v1145_v56 = vadd.f32 %v1144_v52, %v1143_v45  ;;  %v1185_v59 = vrot.slane %v1184_v54, 2 }
 0x197   : > { %v1152_v58 = vadd.f32 %v1151_v53, %v1150_v47  ;;  %v1192_v60 = vrot.slane %v1191_v55, 2 }
 0x198   : > { %v1146_v62 = vrot.slane %v1145_v56, 1  ;;  %v1186_v0 = vadd.f32 %v1185_v59, %v1184_v54 }
 0x199   : > { %v1153_v63 = vrot.slane %v1152_v58, 1  ;;  %v1193_v1 = vadd.f32 %v1192_v60, %v1191_v55 }
 0x19a   : > { %v1147_v2 = vadd.f32 %v1146_v62, %v1145_v56  ;;  %v1187_v5 = vrot.slane %v1186_v0, 1 }
 0x19b   : > { %v1154_v3 = vadd.f32 %v1153_v63, %v1152_v58  ;;  %v1194_v6 = vrot.slane %v1193_v1, 1 }
 0x19c   : > { %v1188_v8 = vadd.f32 %v1187_v5, %v1186_v0 }
 0x19d   : > { %v1157_v7 = vcombine.low %v1147_v2, %v1154_v3  ;;  %v1195_v9 = vadd.f32 %v1194_v6, %v1193_v1 }
 0x19f   : > { %v1164_v10 = vrot.slane %v1157_v7, %v1163_v4  ;;  %v1198_v11 = vcombine.low %v1188_v8, %v1195_v9 }
 0x1a1   : > { %v1171_v12 = vrot.slane %v1164_v10, %v1163_v4  ;;  %v1205_v13 = vrot.slane %v1198_v11, %v1163_v4 }
 0x1a3   : > { %1177 = vst.msk [vmem:[%s594_s9] sm:$0x3] %vm1175_vm0, %v1171_v12  ;;  %v1212_v14 = vrot.slane %v1205_v13, %v1163_v4 }
 0x1a5   : > { %1214 = vst.msk [vmem:[%s603_s1] sm:$0x3] %vm1175_vm0, %v1212_v14 }
 0x1a6 PF: > { %1237 = sbr.rel (!%p1955_p12) target bundleno = 429 (0x1ad), region = 101  ;;  %s1549_s26 = sshll.u32 (%p1955_p12), %s1820_s22, 3  ;;  %v1273_v15 = vld [vmem:[%s2127_s15] sm:$0xff] (%p1955_p12)  ;;  %v1275_v16 = vld [vmem:[%s2127_s15 + $0x8] sm:$0xff] (%p1955_p12) }
 0x1a7   : > { %s1243_s6 = scalar_lea.vmem (%p1955_p12), %s2254_s2, %s1549_s26 }
 0x1a8   : > { %1274 = vst [vmem:[%s1243_s6] sm:$0xff] (%p1955_p12), %v1273_v15  ;;  %1276 = vst [vmem:[%s1243_s6 + $0x10] sm:$0xff] (%p1955_p12), %v1275_v16 }
 0x1ad PF: > { %s15_s25 = sadd.s32 1, %s1832_s25   ;;  %s2268_s1 = sld [smem:[#allocation6_spill]] }
 0x1ae   : > { %p12_p6 = scmp.ge.s32.totalorder %s15_s25, 20   ;;  %s2269_s14 = sld [smem:[#allocation7_spill]] }
 0x1af   : > { %s2270_s15 = smov %s1796_s16  ;;  %s2271_s16 = smov %s1953_s13 }
 0x1b0   : > { %s2272_s17 = smov %s1804_s18  ;;  %s2273_s18 = smov %s1950_s12 }
 0x1b1   : > { %s2274_s19 = smov %s1812_s20  ;;  %s2275_s20 = smov %s1936_s7 }
 0x1b2   : > { %s2276_s21 = smov %s1824_s23  ;;  %s2277_s22 = smov %s1828_s24 }
 0x1b3   : > { %s2278_s23 = smov %s2268_s1  ;;  %14 = sbr.rel (!%p12_p6) target bundleno = 9 (0x9), region = 202 }
 0x1b4   : > { %s2279_s24 = smov %s2269_s14 }

// kernel: resnet_forward.51
= control target key start
LH: loop header
LB: loop body
LE: loop exit
PB: predicated region body
PF: predicated region fallthrough
CT: control target
= control target key end

     0   :  { %v21_v0 = vlaneseq  ;;  %v162_v1 = vmov 1983009808   ;;  %v163_v36 = vmov 1966171168   ;;  %s204_s1 = inlined_call_operand.vmem [shape: f32[1,512], index: 1, kind: input, shape index: {}]   ;;  %s205_s2 = inlined_call_operand.vmem [shape: f32[1,512], index: 2, kind: input, shape index: {}]   ;;  %s206_s0 = inlined_call_operand.vmem [shape: bf16[2,512], index: 0, kind: input, shape index: {}]   ;;  %s207_s3 = inlined_call_operand.vmem [shape: bf16[2,512], index: 3, kind: input, shape index: {}]   ;;  %s208_s4 = inlined_call_operand.vmem [shape: bf16[2,512], index: 4, kind: output, shape index: {}]  }
   0x1   :  { %v40_v2 = vunpack.c.l.s4 %v162_v1  ;;  %v19_v4 = vld [vmem:[%s204_s1] sm:$0xf]  ;;  %v130_v37 = vunpack.c.l.s4 %v163_v36 }
   0x2   :  { %v22_v3 = vshrl.u32 %v21_v0, 7  ;;  %v56_v10 = vld [vmem:[%s205_s2] sm:$0xf] }
   0x3   :  { %v41_v5 = vunpack.c.0.s8 %v40_v2  ;;  %v17_v16 = vld [vmem:[%s206_s0] sm:$0xf]  ;;  %v131_v40 = vunpack.c.0.s8 %v130_v37 }
   0x4   :  { %v23_v6 = vsub.s32 0, %v22_v3  ;;  %v27_v7 = vsub.s32 1, %v22_v3  ;;  %v31_v8 = vsub.s32 2, %v22_v3  ;;  %v35_v9 = vsub.s32 3, %v22_v3  ;;  %v93_v30 = vld [vmem:[%s207_s3] sm:$0xf] }
   0x5   :  { %v44_v11 = vsub.s32 %v41_v5, %v22_v3  ;;  %v18_v25 = vunpack.c.l.bf16 %v17_v16  ;;  %v94_v34 = vunpack.c.l.bf16 %v93_v30  ;;  %v134_v45 = vsub.s32 %v131_v40, %v22_v3 }
   0x6   :  { %v24_v12 = vrot.slane %v19_v4, %v23_v6  ;;  %v28_v13 = vrot.slane %v19_v4, %v27_v7  ;;  %v32_v14 = vrot.slane %v19_v4, %v31_v8  ;;  %v36_v15 = vrot.slane %v19_v4, %v35_v9 }
   0x7   :  { %v61_v17 = vrot.slane %v56_v10, %v23_v6  ;;  %v65_v18 = vrot.slane %v56_v10, %v27_v7  ;;  %v69_v19 = vrot.slane %v56_v10, %v31_v8  ;;  %v73_v20 = vrot.slane %v56_v10, %v35_v9 }
   0x8   :  { %v37_v21 = vcombine.low %v24_v12, %v28_v13  ;;  %v38_v22 = vcombine.low %v32_v14, %v36_v15 }
   0x9   :  { %v74_v23 = vcombine.low %v61_v17, %v65_v18  ;;  %v75_v24 = vcombine.low %v69_v19, %v73_v20 }
   0xa   :  { %v45_v26 = vrot.slane %v37_v21, %v44_v11  ;;  %v52_v27 = vrot.slane %v38_v22, %v44_v11 }
   0xb   :  { %v82_v28 = vrot.slane %v74_v23, %v44_v11  ;;  %v89_v29 = vrot.slane %v75_v24, %v44_v11 }
   0xc   :  { %v53_v31 = vcombine.low %v45_v26, %v52_v27 }
   0xd   :  { %v90_v32 = vcombine.low %v82_v28, %v89_v29 }
   0xe   :  { %v55_v33 = vmul.f32 %v53_v31, %v18_v25 }
  0x10   :  { %v92_v35 = vadd.f32 %v90_v32, %v55_v33 }
  0x12   :  { %v95_v38 = vadd.f32 %v94_v34, %v92_v35 }
  0x14   :  { %v96_v39 = vmax.f32 %v95_v38, 0.0 }
  0x16   :  { %v98_v41 = vcombine.high %v96_v39, %v96_v39  ;;  %v105_v42 = vrot.slane %v96_v39, %v44_v11 }
  0x18   :  { %v112_v43 = vrot.slane %v98_v41, %v44_v11  ;;  %v113_v44 = vcombine.high %v105_v42, %v105_v42 }
  0x1a   :  { %v114_v46 = vcombine.high %v112_v43, %v112_v43  ;;  %v157_v47 = vpack.c.bf16 %v113_v44, %v105_v42 }
  0x1c   :  { %v158_v48 = vpack.c.bf16 %v114_v46, %v112_v43  ;;  %v135_v49 = vrot.slane %v157_v47, %v134_v45 }
  0x1e   :  { %v142_v50 = vrot.slane %v158_v48, %v134_v45 }
  0x20   :  { %v143_v51 = vcombine.low %v135_v49, %v142_v50 }
  0x22   :  { %159 = vst.sshfl [vmem:[%s208_s4] sm:$0x55 pattern:$0x73625140] %v143_v51 }

// kernel: resnet_forward.52
= control target key start
LH: loop header
LB: loop body
LE: loop exit
PB: predicated region body
PF: predicated region fallthrough
CT: control target
= control target key end

     0   :  { %s204_s6 = smov 0   ;;  %s225_s0 = inlined_call_operand.vmem [shape: bf16[2,1,512], index: 0, kind: input, shape index: {}]   ;;  %s226_s1 = inlined_call_operand.vmem [shape: f32[2,1,512], index: 1, kind: output, shape index: {}]  }
   0x1 LB: > { %s182_s7 = sadd.s32 4294967295, %s206_s6   ;;  %p186_p0 = scmp.ge.s32.totalorder %s206_s6, 1  ;;  %s206_s6 = sphi %s204_s6, %s11_s6  }
   0x2   : > { %p86_p1 = scmp.lt.s32.totalorder %s206_s6, 3 }
   0x4   : > { %p87_p2 = pnand %p186_p0, %p86_p1 }
   0x5   : > { %p104_p3 = scmp.lt.s32.totalorder (!%p87_p2), %s182_s7, 1  ;;  %v119_v0 = vlaneseq (!%p87_p2)  ;;  %v208_v1 = vmov (!%p87_p2), 1966171168  }
   0x6   : > { %90 = sbr.rel (%p87_p2) target bundleno = 22 (0x16), region = 24  ;;  %v117_v2 = vunpack.c.l.s4 (!%p87_p2), %v208_v1 }
   0x7   : > { %v120_v3 = vshrl.u32 (!%p87_p2), %v119_v0, 7  ;;  %vm126_vm0 = vcmp.lt.s32.totalorder (!%p87_p2), %v119_v0, 512 }
   0x8   : > { %v118_v4 = vunpack.c.0.s8 (!%p87_p2), %v117_v2 }
   0xa   : > { %v121_v5 = vsub.s32 (!%p87_p2), %v118_v4, %v120_v3 }
   0xd   : > { %s228_s7 = smov (!%p104_p3, %s182_s7), 1 }
   0xe   : > { %s187_s8 = sshll.u32 %s228_s7, 2 }
   0xf   : > { %s107_s11 = scalar_lea.vmem %s225_s0, %s187_s8  ;;  %s111_s14 = scalar_lea.vmem %s226_s1, %s187_s8 }
  0x10   : > { %v112_v6 = vld [vmem:[%s107_s11] sm:$0xf] }
  0x11   : > { %v113_v7 = vunpack.c.l.bf16 %v112_v6 }
  0x13   : > { %v122_v8 = vrot.slane %v113_v7, %v121_v5 }
  0x15   : > { %128 = vst.msk [vmem:[%s111_s14] sm:$0xf] %vm126_vm0, %v122_v8 }
  0x16 PF: > { %s11_s6 = sadd.s32 1, %s206_s6  }
  0x17   : > { %p8_p4 = scmp.ge.s32.totalorder %s11_s6, 4  }
  0x19   :  { %10 = sbr.rel (!%p8_p4) target bundleno = 1 (0x1), region = 54 }

// kernel: resnet_forward.53
= control target key start
LH: loop header
LB: loop body
LE: loop exit
PB: predicated region body
PF: predicated region fallthrough
CT: control target
= control target key end

     0   :  { %s644_s1 = inlined_call_operand.vmem [shape: bf16[512,128], index: 1, kind: input, shape index: {}]   ;;  %s645_s0 = inlined_call_operand.vmem [shape: bf16[16,512], index: 0, kind: input, shape index: {}]   ;;  %s646_s2 = inlined_call_operand.vmem [shape: f32[16,128], index: 2, kind: output, shape index: {}]  }
   0x1   :  { %v477_v0 = vld [vmem:[%s644_s1 + $0x40] sm:$0xff]   ;;  %v481_v4 = vld [vmem:[%s644_s1 + $0x48] sm:$0xff]   ;;  %v485_v8 = vld [vmem:[%s644_s1 + $0x50] sm:$0xff]  }
   0x2   :  { %v478_v1 = vld [vmem:[%s644_s1 + $0xc0] sm:$0xff]   ;;  %433 = vmatprep.subr.bf16.mxu0 %v477_v0  ;;  %v482_v5 = vld [vmem:[%s644_s1 + $0xc8] sm:$0xff]   ;;  %v486_v9 = vld [vmem:[%s644_s1 + $0xd0] sm:$0xff]  }
   0x3   :  { %v479_v2 = vld [vmem:[%s644_s1] sm:$0xff]   ;;  %455 = vmatprep.subr.bf16.mxu1 %v478_v1  ;;  %v483_v6 = vld [vmem:[%s644_s1 + $0x8] sm:$0xff]   ;;  %v487_v10 = vld [vmem:[%s644_s1 + $0x10] sm:$0xff]  }
   0x4   :  { %v480_v3 = vld [vmem:[%s644_s1 + $0x80] sm:$0xff]   ;;  %434 = vmatpush3.bf16.msra.mxu0 %v479_v2  ;;  %v484_v7 = vld [vmem:[%s644_s1 + $0x88] sm:$0xff]   ;;  %v488_v11 = vld [vmem:[%s644_s1 + $0x90] sm:$0xff]  }
   0x5   :  { %456 = vmatpush3.bf16.msra.mxu1 %v480_v3  ;;  %435 = vmatprep.subr.bf16.mxu0 %v481_v4  ;;  %v489_v12 = vld [vmem:[%s644_s1 + $0x58] sm:$0xff]   ;;  %v493_v16 = vld [vmem:[%s644_s1 + $0x60] sm:$0xff]   ;;  %v497_v20 = vld [vmem:[%s644_s1 + $0x68] sm:$0xff]  }
   0x6   :  { %457 = vmatprep.subr.bf16.mxu1 %v482_v5  ;;  %v490_v13 = vld [vmem:[%s644_s1 + $0xd8] sm:$0xff]   ;;  %v494_v17 = vld [vmem:[%s644_s1 + $0xe0] sm:$0xff]   ;;  %v498_v21 = vld [vmem:[%s644_s1 + $0xe8] sm:$0xff]  }
   0x7   :  { %v491_v14 = vld [vmem:[%s644_s1 + $0x18] sm:$0xff]   ;;  %v495_v18 = vld [vmem:[%s644_s1 + $0x20] sm:$0xff]   ;;  %v499_v22 = vld [vmem:[%s644_s1 + $0x28] sm:$0xff]  }
   0x8   :  { %436 = vmatpush3.bf16.msra.mxu0 %v483_v6  ;;  %v492_v15 = vld [vmem:[%s644_s1 + $0x98] sm:$0xff]   ;;  %v496_v19 = vld [vmem:[%s644_s1 + $0xa0] sm:$0xff]   ;;  %v500_v23 = vld [vmem:[%s644_s1 + $0xa8] sm:$0xff]  }
   0x9   :  { %458 = vmatpush3.bf16.msra.mxu1 %v484_v7  ;;  %437 = vmatprep.subr.bf16.mxu0 %v485_v8  ;;  %v501_v24 = vld [vmem:[%s644_s1 + $0x70] sm:$0xff]   ;;  %v505_v28 = vld [vmem:[%s644_s1 + $0x78] sm:$0xff]  }
   0xa   :  { %459 = vmatprep.subr.bf16.mxu1 %v486_v9  ;;  %v502_v25 = vld [vmem:[%s644_s1 + $0xf0] sm:$0xff]   ;;  %v506_v29 = vld [vmem:[%s644_s1 + $0xf8] sm:$0xff]  }
   0xb   :  { %v503_v26 = vld [vmem:[%s644_s1 + $0x30] sm:$0xff]   ;;  %v507_v30 = vld [vmem:[%s644_s1 + $0x38] sm:$0xff]  }
   0xc   :  { %438 = vmatpush3.bf16.msra.mxu0 %v487_v10  ;;  %v504_v27 = vld [vmem:[%s644_s1 + $0xb0] sm:$0xff]   ;;  %v508_v31 = vld [vmem:[%s644_s1 + $0xb8] sm:$0xff]  }
   0xd   :  { %460 = vmatpush3.bf16.msra.mxu1 %v488_v11  ;;  %439 = vmatprep.subr.bf16.mxu0 %v489_v12  ;;  %v509_v32 = vld [vmem:[%s645_s0] ss:$16 sps:$4 sm:$0xff]   ;;  %v511_v33 = vld [vmem:[%s645_s0 + $0x4] ss:$16 sps:$4 sm:$0xff]   ;;  %v512_v34 = vld [vmem:[%s645_s0 + $0x8] ss:$16 sps:$4 sm:$0xff]  }
   0xe   :  { %461 = vmatprep.subr.bf16.mxu1 %v490_v13  ;;  %v514_v35 = vld [vmem:[%s645_s0 + $0xc] ss:$16 sps:$4 sm:$0xff]   ;;  %332 = vmatprep.mubr.bf16.mxu0 %v511_v33 }
   0xf   :  { %373 = vmatprep.mubr.bf16.mxu1 %v514_v35 }
  0x10   :  { %440 = vmatpush3.bf16.msra.mxu0 %v491_v14 }
  0x11   :  { %462 = vmatpush3.bf16.msra.mxu1 %v492_v15  ;;  %441 = vmatprep.subr.bf16.mxu0 %v493_v16 }
  0x12   :  { %463 = vmatprep.subr.bf16.mxu1 %v494_v17 }
  0x14   :  { %442 = vmatpush3.bf16.msra.mxu0 %v495_v18 }
  0x15   :  { %464 = vmatpush3.bf16.msra.mxu1 %v496_v19  ;;  %443 = vmatprep.subr.bf16.mxu0 %v497_v20 }
  0x16   :  { %465 = vmatprep.subr.bf16.mxu1 %v498_v21 }
  0x18   :  { %444 = vmatpush3.bf16.msra.mxu0 %v499_v22 }
  0x19   :  { %466 = vmatpush3.bf16.msra.mxu1 %v500_v23  ;;  %445 = vmatprep.subr.bf16.mxu0 %v501_v24 }
  0x1a   :  { %467 = vmatprep.subr.bf16.mxu1 %v502_v25 }
  0x1c   :  { %446 = vmatpush3.bf16.msra.mxu0 %v503_v26 }
  0x1d   :  { %468 = vmatpush3.bf16.msra.mxu1 %v504_v27  ;;  %447 = vmatprep.subr.bf16.mxu0 %v505_v28 }
  0x1e   :  { %469 = vmatprep.subr.bf16.mxu1 %v506_v29 }
  0x20   :  { %448 = vmatpush3.bf16.msra.mxu0 %v507_v30 }
  0x21   :  { %470 = vmatpush3.bf16.msra.mxu1 %v508_v31 }
  0x23   :  { %333 = vmatmul.mubr.bf16.vlgmr.msra.gmra.mrb[0].mxu0 %v509_v32 }
  0x24   :  { %374 = vmatmul.mubr.bf16.vlgmr.msra.gmra.mrb[0].mxu1 %v512_v34 }
  0xf6   :  { %v449_v36 = vpop.f32.mrb[0].mxu0 }
  0xf7   :  { %v471_v37 = vpop.f32.mrb[0].mxu1  ;;  %v450_v38 = vpop.f32.mrb[1].mxu0 }
  0xf8   :  { %v451_v39 = vadd.f32 %v450_v38, %v449_v36  ;;  %v472_v40 = vpop.f32.mrb[1].mxu1  ;;  %v452_v41 = vpop.f32.mrb[2].mxu0 }
  0xf9   :  { %v473_v42 = vadd.f32 %v472_v40, %v471_v37  ;;  %v474_v43 = vpop.f32.mrb[2].mxu1  ;;  %v453_v44 = vpop.f32.mrb[3].mxu0 }
  0xfa   :  { %v454_v45 = vadd.f32 %v453_v44, %v452_v41  ;;  %v475_v46 = vpop.f32.mrb[3].mxu1 }
  0xfb   :  { %v376_v47 = vadd.f32 %v473_v42, %v451_v39  ;;  %v476_v48 = vadd.f32 %v475_v46, %v474_v43 }
  0xfd   :  { %391 = vst [vmem:[%s646_s2] sm:$0xff] %v376_v47  ;;  %v379_v49 = vadd.f32 %v476_v48, %v454_v45 }
  0xff   :  { %392 = vst [vmem:[%s646_s2 + $0x8] sm:$0xff] %v379_v49 }

</bundles_post_ra>
